<compile_context>
chip_gen: v6e
topology: v6e:2x2x1
jax: 0.10.0
libtpu: 0.0.40
codegen_flags: <defaults>
</compile_context>

<pallas_src>
import functools

import jax
import jax.numpy as jnp
from jax.experimental import pallas as pl
from jax.experimental.pallas import tpu as pltpu


# ------------------------------------------------------------------
# Kernel 1: input->gate convolution for all timesteps (h-independent pre-pass)
#   xpad : (B*T, H+2, W+2, Cin) f32      wx : (3, 3, Cin, 4*Ch) bf16
#   out  : (B*T, H*W, 4*Ch)     f32   (gate pre-activations from the x path)
# ------------------------------------------------------------------
def _xgates_kernel(xpad_ref, wx_ref, o_ref, *, H, W, Cin, C4):
    acc = jnp.zeros((H * W, C4), jnp.float32)
    for ky in range(3):
        for kx in range(3):
            patch = xpad_ref[0, ky:ky + H, kx:kx + W, :].reshape(H * W, Cin)
            acc = acc + jnp.dot(patch.astype(jnp.bfloat16), wx_ref[ky, kx],
                                preferred_element_type=jnp.float32)
    o_ref[0] = acc


def x_gates(x_pad, w_x, H, W):
    BT, Hp2, Wp2, Cin = x_pad.shape
    C4 = w_x.shape[-1]
    kern = functools.partial(_xgates_kernel, H=H, W=W, Cin=Cin, C4=C4)
    return pl.pallas_call(
        kern,
        out_shape=jax.ShapeDtypeStruct((BT, H * W, C4), jnp.float32),
        grid=(BT,),
        in_specs=[
            pl.BlockSpec((1, Hp2, Wp2, Cin), lambda i: (i, 0, 0, 0)),
            pl.BlockSpec((3, 3, Cin, C4), lambda i: (0, 0, 0, 0)),
        ],
        out_specs=pl.BlockSpec((1, H * W, C4), lambda i: (i, 0, 0)),
        compiler_params=pltpu.CompilerParams(dimension_semantics=("parallel",)),
    )(x_pad, w_x)


# ------------------------------------------------------------------
# Kernel 2: fused ConvLSTM recurrence over the whole sequence
#   grid = (B, T); h (zero-padded) and c persist in VMEM scratch across T.
#   xg : (B, T, H*W, 4*Ch) f32 (precomputed x-path gates, streamed per step)
#   wh : (3, 3, Ch, 4*Ch)  bf16 (constant block -> stays VMEM resident)
#   out: (B, H*W, Ch)      f32 (final cell state, written at t == T-1)
# ------------------------------------------------------------------
def _convlstm_recurrent_kernel(xg_ref, wh_ref, c_out_ref, c_s, hpad_s, *, H, W, Ch):
    t = pl.program_id(1)
    T = pl.num_programs(1)

    @pl.when(t == 0)
    def _():
        c_s[...] = jnp.zeros_like(c_s)
        hpad_s[...] = jnp.zeros_like(hpad_s)   # halo stays zero => "same" padding

    # gate pre-activations: precomputed x path + recurrent h path (9 taps on MXU)
    acc = xg_ref[0, 0]
    for ky in range(3):
        for kx in range(3):
            patch = hpad_s[ky:ky + H, kx:kx + W, :].reshape(H * W, Ch)
            acc = acc + jnp.dot(patch.astype(jnp.bfloat16), wh_ref[ky, kx],
                                preferred_element_type=jnp.float32)

    # gates computed directly on the lane-dense (H*W, 4*Ch) accumulator
    i = jax.nn.sigmoid(acc[:, 0 * Ch:1 * Ch])
    f = jax.nn.sigmoid(acc[:, 1 * Ch:2 * Ch])
    o = jax.nn.sigmoid(acc[:, 2 * Ch:3 * Ch])
    g = jnp.tanh(acc[:, 3 * Ch:4 * Ch])

    c_next = f * c_s[...] + i * g            # f32 cell state, VMEM-resident
    h_next = o * jnp.tanh(c_next)
    c_s[...] = c_next
    hpad_s[1:H + 1, 1:W + 1, :] = h_next.reshape(H, W, Ch)

    @pl.when(t == T - 1)
    def _():
        c_out_ref[0] = c_next


def convlstm_recurrence(xg, w_h, H, W, Ch):
    B, T = xg.shape[0], xg.shape[1]
    kern = functools.partial(_convlstm_recurrent_kernel, H=H, W=W, Ch=Ch)
    return pl.pallas_call(
        kern,
        out_shape=jax.ShapeDtypeStruct((B, H * W, Ch), jnp.float32),
        grid=(B, T),
        in_specs=[
            pl.BlockSpec((1, 1, H * W, 4 * Ch), lambda b, t: (b, t, 0, 0)),
            pl.BlockSpec((3, 3, Ch, 4 * Ch), lambda b, t: (0, 0, 0, 0)),
        ],
        out_specs=pl.BlockSpec((1, H * W, Ch), lambda b, t: (b, 0, 0)),
        scratch_shapes=[
            pltpu.VMEM((H * W, Ch), jnp.float32),          # c state
            pltpu.VMEM((H + 2, W + 2, Ch), jnp.float32),   # zero-padded h state
        ],
        compiler_params=pltpu.CompilerParams(
            dimension_semantics=("parallel", "arbitrary")),
    )(xg, w_h)


# ------------------------------------------------------------------
# Kernel 3: fused Conv3x3("same", no bias) + BatchNorm2d(batch stats) + ReLU
#   c    : (B, H*W, Ch) f32      w : (3, 3, Ch, Cp) bf16  (Cp = Cout padded to 128)
#   out  : (B, H*W, Cp) f32 (lane-dense; wrapper slices [:, :, :Cout])
# ------------------------------------------------------------------
def _head_kernel(c_ref, w_ref, g_ref, b_ref, o_ref, cpad_s, *, B, H, W, Ch, Cp, eps):
    # build zero-padded spatial cell state in VMEM (halo handled in-kernel)
    cpad_s[...] = jnp.zeros_like(cpad_s)
    cpad_s[:, 1:H + 1, 1:W + 1, :] = c_ref[...].reshape(B, H, W, Ch)

    acc = jnp.zeros((B * H * W, Cp), jnp.float32)
    for ky in range(3):
        for kx in range(3):
            patch = cpad_s[:, ky:ky + H, kx:kx + W, :].reshape(B * H * W, Ch)
            acc = acc + jnp.dot(patch.astype(jnp.bfloat16), w_ref[ky, kx],
                                preferred_element_type=jnp.float32)

    # BatchNorm (training-mode batch statistics, biased variance) + ReLU
    mean = jnp.mean(acc, axis=0, keepdims=True)
    var = jnp.mean((acc - mean) * (acc - mean), axis=0, keepdims=True)
    y = (acc - mean) * jax.lax.rsqrt(var + eps) * g_ref[...] + b_ref[...]
    o_ref[...] = jnp.maximum(y, 0.0).reshape(B, H * W, Cp)


def conv_bn_relu_head(c, w_out, gamma, beta, H, W, eps=1e-5):
    B, HW, Ch = c.shape
    Cp = w_out.shape[-1]
    kern = functools.partial(_head_kernel, B=B, H=H, W=W, Ch=Ch, Cp=Cp, eps=eps)
    return pl.pallas_call(
        kern,
        out_shape=jax.ShapeDtypeStruct((B, H * W, Cp), jnp.float32),
        grid=(1,),
        in_specs=[
            pl.BlockSpec((B, H * W, Ch), lambda i: (0, 0, 0)),
            pl.BlockSpec((3, 3, Ch, Cp), lambda i: (0, 0, 0, 0)),
            pl.BlockSpec((1, Cp), lambda i: (0, 0)),
            pl.BlockSpec((1, Cp), lambda i: (0, 0)),
        ],
        out_specs=pl.BlockSpec((B, H * W, Cp), lambda i: (0, 0, 0)),
        scratch_shapes=[pltpu.VMEM((B, H + 2, W + 2, Ch), jnp.float32)],
    )(c, w_out, gamma, beta)


# ------------------------------------------------------------------
# ConvLSTMSeg forward (thin XLA glue; all heavy work in the three Pallas kernels)
# ------------------------------------------------------------------
def convlstm_seg_forward(x_btchw, params, out_dim):
    """x_btchw: (B, T, C, H, W) float32 (PyTorch layout)."""
    w_x, w_h, w_out = params["w_x"], params["w_h"], params["w_out"]
    gamma, beta = params["bn_gamma"], params["bn_beta"]

    B, T, Cin, H, W = x_btchw.shape
    Ch = w_h.shape[2]

    # NCHW sequence -> NHWC; single spatial zero-pad for all timesteps (not per step)
    x = jnp.transpose(x_btchw, (0, 1, 3, 4, 2)).reshape(B * T, H, W, Cin)
    x_pad = jnp.pad(x, ((0, 0), (1, 1), (1, 1), (0, 0)))

    # 1) h-independent input->gate conv for all timesteps
    xg = x_gates(x_pad, w_x, H, W).reshape(B, T, H * W, 4 * Ch)

    # 2) fused T-step recurrence; final cell state == states[0][1]
    c_final = convlstm_recurrence(xg, w_h, H, W, Ch)            # (B, H*W, Ch)

    # 3) fused Conv3x3 + BatchNorm + ReLU head (channel dim padded to 128 lanes)
    y = conv_bn_relu_head(c_final, w_out, gamma, beta, H, W)    # (B, H*W, Cp)

    out = y[:, :, :out_dim].reshape(B, H, W, out_dim)
    return jnp.transpose(out, (0, 3, 1, 2))                     # back to NCHW


def init_params(key, input_dim, hidden_dim, out_dim):
    k1, k2 = jax.random.split(key)
    cc = input_dim + hidden_dim
    # Deterministic synthetic init (bias-free convs, HWIO layout); the combined
    # ConvLSTM weight is split into the x-path and h-path halves (conv over
    # concat([x, h]) == conv_x(x) + conv_h(h)).
    w_lstm = jax.random.normal(k1, (3, 3, cc, 4 * hidden_dim), jnp.float32)
    w_lstm = w_lstm * (1.0 / jnp.sqrt(9.0 * cc))
    w_out = jax.random.normal(k2, (3, 3, hidden_dim, out_dim), jnp.float32)
    w_out = w_out * (1.0 / jnp.sqrt(9.0 * hidden_dim))

    cp = ((out_dim + 127) // 128) * 128          # pad Cout to lane width
    w_out_p = jnp.zeros((3, 3, hidden_dim, cp), jnp.float32)
    w_out_p = w_out_p.at[..., :out_dim].set(w_out)

    return {
        "w_x": w_lstm[:, :, :input_dim, :].astype(jnp.bfloat16),
        "w_h": w_lstm[:, :, input_dim:, :].astype(jnp.bfloat16),
        "w_out": w_out_p.astype(jnp.bfloat16),
        "bn_gamma": jnp.ones((1, cp), jnp.float32),   # PyTorch BN defaults
        "bn_beta": jnp.zeros((1, cp), jnp.float32),
    }


if __name__ == "__main__":
    B, T, C, H, W = 2, 8, 4, 16, 16
    hidden_dim, out_dim = 32, 3

    key = jax.random.PRNGKey(0)
    kx, kp = jax.random.split(key)
    x = jax.random.normal(kx, (B, T, C, H, W), jnp.float32)
    params = init_params(kp, C, hidden_dim, out_dim)

    fwd = jax.jit(convlstm_seg_forward, static_argnums=2)
    out = fwd(x, params, out_dim)
    out = jax.block_until_ready(out)
    assert out.shape == (B, out_dim, H, W), out.shape
    assert bool(jnp.all(jnp.isfinite(out)))
    print("KERNEL_OK")
</pallas_src>

<mosaic_0001>
module attributes {stable_mosaic.version = 11 : i64} {
  func.func @_xgates_kernel(%arg0: i32, %arg1: memref<1x18x18x4xf32, #tpu.memory_space<vmem>>, %arg2: memref<3x3x4x128xbf16, #tpu.memory_space<vmem>>, %arg3: memref<1x256x128xf32, #tpu.memory_space<vmem>>) attributes {dimension_semantics = [#tpu.dimension_semantics<parallel>], iteration_bounds = array<i64: 16>, scalar_prefetch = 0 : i64, scratch_operands = 0 : i64, tpu.core_type = #tpu.core_type<tc>, window_params = [{transform_indices = @transform_0, window_bounds = array<i64: 1, 18, 18, 4>}, {pipeline_mode = #tpu.pipeline_mode<synchronous>, transform_indices = @transform_1, window_bounds = array<i64: 3, 3, 4, 128>}, {transform_indices = @transform_2, window_bounds = array<i64: 1, 256, 128>}]} {
    %cst = arith.constant 0.000000e+00 : f32
    %0 = vector.broadcast %cst : f32 to vector<256x128xf32>
    %c0 = arith.constant 0 : index
    %c0_0 = arith.constant 0 : index
    %c0_1 = arith.constant 0 : index
    %c0_2 = arith.constant 0 : index
    %1 = vector.load %arg1[%c0, %c0_0, %c0_1, %c0_2] : memref<1x18x18x4xf32, #tpu.memory_space<vmem>>, vector<1x16x16x4xf32>
    %2 = vector.shape_cast %1 : vector<1x16x16x4xf32> to vector<16x16x4xf32>
    %3 = vector.shape_cast %2 : vector<16x16x4xf32> to vector<256x4xf32>
    %4 = arith.truncf %3 : vector<256x4xf32> to vector<256x4xbf16>
    %c0_3 = arith.constant 0 : index
    %c0_4 = arith.constant 0 : index
    %c0_5 = arith.constant 0 : index
    %c0_6 = arith.constant 0 : index
    %5 = vector.load %arg2[%c0_3, %c0_4, %c0_5, %c0_6] : memref<3x3x4x128xbf16, #tpu.memory_space<vmem>>, vector<1x1x4x128xbf16>
    %6 = vector.shape_cast %5 : vector<1x1x4x128xbf16> to vector<4x128xbf16>
    %cst_7 = arith.constant dense<0.000000e+00> : vector<256x128xf32>
    %7 = tpu.matmul %4, %6, %cst_7 {dimension_numbers = #tpu.dot_dimension_numbers<[1], [0], [0], [1], [0, 0, 1, 1], [], []>} : vector<256x4xbf16>, vector<4x128xbf16>, vector<256x128xf32> -> vector<256x128xf32>
    %8 = arith.addf %0, %7 : vector<256x128xf32>
    %c0_8 = arith.constant 0 : index
    %c0_9 = arith.constant 0 : index
    %c1 = arith.constant 1 : index
    %c0_10 = arith.constant 0 : index
    %9 = vector.load %arg1[%c0_8, %c0_9, %c1, %c0_10] : memref<1x18x18x4xf32, #tpu.memory_space<vmem>>, vector<1x16x16x4xf32>
    %10 = vector.shape_cast %9 : vector<1x16x16x4xf32> to vector<16x16x4xf32>
    %11 = vector.shape_cast %10 : vector<16x16x4xf32> to vector<256x4xf32>
    %12 = arith.truncf %11 : vector<256x4xf32> to vector<256x4xbf16>
    %c0_11 = arith.constant 0 : index
    %c1_12 = arith.constant 1 : index
    %c0_13 = arith.constant 0 : index
    %c0_14 = arith.constant 0 : index
    %13 = vector.load %arg2[%c0_11, %c1_12, %c0_13, %c0_14] : memref<3x3x4x128xbf16, #tpu.memory_space<vmem>>, vector<1x1x4x128xbf16>
    %14 = vector.shape_cast %13 : vector<1x1x4x128xbf16> to vector<4x128xbf16>
    %cst_15 = arith.constant dense<0.000000e+00> : vector<256x128xf32>
    %15 = tpu.matmul %12, %14, %cst_15 {dimension_numbers = #tpu.dot_dimension_numbers<[1], [0], [0], [1], [0, 0, 1, 1], [], []>} : vector<256x4xbf16>, vector<4x128xbf16>, vector<256x128xf32> -> vector<256x128xf32>
    %16 = arith.addf %8, %15 : vector<256x128xf32>
    %c0_16 = arith.constant 0 : index
    %c0_17 = arith.constant 0 : index
    %c2 = arith.constant 2 : index
    %c0_18 = arith.constant 0 : index
    %17 = vector.load %arg1[%c0_16, %c0_17, %c2, %c0_18] : memref<1x18x18x4xf32, #tpu.memory_space<vmem>>, vector<1x16x16x4xf32>
    %18 = vector.shape_cast %17 : vector<1x16x16x4xf32> to vector<16x16x4xf32>
    %19 = vector.shape_cast %18 : vector<16x16x4xf32> to vector<256x4xf32>
    %20 = arith.truncf %19 : vector<256x4xf32> to vector<256x4xbf16>
    %c0_19 = arith.constant 0 : index
    %c2_20 = arith.constant 2 : index
    %c0_21 = arith.constant 0 : index
    %c0_22 = arith.constant 0 : index
    %21 = vector.load %arg2[%c0_19, %c2_20, %c0_21, %c0_22] : memref<3x3x4x128xbf16, #tpu.memory_space<vmem>>, vector<1x1x4x128xbf16>
    %22 = vector.shape_cast %21 : vector<1x1x4x128xbf16> to vector<4x128xbf16>
    %cst_23 = arith.constant dense<0.000000e+00> : vector<256x128xf32>
    %23 = tpu.matmul %20, %22, %cst_23 {dimension_numbers = #tpu.dot_dimension_numbers<[1], [0], [0], [1], [0, 0, 1, 1], [], []>} : vector<256x4xbf16>, vector<4x128xbf16>, vector<256x128xf32> -> vector<256x128xf32>
    %24 = arith.addf %16, %23 : vector<256x128xf32>
    %c0_24 = arith.constant 0 : index
    %c1_25 = arith.constant 1 : index
    %c0_26 = arith.constant 0 : index
    %c0_27 = arith.constant 0 : index
    %25 = vector.load %arg1[%c0_24, %c1_25, %c0_26, %c0_27] : memref<1x18x18x4xf32, #tpu.memory_space<vmem>>, vector<1x16x16x4xf32>
    %26 = vector.shape_cast %25 : vector<1x16x16x4xf32> to vector<16x16x4xf32>
    %27 = vector.shape_cast %26 : vector<16x16x4xf32> to vector<256x4xf32>
    %28 = arith.truncf %27 : vector<256x4xf32> to vector<256x4xbf16>
    %c1_28 = arith.constant 1 : index
    %c0_29 = arith.constant 0 : index
    %c0_30 = arith.constant 0 : index
    %c0_31 = arith.constant 0 : index
    %29 = vector.load %arg2[%c1_28, %c0_29, %c0_30, %c0_31] : memref<3x3x4x128xbf16, #tpu.memory_space<vmem>>, vector<1x1x4x128xbf16>
    %30 = vector.shape_cast %29 : vector<1x1x4x128xbf16> to vector<4x128xbf16>
    %cst_32 = arith.constant dense<0.000000e+00> : vector<256x128xf32>
    %31 = tpu.matmul %28, %30, %cst_32 {dimension_numbers = #tpu.dot_dimension_numbers<[1], [0], [0], [1], [0, 0, 1, 1], [], []>} : vector<256x4xbf16>, vector<4x128xbf16>, vector<256x128xf32> -> vector<256x128xf32>
    %32 = arith.addf %24, %31 : vector<256x128xf32>
    %c0_33 = arith.constant 0 : index
    %c1_34 = arith.constant 1 : index
    %c1_35 = arith.constant 1 : index
    %c0_36 = arith.constant 0 : index
    %33 = vector.load %arg1[%c0_33, %c1_34, %c1_35, %c0_36] : memref<1x18x18x4xf32, #tpu.memory_space<vmem>>, vector<1x16x16x4xf32>
    %34 = vector.shape_cast %33 : vector<1x16x16x4xf32> to vector<16x16x4xf32>
    %35 = vector.shape_cast %34 : vector<16x16x4xf32> to vector<256x4xf32>
    %36 = arith.truncf %35 : vector<256x4xf32> to vector<256x4xbf16>
    %c1_37 = arith.constant 1 : index
    %c1_38 = arith.constant 1 : index
    %c0_39 = arith.constant 0 : index
    %c0_40 = arith.constant 0 : index
    %37 = vector.load %arg2[%c1_37, %c1_38, %c0_39, %c0_40] : memref<3x3x4x128xbf16, #tpu.memory_space<vmem>>, vector<1x1x4x128xbf16>
    %38 = vector.shape_cast %37 : vector<1x1x4x128xbf16> to vector<4x128xbf16>
    %cst_41 = arith.constant dense<0.000000e+00> : vector<256x128xf32>
    %39 = tpu.matmul %36, %38, %cst_41 {dimension_numbers = #tpu.dot_dimension_numbers<[1], [0], [0], [1], [0, 0, 1, 1], [], []>} : vector<256x4xbf16>, vector<4x128xbf16>, vector<256x128xf32> -> vector<256x128xf32>
    %40 = arith.addf %32, %39 : vector<256x128xf32>
    %c0_42 = arith.constant 0 : index
    %c1_43 = arith.constant 1 : index
    %c2_44 = arith.constant 2 : index
    %c0_45 = arith.constant 0 : index
    %41 = vector.load %arg1[%c0_42, %c1_43, %c2_44, %c0_45] : memref<1x18x18x4xf32, #tpu.memory_space<vmem>>, vector<1x16x16x4xf32>
    %42 = vector.shape_cast %41 : vector<1x16x16x4xf32> to vector<16x16x4xf32>
    %43 = vector.shape_cast %42 : vector<16x16x4xf32> to vector<256x4xf32>
    %44 = arith.truncf %43 : vector<256x4xf32> to vector<256x4xbf16>
    %c1_46 = arith.constant 1 : index
    %c2_47 = arith.constant 2 : index
    %c0_48 = arith.constant 0 : index
    %c0_49 = arith.constant 0 : index
    %45 = vector.load %arg2[%c1_46, %c2_47, %c0_48, %c0_49] : memref<3x3x4x128xbf16, #tpu.memory_space<vmem>>, vector<1x1x4x128xbf16>
    %46 = vector.shape_cast %45 : vector<1x1x4x128xbf16> to vector<4x128xbf16>
    %cst_50 = arith.constant dense<0.000000e+00> : vector<256x128xf32>
    %47 = tpu.matmul %44, %46, %cst_50 {dimension_numbers = #tpu.dot_dimension_numbers<[1], [0], [0], [1], [0, 0, 1, 1], [], []>} : vector<256x4xbf16>, vector<4x128xbf16>, vector<256x128xf32> -> vector<256x128xf32>
    %48 = arith.addf %40, %47 : vector<256x128xf32>
    %c0_51 = arith.constant 0 : index
    %c2_52 = arith.constant 2 : index
    %c0_53 = arith.constant 0 : index
    %c0_54 = arith.constant 0 : index
    %49 = vector.load %arg1[%c0_51, %c2_52, %c0_53, %c0_54] : memref<1x18x18x4xf32, #tpu.memory_space<vmem>>, vector<1x16x16x4xf32>
    %50 = vector.shape_cast %49 : vector<1x16x16x4xf32> to vector<16x16x4xf32>
    %51 = vector.shape_cast %50 : vector<16x16x4xf32> to vector<256x4xf32>
    %52 = arith.truncf %51 : vector<256x4xf32> to vector<256x4xbf16>
    %c2_55 = arith.constant 2 : index
    %c0_56 = arith.constant 0 : index
    %c0_57 = arith.constant 0 : index
    %c0_58 = arith.constant 0 : index
    %53 = vector.load %arg2[%c2_55, %c0_56, %c0_57, %c0_58] : memref<3x3x4x128xbf16, #tpu.memory_space<vmem>>, vector<1x1x4x128xbf16>
    %54 = vector.shape_cast %53 : vector<1x1x4x128xbf16> to vector<4x128xbf16>
    %cst_59 = arith.constant dense<0.000000e+00> : vector<256x128xf32>
    %55 = tpu.matmul %52, %54, %cst_59 {dimension_numbers = #tpu.dot_dimension_numbers<[1], [0], [0], [1], [0, 0, 1, 1], [], []>} : vector<256x4xbf16>, vector<4x128xbf16>, vector<256x128xf32> -> vector<256x128xf32>
    %56 = arith.addf %48, %55 : vector<256x128xf32>
    %c0_60 = arith.constant 0 : index
    %c2_61 = arith.constant 2 : index
    %c1_62 = arith.constant 1 : index
    %c0_63 = arith.constant 0 : index
    %57 = vector.load %arg1[%c0_60, %c2_61, %c1_62, %c0_63] : memref<1x18x18x4xf32, #tpu.memory_space<vmem>>, vector<1x16x16x4xf32>
    %58 = vector.shape_cast %57 : vector<1x16x16x4xf32> to vector<16x16x4xf32>
    %59 = vector.shape_cast %58 : vector<16x16x4xf32> to vector<256x4xf32>
    %60 = arith.truncf %59 : vector<256x4xf32> to vector<256x4xbf16>
    %c2_64 = arith.constant 2 : index
    %c1_65 = arith.constant 1 : index
    %c0_66 = arith.constant 0 : index
    %c0_67 = arith.constant 0 : index
    %61 = vector.load %arg2[%c2_64, %c1_65, %c0_66, %c0_67] : memref<3x3x4x128xbf16, #tpu.memory_space<vmem>>, vector<1x1x4x128xbf16>
    %62 = vector.shape_cast %61 : vector<1x1x4x128xbf16> to vector<4x128xbf16>
    %cst_68 = arith.constant dense<0.000000e+00> : vector<256x128xf32>
    %63 = tpu.matmul %60, %62, %cst_68 {dimension_numbers = #tpu.dot_dimension_numbers<[1], [0], [0], [1], [0, 0, 1, 1], [], []>} : vector<256x4xbf16>, vector<4x128xbf16>, vector<256x128xf32> -> vector<256x128xf32>
    %64 = arith.addf %56, %63 : vector<256x128xf32>
    %c0_69 = arith.constant 0 : index
    %c2_70 = arith.constant 2 : index
    %c2_71 = arith.constant 2 : index
    %c0_72 = arith.constant 0 : index
    %65 = vector.load %arg1[%c0_69, %c2_70, %c2_71, %c0_72] : memref<1x18x18x4xf32, #tpu.memory_space<vmem>>, vector<1x16x16x4xf32>
    %66 = vector.shape_cast %65 : vector<1x16x16x4xf32> to vector<16x16x4xf32>
    %67 = vector.shape_cast %66 : vector<16x16x4xf32> to vector<256x4xf32>
    %68 = arith.truncf %67 : vector<256x4xf32> to vector<256x4xbf16>
    %c2_73 = arith.constant 2 : index
    %c2_74 = arith.constant 2 : index
    %c0_75 = arith.constant 0 : index
    %c0_76 = arith.constant 0 : index
    %69 = vector.load %arg2[%c2_73, %c2_74, %c0_75, %c0_76] : memref<3x3x4x128xbf16, #tpu.memory_space<vmem>>, vector<1x1x4x128xbf16>
    %70 = vector.shape_cast %69 : vector<1x1x4x128xbf16> to vector<4x128xbf16>
    %cst_77 = arith.constant dense<0.000000e+00> : vector<256x128xf32>
    %71 = tpu.matmul %68, %70, %cst_77 {dimension_numbers = #tpu.dot_dimension_numbers<[1], [0], [0], [1], [0, 0, 1, 1], [], []>} : vector<256x4xbf16>, vector<4x128xbf16>, vector<256x128xf32> -> vector<256x128xf32>
    %72 = arith.addf %64, %71 : vector<256x128xf32>
    %c0_78 = arith.constant 0 : index
    %c0_79 = arith.constant 0 : index
    %c0_80 = arith.constant 0 : index
    %73 = vector.load %arg3[%c0_78, %c0_79, %c0_80] : memref<1x256x128xf32, #tpu.memory_space<vmem>>, vector<1x256x128xf32>
    %74 = vector.shape_cast %73 : vector<1x256x128xf32> to vector<256x128xf32>
    %75 = vector.shape_cast %72 : vector<256x128xf32> to vector<1x256x128xf32>
    tpu.vector_store %arg3[%c0_78, %c0_79, %c0_80], %75 {strides = array<i32>} : memref<1x256x128xf32, #tpu.memory_space<vmem>>, vector<1x256x128xf32>,
    return
  }
  func.func @transform_0(%arg0: i32) -> (i32, i32, i32, i32) {
    %c0_i32 = arith.constant 0 : i32
    %c0_i32_0 = arith.constant 0 : i32
    %c0_i32_1 = arith.constant 0 : i32
    %c0_i32_2 = arith.constant 0 : i32
    return %arg0, %c0_i32, %c0_i32_0, %c0_i32_1 : i32, i32, i32, i32
  }
  func.func @transform_1(%arg0: i32) -> (i32, i32, i32, i32) {
    %c0_i32 = arith.constant 0 : i32
    %c0_i32_0 = arith.constant 0 : i32
    %c0_i32_1 = arith.constant 0 : i32
    %c0_i32_2 = arith.constant 0 : i32
    %c0_i32_3 = arith.constant 0 : i32
    return %c0_i32, %c0_i32_0, %c0_i32_1, %c0_i32_2 : i32, i32, i32, i32
  }
  func.func @transform_2(%arg0: i32) -> (i32, i32, i32) {
    %c0_i32 = arith.constant 0 : i32
    %c0_i32_0 = arith.constant 0 : i32
    %c0_i32_1 = arith.constant 0 : i32
    return %arg0, %c0_i32, %c0_i32_0 : i32, i32, i32
  }
}

module attributes {stable_mosaic.version = 11 : i64} {
  func.func @_convlstm_recurrent_kernel(%arg0: i32, %arg1: i32, %arg2: memref<1x1x256x128xf32, #tpu.memory_space<vmem>>, %arg3: memref<3x3x32x128xbf16, #tpu.memory_space<vmem>>, %arg4: memref<1x256x32xf32, #tpu.memory_space<vmem>>, %arg5: memref<256x32xf32, #tpu.memory_space<vmem>>, %arg6: memref<18x18x32xf32, #tpu.memory_space<vmem>>) attributes {dimension_semantics = [#tpu.dimension_semantics<parallel>, #tpu.dimension_semantics<arbitrary>], iteration_bounds = array<i64: 2, 8>, scalar_prefetch = 0 : i64, scratch_operands = 2 : i64, tpu.core_type = #tpu.core_type<tc>, window_params = [{transform_indices = @transform_0, window_bounds = array<i64: 1, 1, 256, 128>}, {pipeline_mode = #tpu.pipeline_mode<synchronous>, transform_indices = @transform_1, window_bounds = array<i64: 3, 3, 32, 128>}, {transform_indices = @transform_2, window_bounds = array<i64: 1, 256, 32>}]} {
    %c0_i32 = arith.constant 0 : i32
    %0 = arith.cmpi eq, %arg1, %c0_i32 : i32
    %1 = arith.extui %0 : i1 to i32
    %c0_i32_0 = arith.constant 0 : i32
    %2 = arith.cmpi ne, %1, %c0_i32_0 : i32
    scf.if %2 {
      %cst_84 = arith.constant 0.000000e+00 : f32
      %100 = vector.broadcast %cst_84 : f32 to vector<256x32xf32>
      %c0_85 = arith.constant 0 : index
      %c0_86 = arith.constant 0 : index
      %101 = vector.load %arg5[%c0_85, %c0_86] : memref<256x32xf32, #tpu.memory_space<vmem>>, vector<256x32xf32>
      tpu.vector_store %arg5[%c0_85, %c0_86], %100 {strides = array<i32>} : memref<256x32xf32, #tpu.memory_space<vmem>>, vector<256x32xf32>,
      %cst_87 = arith.constant 0.000000e+00 : f32
      %102 = vector.broadcast %cst_87 : f32 to vector<18x18x32xf32>
      %c0_88 = arith.constant 0 : index
      %c0_89 = arith.constant 0 : index
      %c0_90 = arith.constant 0 : index
      %103 = vector.load %arg6[%c0_88, %c0_89, %c0_90] : memref<18x18x32xf32, #tpu.memory_space<vmem>>, vector<18x18x32xf32>
      tpu.vector_store %arg6[%c0_88, %c0_89, %c0_90], %102 {strides = array<i32>} : memref<18x18x32xf32, #tpu.memory_space<vmem>>, vector<18x18x32xf32>,
    } else {
    }
    %c0 = arith.constant 0 : index
    %c0_1 = arith.constant 0 : index
    %c0_2 = arith.constant 0 : index
    %c0_3 = arith.constant 0 : index
    %3 = vector.load %arg2[%c0, %c0_1, %c0_2, %c0_3] : memref<1x1x256x128xf32, #tpu.memory_space<vmem>>, vector<1x1x256x128xf32>
    %4 = vector.shape_cast %3 : vector<1x1x256x128xf32> to vector<256x128xf32>
    %c0_4 = arith.constant 0 : index
    %c0_5 = arith.constant 0 : index
    %c0_6 = arith.constant 0 : index
    %5 = vector.load %arg6[%c0_4, %c0_5, %c0_6] : memref<18x18x32xf32, #tpu.memory_space<vmem>>, vector<16x16x32xf32>
    %6 = vector.shape_cast %5 : vector<16x16x32xf32> to vector<256x32xf32>
    %7 = arith.truncf %6 : vector<256x32xf32> to vector<256x32xbf16>
    %c0_7 = arith.constant 0 : index
    %c0_8 = arith.constant 0 : index
    %c0_9 = arith.constant 0 : index
    %c0_10 = arith.constant 0 : index
    %8 = vector.load %arg3[%c0_7, %c0_8, %c0_9, %c0_10] : memref<3x3x32x128xbf16, #tpu.memory_space<vmem>>, vector<1x1x32x128xbf16>
    %9 = vector.shape_cast %8 : vector<1x1x32x128xbf16> to vector<32x128xbf16>
    %cst = arith.constant dense<0.000000e+00> : vector<256x128xf32>
    %10 = tpu.matmul %7, %9, %cst {dimension_numbers = #tpu.dot_dimension_numbers<[1], [0], [0], [1], [0, 0, 1, 1], [], []>} : vector<256x32xbf16>, vector<32x128xbf16>, vector<256x128xf32> -> vector<256x128xf32>
    %11 = arith.addf %4, %10 : vector<256x128xf32>
    %c0_11 = arith.constant 0 : index
    %c1 = arith.constant 1 : index
    %c0_12 = arith.constant 0 : index
    %12 = vector.load %arg6[%c0_11, %c1, %c0_12] : memref<18x18x32xf32, #tpu.memory_space<vmem>>, vector<16x16x32xf32>
    %13 = vector.shape_cast %12 : vector<16x16x32xf32> to vector<256x32xf32>
    %14 = arith.truncf %13 : vector<256x32xf32> to vector<256x32xbf16>
    %c0_13 = arith.constant 0 : index
    %c1_14 = arith.constant 1 : index
    %c0_15 = arith.constant 0 : index
    %c0_16 = arith.constant 0 : index
    %15 = vector.load %arg3[%c0_13, %c1_14, %c0_15, %c0_16] : memref<3x3x32x128xbf16, #tpu.memory_space<vmem>>, vector<1x1x32x128xbf16>
    %16 = vector.shape_cast %15 : vector<1x1x32x128xbf16> to vector<32x128xbf16>
    %cst_17 = arith.constant dense<0.000000e+00> : vector<256x128xf32>
    %17 = tpu.matmul %14, %16, %cst_17 {dimension_numbers = #tpu.dot_dimension_numbers<[1], [0], [0], [1], [0, 0, 1, 1], [], []>} : vector<256x32xbf16>, vector<32x128xbf16>, vector<256x128xf32> -> vector<256x128xf32>
    %18 = arith.addf %11, %17 : vector<256x128xf32>
    %c0_18 = arith.constant 0 : index
    %c2 = arith.constant 2 : index
    %c0_19 = arith.constant 0 : index
    %19 = vector.load %arg6[%c0_18, %c2, %c0_19] : memref<18x18x32xf32, #tpu.memory_space<vmem>>, vector<16x16x32xf32>
    %20 = vector.shape_cast %19 : vector<16x16x32xf32> to vector<256x32xf32>
    %21 = arith.truncf %20 : vector<256x32xf32> to vector<256x32xbf16>
    %c0_20 = arith.constant 0 : index
    %c2_21 = arith.constant 2 : index
    %c0_22 = arith.constant 0 : index
    %c0_23 = arith.constant 0 : index
    %22 = vector.load %arg3[%c0_20, %c2_21, %c0_22, %c0_23] : memref<3x3x32x128xbf16, #tpu.memory_space<vmem>>, vector<1x1x32x128xbf16>
    %23 = vector.shape_cast %22 : vector<1x1x32x128xbf16> to vector<32x128xbf16>
    %cst_24 = arith.constant dense<0.000000e+00> : vector<256x128xf32>
    %24 = tpu.matmul %21, %23, %cst_24 {dimension_numbers = #tpu.dot_dimension_numbers<[1], [0], [0], [1], [0, 0, 1, 1], [], []>} : vector<256x32xbf16>, vector<32x128xbf16>, vector<256x128xf32> -> vector<256x128xf32>
    %25 = arith.addf %18, %24 : vector<256x128xf32>
    %c1_25 = arith.constant 1 : index
    %c0_26 = arith.constant 0 : index
    %c0_27 = arith.constant 0 : index
    %26 = vector.load %arg6[%c1_25, %c0_26, %c0_27] : memref<18x18x32xf32, #tpu.memory_space<vmem>>, vector<16x16x32xf32>
    %27 = vector.shape_cast %26 : vector<16x16x32xf32> to vector<256x32xf32>
    %28 = arith.truncf %27 : vector<256x32xf32> to vector<256x32xbf16>
    %c1_28 = arith.constant 1 : index
    %c0_29 = arith.constant 0 : index
    %c0_30 = arith.constant 0 : index
    %c0_31 = arith.constant 0 : index
    %29 = vector.load %arg3[%c1_28, %c0_29, %c0_30, %c0_31] : memref<3x3x32x128xbf16, #tpu.memory_space<vmem>>, vector<1x1x32x128xbf16>
    %30 = vector.shape_cast %29 : vector<1x1x32x128xbf16> to vector<32x128xbf16>
    %cst_32 = arith.constant dense<0.000000e+00> : vector<256x128xf32>
    %31 = tpu.matmul %28, %30, %cst_32 {dimension_numbers = #tpu.dot_dimension_numbers<[1], [0], [0], [1], [0, 0, 1, 1], [], []>} : vector<256x32xbf16>, vector<32x128xbf16>, vector<256x128xf32> -> vector<256x128xf32>
    %32 = arith.addf %25, %31 : vector<256x128xf32>
    %c1_33 = arith.constant 1 : index
    %c1_34 = arith.constant 1 : index
    %c0_35 = arith.constant 0 : index
    %33 = vector.load %arg6[%c1_33, %c1_34, %c0_35] : memref<18x18x32xf32, #tpu.memory_space<vmem>>, vector<16x16x32xf32>
    %34 = vector.shape_cast %33 : vector<16x16x32xf32> to vector<256x32xf32>
    %35 = arith.truncf %34 : vector<256x32xf32> to vector<256x32xbf16>
    %c1_36 = arith.constant 1 : index
    %c1_37 = arith.constant 1 : index
    %c0_38 = arith.constant 0 : index
    %c0_39 = arith.constant 0 : index
    %36 = vector.load %arg3[%c1_36, %c1_37, %c0_38, %c0_39] : memref<3x3x32x128xbf16, #tpu.memory_space<vmem>>, vector<1x1x32x128xbf16>
    %37 = vector.shape_cast %36 : vector<1x1x32x128xbf16> to vector<32x128xbf16>
    %cst_40 = arith.constant dense<0.000000e+00> : vector<256x128xf32>
    %38 = tpu.matmul %35, %37, %cst_40 {dimension_numbers = #tpu.dot_dimension_numbers<[1], [0], [0], [1], [0, 0, 1, 1], [], []>} : vector<256x32xbf16>, vector<32x128xbf16>, vector<256x128xf32> -> vector<256x128xf32>
    %39 = arith.addf %32, %38 : vector<256x128xf32>
    %c1_41 = arith.constant 1 : index
    %c2_42 = arith.constant 2 : index
    %c0_43 = arith.constant 0 : index
    %40 = vector.load %arg6[%c1_41, %c2_42, %c0_43] : memref<18x18x32xf32, #tpu.memory_space<vmem>>, vector<16x16x32xf32>
    %41 = vector.shape_cast %40 : vector<16x16x32xf32> to vector<256x32xf32>
    %42 = arith.truncf %41 : vector<256x32xf32> to vector<256x32xbf16>
    %c1_44 = arith.constant 1 : index
    %c2_45 = arith.constant 2 : index
    %c0_46 = arith.constant 0 : index
    %c0_47 = arith.constant 0 : index
    %43 = vector.load %arg3[%c1_44, %c2_45, %c0_46, %c0_47] : memref<3x3x32x128xbf16, #tpu.memory_space<vmem>>, vector<1x1x32x128xbf16>
    %44 = vector.shape_cast %43 : vector<1x1x32x128xbf16> to vector<32x128xbf16>
    %cst_48 = arith.constant dense<0.000000e+00> : vector<256x128xf32>
    %45 = tpu.matmul %42, %44, %cst_48 {dimension_numbers = #tpu.dot_dimension_numbers<[1], [0], [0], [1], [0, 0, 1, 1], [], []>} : vector<256x32xbf16>, vector<32x128xbf16>, vector<256x128xf32> -> vector<256x128xf32>
    %46 = arith.addf %39, %45 : vector<256x128xf32>
    %c2_49 = arith.constant 2 : index
    %c0_50 = arith.constant 0 : index
    %c0_51 = arith.constant 0 : index
    %47 = vector.load %arg6[%c2_49, %c0_50, %c0_51] : memref<18x18x32xf32, #tpu.memory_space<vmem>>, vector<16x16x32xf32>
    %48 = vector.shape_cast %47 : vector<16x16x32xf32> to vector<256x32xf32>
    %49 = arith.truncf %48 : vector<256x32xf32> to vector<256x32xbf16>
    %c2_52 = arith.constant 2 : index
    %c0_53 = arith.constant 0 : index
    %c0_54 = arith.constant 0 : index
    %c0_55 = arith.constant 0 : index
    %50 = vector.load %arg3[%c2_52, %c0_53, %c0_54, %c0_55] : memref<3x3x32x128xbf16, #tpu.memory_space<vmem>>, vector<1x1x32x128xbf16>
    %51 = vector.shape_cast %50 : vector<1x1x32x128xbf16> to vector<32x128xbf16>
    %cst_56 = arith.constant dense<0.000000e+00> : vector<256x128xf32>
    %52 = tpu.matmul %49, %51, %cst_56 {dimension_numbers = #tpu.dot_dimension_numbers<[1], [0], [0], [1], [0, 0, 1, 1], [], []>} : vector<256x32xbf16>, vector<32x128xbf16>, vector<256x128xf32> -> vector<256x128xf32>
    %53 = arith.addf %46, %52 : vector<256x128xf32>
    %c2_57 = arith.constant 2 : index
    %c1_58 = arith.constant 1 : index
    %c0_59 = arith.constant 0 : index
    %54 = vector.load %arg6[%c2_57, %c1_58, %c0_59] : memref<18x18x32xf32, #tpu.memory_space<vmem>>, vector<16x16x32xf32>
    %55 = vector.shape_cast %54 : vector<16x16x32xf32> to vector<256x32xf32>
    %56 = arith.truncf %55 : vector<256x32xf32> to vector<256x32xbf16>
    %c2_60 = arith.constant 2 : index
    %c1_61 = arith.constant 1 : index
    %c0_62 = arith.constant 0 : index
    %c0_63 = arith.constant 0 : index
    %57 = vector.load %arg3[%c2_60, %c1_61, %c0_62, %c0_63] : memref<3x3x32x128xbf16, #tpu.memory_space<vmem>>, vector<1x1x32x128xbf16>
    %58 = vector.shape_cast %57 : vector<1x1x32x128xbf16> to vector<32x128xbf16>
    %cst_64 = arith.constant dense<0.000000e+00> : vector<256x128xf32>
    %59 = tpu.matmul %56, %58, %cst_64 {dimension_numbers = #tpu.dot_dimension_numbers<[1], [0], [0], [1], [0, 0, 1, 1], [], []>} : vector<256x32xbf16>, vector<32x128xbf16>, vector<256x128xf32> -> vector<256x128xf32>
    %60 = arith.addf %53, %59 : vector<256x128xf32>
    %c2_65 = arith.constant 2 : index
    %c2_66 = arith.constant 2 : index
    %c0_67 = arith.constant 0 : index
    %61 = vector.load %arg6[%c2_65, %c2_66, %c0_67] : memref<18x18x32xf32, #tpu.memory_space<vmem>>, vector<16x16x32xf32>
    %62 = vector.shape_cast %61 : vector<16x16x32xf32> to vector<256x32xf32>
    %63 = arith.truncf %62 : vector<256x32xf32> to vector<256x32xbf16>
    %c2_68 = arith.constant 2 : index
    %c2_69 = arith.constant 2 : index
    %c0_70 = arith.constant 0 : index
    %c0_71 = arith.constant 0 : index
    %64 = vector.load %arg3[%c2_68, %c2_69, %c0_70, %c0_71] : memref<3x3x32x128xbf16, #tpu.memory_space<vmem>>, vector<1x1x32x128xbf16>
    %65 = vector.shape_cast %64 : vector<1x1x32x128xbf16> to vector<32x128xbf16>
    %cst_72 = arith.constant dense<0.000000e+00> : vector<256x128xf32>
    %66 = tpu.matmul %63, %65, %cst_72 {dimension_numbers = #tpu.dot_dimension_numbers<[1], [0], [0], [1], [0, 0, 1, 1], [], []>} : vector<256x32xbf16>, vector<32x128xbf16>, vector<256x128xf32> -> vector<256x128xf32>
    %67 = arith.addf %60, %66 : vector<256x128xf32>
    %68 = vector.extract_strided_slice %67 {offsets = [0, 0], sizes = [256, 32], strides = [1, 1]} : vector<256x128xf32> to vector<256x32xf32>
    %69 = arith.negf %68 : vector<256x32xf32>
    %70 = math.exp %69 : vector<256x32xf32>
    %cst_73 = arith.constant 1.000000e+00 : f32
    %71 = vector.broadcast %cst_73 : f32 to vector<256x32xf32>
    %72 = arith.addf %71, %70 : vector<256x32xf32>
    %73 = arith.divf %71, %72 : vector<256x32xf32>
    %74 = vector.extract_strided_slice %67 {offsets = [0, 32], sizes = [256, 32], strides = [1, 1]} : vector<256x128xf32> to vector<256x32xf32>
    %75 = arith.negf %74 : vector<256x32xf32>
    %76 = math.exp %75 : vector<256x32xf32>
    %cst_74 = arith.constant 1.000000e+00 : f32
    %77 = vector.broadcast %cst_74 : f32 to vector<256x32xf32>
    %78 = arith.addf %77, %76 : vector<256x32xf32>
    %79 = arith.divf %77, %78 : vector<256x32xf32>
    %80 = vector.extract_strided_slice %67 {offsets = [0, 64], sizes = [256, 32], strides = [1, 1]} : vector<256x128xf32> to vector<256x32xf32>
    %81 = arith.negf %80 : vector<256x32xf32>
    %82 = math.exp %81 : vector<256x32xf32>
    %cst_75 = arith.constant 1.000000e+00 : f32
    %83 = vector.broadcast %cst_75 : f32 to vector<256x32xf32>
    %84 = arith.addf %83, %82 : vector<256x32xf32>
    %85 = arith.divf %83, %84 : vector<256x32xf32>
    %86 = vector.extract_strided_slice %67 {offsets = [0, 96], sizes = [256, 32], strides = [1, 1]} : vector<256x128xf32> to vector<256x32xf32>
    %87 = math.tanh %86 : vector<256x32xf32>
    %c0_76 = arith.constant 0 : index
    %c0_77 = arith.constant 0 : index
    %88 = vector.load %arg5[%c0_76, %c0_77] : memref<256x32xf32, #tpu.memory_space<vmem>>, vector<256x32xf32>
    %89 = arith.mulf %79, %88 : vector<256x32xf32>
    %90 = arith.mulf %73, %87 : vector<256x32xf32>
    %91 = arith.addf %89, %90 : vector<256x32xf32>
    %92 = math.tanh %91 : vector<256x32xf32>
    %93 = arith.mulf %85, %92 : vector<256x32xf32>
    %c0_78 = arith.constant 0 : index
    %c0_79 = arith.constant 0 : index
    %94 = vector.load %arg5[%c0_78, %c0_79] : memref<256x32xf32, #tpu.memory_space<vmem>>, vector<256x32xf32>
    tpu.vector_store %arg5[%c0_78, %c0_79], %91 {strides = array<i32>} : memref<256x32xf32, #tpu.memory_space<vmem>>, vector<256x32xf32>,
    %95 = vector.shape_cast %93 : vector<256x32xf32> to vector<16x16x32xf32>
    %c1_80 = arith.constant 1 : index
    %c1_81 = arith.constant 1 : index
    %c0_82 = arith.constant 0 : index
    %96 = vector.load %arg6[%c1_80, %c1_81, %c0_82] : memref<18x18x32xf32, #tpu.memory_space<vmem>>, vector<16x16x32xf32>
    tpu.vector_store %arg6[%c1_80, %c1_81, %c0_82], %95 {strides = array<i32>} : memref<18x18x32xf32, #tpu.memory_space<vmem>>, vector<16x16x32xf32>,
    %c7_i32 = arith.constant 7 : i32
    %97 = arith.cmpi eq, %arg1, %c7_i32 : i32
    %98 = arith.extui %97 : i1 to i32
    %c0_i32_83 = arith.constant 0 : i32
    %99 = arith.cmpi ne, %98, %c0_i32_83 : i32
    scf.if %99 {
      %c0_84 = arith.constant 0 : index
      %c0_85 = arith.constant 0 : index
      %c0_86 = arith.constant 0 : index
      %100 = vector.load %arg4[%c0_84, %c0_85, %c0_86] : memref<1x256x32xf32, #tpu.memory_space<vmem>>, vector<1x256x32xf32>
      %101 = vector.shape_cast %100 : vector<1x256x32xf32> to vector<256x32xf32>
      %102 = vector.shape_cast %91 : vector<256x32xf32> to vector<1x256x32xf32>
      tpu.vector_store %arg4[%c0_84, %c0_85, %c0_86], %102 {strides = array<i32>} : memref<1x256x32xf32, #tpu.memory_space<vmem>>, vector<1x256x32xf32>,
    } else {
    }
    return
  }
  func.func @transform_0(%arg0: i32, %arg1: i32) -> (i32, i32, i32, i32) {
    %c0_i32 = arith.constant 0 : i32
    %c0_i32_0 = arith.constant 0 : i32
    %c0_i32_1 = arith.constant 0 : i32
    return %arg0, %arg1, %c0_i32, %c0_i32_0 : i32, i32, i32, i32
  }
  func.func @transform_1(%arg0: i32, %arg1: i32) -> (i32, i32, i32, i32) {
    %c0_i32 = arith.constant 0 : i32
    %c0_i32_0 = arith.constant 0 : i32
    %c0_i32_1 = arith.constant 0 : i32
    %c0_i32_2 = arith.constant 0 : i32
    %c0_i32_3 = arith.constant 0 : i32
    return %c0_i32, %c0_i32_0, %c0_i32_1, %c0_i32_2 : i32, i32, i32, i32
  }
  func.func @transform_2(%arg0: i32, %arg1: i32) -> (i32, i32, i32) {
    %c0_i32 = arith.constant 0 : i32
    %c0_i32_0 = arith.constant 0 : i32
    %c0_i32_1 = arith.constant 0 : i32
    return %arg0, %c0_i32, %c0_i32_0 : i32, i32, i32
  }
}

module attributes {stable_mosaic.version = 11 : i64} {
  func.func @_head_kernel(%arg0: i32, %arg1: memref<2x256x32xf32, #tpu.memory_space<vmem>>, %arg2: memref<3x3x32x128xbf16, #tpu.memory_space<vmem>>, %arg3: memref<1x128xf32, #tpu.memory_space<vmem>>, %arg4: memref<1x128xf32, #tpu.memory_space<vmem>>, %arg5: memref<2x256x128xf32, #tpu.memory_space<vmem>>, %arg6: memref<2x18x18x32xf32, #tpu.memory_space<vmem>>) attributes {dimension_semantics = [#tpu.dimension_semantics<arbitrary>], iteration_bounds = array<i64: 1>, scalar_prefetch = 0 : i64, scratch_operands = 1 : i64, tpu.core_type = #tpu.core_type<tc>, window_params = [{pipeline_mode = #tpu.pipeline_mode<synchronous>, transform_indices = @transform_0, window_bounds = array<i64: 2, 256, 32>}, {pipeline_mode = #tpu.pipeline_mode<synchronous>, transform_indices = @transform_1, window_bounds = array<i64: 3, 3, 32, 128>}, {pipeline_mode = #tpu.pipeline_mode<synchronous>, transform_indices = @transform_2, window_bounds = array<i64: 1, 128>}, {pipeline_mode = #tpu.pipeline_mode<synchronous>, transform_indices = @transform_3, window_bounds = array<i64: 1, 128>}, {pipeline_mode = #tpu.pipeline_mode<synchronous>, transform_indices = @transform_4, window_bounds = array<i64: 2, 256, 128>}]} {
    %cst = arith.constant 0.000000e+00 : f32
    %0 = vector.broadcast %cst : f32 to vector<2x18x18x32xf32>
    %c0 = arith.constant 0 : index
    %c0_0 = arith.constant 0 : index
    %c0_1 = arith.constant 0 : index
    %c0_2 = arith.constant 0 : index
    %1 = vector.load %arg6[%c0, %c0_0, %c0_1, %c0_2] : memref<2x18x18x32xf32, #tpu.memory_space<vmem>>, vector<2x18x18x32xf32>
    tpu.vector_store %arg6[%c0, %c0_0, %c0_1, %c0_2], %0 {strides = array<i32>} : memref<2x18x18x32xf32, #tpu.memory_space<vmem>>, vector<2x18x18x32xf32>,
    %c0_3 = arith.constant 0 : index
    %c0_4 = arith.constant 0 : index
    %c0_5 = arith.constant 0 : index
    %2 = vector.load %arg1[%c0_3, %c0_4, %c0_5] : memref<2x256x32xf32, #tpu.memory_space<vmem>>, vector<2x256x32xf32>
    %3 = vector.shape_cast %2 : vector<2x256x32xf32> to vector<2x16x16x32xf32>
    %c0_6 = arith.constant 0 : index
    %c1 = arith.constant 1 : index
    %c1_7 = arith.constant 1 : index
    %c0_8 = arith.constant 0 : index
    %4 = vector.load %arg6[%c0_6, %c1, %c1_7, %c0_8] : memref<2x18x18x32xf32, #tpu.memory_space<vmem>>, vector<2x16x16x32xf32>
    tpu.vector_store %arg6[%c0_6, %c1, %c1_7, %c0_8], %3 {strides = array<i32>} : memref<2x18x18x32xf32, #tpu.memory_space<vmem>>, vector<2x16x16x32xf32>,
    %cst_9 = arith.constant 0.000000e+00 : f32
    %5 = vector.broadcast %cst_9 : f32 to vector<512x128xf32>
    %c0_10 = arith.constant 0 : index
    %c0_11 = arith.constant 0 : index
    %c0_12 = arith.constant 0 : index
    %c0_13 = arith.constant 0 : index
    %6 = vector.load %arg6[%c0_10, %c0_11, %c0_12, %c0_13] : memref<2x18x18x32xf32, #tpu.memory_space<vmem>>, vector<2x16x16x32xf32>
    %7 = vector.shape_cast %6 : vector<2x16x16x32xf32> to vector<512x32xf32>
    %8 = arith.truncf %7 : vector<512x32xf32> to vector<512x32xbf16>
    %c0_14 = arith.constant 0 : index
    %c0_15 = arith.constant 0 : index
    %c0_16 = arith.constant 0 : index
    %c0_17 = arith.constant 0 : index
    %9 = vector.load %arg2[%c0_14, %c0_15, %c0_16, %c0_17] : memref<3x3x32x128xbf16, #tpu.memory_space<vmem>>, vector<1x1x32x128xbf16>
    %10 = vector.shape_cast %9 : vector<1x1x32x128xbf16> to vector<32x128xbf16>
    %cst_18 = arith.constant dense<0.000000e+00> : vector<512x128xf32>
    %11 = tpu.matmul %8, %10, %cst_18 {dimension_numbers = #tpu.dot_dimension_numbers<[1], [0], [0], [1], [0, 0, 1, 1], [], []>} : vector<512x32xbf16>, vector<32x128xbf16>, vector<512x128xf32> -> vector<512x128xf32>
    %12 = arith.addf %5, %11 : vector<512x128xf32>
    %c0_19 = arith.constant 0 : index
    %c0_20 = arith.constant 0 : index
    %c1_21 = arith.constant 1 : index
    %c0_22 = arith.constant 0 : index
    %13 = vector.load %arg6[%c0_19, %c0_20, %c1_21, %c0_22] : memref<2x18x18x32xf32, #tpu.memory_space<vmem>>, vector<2x16x16x32xf32>
    %14 = vector.shape_cast %13 : vector<2x16x16x32xf32> to vector<512x32xf32>
    %15 = arith.truncf %14 : vector<512x32xf32> to vector<512x32xbf16>
    %c0_23 = arith.constant 0 : index
    %c1_24 = arith.constant 1 : index
    %c0_25 = arith.constant 0 : index
    %c0_26 = arith.constant 0 : index
    %16 = vector.load %arg2[%c0_23, %c1_24, %c0_25, %c0_26] : memref<3x3x32x128xbf16, #tpu.memory_space<vmem>>, vector<1x1x32x128xbf16>
    %17 = vector.shape_cast %16 : vector<1x1x32x128xbf16> to vector<32x128xbf16>
    %cst_27 = arith.constant dense<0.000000e+00> : vector<512x128xf32>
    %18 = tpu.matmul %15, %17, %cst_27 {dimension_numbers = #tpu.dot_dimension_numbers<[1], [0], [0], [1], [0, 0, 1, 1], [], []>} : vector<512x32xbf16>, vector<32x128xbf16>, vector<512x128xf32> -> vector<512x128xf32>
    %19 = arith.addf %12, %18 : vector<512x128xf32>
    %c0_28 = arith.constant 0 : index
    %c0_29 = arith.constant 0 : index
    %c2 = arith.constant 2 : index
    %c0_30 = arith.constant 0 : index
    %20 = vector.load %arg6[%c0_28, %c0_29, %c2, %c0_30] : memref<2x18x18x32xf32, #tpu.memory_space<vmem>>, vector<2x16x16x32xf32>
    %21 = vector.shape_cast %20 : vector<2x16x16x32xf32> to vector<512x32xf32>
    %22 = arith.truncf %21 : vector<512x32xf32> to vector<512x32xbf16>
    %c0_31 = arith.constant 0 : index
    %c2_32 = arith.constant 2 : index
    %c0_33 = arith.constant 0 : index
    %c0_34 = arith.constant 0 : index
    %23 = vector.load %arg2[%c0_31, %c2_32, %c0_33, %c0_34] : memref<3x3x32x128xbf16, #tpu.memory_space<vmem>>, vector<1x1x32x128xbf16>
    %24 = vector.shape_cast %23 : vector<1x1x32x128xbf16> to vector<32x128xbf16>
    %cst_35 = arith.constant dense<0.000000e+00> : vector<512x128xf32>
    %25 = tpu.matmul %22, %24, %cst_35 {dimension_numbers = #tpu.dot_dimension_numbers<[1], [0], [0], [1], [0, 0, 1, 1], [], []>} : vector<512x32xbf16>, vector<32x128xbf16>, vector<512x128xf32> -> vector<512x128xf32>
    %26 = arith.addf %19, %25 : vector<512x128xf32>
    %c0_36 = arith.constant 0 : index
    %c1_37 = arith.constant 1 : index
    %c0_38 = arith.constant 0 : index
    %c0_39 = arith.constant 0 : index
    %27 = vector.load %arg6[%c0_36, %c1_37, %c0_38, %c0_39] : memref<2x18x18x32xf32, #tpu.memory_space<vmem>>, vector<2x16x16x32xf32>
    %28 = vector.shape_cast %27 : vector<2x16x16x32xf32> to vector<512x32xf32>
    %29 = arith.truncf %28 : vector<512x32xf32> to vector<512x32xbf16>
    %c1_40 = arith.constant 1 : index
    %c0_41 = arith.constant 0 : index
    %c0_42 = arith.constant 0 : index
    %c0_43 = arith.constant 0 : index
    %30 = vector.load %arg2[%c1_40, %c0_41, %c0_42, %c0_43] : memref<3x3x32x128xbf16, #tpu.memory_space<vmem>>, vector<1x1x32x128xbf16>
    %31 = vector.shape_cast %30 : vector<1x1x32x128xbf16> to vector<32x128xbf16>
    %cst_44 = arith.constant dense<0.000000e+00> : vector<512x128xf32>
    %32 = tpu.matmul %29, %31, %cst_44 {dimension_numbers = #tpu.dot_dimension_numbers<[1], [0], [0], [1], [0, 0, 1, 1], [], []>} : vector<512x32xbf16>, vector<32x128xbf16>, vector<512x128xf32> -> vector<512x128xf32>
    %33 = arith.addf %26, %32 : vector<512x128xf32>
    %c0_45 = arith.constant 0 : index
    %c1_46 = arith.constant 1 : index
    %c1_47 = arith.constant 1 : index
    %c0_48 = arith.constant 0 : index
    %34 = vector.load %arg6[%c0_45, %c1_46, %c1_47, %c0_48] : memref<2x18x18x32xf32, #tpu.memory_space<vmem>>, vector<2x16x16x32xf32>
    %35 = vector.shape_cast %34 : vector<2x16x16x32xf32> to vector<512x32xf32>
    %36 = arith.truncf %35 : vector<512x32xf32> to vector<512x32xbf16>
    %c1_49 = arith.constant 1 : index
    %c1_50 = arith.constant 1 : index
    %c0_51 = arith.constant 0 : index
    %c0_52 = arith.constant 0 : index
    %37 = vector.load %arg2[%c1_49, %c1_50, %c0_51, %c0_52] : memref<3x3x32x128xbf16, #tpu.memory_space<vmem>>, vector<1x1x32x128xbf16>
    %38 = vector.shape_cast %37 : vector<1x1x32x128xbf16> to vector<32x128xbf16>
    %cst_53 = arith.constant dense<0.000000e+00> : vector<512x128xf32>
    %39 = tpu.matmul %36, %38, %cst_53 {dimension_numbers = #tpu.dot_dimension_numbers<[1], [0], [0], [1], [0, 0, 1, 1], [], []>} : vector<512x32xbf16>, vector<32x128xbf16>, vector<512x128xf32> -> vector<512x128xf32>
    %40 = arith.addf %33, %39 : vector<512x128xf32>
    %c0_54 = arith.constant 0 : index
    %c1_55 = arith.constant 1 : index
    %c2_56 = arith.constant 2 : index
    %c0_57 = arith.constant 0 : index
    %41 = vector.load %arg6[%c0_54, %c1_55, %c2_56, %c0_57] : memref<2x18x18x32xf32, #tpu.memory_space<vmem>>, vector<2x16x16x32xf32>
    %42 = vector.shape_cast %41 : vector<2x16x16x32xf32> to vector<512x32xf32>
    %43 = arith.truncf %42 : vector<512x32xf32> to vector<512x32xbf16>
    %c1_58 = arith.constant 1 : index
    %c2_59 = arith.constant 2 : index
    %c0_60 = arith.constant 0 : index
    %c0_61 = arith.constant 0 : index
    %44 = vector.load %arg2[%c1_58, %c2_59, %c0_60, %c0_61] : memref<3x3x32x128xbf16, #tpu.memory_space<vmem>>, vector<1x1x32x128xbf16>
    %45 = vector.shape_cast %44 : vector<1x1x32x128xbf16> to vector<32x128xbf16>
    %cst_62 = arith.constant dense<0.000000e+00> : vector<512x128xf32>
    %46 = tpu.matmul %43, %45, %cst_62 {dimension_numbers = #tpu.dot_dimension_numbers<[1], [0], [0], [1], [0, 0, 1, 1], [], []>} : vector<512x32xbf16>, vector<32x128xbf16>, vector<512x128xf32> -> vector<512x128xf32>
    %47 = arith.addf %40, %46 : vector<512x128xf32>
    %c0_63 = arith.constant 0 : index
    %c2_64 = arith.constant 2 : index
    %c0_65 = arith.constant 0 : index
    %c0_66 = arith.constant 0 : index
    %48 = vector.load %arg6[%c0_63, %c2_64, %c0_65, %c0_66] : memref<2x18x18x32xf32, #tpu.memory_space<vmem>>, vector<2x16x16x32xf32>
    %49 = vector.shape_cast %48 : vector<2x16x16x32xf32> to vector<512x32xf32>
    %50 = arith.truncf %49 : vector<512x32xf32> to vector<512x32xbf16>
    %c2_67 = arith.constant 2 : index
    %c0_68 = arith.constant 0 : index
    %c0_69 = arith.constant 0 : index
    %c0_70 = arith.constant 0 : index
    %51 = vector.load %arg2[%c2_67, %c0_68, %c0_69, %c0_70] : memref<3x3x32x128xbf16, #tpu.memory_space<vmem>>, vector<1x1x32x128xbf16>
    %52 = vector.shape_cast %51 : vector<1x1x32x128xbf16> to vector<32x128xbf16>
    %cst_71 = arith.constant dense<0.000000e+00> : vector<512x128xf32>
    %53 = tpu.matmul %50, %52, %cst_71 {dimension_numbers = #tpu.dot_dimension_numbers<[1], [0], [0], [1], [0, 0, 1, 1], [], []>} : vector<512x32xbf16>, vector<32x128xbf16>, vector<512x128xf32> -> vector<512x128xf32>
    %54 = arith.addf %47, %53 : vector<512x128xf32>
    %c0_72 = arith.constant 0 : index
    %c2_73 = arith.constant 2 : index
    %c1_74 = arith.constant 1 : index
    %c0_75 = arith.constant 0 : index
    %55 = vector.load %arg6[%c0_72, %c2_73, %c1_74, %c0_75] : memref<2x18x18x32xf32, #tpu.memory_space<vmem>>, vector<2x16x16x32xf32>
    %56 = vector.shape_cast %55 : vector<2x16x16x32xf32> to vector<512x32xf32>
    %57 = arith.truncf %56 : vector<512x32xf32> to vector<512x32xbf16>
    %c2_76 = arith.constant 2 : index
    %c1_77 = arith.constant 1 : index
    %c0_78 = arith.constant 0 : index
    %c0_79 = arith.constant 0 : index
    %58 = vector.load %arg2[%c2_76, %c1_77, %c0_78, %c0_79] : memref<3x3x32x128xbf16, #tpu.memory_space<vmem>>, vector<1x1x32x128xbf16>
    %59 = vector.shape_cast %58 : vector<1x1x32x128xbf16> to vector<32x128xbf16>
    %cst_80 = arith.constant dense<0.000000e+00> : vector<512x128xf32>
    %60 = tpu.matmul %57, %59, %cst_80 {dimension_numbers = #tpu.dot_dimension_numbers<[1], [0], [0], [1], [0, 0, 1, 1], [], []>} : vector<512x32xbf16>, vector<32x128xbf16>, vector<512x128xf32> -> vector<512x128xf32>
    %61 = arith.addf %54, %60 : vector<512x128xf32>
    %c0_81 = arith.constant 0 : index
    %c2_82 = arith.constant 2 : index
    %c2_83 = arith.constant 2 : index
    %c0_84 = arith.constant 0 : index
    %62 = vector.load %arg6[%c0_81, %c2_82, %c2_83, %c0_84] : memref<2x18x18x32xf32, #tpu.memory_space<vmem>>, vector<2x16x16x32xf32>
    %63 = vector.shape_cast %62 : vector<2x16x16x32xf32> to vector<512x32xf32>
    %64 = arith.truncf %63 : vector<512x32xf32> to vector<512x32xbf16>
    %c2_85 = arith.constant 2 : index
    %c2_86 = arith.constant 2 : index
    %c0_87 = arith.constant 0 : index
    %c0_88 = arith.constant 0 : index
    %65 = vector.load %arg2[%c2_85, %c2_86, %c0_87, %c0_88] : memref<3x3x32x128xbf16, #tpu.memory_space<vmem>>, vector<1x1x32x128xbf16>
    %66 = vector.shape_cast %65 : vector<1x1x32x128xbf16> to vector<32x128xbf16>
    %cst_89 = arith.constant dense<0.000000e+00> : vector<512x128xf32>
    %67 = tpu.matmul %64, %66, %cst_89 {dimension_numbers = #tpu.dot_dimension_numbers<[1], [0], [0], [1], [0, 0, 1, 1], [], []>} : vector<512x32xbf16>, vector<32x128xbf16>, vector<512x128xf32> -> vector<512x128xf32>
    %68 = arith.addf %61, %67 : vector<512x128xf32>
    %cst_90 = arith.constant dense<0.000000e+00> : vector<128xf32>
    %69 = vector.multi_reduction <add>, %68, %cst_90 [0] : vector<512x128xf32> to vector<128xf32>
    %70 = vector.shape_cast %69 : vector<128xf32> to vector<1x128xf32>
    %cst_91 = arith.constant 5.120000e+02 : f32
    %71 = vector.broadcast %cst_91 : f32 to vector<1x128xf32>
    %72 = arith.divf %70, %71 : vector<1x128xf32>
    %73 = vector.broadcast %72 : vector<1x128xf32> to vector<512x128xf32>
    %74 = arith.subf %68, %73 : vector<512x128xf32>
    %75 = vector.broadcast %72 : vector<1x128xf32> to vector<512x128xf32>
    %76 = arith.subf %68, %75 : vector<512x128xf32>
    %77 = arith.mulf %74, %76 : vector<512x128xf32>
    %cst_92 = arith.constant dense<0.000000e+00> : vector<128xf32>
    %78 = vector.multi_reduction <add>, %77, %cst_92 [0] : vector<512x128xf32> to vector<128xf32>
    %79 = vector.shape_cast %78 : vector<128xf32> to vector<1x128xf32>
    %cst_93 = arith.constant 5.120000e+02 : f32
    %80 = vector.broadcast %cst_93 : f32 to vector<1x128xf32>
    %81 = arith.divf %79, %80 : vector<1x128xf32>
    %82 = vector.broadcast %72 : vector<1x128xf32> to vector<512x128xf32>
    %83 = arith.subf %68, %82 : vector<512x128xf32>
    %cst_94 = arith.constant 9.99999974E-6 : f32
    %84 = vector.broadcast %cst_94 : f32 to vector<1x128xf32>
    %85 = arith.addf %81, %84 : vector<1x128xf32>
    %86 = math.rsqrt %85 : vector<1x128xf32>
    %87 = vector.broadcast %86 : vector<1x128xf32> to vector<512x128xf32>
    %88 = arith.mulf %83, %87 : vector<512x128xf32>
    %c0_95 = arith.constant 0 : index
    %c0_96 = arith.constant 0 : index
    %89 = vector.load %arg3[%c0_95, %c0_96] : memref<1x128xf32, #tpu.memory_space<vmem>>, vector<1x128xf32>
    %90 = vector.broadcast %89 : vector<1x128xf32> to vector<512x128xf32>
    %91 = arith.mulf %88, %90 : vector<512x128xf32>
    %c0_97 = arith.constant 0 : index
    %c0_98 = arith.constant 0 : index
    %92 = vector.load %arg4[%c0_97, %c0_98] : memref<1x128xf32, #tpu.memory_space<vmem>>, vector<1x128xf32>
    %93 = vector.broadcast %92 : vector<1x128xf32> to vector<512x128xf32>
    %94 = arith.addf %91, %93 : vector<512x128xf32>
    %cst_99 = arith.constant 0.000000e+00 : f32
    %95 = vector.broadcast %cst_99 : f32 to vector<512x128xf32>
    %96 = arith.maximumf %94, %95 : vector<512x128xf32>
    %97 = vector.shape_cast %96 : vector<512x128xf32> to vector<2x256x128xf32>
    %c0_100 = arith.constant 0 : index
    %c0_101 = arith.constant 0 : index
    %c0_102 = arith.constant 0 : index
    %98 = vector.load %arg5[%c0_100, %c0_101, %c0_102] : memref<2x256x128xf32, #tpu.memory_space<vmem>>, vector<2x256x128xf32>
    tpu.vector_store %arg5[%c0_100, %c0_101, %c0_102], %97 {strides = array<i32>} : memref<2x256x128xf32, #tpu.memory_space<vmem>>, vector<2x256x128xf32>,
    return
  }
  func.func @transform_0(%arg0: i32) -> (i32, i32, i32) {
    %c0_i32 = arith.constant 0 : i32
    %c0_i32_0 = arith.constant 0 : i32
    %c0_i32_1 = arith.constant 0 : i32
    %c0_i32_2 = arith.constant 0 : i32
    return %c0_i32, %c0_i32_0, %c0_i32_1 : i32, i32, i32
  }
  func.func @transform_1(%arg0: i32) -> (i32, i32, i32, i32) {
    %c0_i32 = arith.constant 0 : i32
    %c0_i32_0 = arith.constant 0 : i32
    %c0_i32_1 = arith.constant 0 : i32
    %c0_i32_2 = arith.constant 0 : i32
    %c0_i32_3 = arith.constant 0 : i32
    return %c0_i32, %c0_i32_0, %c0_i32_1, %c0_i32_2 : i32, i32, i32, i32
  }
  func.func @transform_2(%arg0: i32) -> (i32, i32) {
    %c0_i32 = arith.constant 0 : i32
    %c0_i32_0 = arith.constant 0 : i32
    %c0_i32_1 = arith.constant 0 : i32
    return %c0_i32, %c0_i32_0 : i32, i32
  }
  func.func @transform_3(%arg0: i32) -> (i32, i32) {
    %c0_i32 = arith.constant 0 : i32
    %c0_i32_0 = arith.constant 0 : i32
    %c0_i32_1 = arith.constant 0 : i32
    return %c0_i32, %c0_i32_0 : i32, i32
  }
  func.func @transform_4(%arg0: i32) -> (i32, i32, i32) {
    %c0_i32 = arith.constant 0 : i32
    %c0_i32_0 = arith.constant 0 : i32
    %c0_i32_1 = arith.constant 0 : i32
    %c0_i32_2 = arith.constant 0 : i32
    return %c0_i32, %c0_i32_0, %c0_i32_1 : i32, i32, i32
  }
}

</mosaic_0001>

<bundles_post_ra>
// kernel: convlstm_seg_forward.3
= control target key start
LH: loop header
LB: loop body
LE: loop exit
PB: predicated region body
PF: predicated region fallthrough
CT: control target
= control target key end

     0   :  { %s3675_s9 = smov 0   ;;  %s4749_s0 = inlined_call_operand.vmem [shape: f32[16,18,18,4], index: 0, kind: input, shape index: {}]   ;;  %s4750_s1 = inlined_call_operand.vmem [shape: bf16[3,3,4,128], index: 1, kind: input, shape index: {}]   ;;  %s4751_s2 = inlined_call_operand.vmem [shape: f32[16,256,128], index: 2, kind: output, shape index: {}]  }
   0x1 LB: > { %s2817_s10 = sadd.s32 4294967295, %s3658_s9   ;;  %p2821_p0 = scmp.ge.s32.totalorder %s3658_s9, 1  ;;  %s3658_s9 = sphi %s3675_s9, %s12_s9  }
   0x2   : > { %p112_p1 = scmp.lt.s32.totalorder %s3658_s9, 17 }
   0x4   : > { %p113_p2 = pnand %p2821_p0, %p112_p1 }
   0x6   : > { %116 = sbr.rel (%p113_p2) target bundleno = 507 (0x1fb), region = 28 }
   0xb   : > { %v2825_v0 = vld [vmem:[%s4750_s1 + $0x2] sm:$0x3]  ;;  %vm293_vm0 = vcmask 1041408   ;;  %p134_p3 = scmp.lt.s32.totalorder %s2817_s10, 15  ;;  %v193_v2 = vld [vmem:[%s4750_s1] sm:$0x3] }
   0xc   : > { %3634 = vmatprep.subr.msk.bf16.mxu1 %vm293_vm0, %v2825_v0  ;;  %3633 = vmatprep.subr.msk.bf16.mxu0 %vm293_vm0, %v2825_v0  ;;  %v295_v1 = vsel %vm293_vm0, %v2825_v0, 0  ;;  %v2858_v3 = vld [vmem:[%s4750_s1 + $0x4] sm:$0x3]  ;;  %vm244_vm1 = vcmask 31744   ;;  %v507_v18 = vsel %vm293_vm0, %v193_v2, 0 }
   0xd   : > { %3632 = vmatpush3.bf16.msra.mxu1 %v295_v1  ;;  %3326 = vmatpush3.bf16.msra.mxu0 %v295_v1  ;;  %s4835_s10 = smov (!%p134_p3, %s2817_s10), 15  ;;  %v769_v15 = vsel %vm293_vm0, %v2858_v3, 0  ;;  %v3737_v24 = vld [vmem:[%s4750_s1 + $0x6] sm:$0x3]  ;;  %v3742_v25 = vld [vmem:[%s4750_s1 + $0x8] sm:$0x3] }
   0xe   : > { %3635 = vmatprep.subr.msk.bf16.mxu1 %vm293_vm0, %v193_v2  ;;  %3636 = vmatprep.subr.msk.bf16.mxu0 %vm293_vm0, %v2858_v3  ;;  %s3643_s17 = smul.u32 432, %s4835_s10  ;;  %s3171_s5 = sshll.u32 %s4835_s10, 8 }
   0xf   : > { %s4626_s8 = scalar_lea.vmem %s4751_s2, %s3171_s5 }
  0x10   : > { %s3703_s20 = scalar_lea.vmem %s4749_s0, %s3643_s17 }
  0x11   : > { %v194_v4 = vld [vmem:[%s3703_s20 + $0x1] sm:$0xff]  ;;  %v195_v5 = vld [vmem:[%s3703_s20 + $0x9] sm:$0xff]  ;;  %v196_v9 = vld [vmem:[%s3703_s20 + $0x19] sm:$0xff] }
  0x12   : > { %v210_v6 = vld [vmem:[%s3703_s20 + $0xc1] sm:$0xff]  ;;  %v226_v7 = vpack.c.bf16 %v195_v5, %v194_v4  ;;  %v211_v8 = vld [vmem:[%s3703_s20 + $0xc9] sm:$0xff]  ;;  %v212_v13 = vld [vmem:[%s3703_s20 + $0xd9] sm:$0xff] }
  0x13   : > { %v197_v10 = vld [vmem:[%s3703_s20 + $0x21] sm:$0xff]  ;;  %v3711_v11 = vpack.c.bf16 %v211_v8, %v210_v6  ;;  %v198_v16 = vld [vmem:[%s3703_s20 + $0x31] sm:$0xff]  ;;  %v199_v19 = vld [vmem:[%s3703_s20 + $0x39] sm:$0xff]  ;;  %v1358_v8 = vsel %vm293_vm0, %v3742_v25, 0 }
  0x14   : > { %v3713_v12 = vpack.c.bf16 %v197_v10, %v196_v9  ;;  %v213_v14 = vld [vmem:[%s3703_s20 + $0xe1] sm:$0xff]  ;;  %3327 = vmatprep.mubr.msk.bf16.mxu0 %vm244_vm1, %v226_v7  ;;  %v214_v20 = vld [vmem:[%s3703_s20 + $0xf1] sm:$0xff]  ;;  %v215_v21 = vld [vmem:[%s3703_s20 + $0xf9] sm:$0xff]  ;;  %v3730_v22 = vpack.c.bf16 %v199_v19, %v198_v16  ;;  %v1064_v10 = vsel %vm293_vm0, %v3737_v24, 0 }
  0x15   : > { %v3720_v17 = vpack.c.bf16 %v213_v14, %v212_v13  ;;  %3343 = vmatprep.mubr.msk.bf16.mxu1 %vm244_vm1, %v3711_v11  ;;  %v3732_v23 = vpack.c.bf16 %v215_v21, %v214_v20  ;;  %v200_v26 = vld [vmem:[%s3703_s20 + $0x49] sm:$0xff]  ;;  %v201_v27 = vld [vmem:[%s3703_s20 + $0x51] sm:$0xff]  ;;  %v202_v30 = vld [vmem:[%s3703_s20 + $0x61] sm:$0xff] }
  0x16   : > { %3328 = vmatmul.mubr.msk.bf16.vlgmr.msra.gmra.mxu0 %vm244_vm1, %v3713_v12  ;;  %v216_v28 = vld [vmem:[%s3703_s20 + $0x109] sm:$0xff]  ;;  %v217_v29 = vld [vmem:[%s3703_s20 + $0x111] sm:$0xff]  ;;  %v218_v32 = vld [vmem:[%s3703_s20 + $0x121] sm:$0xff]  ;;  %v3760_v34 = vpack.c.bf16 %v201_v27, %v200_v26 }
  0x17   : > { %3344 = vmatmul.mubr.msk.bf16.vlgmr.msra.gmra.mxu1 %vm244_vm1, %v3720_v17  ;;  %3394 = vmatpush3.bf16.msra.mxu0 %v769_v15  ;;  %v203_v31 = vld [vmem:[%s3703_s20 + $0x69] sm:$0xff]  ;;  %v3764_v35 = vpack.c.bf16 %v217_v29, %v216_v28  ;;  %v204_v38 = vld [vmem:[%s3703_s20 + $0x79] sm:$0xff]  ;;  %v205_v39 = vld [vmem:[%s3703_s20 + $0x81] sm:$0xff] }
  0x18   : > { %3360 = vmatpush3.bf16.msra.mxu1 %v507_v18  ;;  %3331 = vmatprep.mubr.msk.bf16.mxu0 %vm244_vm1, %v3730_v22  ;;  %v219_v33 = vld [vmem:[%s3703_s20 + $0x129] sm:$0xff]  ;;  %v3766_v36 = vpack.c.bf16 %v203_v31, %v202_v30  ;;  %v220_v40 = vld [vmem:[%s3703_s20 + $0x139] sm:$0xff]  ;;  %v221_v41 = vld [vmem:[%s3703_s20 + $0x141] sm:$0xff]  ;;  %v3786_v46 = vpack.c.bf16 %v205_v39, %v204_v38 }
  0x19   : > { %3347 = vmatprep.mubr.msk.bf16.mxu1 %vm244_vm1, %v3732_v23  ;;  %3637 = vmatprep.subr.msk.bf16.mxu1 %vm293_vm0, %v3737_v24  ;;  %v3768_v37 = vpack.c.bf16 %v219_v33, %v218_v32  ;;  %v206_v42 = vld [vmem:[%s3703_s20 + $0x91] sm:$0xff]  ;;  %v207_v43 = vld [vmem:[%s3703_s20 + $0x99] sm:$0xff]  ;;  %v3788_v47 = vpack.c.bf16 %v221_v41, %v220_v40  ;;  %v208_v50 = vld [vmem:[%s3703_s20 + $0xa9] sm:$0xff] }
  0x1a   : > { %3638 = vmatprep.subr.msk.bf16.mxu0 %vm293_vm0, %v3742_v25  ;;  %v222_v44 = vld [vmem:[%s3703_s20 + $0x151] sm:$0xff]  ;;  %v223_v45 = vld [vmem:[%s3703_s20 + $0x159] sm:$0xff]  ;;  %v3790_v48 = vpack.c.bf16 %v207_v43, %v206_v42  ;;  %v224_v52 = vld [vmem:[%s3703_s20 + $0x169] sm:$0xff] }
  0x1b   : > { %v3792_v49 = vpack.c.bf16 %v223_v45, %v222_v44  ;;  %v209_v51 = vld [vmem:[%s3703_s20 + $0xb1] sm:$0xff]  ;;  %v670_v54 = vld [vmem:[%s3703_s20 + $0x2] sm:$0xff]  ;;  %v672_v62 = vld [vmem:[%s3703_s20 + $0x1a] sm:$0xff] }
  0x1c   : > { %v225_v53 = vld [vmem:[%s3703_s20 + $0x171] sm:$0xff]  ;;  %v145_v56 = vld [vmem:[%s3703_s20] sm:$0xff]  ;;  %v146_v57 = vld [vmem:[%s3703_s20 + $0x8] sm:$0xff]  ;;  %v3810_v58 = vpack.c.bf16 %v209_v51, %v208_v50 }
  0x1d   : > { %v671_v55 = vld [vmem:[%s3703_s20 + $0xa] sm:$0xff]  ;;  %v3812_v59 = vpack.c.bf16 %v225_v53, %v224_v52  ;;  %v177_v61 = vpack.c.bf16 %v146_v57, %v145_v56  ;;  %v673_v63 = vld [vmem:[%s3703_s20 + $0x22] sm:$0xff]  ;;  %v147_v0 = vld [vmem:[%s3703_s20 + $0x18] sm:$0xff] }
  0x1e   : > { %3332 = vmatmul.mubr.msk.bf16.gmra.mxu0 %vm244_vm1, %v3760_v34  ;;  %v702_v60 = vpack.c.bf16 %v671_v55, %v670_v54  ;;  %v148_v1 = vld [vmem:[%s3703_s20 + $0x20] sm:$0xff]  ;;  %v149_v2 = vld [vmem:[%s3703_s20 + $0x30] sm:$0xff]  ;;  %v150_v3 = vld [vmem:[%s3703_s20 + $0x38] sm:$0xff]  ;;  %v3826_v4 = vpack.c.bf16 %v673_v63, %v672_v62 }
  0x1f   : > { %3348 = vmatmul.mubr.msk.bf16.gmra.mxu1 %vm244_vm1, %v3764_v35  ;;  %3335 = vmatprep.mubr.msk.bf16.mxu0 %vm244_vm1, %v3766_v36  ;;  %v674_v5 = vld [vmem:[%s3703_s20 + $0x32] sm:$0xff]  ;;  %v675_v6 = vld [vmem:[%s3703_s20 + $0x3a] sm:$0xff]  ;;  %v3830_v7 = vpack.c.bf16 %v148_v1, %v147_v0  ;;  %v3834_v9 = vpack.c.bf16 %v150_v3, %v149_v2  ;;  %v3845_v14 = vld [vmem:[%s4750_s1 + $0xa] sm:$0x3] }
  0x20   : > { %3351 = vmatprep.mubr.msk.bf16.mxu1 %vm244_vm1, %v3768_v37  ;;  %v3838_v13 = vpack.c.bf16 %v675_v6, %v674_v5  ;;  %v3850_v15 = vld [vmem:[%s4750_s1 + $0xc] sm:$0x3]  ;;  %v677_v19 = vld [vmem:[%s3703_s20 + $0x52] sm:$0xff]  ;;  %v678_v21 = vld [vmem:[%s3703_s20 + $0x62] sm:$0xff] }
  0x21   : > { %v151_v16 = vld [vmem:[%s3703_s20 + $0x48] sm:$0xff]  ;;  %v152_v20 = vld [vmem:[%s3703_s20 + $0x50] sm:$0xff]  ;;  %v153_v25 = vld [vmem:[%s3703_s20 + $0x60] sm:$0xff] }
  0x22   : > { %v676_v18 = vld [vmem:[%s3703_s20 + $0x4a] sm:$0xff]  ;;  %v3872_v28 = vpack.c.bf16 %v152_v20, %v151_v16  ;;  %v155_v31 = vld [vmem:[%s3703_s20 + $0x78] sm:$0xff]  ;;  %v681_v33 = vld [vmem:[%s3703_s20 + $0x82] sm:$0xff] }
  0x23   : > { %v679_v24 = vld [vmem:[%s3703_s20 + $0x6a] sm:$0xff]  ;;  %v3868_v27 = vpack.c.bf16 %v677_v19, %v676_v18  ;;  %v680_v32 = vld [vmem:[%s3703_s20 + $0x7a] sm:$0xff]  ;;  %v682_v39 = vld [vmem:[%s3703_s20 + $0x92] sm:$0xff] }
  0x24   : > { %v154_v26 = vld [vmem:[%s3703_s20 + $0x68] sm:$0xff]  ;;  %v3874_v29 = vpack.c.bf16 %v679_v24, %v678_v21  ;;  %v156_v38 = vld [vmem:[%s3703_s20 + $0x80] sm:$0xff]  ;;  %v157_v41 = vld [vmem:[%s3703_s20 + $0x90] sm:$0xff]  ;;  %v3894_v43 = vpack.c.bf16 %v681_v33, %v680_v32 }
  0x25   : > { %v3876_v30 = vpack.c.bf16 %v154_v26, %v153_v25  ;;  %v683_v40 = vld [vmem:[%s3703_s20 + $0x9a] sm:$0xff]  ;;  %v3896_v44 = vpack.c.bf16 %v156_v38, %v155_v31  ;;  %v159_v51 = vld [vmem:[%s3703_s20 + $0xa8] sm:$0xff]  ;;  %v685_v53 = vld [vmem:[%s3703_s20 + $0xb2] sm:$0xff] }
  0x26   : > { %3336 = vmatmul.mubr.msk.bf16.gmra.mxu0 %vm244_vm1, %v3786_v46  ;;  %v158_v42 = vld [vmem:[%s3703_s20 + $0x98] sm:$0xff]  ;;  %v3898_v45 = vpack.c.bf16 %v683_v40, %v682_v39  ;;  %v684_v52 = vld [vmem:[%s3703_s20 + $0xaa] sm:$0xff]  ;;  %v686_v55 = vld [vmem:[%s3703_s20 + $0xc2] sm:$0xff] }
  0x27   : > { %3352 = vmatmul.mubr.msk.bf16.gmra.mxu1 %vm244_vm1, %v3788_v47  ;;  %3339 = vmatprep.mubr.msk.bf16.mxu0 %vm244_vm1, %v3790_v48  ;;  %v3900_v50 = vpack.c.bf16 %v158_v42, %v157_v41  ;;  %v160_v54 = vld [vmem:[%s3703_s20 + $0xb0] sm:$0xff]  ;;  %v161_v57 = vld [vmem:[%s3703_s20 + $0xc0] sm:$0xff]  ;;  %v163_v1 = vld [vmem:[%s3703_s20 + $0xd8] sm:$0xff] }
  0x28   : > { %3355 = vmatprep.mubr.msk.bf16.mxu1 %vm244_vm1, %v3792_v49  ;;  %v687_v56 = vld [vmem:[%s3703_s20 + $0xca] sm:$0xff]  ;;  %v3920_v62 = vpack.c.bf16 %v160_v54, %v159_v51  ;;  %v688_v2 = vld [vmem:[%s3703_s20 + $0xda] sm:$0xff]  ;;  %v689_v3 = vld [vmem:[%s3703_s20 + $0xe2] sm:$0xff] }
  0x29   : > { %v3922_v63 = vpack.c.bf16 %v687_v56, %v686_v55  ;;  %v164_v5 = vld [vmem:[%s3703_s20 + $0xe0] sm:$0xff]  ;;  %v690_v6 = vld [vmem:[%s3703_s20 + $0xf2] sm:$0xff]  ;;  %v3942_v18 = vpack.c.bf16 %v689_v3, %v688_v2  ;;  %v167_v24 = vld [vmem:[%s3703_s20 + $0x108] sm:$0xff] }
  0x2a   : > { %v166_v16 = vld [vmem:[%s3703_s20 + $0xf8] sm:$0xff]  ;;  %v3944_v19 = vpack.c.bf16 %v164_v5, %v163_v1  ;;  %v692_v25 = vld [vmem:[%s3703_s20 + $0x10a] sm:$0xff]  ;;  %v694_v32 = vld [vmem:[%s3703_s20 + $0x122] sm:$0xff] }
  0x2b   : > { %v693_v26 = vld [vmem:[%s3703_s20 + $0x112] sm:$0xff]  ;;  %v695_v33 = vld [vmem:[%s3703_s20 + $0x12a] sm:$0xff]  ;;  %v169_v38 = vld [vmem:[%s3703_s20 + $0x120] sm:$0xff] }
  0x2c   : > { %v168_v31 = vld [vmem:[%s3703_s20 + $0x110] sm:$0xff]  ;;  %v170_v39 = vld [vmem:[%s3703_s20 + $0x128] sm:$0xff]  ;;  %v3966_v40 = vpack.c.bf16 %v693_v26, %v692_v25  ;;  %v3970_v42 = vpack.c.bf16 %v695_v33, %v694_v32  ;;  %v172_v55 = vld [vmem:[%s3703_s20 + $0x140] sm:$0xff]  ;;  %v1652_v32 = vsel %vm293_vm0, %v3845_v14, 0 }
  0x2d   : > { %v3968_v41 = vpack.c.bf16 %v168_v31, %v167_v24  ;;  %v3972_v51 = vpack.c.bf16 %v170_v39, %v169_v38  ;;  %v697_v54 = vld [vmem:[%s3703_s20 + $0x142] sm:$0xff]  ;;  %v698_v56 = vld [vmem:[%s3703_s20 + $0x152] sm:$0xff]  ;;  %v1947_v31 = vsel %vm293_vm0, %v3850_v15, 0  ;;  %v3103_v33 = vld [vmem:[%s4750_s1 + $0xe] sm:$0x3] }
  0x2e   : > { %3340 = vmatmul.mubr.msk.bf16.gmra.mxu0 %vm244_vm1, %v3810_v58  ;;  %v174_v1 = vld [vmem:[%s3703_s20 + $0x158] sm:$0xff]  ;;  %v176_v24 = vld [vmem:[%s3703_s20 + $0x170] sm:$0xff] }
  0x2f   : > { %3356 = vmatmul.mubr.msk.bf16.gmra.mxu1 %vm244_vm1, %v3812_v59  ;;  %3395 = vmatprep.mubr.msk.bf16.mxu0 %vm244_vm1, %v702_v60  ;;  %v162_v60 = vld [vmem:[%s3703_s20 + $0xc8] sm:$0xff] }
  0x30   : > { %3361 = vmatprep.mubr.msk.bf16.mxu1 %vm244_vm1, %v177_v61  ;;  %v3918_v61 = vpack.c.bf16 %v685_v53, %v684_v52  ;;  %v3924_v0 = vpack.c.bf16 %v162_v60, %v161_v57  ;;  %v171_v52 = vld [vmem:[%s3703_s20 + $0x138] sm:$0xff]  ;;  %v173_v60 = vld [vmem:[%s3703_s20 + $0x150] sm:$0xff] }
  0x31   : > { %v696_v53 = vld [vmem:[%s3703_s20 + $0x13a] sm:$0xff]  ;;  %v3992_v3 = vpack.c.bf16 %v172_v55, %v171_v52  ;;  %v3004_v55 = vld [vmem:[%s3703_s20 + $0x18a] sm:$0xff] }
  0x32   : > { %v699_v57 = vld [vmem:[%s3703_s20 + $0x15a] sm:$0xff]  ;;  %v3990_v2 = vpack.c.bf16 %v697_v54, %v696_v53  ;;  %v3003_v54 = vld [vmem:[%s3703_s20 + $0x182] sm:$0xff] }
  0x33   : > { %v3994_v5 = vpack.c.bf16 %v699_v57, %v698_v56  ;;  %v3053_v52 = vld [vmem:[%s3703_s20 + $0x1a0] sm:$0xff] }
  0x36   : > { %3396 = vmatmul.mubr.msk.bf16.vlgmr.msra.gmra.mxu0 %vm244_vm1, %v3826_v4 }
  0x37   : > { %3362 = vmatmul.mubr.msk.bf16.vlgmr.msra.gmra.mxu1 %vm244_vm1, %v3830_v7  ;;  %3462 = vmatpush3.bf16.msra.mxu0 %v1358_v8  ;;  %v691_v8 = vld [vmem:[%s3703_s20 + $0xfa] sm:$0xff] }
  0x38   : > { %3428 = vmatpush3.bf16.msra.mxu1 %v1064_v10  ;;  %3365 = vmatprep.mubr.msk.bf16.mxu1 %vm244_vm1, %v3834_v9  ;;  %v165_v10 = vld [vmem:[%s3703_s20 + $0xf0] sm:$0xff]  ;;  %v3946_v20 = vpack.c.bf16 %v691_v8, %v690_v6  ;;  %v3996_v6 = vpack.c.bf16 %v174_v1, %v173_v60 }
  0x39   : > { %3399 = vmatprep.mubr.msk.bf16.mxu0 %vm244_vm1, %v3838_v13  ;;  %3639 = vmatprep.subr.msk.bf16.mxu1 %vm293_vm0, %v3845_v14  ;;  %v3948_v21 = vpack.c.bf16 %v166_v16, %v165_v10  ;;  %v700_v8 = vld [vmem:[%s3703_s20 + $0x16a] sm:$0xff]  ;;  %v701_v10 = vld [vmem:[%s3703_s20 + $0x172] sm:$0xff] }
  0x3a   : > { %3640 = vmatprep.subr.msk.bf16.mxu0 %vm293_vm0, %v3850_v15  ;;  %v175_v16 = vld [vmem:[%s3703_s20 + $0x168] sm:$0xff]  ;;  %v4010_v25 = vpack.c.bf16 %v701_v10, %v700_v8 }
  0x3b   : > { %v4012_v26 = vpack.c.bf16 %v176_v24, %v175_v16 }
  0x3e   : > { %3400 = vmatmul.mubr.msk.bf16.gmra.mxu0 %vm244_vm1, %v3868_v27 }
  0x3f   : > { %3366 = vmatmul.mubr.msk.bf16.gmra.mxu1 %vm244_vm1, %v3872_v28  ;;  %3403 = vmatprep.mubr.msk.bf16.mxu0 %vm244_vm1, %v3874_v29 }
  0x40   : > { %3369 = vmatprep.mubr.msk.bf16.mxu1 %vm244_vm1, %v3876_v30 }
  0x46   : > { %3404 = vmatmul.mubr.msk.bf16.gmra.mxu0 %vm244_vm1, %v3894_v43 }
  0x47   : > { %3370 = vmatmul.mubr.msk.bf16.gmra.mxu1 %vm244_vm1, %v3896_v44  ;;  %3407 = vmatprep.mubr.msk.bf16.mxu0 %vm244_vm1, %v3898_v45 }
  0x48   : > { %3373 = vmatprep.mubr.msk.bf16.mxu1 %vm244_vm1, %v3900_v50 }
  0x4e   : > { %3408 = vmatmul.mubr.msk.bf16.gmra.mxu0 %vm244_vm1, %v3918_v61 }
  0x4f   : > { %3374 = vmatmul.mubr.msk.bf16.gmra.mxu1 %vm244_vm1, %v3920_v62  ;;  %3411 = vmatprep.mubr.msk.bf16.mxu0 %vm244_vm1, %v3922_v63 }
  0x50   : > { %3377 = vmatprep.mubr.msk.bf16.mxu1 %vm244_vm1, %v3924_v0 }
  0x56   : > { %3412 = vmatmul.mubr.msk.bf16.gmra.mxu0 %vm244_vm1, %v3942_v18 }
  0x57   : > { %3378 = vmatmul.mubr.msk.bf16.gmra.mxu1 %vm244_vm1, %v3944_v19  ;;  %3415 = vmatprep.mubr.msk.bf16.mxu0 %vm244_vm1, %v3946_v20 }
  0x58   : > { %3381 = vmatprep.mubr.msk.bf16.mxu1 %vm244_vm1, %v3948_v21 }
  0x5e   : > { %3416 = vmatmul.mubr.msk.bf16.gmra.mxu0 %vm244_vm1, %v3966_v40 }
  0x5f   : > { %3382 = vmatmul.mubr.msk.bf16.gmra.mxu1 %vm244_vm1, %v3968_v41  ;;  %3419 = vmatprep.mubr.msk.bf16.mxu0 %vm244_vm1, %v3970_v42 }
  0x60   : > { %3385 = vmatprep.mubr.msk.bf16.mxu1 %vm244_vm1, %v3972_v51 }
  0x66   : > { %3420 = vmatmul.mubr.msk.bf16.gmra.mxu0 %vm244_vm1, %v3990_v2 }
  0x67   : > { %3386 = vmatmul.mubr.msk.bf16.gmra.mxu1 %vm244_vm1, %v3992_v3  ;;  %3423 = vmatprep.mubr.msk.bf16.mxu0 %vm244_vm1, %v3994_v5 }
  0x68   : > { %3389 = vmatprep.mubr.msk.bf16.mxu1 %vm244_vm1, %v3996_v6 }
  0x6e   : > { %3424 = vmatmul.mubr.msk.bf16.gmra.mxu0 %vm244_vm1, %v4010_v25 }
  0x6f   : > { %3390 = vmatmul.mubr.msk.bf16.gmra.mxu1 %vm244_vm1, %v4012_v26  ;;  %3463 = vmatprep.mubr.msk.bf16.mxu0 %vm244_vm1, %v3713_v12  ;;  %v3152_v12 = vld [vmem:[%s4750_s1 + $0x10] sm:$0x3] }
  0x70   : > { %3429 = vmatprep.mubr.msk.bf16.mxu1 %vm244_vm1, %v3830_v7 }
  0x76   : > { %3464 = vmatmul.mubr.msk.bf16.vlgmr.msra.gmra.mxu0 %vm244_vm1, %v3730_v22 }
  0x77   : > { %3430 = vmatmul.mubr.msk.bf16.vlgmr.msra.gmra.mxu1 %vm244_vm1, %v3834_v9  ;;  %3530 = vmatpush3.bf16.msra.mxu0 %v1947_v31 }
  0x78   : > { %3496 = vmatpush3.bf16.msra.mxu1 %v1652_v32  ;;  %3433 = vmatprep.mubr.msk.bf16.mxu1 %vm244_vm1, %v3872_v28 }
  0x79   : > { %3467 = vmatprep.mubr.msk.bf16.mxu0 %vm244_vm1, %v3760_v34  ;;  %3641 = vmatprep.subr.msk.bf16.mxu1 %vm293_vm0, %v3103_v33 }
  0x7a   : > { %3642 = vmatprep.subr.msk.bf16.mxu0 %vm293_vm0, %v3152_v12 }
  0x7e   : > { %3468 = vmatmul.mubr.msk.bf16.gmra.mxu0 %vm244_vm1, %v3766_v36 }
  0x7f   : > { %3434 = vmatmul.mubr.msk.bf16.gmra.mxu1 %vm244_vm1, %v3876_v30  ;;  %3471 = vmatprep.mubr.msk.bf16.mxu0 %vm244_vm1, %v3786_v46 }
  0x80   : > { %3437 = vmatprep.mubr.msk.bf16.mxu1 %vm244_vm1, %v3896_v44 }
  0x86   : > { %3472 = vmatmul.mubr.msk.bf16.gmra.mxu0 %vm244_vm1, %v3790_v48  ;;  %v2535_v48 = vsel %vm293_vm0, %v3152_v12, 0 }
  0x87   : > { %3438 = vmatmul.mubr.msk.bf16.gmra.mxu1 %vm244_vm1, %v3900_v50  ;;  %3475 = vmatprep.mubr.msk.bf16.mxu0 %vm244_vm1, %v3810_v58 }
  0x88   : > { %3441 = vmatprep.mubr.msk.bf16.mxu1 %vm244_vm1, %v3920_v62 }
  0x8e   : > { %3476 = vmatmul.mubr.msk.bf16.gmra.mxu0 %vm244_vm1, %v3711_v11  ;;  %v2954_v11 = vld [vmem:[%s3703_s20 + $0x181] sm:$0xff] }
  0x8f   : > { %3442 = vmatmul.mubr.msk.bf16.gmra.mxu1 %vm244_vm1, %v3924_v0  ;;  %3479 = vmatprep.mubr.msk.bf16.mxu0 %vm244_vm1, %v3720_v17  ;;  %v2955_v17 = vld [vmem:[%s3703_s20 + $0x189] sm:$0xff] }
  0x90   : > { %3445 = vmatprep.mubr.msk.bf16.mxu1 %vm244_vm1, %v3944_v19 }
  0x96   : > { %3480 = vmatmul.mubr.msk.bf16.gmra.mxu0 %vm244_vm1, %v3732_v23  ;;  %v2905_v23 = vld [vmem:[%s3703_s20 + $0x180] sm:$0xff] }
  0x97   : > { %3446 = vmatmul.mubr.msk.bf16.gmra.mxu1 %vm244_vm1, %v3948_v21  ;;  %3483 = vmatprep.mubr.msk.bf16.mxu0 %vm244_vm1, %v3764_v35  ;;  %v2906_v35 = vld [vmem:[%s3703_s20 + $0x188] sm:$0xff] }
  0x98   : > { %3449 = vmatprep.mubr.msk.bf16.mxu1 %vm244_vm1, %v3968_v41 }
  0x9e   : > { %3484 = vmatmul.mubr.msk.bf16.gmra.mxu0 %vm244_vm1, %v3768_v37  ;;  %v4094_v37 = vpack.c.bf16 %v2955_v17, %v2954_v11 }
  0x9f   : > { %3450 = vmatmul.mubr.msk.bf16.gmra.mxu1 %vm244_vm1, %v3972_v51  ;;  %3487 = vmatprep.mubr.msk.bf16.mxu0 %vm244_vm1, %v3788_v47  ;;  %v1012_v47 = vpack.c.bf16 %v2906_v35, %v2905_v23  ;;  %v3079_v23 = vld [vmem:[%s3703_s20 + $0x91] sm:$0xff]  ;;  %v3080_v35 = vld [vmem:[%s3703_s20 + $0x99] sm:$0xff] }
  0xa0   : > { %3453 = vmatprep.mubr.msk.bf16.mxu1 %vm244_vm1, %v3992_v3 }
  0xa6   : > { %3488 = vmatmul.mubr.msk.bf16.gmra.mxu0 %vm244_vm1, %v3792_v49  ;;  %v2241_v49 = vsel %vm293_vm0, %v3103_v33, 0 }
  0xa7   : > { %3454 = vmatmul.mubr.msk.bf16.gmra.mxu1 %vm244_vm1, %v3996_v6  ;;  %3491 = vmatprep.mubr.msk.bf16.mxu0 %vm244_vm1, %v3812_v59 }
  0xa8   : > { %3457 = vmatprep.mubr.msk.bf16.mxu1 %vm244_vm1, %v4012_v26 }
  0xae   : > { %3492 = vmatmul.mubr.msk.bf16.gmra.mxu0 %vm244_vm1, %v4094_v37 }
  0xaf   : > { %3458 = vmatmul.mubr.msk.bf16.gmra.mxu1 %vm244_vm1, %v1012_v47  ;;  %3531 = vmatprep.mubr.msk.bf16.mxu0 %vm244_vm1, %v3834_v9 }
  0xb0   : > { %3497 = vmatprep.mubr.msk.bf16.mxu1 %vm244_vm1, %v3826_v4 }
  0xb6   : > { %3532 = vmatmul.mubr.msk.bf16.vlgmr.msra.gmra.mxu0 %vm244_vm1, %v3872_v28 }
  0xb7   : > { %3498 = vmatmul.mubr.msk.bf16.vlgmr.msra.gmra.mxu1 %vm244_vm1, %v3838_v13  ;;  %3598 = vmatpush3.bf16.msra.mxu0 %v2535_v48 }
  0xb8   : > { %3564 = vmatpush3.bf16.msra.mxu1 %v2241_v49  ;;  %3501 = vmatprep.mubr.msk.bf16.mxu1 %vm244_vm1, %v3868_v27 }
  0xb9   : > { %3535 = vmatprep.mubr.msk.bf16.mxu0 %vm244_vm1, %v3876_v30 }
  0xbe   : > { %3536 = vmatmul.mubr.msk.bf16.gmra.mxu0 %vm244_vm1, %v3896_v44 }
  0xbf   : > { %3502 = vmatmul.mubr.msk.bf16.gmra.mxu1 %vm244_vm1, %v3874_v29  ;;  %3539 = vmatprep.mubr.msk.bf16.mxu0 %vm244_vm1, %v3900_v50 }
  0xc0   : > { %3505 = vmatprep.mubr.msk.bf16.mxu1 %vm244_vm1, %v3894_v43 }
  0xc6   : > { %3540 = vmatmul.mubr.msk.bf16.gmra.mxu0 %vm244_vm1, %v3920_v62 }
  0xc7   : > { %3506 = vmatmul.mubr.msk.bf16.gmra.mxu1 %vm244_vm1, %v3898_v45  ;;  %3543 = vmatprep.mubr.msk.bf16.mxu0 %vm244_vm1, %v3924_v0 }
  0xc8   : > { %3509 = vmatprep.mubr.msk.bf16.mxu1 %vm244_vm1, %v3918_v61 }
  0xce   : > { %3544 = vmatmul.mubr.msk.bf16.gmra.mxu0 %vm244_vm1, %v3944_v19 }
  0xcf   : > { %3510 = vmatmul.mubr.msk.bf16.gmra.mxu1 %vm244_vm1, %v3922_v63  ;;  %3547 = vmatprep.mubr.msk.bf16.mxu0 %vm244_vm1, %v3948_v21 }
  0xd0   : > { %3513 = vmatprep.mubr.msk.bf16.mxu1 %vm244_vm1, %v3942_v18 }
  0xd6   : > { %v3329_v58 = vpop.f32.mrf.mxu0  ;;  %3548 = vmatmul.mubr.msk.bf16.gmra.mxu0 %vm244_vm1, %v3968_v41 }
  0xd7   : > { %v4139_v59 = vpop.f32.mrf.mxu1  ;;  %3514 = vmatmul.mubr.msk.bf16.gmra.mxu1 %vm244_vm1, %v3946_v20  ;;  %3551 = vmatprep.mubr.msk.bf16.mxu0 %vm244_vm1, %v3972_v51  ;;  %v3052_v51 = vld [vmem:[%s3703_s20 + $0x198] sm:$0xff] }
  0xd8   : > { %v331_v4 = vpop.f32.mrf.mxu0  ;;  %3517 = vmatprep.mubr.msk.bf16.mxu1 %vm244_vm1, %v3966_v40  ;;  %v1895_v60 = vpack.c.bf16 %v3053_v52, %v3052_v51 }
  0xd9   : > { %v4147_v7 = vpop.f32.mrf.mxu1 }
  0xda   : > { %v3330_v9 = vpop.f32.mrf.mxu0 }
  0xdb   : > { %v4149_v14 = vpop.f32.mrf.mxu1 }
  0xdc   : > { %v4151_v15 = vpop.f32.mrf.mxu0 }
  0xdd   : > { %v4153_v28 = vpop.f32.mrf.mxu1 }
  0xde   : > { %v4155_v30 = vpop.f32.mrf.mxu0  ;;  %3552 = vmatmul.mubr.msk.bf16.gmra.mxu0 %vm244_vm1, %v3992_v3  ;;  %v4202_v3 = vpack.c.bf16 %v3004_v55, %v3003_v54 }
  0xdf   : > { %v4159_v44 = vpop.f32.mrf.mxu1  ;;  %3518 = vmatmul.mubr.msk.bf16.gmra.mxu1 %vm244_vm1, %v3970_v42  ;;  %3555 = vmatprep.mubr.msk.bf16.mxu0 %vm244_vm1, %v3996_v6 }
  0xe0   : > { %v4165_v50 = vpop.f32.mrf.mxu0  ;;  %3521 = vmatprep.mubr.msk.bf16.mxu1 %vm244_vm1, %v3990_v2 }
  0xe1   : > { %v4169_v62 = vpop.f32.mrf.mxu1 }
  0xe2   : > { %v4171_v0 = vpop.f32.mrf.mxu0 }
  0xe3   : > { %v4173_v19 = vpop.f32.mrf.mxu1 }
  0xe4   : > { %v4175_v21 = vpop.f32.mrf.mxu0 }
  0xe5   : > { %v4177_v38 = vpop.f32.mrf.mxu1 }
  0xe6   : > { %v4179_v39 = vpop.f32.mrf.mxu0  ;;  %3556 = vmatmul.mubr.msk.bf16.gmra.mxu0 %vm244_vm1, %v4012_v26 }
  0xe7   : > { %v4183_v41 = vpop.f32.mrf.mxu1  ;;  %3522 = vmatmul.mubr.msk.bf16.gmra.mxu1 %vm244_vm1, %v3994_v5  ;;  %3559 = vmatprep.mubr.msk.bf16.mxu0 %vm244_vm1, %v1012_v47 }
  0xe8   : > { %v4190_v53 = vpop.f32.mrf.mxu0  ;;  %3525 = vmatprep.mubr.msk.bf16.mxu1 %vm244_vm1, %v4010_v25 }
  0xe9   : > { %v4196_v56 = vpop.f32.mrf.mxu1 }
  0xea   : > { %v4198_v57 = vpop.f32.mrf.mxu0 }
  0xeb   : > { %v4200_v1 = vpop.f32.mrf.mxu1 }
  0xec   : > { %v4204_v6 = vpop.f32.mrf.mxu0 }
  0xed   : > { %v4206_v8 = vpop.f32.mrf.mxu1 }
  0xee   : > { %v4208_v10 = vpop.f32.mrf.mxu0  ;;  %3560 = vmatmul.mubr.msk.bf16.gmra.mxu0 %vm244_vm1, %v1895_v60 }
  0xef   : > { %v4211_v16 = vpop.f32.mrf.mxu1  ;;  %3526 = vmatmul.mubr.msk.bf16.gmra.mxu1 %vm244_vm1, %v4202_v3  ;;  %3599 = vmatprep.mubr.msk.bf16.mxu0 %vm244_vm1, %v3838_v13 }
  0xf0   : > { %v4217_v24 = vpop.f32.mrf.mxu0  ;;  %3565 = vmatprep.mubr.msk.bf16.mxu1 %vm244_vm1, %v3730_v22 }
  0xf1   : > { %v4221_v25 = vpop.f32.mrf.mxu1 }
  0xf2   : > { %v4223_v26 = vpop.f32.mrf.mxu0 }
  0xf3   : > { %v4225_v31 = vpop.f32.mrf.mxu1 }
  0xf4   : > { %v4227_v32 = vpop.f32.mrf.mxu0 }
  0xf5   : > { %v4229_v33 = vpop.f32.mrf.mxu1 }
  0xf6   : > { %v3397_v12 = vpop.f32.mrf.mxu0  ;;  %3600 = vmatmul.mubr.msk.bf16.vlgmr.msra.gmra.mxu0 %vm244_vm1, %v3868_v27 }
  0xf7   : > { %v3363_v13 = vpop.f32.mrf.mxu1  ;;  %3566 = vmatmul.mubr.msk.bf16.vlgmr.msra.gmra.mxu1 %vm244_vm1, %v3760_v34  ;;  %3603 = vmatprep.mubr.msk.bf16.mxu0 %vm244_vm1, %v3874_v29  ;;  %v2178_v29 = vpack.c.bf16 %v3080_v35, %v3079_v23 }
  0xf8   : > { %v552_v22 = vadd.f32 %v3363_v13, %v3329_v58  ;;  %v805_v11 = vpop.f32.mrf.mxu0  ;;  %3569 = vmatprep.mubr.msk.bf16.mxu1 %vm244_vm1, %v3766_v36  ;;  %v3081_v13 = vld [vmem:[%s3703_s20 + $0xa9] sm:$0xff] }
  0xf9   : > { %v543_v17 = vpop.f32.mrf.mxu1 }
  0xfa   : > { %v4241_v47 = vadd.f32 %v3397_v12, %v552_v22  ;;  %v544_v48 = vadd.f32 %v543_v17, %v331_v4  ;;  %v3398_v49 = vpop.f32.mrf.mxu0  ;;  %v3084_v17 = vld [vmem:[%s3703_s20 + $0xc9] sm:$0xff] }
  0xfb   : > { %v3364_v27 = vpop.f32.mrf.mxu1 }
  0xfc   : > { %v4243_v51 = vadd.f32 %v805_v11, %v544_v48  ;;  %v555_v34 = vadd.f32 %v3364_v27, %v3330_v9  ;;  %v808_v52 = vpop.f32.mrf.mxu0  ;;  %v3083_v11 = vld [vmem:[%s3703_s20 + $0xc1] sm:$0xff] }
  0xfd   : > { %v546_v58 = vpop.f32.mrf.mxu1  ;;  %v2180_v27 = vpack.c.bf16 %v3084_v17, %v3083_v11 }
  0xfe   : > { %v4245_v54 = vadd.f32 %v3398_v49, %v555_v34  ;;  %v547_v36 = vadd.f32 %v546_v58, %v4151_v15  ;;  %v3401_v55 = vpop.f32.mrf.mxu0  ;;  %3604 = vmatmul.mubr.msk.bf16.gmra.mxu0 %vm244_vm1, %v3894_v43  ;;  %v3082_v15 = vld [vmem:[%s3703_s20 + $0xb1] sm:$0xff] }
  0xff   : > { %v3367_v4 = vpop.f32.mrf.mxu1  ;;  %3570 = vmatmul.mubr.msk.bf16.gmra.mxu1 %vm244_vm1, %v3786_v46  ;;  %3607 = vmatprep.mubr.msk.bf16.mxu0 %vm244_vm1, %v3898_v45  ;;  %v2179_v48 = vpack.c.bf16 %v3082_v15, %v3081_v13  ;;  %v3088_v13 = vld [vmem:[%s3703_s20 + $0xf9] sm:$0xff] }
 0x100   : > { %v4254_v9 = vadd.f32 %v808_v52, %v547_v36  ;;  %v568_v60 = vadd.f32 %v3367_v4, %v4155_v30  ;;  %v821_v12 = vpop.f32.mrf.mxu0  ;;  %3573 = vmatprep.mubr.msk.bf16.mxu1 %vm244_vm1, %v2178_v29  ;;  %v3085_v4 = vld [vmem:[%s3703_s20 + $0xd9] sm:$0xff] }
 0x101   : > { %v559_v22 = vpop.f32.mrf.mxu1 }
 0x102   : > { %v4262_v43 = vadd.f32 %v3401_v55, %v568_v60  ;;  %v560_v23 = vadd.f32 %v559_v22, %v4165_v50  ;;  %v3402_v46 = vpop.f32.mrf.mxu0  ;;  %v3086_v60 = vld [vmem:[%s3703_s20 + $0xe1] sm:$0xff] }
 0x103   : > { %v3368_v35 = vpop.f32.mrf.mxu1  ;;  %v2181_v17 = vpack.c.bf16 %v3086_v60, %v3085_v4 }
 0x104   : > { %v4265_v45 = vadd.f32 %v821_v12, %v560_v23  ;;  %v571_v30 = vadd.f32 %v3368_v35, %v4171_v0  ;;  %v824_v49 = vpop.f32.mrf.mxu0  ;;  %v3087_v12 = vld [vmem:[%s3703_s20 + $0xf1] sm:$0xff] }
 0x105   : > { %v562_v34 = vpop.f32.mrf.mxu1 }
 0x106   : > { %v4268_v52 = vadd.f32 %v3402_v46, %v571_v30  ;;  %v563_v29 = vadd.f32 %v562_v34, %v4175_v21  ;;  %v3405_v58 = vpop.f32.mrf.mxu0  ;;  %3608 = vmatmul.mubr.msk.bf16.gmra.mxu0 %vm244_vm1, %v3918_v61  ;;  %v2182_v46 = vpack.c.bf16 %v3088_v13, %v3087_v12 }
 0x107   : > { %v3371_v50 = vpop.f32.mrf.mxu1  ;;  %3574 = vmatmul.mubr.msk.bf16.gmra.mxu1 %vm244_vm1, %v2179_v48  ;;  %3611 = vmatprep.mubr.msk.bf16.mxu0 %vm244_vm1, %v3922_v63 }
 0x108   : > { %v4276_v0 = vadd.f32 %v824_v49, %v563_v29  ;;  %v584_v36 = vadd.f32 %v3371_v50, %v4179_v39  ;;  %v837_v55 = vpop.f32.mrf.mxu0  ;;  %3577 = vmatprep.mubr.msk.bf16.mxu1 %vm244_vm1, %v2180_v27  ;;  %v3089_v29 = vld [vmem:[%s3703_s20 + $0x109] sm:$0xff]  ;;  %v3091_v50 = vld [vmem:[%s3703_s20 + $0x121] sm:$0xff] }
 0x109   : > { %v575_v21 = vpop.f32.mrf.mxu1 }
 0x10a   : > { %v4284_v15 = vadd.f32 %v3405_v58, %v584_v36  ;;  %v576_v61 = vadd.f32 %v575_v21, %v4190_v53  ;;  %v3406_v22 = vpop.f32.mrf.mxu0  ;;  %v3090_v58 = vld [vmem:[%s3703_s20 + $0x111] sm:$0xff]  ;;  %v3092_v36 = vld [vmem:[%s3703_s20 + $0x129] sm:$0xff] }
 0x10b   : > { %v3372_v11 = vpop.f32.mrf.mxu1  ;;  %v2183_v21 = vpack.c.bf16 %v3090_v58, %v3089_v29  ;;  %v2184_v13 = vpack.c.bf16 %v3092_v36, %v3091_v50 }
 0x10c   : > { %v4287_v63 = vadd.f32 %v837_v55, %v576_v61  ;;  %v587_v39 = vadd.f32 %v3372_v11, %v4198_v57  ;;  %v840_v23 = vpop.f32.mrf.mxu0 }
 0x10d   : > { %v578_v35 = vpop.f32.mrf.mxu1 }
 0x10e   : > { %v4290_v48 = vadd.f32 %v3406_v22, %v587_v39  ;;  %v579_v30 = vadd.f32 %v578_v35, %v4204_v6  ;;  %v3409_v49 = vpop.f32.mrf.mxu0  ;;  %3612 = vmatmul.mubr.msk.bf16.gmra.mxu0 %vm244_vm1, %v3942_v18  ;;  %v3094_v35 = vld [vmem:[%s3703_s20 + $0x141] sm:$0xff] }
 0x10f   : > { %v3375_v53 = vpop.f32.mrf.mxu1  ;;  %3578 = vmatmul.mubr.msk.bf16.gmra.mxu1 %vm244_vm1, %v2181_v17  ;;  %3615 = vmatprep.mubr.msk.bf16.mxu0 %vm244_vm1, %v3946_v20 }
 0x110   : > { %v4298_v57 = vadd.f32 %v840_v23, %v579_v30  ;;  %v600_v27 = vadd.f32 %v3375_v53, %v4208_v10  ;;  %v853_v34 = vpop.f32.mrf.mxu0  ;;  %3581 = vmatprep.mubr.msk.bf16.mxu1 %vm244_vm1, %v2182_v46  ;;  %v3093_v46 = vld [vmem:[%s3703_s20 + $0x139] sm:$0xff]  ;;  %v3095_v30 = vld [vmem:[%s3703_s20 + $0x151] sm:$0xff] }
 0x111   : > { %v591_v6 = vpop.f32.mrf.mxu1 }
 0x112   : > { %v4306_v55 = vadd.f32 %v3409_v49, %v600_v27  ;;  %v592_v18 = vadd.f32 %v591_v6, %v4217_v24  ;;  %v3410_v4 = vpop.f32.mrf.mxu0  ;;  %v3096_v49 = vld [vmem:[%s3703_s20 + $0x159] sm:$0xff] }
 0x113   : > { %v3376_v60 = vpop.f32.mrf.mxu1  ;;  %v2186_v6 = vpack.c.bf16 %v3096_v49, %v3095_v30 }
 0x114   : > { %v4309_v20 = vadd.f32 %v853_v34, %v592_v18  ;;  %v603_v10 = vadd.f32 %v3376_v60, %v4223_v26  ;;  %v856_v12 = vpop.f32.mrf.mxu0  ;;  %v2185_v34 = vpack.c.bf16 %v3094_v35, %v3093_v46  ;;  %v3147_v60 = vld [vmem:[%s3703_s20 + $0x172] sm:$0xff] }
 0x115   : > { %v594_v61 = vpop.f32.mrf.mxu1 }
 0x116   : > { %v4312_v22 = vadd.f32 %v3410_v4, %v603_v10  ;;  %v595_v11 = vadd.f32 %v594_v61, %v4227_v32  ;;  %v3413_v17 = vpop.f32.mrf.mxu0  ;;  %3616 = vmatmul.mubr.msk.bf16.gmra.mxu0 %vm244_vm1, %v3966_v40 }
 0x117   : > { %v3379_v24 = vpop.f32.mrf.mxu1  ;;  %3582 = vmatmul.mubr.msk.bf16.gmra.mxu1 %vm244_vm1, %v2183_v21  ;;  %3619 = vmatprep.mubr.msk.bf16.mxu0 %vm244_vm1, %v3970_v42 }
 0x118   : > { %v4320_v26 = vadd.f32 %v856_v12, %v595_v11  ;;  %v616_v39 = vadd.f32 %v3379_v24, %v4139_v59  ;;  %v869_v23 = vpop.f32.mrf.mxu0  ;;  %3585 = vmatprep.mubr.msk.bf16.mxu1 %vm244_vm1, %v2184_v13  ;;  %v3098_v13 = vld [vmem:[%s3703_s20 + $0x171] sm:$0xff] }
 0x119   : > { %v607_v32 = vpop.f32.mrf.mxu1 }
 0x11a   : > { %v4328_v53 = vadd.f32 %v3413_v17, %v616_v39  ;;  %v608_v40 = vadd.f32 %v607_v32, %v4147_v7  ;;  %v3414_v27 = vpop.f32.mrf.mxu0 }
 0x11b   : > { %v3380_v42 = vpop.f32.mrf.mxu1 }
 0x11c   : > { %v4331_v29 = vadd.f32 %v869_v23, %v608_v40  ;;  %v619_v59 = vadd.f32 %v3380_v42, %v4149_v14  ;;  %v872_v58 = vpop.f32.mrf.mxu0  ;;  %v3146_v14 = vld [vmem:[%s3703_s20 + $0x16a] sm:$0xff]  ;;  %v3150_v40 = vld [vmem:[%s3703_s20 + $0x19a] sm:$0xff] }
 0x11d   : > { %v610_v50 = vpop.f32.mrf.mxu1 }
 0x11e   : > { %v4334_v36 = vadd.f32 %v3414_v27, %v619_v59  ;;  %v611_v18 = vadd.f32 %v610_v50, %v4153_v28  ;;  %v3417_v4 = vpop.f32.mrf.mxu0  ;;  %3620 = vmatmul.mubr.msk.bf16.gmra.mxu0 %vm244_vm1, %v3990_v2  ;;  %v3097_v28 = vld [vmem:[%s3703_s20 + $0x169] sm:$0xff]  ;;  %v3102_v59 = vld [vmem:[%s3703_s20 + $0x1a1] sm:$0xff] }
 0x11f   : > { %v3383_v7 = vpop.f32.mrf.mxu1  ;;  %3586 = vmatmul.mubr.msk.bf16.gmra.mxu1 %vm244_vm1, %v2185_v34  ;;  %3623 = vmatprep.mubr.msk.bf16.mxu0 %vm244_vm1, %v3994_v5  ;;  %v2481_v5 = vpack.c.bf16 %v3147_v60, %v3146_v14  ;;  %v2187_v39 = vpack.c.bf16 %v3098_v13, %v3097_v28  ;;  %v3151_v27 = vld [vmem:[%s3703_s20 + $0x1a2] sm:$0xff] }
 0x120   : > { %v4344_v21 = vadd.f32 %v872_v58, %v611_v18  ;;  %v632_v10 = vadd.f32 %v3383_v7, %v4159_v44  ;;  %v885_v12 = vpop.f32.mrf.mxu0  ;;  %3589 = vmatprep.mubr.msk.bf16.mxu1 %vm244_vm1, %v2186_v6 }
 0x121   : > { %v623_v61 = vpop.f32.mrf.mxu1 }
 0x122   : > { %v4350_v11 = vadd.f32 %v3417_v4, %v632_v10  ;;  %v624_v2 = vadd.f32 %v623_v61, %v4169_v62  ;;  %v3418_v17 = vpop.f32.mrf.mxu0  ;;  %v2483_v4 = vpack.c.bf16 %v3151_v27, %v3150_v40 }
 0x123   : > { %v3384_v24 = vpop.f32.mrf.mxu1 }
 0x124   : > { %v4353_v23 = vadd.f32 %v885_v12, %v624_v2  ;;  %v635_v44 = vadd.f32 %v3384_v24, %v4173_v19  ;;  %v888_v46 = vpop.f32.mrf.mxu0 }
 0x125   : > { %v626_v35 = vpop.f32.mrf.mxu1 }
 0x126   : > { %v4356_v32 = vadd.f32 %v3418_v17, %v635_v44  ;;  %v627_v30 = vadd.f32 %v626_v35, %v4177_v38  ;;  %v3421_v49 = vpop.f32.mrf.mxu0  ;;  %3624 = vmatmul.mubr.msk.bf16.gmra.mxu0 %vm244_vm1, %v2481_v5  ;;  %v3101_v38 = vld [vmem:[%s3703_s20 + $0x199] sm:$0xff] }
 0x127   : > { %v3387_v62 = vpop.f32.mrf.mxu1  ;;  %3590 = vmatmul.mubr.msk.bf16.gmra.mxu1 %vm244_vm1, %v2187_v39  ;;  %3627 = vmatprep.mubr.msk.bf16.mxu0 %vm244_vm1, %v4202_v3  ;;  %v2189_v7 = vpack.c.bf16 %v3102_v59, %v3101_v38 }
 0x128   : > { %v4365_v19 = vadd.f32 %v888_v46, %v627_v30  ;;  %v648_v42 = vadd.f32 %v3387_v62, %v4183_v41  ;;  %v901_v34 = vpop.f32.mrf.mxu0  ;;  %3593 = vmatprep.mubr.msk.bf16.mxu1 %vm244_vm1, %v4094_v37 }
 0x129   : > { %v639_v58 = vpop.f32.mrf.mxu1 }
 0x12a   : > { %v4372_v6 = vadd.f32 %v3421_v49, %v648_v42  ;;  %v640_v50 = vadd.f32 %v639_v58, %v4196_v56  ;;  %v3422_v18 = vpop.f32.mrf.mxu0 }
 0x12b   : > { %v3388_v3 = vpop.f32.mrf.mxu1 }
 0x12c   : > { %v4375_v14 = vadd.f32 %v901_v34, %v640_v50  ;;  %v651_v60 = vadd.f32 %v3388_v3, %v4200_v1  ;;  %v904_v41 = vpop.f32.mrf.mxu0 }
 0x12d   : > { %v642_v10 = vpop.f32.mrf.mxu1 }
 0x12e   : > { %v4378_v12 = vadd.f32 %v3422_v18, %v651_v60  ;;  %v643_v37 = vadd.f32 %v642_v10, %v4206_v8  ;;  %v3425_v28 = vpop.f32.mrf.mxu0  ;;  %3628 = vmatmul.mubr.msk.bf16.gmra.mxu0 %vm244_vm1, %v2483_v4 }
 0x12f   : > { %v3391_v13 = vpop.f32.mrf.mxu1  ;;  %3594 = vmatmul.mubr.msk.bf16.gmra.mxu1 %vm244_vm1, %v2189_v7 }
 0x130   : > { %v4383_v56 = vadd.f32 %v904_v41, %v643_v37  ;;  %v664_v61 = vadd.f32 %v3391_v13, %v4211_v16  ;;  %v917_v2 = vpop.f32.mrf.mxu0 }
 0x131   : > { %v655_v17 = vpop.f32.mrf.mxu1 }
 0x132   : > { %v4386_v5 = vadd.f32 %v3425_v28, %v664_v61  ;;  %v656_v1 = vadd.f32 %v655_v17, %v4221_v25  ;;  %v3426_v24 = vpop.f32.mrf.mxu0 }
 0x133   : > { %v3392_v39 = vpop.f32.mrf.mxu1 }
 0x134   : > { %v4389_v44 = vadd.f32 %v917_v2, %v656_v1  ;;  %v667_v8 = vadd.f32 %v3392_v39, %v4225_v31  ;;  %v920_v46 = vpop.f32.mrf.mxu0 }
 0x135   : > { %v658_v35 = vpop.f32.mrf.mxu1 }
 0x136   : > { %v4392_v30 = vadd.f32 %v3426_v24, %v667_v8  ;;  %v659_v49 = vadd.f32 %v658_v35, %v4229_v33  ;;  %v3465_v62 = vpop.f32.mrf.mxu0 }
 0x137   : > { %v3431_v16 = vpop.f32.mrf.mxu1 }
 0x138   : > { %v4395_v40 = vadd.f32 %v920_v46, %v659_v49  ;;  %v1229_v27 = vadd.f32 %v3431_v16, %v4241_v47  ;;  %v1394_v42 = vpop.f32.mrf.mxu0 }
 0x139   : > { %v1100_v25 = vpop.f32.mrf.mxu1 }
 0x13a   : > { %v4398_v34 = vadd.f32 %v3465_v62, %v1229_v27  ;;  %v1227_v38 = vadd.f32 %v1100_v25, %v4243_v51  ;;  %v3466_v59 = vpop.f32.mrf.mxu0 }
 0x13b   : > { %v3432_v31 = vpop.f32.mrf.mxu1 }
 0x13c   : > { %v4401_v58 = vadd.f32 %v1394_v42, %v1227_v38  ;;  %v1230_v50 = vadd.f32 %v3432_v31, %v4245_v54  ;;  %v1397_v18 = vpop.f32.mrf.mxu0 }
 0x13d   : > { %v1103_v33 = vpop.f32.mrf.mxu1 }
 0x13e   : > { %v4404_v4 = vadd.f32 %v3466_v59, %v1230_v50  ;;  %v1228_v3 = vadd.f32 %v1103_v33, %v4254_v9  ;;  %v3469_v7 = vpop.f32.mrf.mxu0 }
 0x13f   : > { %v3435_v47 = vpop.f32.mrf.mxu1 }
 0x140   : > { %v4407_v60 = vadd.f32 %v1397_v18, %v1228_v3  ;;  %v1233_v41 = vadd.f32 %v3435_v47, %v4262_v43  ;;  %v1410_v10 = vpop.f32.mrf.mxu0 }
 0x141   : > { %v1116_v51 = vpop.f32.mrf.mxu1 }
 0x142   : > { %v4410_v37 = vadd.f32 %v3469_v7, %v1233_v41  ;;  %v1231_v28 = vadd.f32 %v1116_v51, %v4265_v45  ;;  %v3470_v13 = vpop.f32.mrf.mxu0 }
 0x143   : > { %v3436_v54 = vpop.f32.mrf.mxu1 }
 0x144   : > { %v4413_v61 = vadd.f32 %v1410_v10, %v1231_v28  ;;  %v1234_v2 = vadd.f32 %v3436_v54, %v4268_v52  ;;  %v1413_v17 = vpop.f32.mrf.mxu0 }
 0x145   : > { %v1119_v9 = vpop.f32.mrf.mxu1 }
 0x146   : > { %v4416_v1 = vadd.f32 %v3470_v13, %v1234_v2  ;;  %v1232_v24 = vadd.f32 %v1119_v9, %v4276_v0  ;;  %v3473_v39 = vpop.f32.mrf.mxu0 }
 0x147   : > { %v3439_v43 = vpop.f32.mrf.mxu1 }
 0x148   : > { %v4419_v8 = vadd.f32 %v1413_v17, %v1232_v24  ;;  %v1237_v46 = vadd.f32 %v3439_v43, %v4284_v15  ;;  %v1426_v35 = vpop.f32.mrf.mxu0 }
 0x149   : > { %v1132_v45 = vpop.f32.mrf.mxu1 }
 0x14a   : > { %v4422_v49 = vadd.f32 %v3473_v39, %v1237_v46  ;;  %v1235_v62 = vadd.f32 %v1132_v45, %v4287_v63  ;;  %v3474_v16 = vpop.f32.mrf.mxu0 }
 0x14b   : > { %v3440_v52 = vpop.f32.mrf.mxu1 }
 0x14c   : > { %v4425_v27 = vadd.f32 %v1426_v35, %v1235_v62  ;;  %v1238_v42 = vadd.f32 %v3440_v52, %v4290_v48  ;;  %v1429_v25 = vpop.f32.mrf.mxu0 }
 0x14d   : > { %v1135_v0 = vpop.f32.mrf.mxu1 }
 0x14e   : > { %v4428_v38 = vadd.f32 %v3474_v16, %v1238_v42  ;;  %v1236_v59 = vadd.f32 %v1135_v0, %v4298_v57  ;;  %v3477_v31 = vpop.f32.mrf.mxu0 }
 0x14f   : > { %v3443_v15 = vpop.f32.mrf.mxu1 }
 0x150   : > { %v4431_v50 = vadd.f32 %v1429_v25, %v1236_v59  ;;  %v1241_v18 = vadd.f32 %v3443_v15, %v4306_v55  ;;  %v1442_v33 = vpop.f32.mrf.mxu0 }
 0x151   : > { %v1148_v63 = vpop.f32.mrf.mxu1 }
 0x152   : > { %v4434_v3 = vadd.f32 %v3477_v31, %v1241_v18  ;;  %v1239_v7 = vadd.f32 %v1148_v63, %v4309_v20  ;;  %v3478_v47 = vpop.f32.mrf.mxu0 }
 0x153   : > { %v3444_v48 = vpop.f32.mrf.mxu1 }
 0x154   : > { %v4437_v41 = vadd.f32 %v1442_v33, %v1239_v7  ;;  %v1242_v10 = vadd.f32 %v3444_v48, %v4312_v22  ;;  %v1445_v51 = vpop.f32.mrf.mxu0 }
 0x155   : > { %v1151_v57 = vpop.f32.mrf.mxu1 }
 0x156   : > { %v4440_v28 = vadd.f32 %v3478_v47, %v1242_v10  ;;  %v1240_v13 = vadd.f32 %v1151_v57, %v4320_v26  ;;  %v3481_v54 = vpop.f32.mrf.mxu0 }
 0x157   : > { %v3447_v55 = vpop.f32.mrf.mxu1 }
 0x158   : > { %v4443_v2 = vadd.f32 %v1445_v51, %v1240_v13  ;;  %v1245_v17 = vadd.f32 %v3447_v55, %v4328_v53  ;;  %v1458_v9 = vpop.f32.mrf.mxu0 }
 0x159   : > { %v1164_v20 = vpop.f32.mrf.mxu1 }
 0x15a   : > { %v4446_v24 = vadd.f32 %v3481_v54, %v1245_v17  ;;  %v1243_v39 = vadd.f32 %v1164_v20, %v4331_v29  ;;  %v3482_v43 = vpop.f32.mrf.mxu0 }
 0x15b   : > { %v3448_v22 = vpop.f32.mrf.mxu1 }
 0x15c   : > { %v4449_v46 = vadd.f32 %v1458_v9, %v1243_v39  ;;  %v1246_v35 = vadd.f32 %v3448_v22, %v4334_v36  ;;  %v1461_v45 = vpop.f32.mrf.mxu0 }
 0x15d   : > { %v1167_v26 = vpop.f32.mrf.mxu1 }
 0x15e   : > { %v4452_v62 = vadd.f32 %v3482_v43, %v1246_v35  ;;  %v1244_v16 = vadd.f32 %v1167_v26, %v4344_v21  ;;  %v3485_v52 = vpop.f32.mrf.mxu0 }
 0x15f   : > { %v3451_v53 = vpop.f32.mrf.mxu1 }
 0x160   : > { %4752 = vst [vmem:[#allocation2_spill] sm:$0xff] %v4452_v62  ;;  %v4455_v42 = vadd.f32 %v1461_v45, %v1244_v16  ;;  %v1249_v25 = vadd.f32 %v3451_v53, %v4350_v11  ;;  %v1474_v0 = vpop.f32.mrf.mxu0 }
 0x161   : > { %v1180_v29 = vpop.f32.mrf.mxu1 }
 0x162   : > { %4753 = vst [vmem:[#allocation3_spill] sm:$0xff] %v4455_v42  ;;  %v4458_v59 = vadd.f32 %v3485_v52, %v1249_v25  ;;  %v1247_v31 = vadd.f32 %v1180_v29, %v4353_v23  ;;  %v3486_v15 = vpop.f32.mrf.mxu0 }
 0x163   : > { %v3452_v36 = vpop.f32.mrf.mxu1 }
 0x164   : > { %4754 = vst [vmem:[#allocation4_spill] sm:$0xff] %v4458_v59  ;;  %v4461_v18 = vadd.f32 %v1474_v0, %v1247_v31  ;;  %v1250_v33 = vadd.f32 %v3452_v36, %v4356_v32  ;;  %v1477_v63 = vpop.f32.mrf.mxu0 }
 0x165   : > { %v1183_v21 = vpop.f32.mrf.mxu1 }
 0x166   : > { %4755 = vst [vmem:[#allocation5_spill] sm:$0xff] %v4461_v18  ;;  %v4464_v7 = vadd.f32 %v3486_v15, %v1250_v33  ;;  %v1248_v47 = vadd.f32 %v1183_v21, %v4365_v19  ;;  %v3489_v48 = vpop.f32.mrf.mxu0 }
 0x167   : > { %v3455_v11 = vpop.f32.mrf.mxu1 }
 0x168   : > { %4756 = vst [vmem:[#allocation6_spill] sm:$0xff] %v4464_v7  ;;  %v4467_v10 = vadd.f32 %v1477_v63, %v1248_v47  ;;  %v1253_v51 = vadd.f32 %v3455_v11, %v4372_v6  ;;  %v1490_v57 = vpop.f32.mrf.mxu0 }
 0x169   : > { %v1196_v23 = vpop.f32.mrf.mxu1 }
 0x16a   : > { %4757 = vst [vmem:[#allocation7_spill] sm:$0xff] %v4467_v10  ;;  %v4470_v13 = vadd.f32 %v3489_v48, %v1253_v51  ;;  %v1251_v54 = vadd.f32 %v1196_v23, %v4375_v14  ;;  %v3490_v55 = vpop.f32.mrf.mxu0 }
 0x16b   : > { %v3456_v32 = vpop.f32.mrf.mxu1 }
 0x16c   : > { %4758 = vst [vmem:[#allocation8_spill] sm:$0xff] %v4470_v13  ;;  %v4473_v17 = vadd.f32 %v1490_v57, %v1251_v54  ;;  %v1254_v9 = vadd.f32 %v3456_v32, %v4378_v12  ;;  %v1493_v20 = vpop.f32.mrf.mxu0 }
 0x16d   : > { %v1199_v19 = vpop.f32.mrf.mxu1 }
 0x16e   : > { %4759 = vst [vmem:[#allocation9_spill] sm:$0xff] %v4473_v17  ;;  %v4476_v39 = vadd.f32 %v3490_v55, %v1254_v9  ;;  %v1252_v43 = vadd.f32 %v1199_v19, %v4383_v56  ;;  %v3493_v22 = vpop.f32.mrf.mxu0 }
 0x16f   : > { %v3459_v6 = vpop.f32.mrf.mxu1 }
 0x170   : > { %4760 = vst [vmem:[#allocation10_spill] sm:$0xff] %v4476_v39  ;;  %v4479_v35 = vadd.f32 %v1493_v20, %v1252_v43  ;;  %v1257_v45 = vadd.f32 %v3459_v6, %v4386_v5  ;;  %v1506_v26 = vpop.f32.mrf.mxu0 }
 0x171   : > { %v1212_v14 = vpop.f32.mrf.mxu1 }
 0x172   : > { %4761 = vst [vmem:[#allocation11_spill] sm:$0xff] %v4479_v35  ;;  %v4482_v16 = vadd.f32 %v3493_v22, %v1257_v45  ;;  %v1255_v52 = vadd.f32 %v1212_v14, %v4389_v44  ;;  %v3494_v53 = vpop.f32.mrf.mxu0 }
 0x173   : > { %v3460_v12 = vpop.f32.mrf.mxu1 }
 0x174   : > { %4762 = vst [vmem:[#allocation12_spill] sm:$0xff] %v4482_v16  ;;  %v4485_v25 = vadd.f32 %v1506_v26, %v1255_v52  ;;  %v1258_v0 = vadd.f32 %v3460_v12, %v4392_v30  ;;  %v1509_v29 = vpop.f32.mrf.mxu0 }
 0x175   : > { %v1215_v56 = vpop.f32.mrf.mxu1 }
 0x176   : > { %4763 = vst [vmem:[#allocation13_spill] sm:$0xff] %v4485_v25  ;;  %v4488_v31 = vadd.f32 %v3494_v53, %v1258_v0  ;;  %v1256_v15 = vadd.f32 %v1215_v56, %v4395_v40  ;;  %v4491_v36 = vpop.f32.mrf.mxu0 }
 0x177   : > { %v3499_v5 = vpop.f32.mrf.mxu1 }
 0x178   : > { %4764 = vst [vmem:[#allocation14_spill] sm:$0xff] %v4488_v31  ;;  %v4493_v33 = vadd.f32 %v1509_v29, %v1256_v15  ;;  %v4495_v63 = vpop.f32.mrf.mxu0 }
 0x179   : > { %v1688_v44 = vpop.f32.mrf.mxu1 }
 0x17a   : > { %4765 = vst [vmem:[#allocation15_spill] sm:$0xff] %v4493_v33  ;;  %v4497_v21 = vpop.f32.mrf.mxu0 }
 0x17b   : > { %v3500_v47 = vpop.f32.mrf.mxu1 }
 0x17c   : > { %v4499_v48 = vpop.f32.mrf.mxu0 }
 0x17d   : > { %v4501_v30 = vpop.f32.mrf.mxu1 }
 0x17e   : > { %v4503_v11 = vpop.f32.mrf.mxu0 }
 0x17f   : > { %v4505_v51 = vpop.f32.mrf.mxu1 }
 0x180   : > { %v4507_v40 = vpop.f32.mrf.mxu0 }
 0x181   : > { %v4509_v57 = vpop.f32.mrf.mxu1 }
 0x182   : > { %v4511_v23 = vpop.f32.mrf.mxu0 }
 0x183   : > { %v4513_v54 = vpop.f32.mrf.mxu1 }
 0x184   : > { %v4515_v55 = vpop.f32.mrf.mxu0 }
 0x185   : > { %v4517_v32 = vpop.f32.mrf.mxu1 }
 0x186   : > { %v4519_v9 = vpop.f32.mrf.mxu0 }
 0x187   : > { %v4521_v20 = vpop.f32.mrf.mxu1 }
 0x188   : > { %v4523_v19 = vpop.f32.mrf.mxu0 }
 0x189   : > { %v4525_v43 = vpop.f32.mrf.mxu1 }
 0x18a   : > { %v4527_v22 = vpop.f32.mrf.mxu0 }
 0x18b   : > { %v4529_v6 = vpop.f32.mrf.mxu1 }
 0x18c   : > { %v4531_v45 = vpop.f32.mrf.mxu0 }
 0x18d   : > { %v4533_v26 = vpop.f32.mrf.mxu1 }
 0x18e   : > { %v4535_v14 = vpop.f32.mrf.mxu0 }
 0x18f   : > { %v4537_v52 = vpop.f32.mrf.mxu1 }
 0x190   : > { %v4539_v53 = vpop.f32.mrf.mxu0 }
 0x191   : > { %v4541_v12 = vpop.f32.mrf.mxu1 }
 0x192   : > { %v4543_v0 = vpop.f32.mrf.mxu0 }
 0x193   : > { %v4545_v29 = vpop.f32.mrf.mxu1 }
 0x194   : > { %v4547_v56 = vpop.f32.mrf.mxu0 }
 0x195   : > { %v4549_v15 = vpop.f32.mrf.mxu1 }
 0x196   : > { %v4551_v33 = vpop.f32.mrf.mxu0 }
 0x197   : > { %v4553_v31 = vpop.f32.mrf.mxu1 }
 0x198   : > { %v4555_v25 = vpop.f32.mrf.mxu0 }
 0x199   : > { %4766 = vst [vmem:[#allocation16_spill] sm:$0xff] %v4555_v25  ;;  %v4557_v16 = vpop.f32.mrf.mxu1 }
 0x19a   : > { %v4559_v35 = vpop.f32.mrf.mxu0 }
 0x19b   : > { %4767 = vst [vmem:[#allocation17_spill] sm:$0xff] %v4559_v35  ;;  %v4561_v39 = vpop.f32.mrf.mxu1 }
 0x19c   : > { %4768 = vst [vmem:[#allocation18_spill] sm:$0xff] %v4561_v39  ;;  %v4563_v17 = vpop.f32.mrf.mxu0 }
 0x19d   : > { %4769 = vst [vmem:[#allocation19_spill] sm:$0xff] %v4563_v17  ;;  %v4565_v13 = vpop.f32.mrf.mxu1 }
 0x19e   : > { %4770 = vst [vmem:[#allocation20_spill] sm:$0xff] %v4565_v13  ;;  %v4567_v10 = vpop.f32.mrf.mxu0 }
 0x19f   : > { %4771 = vst [vmem:[#allocation21_spill] sm:$0xff] %v4567_v10  ;;  %v4569_v7 = vpop.f32.mrf.mxu1 }
 0x1a0   : > { %4772 = vst [vmem:[#allocation22_spill] sm:$0xff] %v4569_v7  ;;  %v4571_v18 = vpop.f32.mrf.mxu0 }
 0x1a1   : > { %4773 = vst [vmem:[#allocation23_spill] sm:$0xff] %v4571_v18  ;;  %v4573_v59 = vpop.f32.mrf.mxu1 }
 0x1a2   : > { %4774 = vst [vmem:[#allocation24_spill] sm:$0xff] %v4573_v59  ;;  %v4575_v42 = vpop.f32.mrf.mxu0 }
 0x1a3   : > { %4775 = vst [vmem:[#allocation25_spill] sm:$0xff] %v4575_v42  ;;  %v4577_v25 = vpop.f32.mrf.mxu1 }
 0x1a4   : > { %4776 = vst [vmem:[#allocation26_spill] sm:$0xff] %v4577_v25  ;;  %v4579_v62 = vpop.f32.mrf.mxu0 }
 0x1a5   : > { %4777 = vst [vmem:[#allocation27_spill] sm:$0xff] %v4579_v62  ;;  %v4581_v35 = vpop.f32.mrf.mxu1 }
 0x1a6   : > { %4778 = vst [vmem:[#allocation28_spill] sm:$0xff] %v4581_v35  ;;  %v4583_v39 = vpop.f32.mrf.mxu0 }
 0x1a7   : > { %4779 = vst [vmem:[#allocation29_spill] sm:$0xff] %v4583_v39  ;;  %v4585_v17 = vpop.f32.mrf.mxu1 }
 0x1a8   : > { %4780 = vst [vmem:[#allocation30_spill] sm:$0xff] %v4585_v17  ;;  %v4587_v13 = vpop.f32.mrf.mxu0 }
 0x1a9   : > { %4781 = vst [vmem:[#allocation31_spill] sm:$0xff] %v4587_v13  ;;  %v4589_v10 = vpop.f32.mrf.mxu1  ;;  %v1817_v13 = vadd.f32 %v3499_v5, %v4398_v34  ;;  %v1816_v34 = vadd.f32 %v4501_v30, %v4407_v60 }
 0x1aa   : > { %4782 = vst [vmem:[#allocation32_spill] sm:$0xff] %v4589_v10  ;;  %v4591_v7 = vpop.f32.mrf.mxu0 }
 0x1ab   : > { %4783 = vst [vmem:[#allocation33_spill] sm:$0xff] %v4591_v7  ;;  %v4593_v18 = vpop.f32.mrf.mxu1  ;;  %v2111_v60 = vadd.f32 %v4499_v48, %v1816_v34 }
 0x1ac   : > { %4784 = vst [vmem:[#allocation34_spill] sm:$0xff] %v4593_v18  ;;  %v4595_v42 = vpop.f32.mrf.mxu0  ;;  %v1815_v18 = vadd.f32 %v1688_v44, %v4401_v58 }
 0x1ad   : > { %4785 = vst [vmem:[#allocation35_spill] sm:$0xff] %v4595_v42  ;;  %v4597_v25 = vpop.f32.mrf.mxu1 }
 0x1ae   : > { %4786 = vst [vmem:[#allocation36_spill] sm:$0xff] %v4597_v25  ;;  %v4599_v62 = vpop.f32.mrf.mxu0 }
 0x1af   : > { %4787 = vst [vmem:[#allocation37_spill] sm:$0xff] %v4599_v62  ;;  %v4601_v35 = vpop.f32.mrf.mxu1  ;;  %v2112_v62 = vadd.f32 %v4491_v36, %v1817_v13  ;;  %v1821_v13 = vadd.f32 %v4505_v51, %v4410_v37  ;;  %v1822_v37 = vadd.f32 %v4513_v54, %v4416_v1  ;;  %v1825_v1 = vadd.f32 %v4521_v20, %v4422_v49 }
 0x1b0   : > { %4788 = vst [vmem:[#allocation38_spill] sm:$0xff] %v4601_v35  ;;  %v4603_v39 = vpop.f32.mrf.mxu0  ;;  %v1818_v35 = vadd.f32 %v3500_v47, %v4404_v4  ;;  %v1826_v49 = vadd.f32 %v4529_v6, %v4428_v38  ;;  %v1829_v38 = vadd.f32 %v4537_v52, %v4434_v3  ;;  %v1830_v3 = vadd.f32 %v4545_v29, %v4440_v28 }
 0x1b1   : > { %4789 = vst [vmem:[#allocation39_spill] sm:$0xff] %v4603_v39  ;;  %v4605_v17 = vpop.f32.mrf.mxu1  ;;  %v1833_v28 = vadd.f32 %v4553_v31, %v4446_v24  ;;  %v4794_v24 = vld [vmem:[#allocation18_spill] sm:$0xff] }
 0x1b2   : > { %4790 = vst [vmem:[#allocation40_spill] sm:$0xff] %v4605_v17  ;;  %v4608_v10 = vpop.f32.mrf.mxu0  ;;  %v2110_v17 = vadd.f32 %v4495_v63, %v1815_v18  ;;  %v2113_v4 = vadd.f32 %v4497_v21, %v1818_v35  ;;  %v2116_v35 = vadd.f32 %v4503_v11, %v1821_v13 }
 0x1b3   : > { %4791 = vst [vmem:[#allocation41_spill] sm:$0xff] %v4608_v10  ;;  %v4610_v7 = vpop.f32.mrf.mxu1 }
 0x1b4   : > { %v4613_v59 = vpop.f32.mrf.mxu0 }
 0x1b5   : > { %4792 = vst [vmem:[#allocation42_spill] sm:$0xff] %v4613_v59  ;;  %v4615_v42 = vpop.f32.mrf.mxu1 }
 0x1b6   : > { %v3601_v39 = vpop.f32.mrf.mxu0 }
 0x1b7   : > { %v3567_v25 = vpop.f32.mrf.mxu1 }
 0x1b8   : > { %v2406_v5 = vadd.f32 %v3567_v25, %v2112_v62  ;;  %v2571_v10 = vpop.f32.mrf.mxu0  ;;  %v1819_v62 = vadd.f32 %v4509_v57, %v4413_v61  ;;  %v1820_v61 = vadd.f32 %v4517_v32, %v4419_v8  ;;  %v1823_v8 = vadd.f32 %v4525_v43, %v4425_v27 }
 0x1b9   : > { %v2277_v58 = vpop.f32.mrf.mxu1  ;;  %v1824_v27 = vadd.f32 %v4533_v26, %v4431_v50  ;;  %v1827_v50 = vadd.f32 %v4541_v12, %v4437_v41  ;;  %v1828_v41 = vadd.f32 %v4549_v15, %v4443_v2  ;;  %v1831_v2 = vadd.f32 %v4557_v16, %v4449_v46  ;;  %v4797_v46 = vld [vmem:[#allocation20_spill] sm:$0xff] }
 0x1ba   : > { %v2700_v36 = vadd.f32 %v3601_v39, %v2406_v5  ;;  %v2404_v18 = vadd.f32 %v2277_v58, %v2110_v17  ;;  %v3602_v63 = vpop.f32.mrf.mxu0  ;;  %v2114_v51 = vadd.f32 %v4507_v40, %v1819_v62  ;;  %v2117_v5 = vadd.f32 %v4511_v23, %v1822_v37 }
 0x1bb   : > { %v3568_v44 = vpop.f32.mrf.mxu1  ;;  %v2119_v37 = vadd.f32 %v4531_v45, %v1824_v27 }
 0x1bc   : > { %2732 = vst [vmem:[%s4626_s8 + $0x10] sm:$0xff] %v2700_v36  ;;  %v2698_v25 = vadd.f32 %v2571_v10, %v2404_v18  ;;  %v2407_v47 = vadd.f32 %v3568_v44, %v2113_v4  ;;  %v2574_v30 = vpop.f32.mrf.mxu0  ;;  %v2115_v4 = vadd.f32 %v4515_v55, %v1820_v61  ;;  %v2120_v18 = vadd.f32 %v4519_v9, %v1825_v1 }
 0x1bd   : > { %v2280_v59 = vpop.f32.mrf.mxu1  ;;  %v2122_v61 = vadd.f32 %v4539_v53, %v1827_v50  ;;  %v2123_v1 = vadd.f32 %v4547_v56, %v1828_v41 }
 0x1be   : > { %2730 = vst [vmem:[%s4626_s8] sm:$0xff] %v2698_v25  ;;  %v2701_v17 = vadd.f32 %v3602_v63, %v2407_v47  ;;  %v2405_v39 = vadd.f32 %v2280_v59, %v2111_v60  ;;  %v3605_v21 = vpop.f32.mrf.mxu0  ;;  %v2118_v60 = vadd.f32 %v4523_v19, %v1823_v8  ;;  %v2121_v47 = vadd.f32 %v4527_v22, %v1826_v49 }
 0x1bf   : > { %v3571_v48 = vpop.f32.mrf.mxu1 }
 0x1c0   : > { %2733 = vst [vmem:[%s4626_s8 + $0x18] sm:$0xff] %v2701_v17  ;;  %v2699_v10 = vadd.f32 %v2574_v30, %v2405_v39  ;;  %v2410_v57 = vadd.f32 %v3571_v48, %v2116_v35  ;;  %v2587_v34 = vpop.f32.mrf.mxu0 }
 0x1c1   : > { %v2293_v11 = vpop.f32.mrf.mxu1 }
 0x1c2   : > { %2731 = vst [vmem:[%s4626_s8 + $0x8] sm:$0xff] %v2699_v10  ;;  %v2704_v59 = vadd.f32 %v3605_v21, %v2410_v57  ;;  %v2408_v54 = vadd.f32 %v2293_v11, %v2114_v51  ;;  %v3606_v58 = vpop.f32.mrf.mxu0  ;;  %v2124_v21 = vadd.f32 %v4535_v14, %v1829_v38 }
 0x1c3   : > { %v3572_v40 = vpop.f32.mrf.mxu1 }
 0x1c4   : > { %2736 = vst [vmem:[%s4626_s8 + $0x30] sm:$0xff] %v2704_v59  ;;  %v2702_v32 = vadd.f32 %v2587_v34, %v2408_v54  ;;  %v2411_v13 = vadd.f32 %v3572_v40, %v2117_v5  ;;  %v2590_v36 = vpop.f32.mrf.mxu0  ;;  %v2125_v34 = vadd.f32 %v4543_v0, %v1830_v3  ;;  %v4793_v40 = vld [vmem:[#allocation2_spill] sm:$0xff] }
 0x1c5   : > { %v2296_v23 = vpop.f32.mrf.mxu1  ;;  %v1834_v31 = vadd.f32 %v4794_v24, %v4793_v40  ;;  %v4814_v24 = vld [vmem:[#allocation9_spill] sm:$0xff] }
 0x1c6   : > { %2734 = vst [vmem:[%s4626_s8 + $0x20] sm:$0xff] %v2702_v32  ;;  %v2705_v20 = vadd.f32 %v3606_v58, %v2411_v13  ;;  %v2409_v63 = vadd.f32 %v2296_v23, %v2115_v4  ;;  %v3609_v44 = vpop.f32.mrf.mxu0  ;;  %v2128_v58 = vadd.f32 %v4551_v33, %v1833_v28  ;;  %v4795_v13 = vld [vmem:[#allocation16_spill] sm:$0xff]  ;;  %v4796_v23 = vld [vmem:[#allocation3_spill] sm:$0xff] }
 0x1c7   : > { %v3575_v55 = vpop.f32.mrf.mxu1  ;;  %v1832_v16 = vadd.f32 %v4797_v46, %v4796_v23  ;;  %v4817_v46 = vld [vmem:[#allocation10_spill] sm:$0xff] }
 0x1c8   : > { %2737 = vst [vmem:[%s4626_s8 + $0x38] sm:$0xff] %v2705_v20  ;;  %v2703_v43 = vadd.f32 %v2590_v36, %v2409_v63  ;;  %v2414_v62 = vadd.f32 %v3575_v55, %v2120_v18  ;;  %v2603_v25 = vpop.f32.mrf.mxu0  ;;  %v2126_v36 = vadd.f32 %v4795_v13, %v1831_v2  ;;  %v4798_v63 = vld [vmem:[#allocation17_spill] sm:$0xff]  ;;  %v4799_v55 = vld [vmem:[#allocation4_spill] sm:$0xff] }
 0x1c9   : > { %v2309_v9 = vpop.f32.mrf.mxu1 }
 0x1ca   : > { %2735 = vst [vmem:[%s4626_s8 + $0x28] sm:$0xff] %v2703_v43  ;;  %v2708_v6 = vadd.f32 %v3609_v44, %v2414_v62  ;;  %v2412_v30 = vadd.f32 %v2309_v9, %v2118_v60  ;;  %v3610_v35 = vpop.f32.mrf.mxu0  ;;  %v2129_v44 = vadd.f32 %v4798_v63, %v1834_v31  ;;  %v4800_v60 = vld [vmem:[#allocation22_spill] sm:$0xff]  ;;  %v4815_v31 = vld [vmem:[#allocation32_spill] sm:$0xff] }
 0x1cb   : > { %v3576_v19 = vpop.f32.mrf.mxu1  ;;  %v1837_v27 = vadd.f32 %v4800_v60, %v4799_v55  ;;  %v4820_v60 = vld [vmem:[#allocation11_spill] sm:$0xff] }
 0x1cc   : > { %2740 = vst [vmem:[%s4626_s8 + $0x50] sm:$0xff] %v2708_v6  ;;  %v2706_v26 = vadd.f32 %v2603_v25, %v2412_v30  ;;  %v2415_v17 = vadd.f32 %v3576_v19, %v2121_v47  ;;  %v2606_v39 = vpop.f32.mrf.mxu0  ;;  %v4801_v47 = vld [vmem:[#allocation19_spill] sm:$0xff]  ;;  %v4802_v6 = vld [vmem:[#allocation5_spill] sm:$0xff]  ;;  %v4803_v30 = vld [vmem:[#allocation24_spill] sm:$0xff] }
 0x1cd   : > { %v2312_v22 = vpop.f32.mrf.mxu1  ;;  %v2127_v38 = vadd.f32 %v4801_v47, %v1832_v16  ;;  %v4818_v16 = vld [vmem:[#allocation34_spill] sm:$0xff] }
 0x1ce   : > { %2738 = vst [vmem:[%s4626_s8 + $0x40] sm:$0xff] %v2706_v26  ;;  %v2709_v52 = vadd.f32 %v3610_v35, %v2415_v17  ;;  %v2413_v48 = vadd.f32 %v2312_v22, %v2119_v37  ;;  %v3613_v51 = vpop.f32.mrf.mxu0  ;;  %v1835_v35 = vadd.f32 %v4803_v30, %v4802_v6  ;;  %v4804_v17 = vld [vmem:[#allocation21_spill] sm:$0xff]  ;;  %v4805_v22 = vld [vmem:[#allocation6_spill] sm:$0xff]  ;;  %v4823_v30 = vld [vmem:[#allocation12_spill] sm:$0xff] }
 0x1cf   : > { %v3579_v45 = vpop.f32.mrf.mxu1 }
 0x1d0   : > { %2741 = vst [vmem:[%s4626_s8 + $0x58] sm:$0xff] %v2709_v52  ;;  %v2707_v12 = vadd.f32 %v2606_v39, %v2413_v48  ;;  %v2418_v10 = vadd.f32 %v3579_v45, %v2124_v21  ;;  %v2619_v57 = vpop.f32.mrf.mxu0  ;;  %v2132_v39 = vadd.f32 %v4804_v17, %v1837_v27  ;;  %v4806_v21 = vld [vmem:[#allocation26_spill] sm:$0xff]  ;;  %v4821_v27 = vld [vmem:[#allocation36_spill] sm:$0xff] }
 0x1d1   : > { %v2325_v14 = vpop.f32.mrf.mxu1  ;;  %v1838_v3 = vadd.f32 %v4806_v21, %v4805_v22  ;;  %v4826_v21 = vld [vmem:[#allocation13_spill] sm:$0xff] }
 0x1d2   : > { %2739 = vst [vmem:[%s4626_s8 + $0x48] sm:$0xff] %v2707_v12  ;;  %v2712_v29 = vadd.f32 %v3613_v51, %v2418_v10  ;;  %v2416_v11 = vadd.f32 %v2325_v14, %v2122_v61  ;;  %v3614_v5 = vpop.f32.mrf.mxu0  ;;  %v4807_v61 = vld [vmem:[#allocation23_spill] sm:$0xff]  ;;  %v4809_v10 = vld [vmem:[#allocation28_spill] sm:$0xff] }
 0x1d3   : > { %v3580_v53 = vpop.f32.mrf.mxu1  ;;  %v2130_v41 = vadd.f32 %v4807_v61, %v1835_v35  ;;  %v4808_v12 = vld [vmem:[#allocation7_spill] sm:$0xff]  ;;  %v4824_v35 = vld [vmem:[#allocation38_spill] sm:$0xff] }
 0x1d4   : > { %2744 = vst [vmem:[%s4626_s8 + $0x70] sm:$0xff] %v2712_v29  ;;  %v2710_v15 = vadd.f32 %v2619_v57, %v2416_v11  ;;  %v2419_v59 = vadd.f32 %v3580_v53, %v2125_v34  ;;  %v2622_v54 = vpop.f32.mrf.mxu0  ;;  %v1836_v57 = vadd.f32 %v4809_v10, %v4808_v12  ;;  %v4810_v11 = vld [vmem:[#allocation25_spill] sm:$0xff]  ;;  %v4811_v53 = vld [vmem:[#allocation8_spill] sm:$0xff]  ;;  %v4829_v10 = vld [vmem:[#allocation14_spill] sm:$0xff] }
 0x1d5   : > { %v2328_v0 = vpop.f32.mrf.mxu1 }
 0x1d6   : > { %2742 = vst [vmem:[%s4626_s8 + $0x60] sm:$0xff] %v2710_v15  ;;  %v2713_v4 = vadd.f32 %v3614_v5, %v2419_v59  ;;  %v2417_v8 = vadd.f32 %v2328_v0, %v2123_v1  ;;  %v3617_v32 = vpop.f32.mrf.mxu0  ;;  %v2133_v5 = vadd.f32 %v4810_v11, %v1838_v3  ;;  %v4812_v1 = vld [vmem:[#allocation30_spill] sm:$0xff]  ;;  %v4827_v3 = vld [vmem:[#allocation40_spill] sm:$0xff]  ;;  %v4830_v11 = vld [vmem:[#allocation39_spill] sm:$0xff] }
 0x1d7   : > { %v3583_v56 = vpop.f32.mrf.mxu1  ;;  %v1841_v2 = vadd.f32 %v4812_v1, %v4811_v53  ;;  %v4831_v53 = vld [vmem:[#allocation15_spill] sm:$0xff] }
 0x1d8   : > { %2745 = vst [vmem:[%s4626_s8 + $0x78] sm:$0xff] %v2713_v4  ;;  %v2711_v18 = vadd.f32 %v2622_v54, %v2417_v8  ;;  %v2422_v49 = vadd.f32 %v3583_v56, %v2128_v58  ;;  %v2635_v20 = vpop.f32.mrf.mxu0  ;;  %v4813_v58 = vld [vmem:[#allocation27_spill] sm:$0xff]  ;;  %v1839_v4 = vadd.f32 %v4815_v31, %v4814_v24  ;;  %v1844_v1 = vadd.f32 %v4615_v42, %v4831_v53 }
 0x1d9   : > { %v2341_v33 = vpop.f32.mrf.mxu1  ;;  %v2131_v40 = vadd.f32 %v4813_v58, %v1836_v57  ;;  %v1846_v57 = vadd.f32 %v4610_v7, %v4829_v10 }
 0x1da   : > { %2743 = vst [vmem:[%s4626_s8 + $0x68] sm:$0xff] %v2711_v18  ;;  %v2716_v43 = vadd.f32 %v3617_v32, %v2422_v49  ;;  %v2420_v62 = vadd.f32 %v2341_v33, %v2126_v36  ;;  %v3618_v25 = vpop.f32.mrf.mxu0  ;;  %v4816_v36 = vld [vmem:[#allocation29_spill] sm:$0xff]  ;;  %v1842_v18 = vadd.f32 %v4818_v16, %v4817_v46 }
 0x1db   : > { %v3584_v9 = vpop.f32.mrf.mxu1  ;;  %v2136_v23 = vadd.f32 %v4816_v36, %v1841_v2 }
 0x1dc   : > { %2748 = vst [vmem:[%s4626_s8 + $0x90] sm:$0xff] %v2716_v43  ;;  %v2714_v19 = vadd.f32 %v2635_v20, %v2420_v62  ;;  %v2423_v37 = vadd.f32 %v3584_v9, %v2129_v44  ;;  %v2638_v50 = vpop.f32.mrf.mxu0  ;;  %v4819_v44 = vld [vmem:[#allocation31_spill] sm:$0xff]  ;;  %v1840_v43 = vadd.f32 %v4821_v27, %v4820_v60 }
 0x1dd   : > { %v2344_v26 = vpop.f32.mrf.mxu1  ;;  %v2134_v55 = vadd.f32 %v4819_v44, %v1839_v4  ;;  %v4833_v4 = vld [vmem:[#allocation42_spill] sm:$0xff] }
 0x1de   : > { %2746 = vst [vmem:[%s4626_s8 + $0x80] sm:$0xff] %v2714_v19  ;;  %v2717_v52 = vadd.f32 %v3618_v25, %v2423_v37  ;;  %v2421_v48 = vadd.f32 %v2344_v26, %v2127_v38  ;;  %v3621_v51 = vpop.f32.mrf.mxu0  ;;  %v4822_v38 = vld [vmem:[#allocation33_spill] sm:$0xff]  ;;  %v1845_v19 = vadd.f32 %v4824_v35, %v4823_v30 }
 0x1df   : > { %v3587_v45 = vpop.f32.mrf.mxu1  ;;  %v2137_v6 = vadd.f32 %v4822_v38, %v1842_v18 }
 0x1e0   : > { %2749 = vst [vmem:[%s4626_s8 + $0x98] sm:$0xff] %v2717_v52  ;;  %v2715_v14 = vadd.f32 %v2638_v50, %v2421_v48  ;;  %v2426_v34 = vadd.f32 %v3587_v45, %v2132_v39  ;;  %v2651_v28 = vpop.f32.mrf.mxu0  ;;  %v4825_v39 = vld [vmem:[#allocation35_spill] sm:$0xff]  ;;  %v1843_v52 = vadd.f32 %v4827_v3, %v4826_v21 }
 0x1e1   : > { %v2357_v29 = vpop.f32.mrf.mxu1  ;;  %v2135_v22 = vadd.f32 %v4825_v39, %v1840_v43 }
 0x1e2   : > { %2747 = vst [vmem:[%s4626_s8 + $0x88] sm:$0xff] %v2715_v14  ;;  %v2720_v15 = vadd.f32 %v3621_v51, %v2426_v34  ;;  %v2424_v59 = vadd.f32 %v2357_v29, %v2130_v41  ;;  %v3622_v54 = vpop.f32.mrf.mxu0  ;;  %v4828_v41 = vld [vmem:[#allocation37_spill] sm:$0xff] }
 0x1e3   : > { %v3588_v0 = vpop.f32.mrf.mxu1  ;;  %v2140_v12 = vadd.f32 %v4828_v41, %v1845_v19 }
 0x1e4   : > { %2752 = vst [vmem:[%s4626_s8 + $0xb0] sm:$0xff] %v2720_v15  ;;  %v2718_v8 = vadd.f32 %v2651_v28, %v2424_v59  ;;  %v2427_v32 = vadd.f32 %v3588_v0, %v2133_v5  ;;  %v2654_v56 = vpop.f32.mrf.mxu0  ;;  %v2138_v5 = vadd.f32 %v4830_v11, %v1843_v52  ;;  %v4832_v0 = vld [vmem:[#allocation41_spill] sm:$0xff] }
 0x1e5   : > { %v2360_v13 = vpop.f32.mrf.mxu1  ;;  %v2141_v7 = vadd.f32 %v4832_v0, %v1846_v57 }
 0x1e6   : > { %2750 = vst [vmem:[%s4626_s8 + $0xa0] sm:$0xff] %v2718_v8  ;;  %v2721_v49 = vadd.f32 %v3622_v54, %v2427_v32  ;;  %v2425_v20 = vadd.f32 %v2360_v13, %v2131_v40  ;;  %v3625_v33 = vpop.f32.mrf.mxu0  ;;  %v2139_v8 = vadd.f32 %v4833_v4, %v1844_v1 }
 0x1e7   : > { %v3591_v63 = vpop.f32.mrf.mxu1 }
 0x1e8   : > { %2753 = vst [vmem:[%s4626_s8 + $0xb8] sm:$0xff] %v2721_v49  ;;  %v2719_v62 = vadd.f32 %v2654_v56, %v2425_v20  ;;  %v2430_v25 = vadd.f32 %v3591_v63, %v2136_v23  ;;  %v2667_v9 = vpop.f32.mrf.mxu0 }
 0x1e9   : > { %v2373_v47 = vpop.f32.mrf.mxu1 }
 0x1ea   : > { %2751 = vst [vmem:[%s4626_s8 + $0xa8] sm:$0xff] %v2719_v62  ;;  %v2724_v37 = vadd.f32 %v3625_v33, %v2430_v25  ;;  %v2428_v50 = vadd.f32 %v2373_v47, %v2134_v55  ;;  %v3626_v26 = vpop.f32.mrf.mxu0 }
 0x1eb   : > { %v3592_v17 = vpop.f32.mrf.mxu1 }
 0x1ec   : > { %2756 = vst [vmem:[%s4626_s8 + $0xd0] sm:$0xff] %v2724_v37  ;;  %v2722_v48 = vadd.f32 %v2667_v9, %v2428_v50  ;;  %v2431_v51 = vadd.f32 %v3592_v17, %v2137_v6  ;;  %v2670_v45 = vpop.f32.mrf.mxu0 }
 0x1ed   : > { %v2376_v61 = vpop.f32.mrf.mxu1 }
 0x1ee   : > { %2754 = vst [vmem:[%s4626_s8 + $0xc0] sm:$0xff] %v2722_v48  ;;  %v2725_v14 = vadd.f32 %v3626_v26, %v2431_v51  ;;  %v2429_v34 = vadd.f32 %v2376_v61, %v2135_v22  ;;  %v3629_v28 = vpop.f32.mrf.mxu0 }
 0x1ef   : > { %v3595_v29 = vpop.f32.mrf.mxu1 }
 0x1f0   : > { %2757 = vst [vmem:[%s4626_s8 + $0xd8] sm:$0xff] %v2725_v14  ;;  %v2723_v2 = vadd.f32 %v2670_v45, %v2429_v34  ;;  %v2434_v15 = vadd.f32 %v3595_v29, %v2140_v12  ;;  %v2683_v59 = vpop.f32.mrf.mxu0 }
 0x1f1   : > { %v2389_v54 = vpop.f32.mrf.mxu1 }
 0x1f2   : > { %2755 = vst [vmem:[%s4626_s8 + $0xc8] sm:$0xff] %v2723_v2  ;;  %v2728_v58 = vadd.f32 %v3629_v28, %v2434_v15  ;;  %v2432_v40 = vadd.f32 %v2389_v54, %v2138_v5  ;;  %v3630_v31 = vpop.f32.mrf.mxu0 }
 0x1f3   : > { %v3596_v24 = vpop.f32.mrf.mxu1 }
 0x1f4   : > { %2760 = vst [vmem:[%s4626_s8 + $0xf0] sm:$0xff] %v2728_v58  ;;  %v2726_v32 = vadd.f32 %v2683_v59, %v2432_v40  ;;  %v2435_v42 = vadd.f32 %v3596_v24, %v2141_v7  ;;  %v2686_v23 = vpop.f32.mrf.mxu0 }
 0x1f5   : > { %v2392_v56 = vpop.f32.mrf.mxu1 }
 0x1f6   : > { %2758 = vst [vmem:[%s4626_s8 + $0xe0] sm:$0xff] %v2726_v32  ;;  %v2729_v13 = vadd.f32 %v3630_v31, %v2435_v42  ;;  %v2433_v36 = vadd.f32 %v2392_v56, %v2139_v8 }
 0x1f8   : > { %2761 = vst [vmem:[%s4626_s8 + $0xf8] sm:$0xff] %v2729_v13  ;;  %v2727_v46 = vadd.f32 %v2686_v23, %v2433_v36 }
 0x1fa   : > { %2759 = vst [vmem:[%s4626_s8 + $0xe8] sm:$0xff] %v2727_v46 }
 0x1fb PF: > { %s12_s9 = sadd.s32 1, %s3658_s9  }
 0x1fc   : > { %p9_p4 = scmp.ge.s32.totalorder %s12_s9, 18  }
 0x1fe   :  { %11 = sbr.rel (!%p9_p4) target bundleno = 1 (0x1), region = 68 }

// kernel: convlstm_seg_forward.4
= control target key start
LH: loop header
LB: loop body
LE: loop exit
PB: predicated region body
PF: predicated region fallthrough
CT: control target
= control target key end

     0   :  { %s5518_s9 = smov 0   ;;  %s5520_s10 = smov 0   ;;  %s7426_s0 = inlined_call_operand.vmem [shape: f32[2,8,256,128], index: 0, kind: input, shape index: {}]   ;;  %s7427_s1 = inlined_call_operand.vmem [shape: bf16[3,3,32,128], index: 1, kind: input, shape index: {}]   ;;  %s7428_s2 = inlined_call_operand.vmem [shape: f32[2,256,32], index: 2, kind: output, shape index: {}]  }
   0x1   :  { %s5522_s11 = smov 0   ;;  %s5524_s12 = smov 0  }
   0x2   :  { %s5526_s13 = smov 0  }
   0x3 LB: > { %s21_s14 = sadd.s32 1, %s5489_s11  ;;  %s24_s15 = sadd.s32 1, %s5493_s12  ;;  %s5497_s13 = sphi %s5526_s13, %s12_s13   ;;  %s5493_s12 = sphi %s5524_s12, %s7464_s12   ;;  %s5489_s11 = sphi %s5522_s11, %s7463_s11   ;;  %s5485_s10 = sphi %s5520_s10, %s7462_s10   ;;  %s5481_s9 = sphi %s5518_s9, %s7461_s9  }
   0x4   : > { %p22_p0 = scmp.ge.s32.totalorder %s21_s14, 8  ;;  %p4414_p1 = scmp.ge.s32.totalorder %s5497_s13, 1 }
   0x5   : > { %p130_p2 = scmp.lt.s32.totalorder %s5497_s13, 17 }
   0x6   : > { %s7466_s14 = smov (%p22_p0, %s21_s14), 0  ;;  %s7468_s15 = smov (!%p22_p0, %s24_s15), %s5493_s12 }
   0x7   : > { %p131_p3 = pnand %p4414_p1, %p130_p2  ;;  %p26_p4 = scmp.ge.s32.totalorder %s7468_s15, 2 }
   0x9   : > { %s7470_s15 = smov (%p26_p4, %s7468_s15), 0  ;;  %134 = sbr.rel (%p131_p3) target bundleno = 1126 (0x466), region = 28 }
   0xe   : > { %p156_p5 = scmp.lt.s32.totalorder %s5485_s10, 1  ;;  %p158_p6 = scmp.lt.s32.totalorder %s5481_s9, 7 }
   0xf   : > { %p4420_p7 = scmp.ne.s32.totalorder %s5481_s9, 0 }
  0x10   : > { %s7472_s10 = smov (!%p156_p5, %s5485_s10), 1 }
  0x11   : > { %s159_s16 = scalar_select %p158_p6, %s5481_s9, 7 }
  0x12   : > { %s4416_s17 = sshll.u32 %s7472_s10, 8  ;;  %174 = sbr.rel (%p4420_p7) target bundleno = 67 (0x43), region = 32 }
  0x13   : > { %s4415_s18 = sshll.u32 %s159_s16, 5  ;;  %s5555_s21 = scalar_lea.vmem %s7428_s2, %s4416_s17 }
  0x14   : > { %s162_s22 = sadd.s32 %s4416_s17, %s4415_s18 }
  0x15   : > { %s4417_s23 = sshll.u32 %s162_s22, 3 }
  0x16   : > { %s5560_s26 = scalar_lea.vmem %s7426_s0, %s4417_s23 }
  0x17   : > { %vm175_vm0 = vcmask 261120   ;;  %vm210_vm1 = vcmask 254976   ;;  %v5499_v0 = vmov 0.0  }
  0x18   : > { %176 = vst.msk [vmem:[#allocation2] sm:$0xff] %vm175_vm0, %v5499_v0  ;;  %177 = vst.msk [vmem:[#allocation2 + $0x8] sm:$0xff] %vm175_vm0, %v5499_v0 }
  0x19   : > { %178 = vst.msk [vmem:[#allocation2 + $0x10] sm:$0xff] %vm175_vm0, %v5499_v0  ;;  %179 = vst.msk [vmem:[#allocation2 + $0x18] sm:$0xff] %vm175_vm0, %v5499_v0 }
  0x1a   : > { %180 = vst.msk [vmem:[#allocation2 + $0x20] sm:$0xff] %vm175_vm0, %v5499_v0  ;;  %181 = vst.msk [vmem:[#allocation2 + $0x28] sm:$0xff] %vm175_vm0, %v5499_v0 }
  0x1b   : > { %182 = vst.msk [vmem:[#allocation2 + $0x30] sm:$0xff] %vm175_vm0, %v5499_v0  ;;  %183 = vst.msk [vmem:[#allocation2 + $0x38] sm:$0xff] %vm175_vm0, %v5499_v0 }
  0x1c   : > { %184 = vst.msk [vmem:[#allocation2 + $0x40] sm:$0xff] %vm175_vm0, %v5499_v0  ;;  %185 = vst.msk [vmem:[#allocation2 + $0x48] sm:$0xff] %vm175_vm0, %v5499_v0 }
  0x1d   : > { %186 = vst.msk [vmem:[#allocation2 + $0x50] sm:$0xff] %vm175_vm0, %v5499_v0  ;;  %187 = vst.msk [vmem:[#allocation2 + $0x58] sm:$0xff] %vm175_vm0, %v5499_v0 }
  0x1e   : > { %188 = vst.msk [vmem:[#allocation2 + $0x60] sm:$0xff] %vm175_vm0, %v5499_v0  ;;  %189 = vst.msk [vmem:[#allocation2 + $0x68] sm:$0xff] %vm175_vm0, %v5499_v0 }
  0x1f   : > { %190 = vst.msk [vmem:[#allocation2 + $0x70] sm:$0xff] %vm175_vm0, %v5499_v0  ;;  %191 = vst.msk [vmem:[#allocation2 + $0x78] sm:$0xff] %vm175_vm0, %v5499_v0 }
  0x20   : > { %192 = vst.msk [vmem:[#allocation2 + $0x80] sm:$0xff] %vm175_vm0, %v5499_v0  ;;  %193 = vst.msk [vmem:[#allocation2 + $0x88] sm:$0xff] %vm175_vm0, %v5499_v0 }
  0x21   : > { %194 = vst.msk [vmem:[#allocation2 + $0x90] sm:$0xff] %vm175_vm0, %v5499_v0  ;;  %195 = vst.msk [vmem:[#allocation2 + $0x98] sm:$0xff] %vm175_vm0, %v5499_v0 }
  0x22   : > { %196 = vst.msk [vmem:[#allocation2 + $0xa0] sm:$0xff] %vm175_vm0, %v5499_v0  ;;  %197 = vst.msk [vmem:[#allocation2 + $0xa8] sm:$0xff] %vm175_vm0, %v5499_v0 }
  0x23   : > { %198 = vst.msk [vmem:[#allocation2 + $0xb0] sm:$0xff] %vm175_vm0, %v5499_v0  ;;  %199 = vst.msk [vmem:[#allocation2 + $0xb8] sm:$0xff] %vm175_vm0, %v5499_v0 }
  0x24   : > { %200 = vst.msk [vmem:[#allocation2 + $0xc0] sm:$0xff] %vm175_vm0, %v5499_v0  ;;  %201 = vst.msk [vmem:[#allocation2 + $0xc8] sm:$0xff] %vm175_vm0, %v5499_v0 }
  0x25   : > { %202 = vst.msk [vmem:[#allocation2 + $0xd0] sm:$0xff] %vm175_vm0, %v5499_v0  ;;  %203 = vst.msk [vmem:[#allocation2 + $0xd8] sm:$0xff] %vm175_vm0, %v5499_v0 }
  0x26   : > { %204 = vst.msk [vmem:[#allocation2 + $0xe0] sm:$0xff] %vm175_vm0, %v5499_v0  ;;  %205 = vst.msk [vmem:[#allocation2 + $0xe8] sm:$0xff] %vm175_vm0, %v5499_v0 }
  0x27   : > { %206 = vst.msk [vmem:[#allocation2 + $0xf0] sm:$0xff] %vm175_vm0, %v5499_v0  ;;  %207 = vst.msk [vmem:[#allocation2 + $0xf8] sm:$0xff] %vm175_vm0, %v5499_v0 }
  0x28   : > { %208 = vst.msk [vmem:[#allocation3] sm:$0xff] %vm175_vm0, %v5499_v0  ;;  %209 = vst.msk [vmem:[#allocation3 + $0x8] sm:$0xff] %vm175_vm0, %v5499_v0 }
  0x29   : > { %212 = vst.msk [vmem:[#allocation3 + $0x18] sm:$0xff] %vm175_vm0, %v5499_v0  ;;  %213 = vst.msk [vmem:[#allocation3 + $0x20] sm:$0xff] %vm175_vm0, %v5499_v0 }
  0x2a   : > { %215 = vst.msk [vmem:[#allocation3 + $0x30] sm:$0xff] %vm175_vm0, %v5499_v0  ;;  %216 = vst.msk [vmem:[#allocation3 + $0x38] sm:$0xff] %vm175_vm0, %v5499_v0 }
  0x2b   : > { %218 = vst.msk [vmem:[#allocation3 + $0x48] sm:$0xff] %vm175_vm0, %v5499_v0  ;;  %219 = vst.msk [vmem:[#allocation3 + $0x50] sm:$0xff] %vm175_vm0, %v5499_v0 }
  0x2c   : > { %221 = vst.msk [vmem:[#allocation3 + $0x60] sm:$0xff] %vm175_vm0, %v5499_v0  ;;  %222 = vst.msk [vmem:[#allocation3 + $0x68] sm:$0xff] %vm175_vm0, %v5499_v0 }
  0x2d   : > { %224 = vst.msk [vmem:[#allocation3 + $0x78] sm:$0xff] %vm175_vm0, %v5499_v0  ;;  %225 = vst.msk [vmem:[#allocation3 + $0x80] sm:$0xff] %vm175_vm0, %v5499_v0 }
  0x2e   : > { %227 = vst.msk [vmem:[#allocation3 + $0x90] sm:$0xff] %vm175_vm0, %v5499_v0  ;;  %228 = vst.msk [vmem:[#allocation3 + $0x98] sm:$0xff] %vm175_vm0, %v5499_v0 }
  0x2f   : > { %230 = vst.msk [vmem:[#allocation3 + $0xa8] sm:$0xff] %vm175_vm0, %v5499_v0  ;;  %231 = vst.msk [vmem:[#allocation3 + $0xb0] sm:$0xff] %vm175_vm0, %v5499_v0 }
  0x30   : > { %233 = vst.msk [vmem:[#allocation3 + $0xc0] sm:$0xff] %vm175_vm0, %v5499_v0  ;;  %234 = vst.msk [vmem:[#allocation3 + $0xc8] sm:$0xff] %vm175_vm0, %v5499_v0 }
  0x31   : > { %236 = vst.msk [vmem:[#allocation3 + $0xd8] sm:$0xff] %vm175_vm0, %v5499_v0  ;;  %237 = vst.msk [vmem:[#allocation3 + $0xe0] sm:$0xff] %vm175_vm0, %v5499_v0 }
  0x32   : > { %239 = vst.msk [vmem:[#allocation3 + $0xf0] sm:$0xff] %vm175_vm0, %v5499_v0  ;;  %240 = vst.msk [vmem:[#allocation3 + $0xf8] sm:$0xff] %vm175_vm0, %v5499_v0 }
  0x33   : > { %242 = vst.msk [vmem:[#allocation3 + $0x108] sm:$0xff] %vm175_vm0, %v5499_v0  ;;  %243 = vst.msk [vmem:[#allocation3 + $0x110] sm:$0xff] %vm175_vm0, %v5499_v0 }
  0x34   : > { %245 = vst.msk [vmem:[#allocation3 + $0x120] sm:$0xff] %vm175_vm0, %v5499_v0  ;;  %246 = vst.msk [vmem:[#allocation3 + $0x128] sm:$0xff] %vm175_vm0, %v5499_v0 }
  0x35   : > { %248 = vst.msk [vmem:[#allocation3 + $0x138] sm:$0xff] %vm175_vm0, %v5499_v0  ;;  %249 = vst.msk [vmem:[#allocation3 + $0x140] sm:$0xff] %vm175_vm0, %v5499_v0 }
  0x36   : > { %251 = vst.msk [vmem:[#allocation3 + $0x150] sm:$0xff] %vm175_vm0, %v5499_v0  ;;  %252 = vst.msk [vmem:[#allocation3 + $0x158] sm:$0xff] %vm175_vm0, %v5499_v0 }
  0x37   : > { %254 = vst.msk [vmem:[#allocation3 + $0x168] sm:$0xff] %vm175_vm0, %v5499_v0  ;;  %255 = vst.msk [vmem:[#allocation3 + $0x170] sm:$0xff] %vm175_vm0, %v5499_v0 }
  0x38   : > { %257 = vst.msk [vmem:[#allocation3 + $0x180] sm:$0xff] %vm175_vm0, %v5499_v0  ;;  %258 = vst.msk [vmem:[#allocation3 + $0x188] sm:$0xff] %vm175_vm0, %v5499_v0 }
  0x39   : > { %260 = vst.msk [vmem:[#allocation3 + $0x198] sm:$0xff] %vm175_vm0, %v5499_v0  ;;  %261 = vst.msk [vmem:[#allocation3 + $0x1a0] sm:$0xff] %vm175_vm0, %v5499_v0 }
  0x3a   : > { %211 = vst.msk [vmem:[#allocation3 + $0x10] sm:$0x3] %vm210_vm1, %v5499_v0  ;;  %214 = vst.msk [vmem:[#allocation3 + $0x28] sm:$0x3] %vm210_vm1, %v5499_v0 }
  0x3b   : > { %217 = vst.msk [vmem:[#allocation3 + $0x40] sm:$0x3] %vm210_vm1, %v5499_v0  ;;  %220 = vst.msk [vmem:[#allocation3 + $0x58] sm:$0x3] %vm210_vm1, %v5499_v0 }
  0x3c   : > { %223 = vst.msk [vmem:[#allocation3 + $0x70] sm:$0x3] %vm210_vm1, %v5499_v0  ;;  %226 = vst.msk [vmem:[#allocation3 + $0x88] sm:$0x3] %vm210_vm1, %v5499_v0 }
  0x3d   : > { %229 = vst.msk [vmem:[#allocation3 + $0xa0] sm:$0x3] %vm210_vm1, %v5499_v0  ;;  %232 = vst.msk [vmem:[#allocation3 + $0xb8] sm:$0x3] %vm210_vm1, %v5499_v0 }
  0x3e   : > { %235 = vst.msk [vmem:[#allocation3 + $0xd0] sm:$0x3] %vm210_vm1, %v5499_v0  ;;  %238 = vst.msk [vmem:[#allocation3 + $0xe8] sm:$0x3] %vm210_vm1, %v5499_v0 }
  0x3f   : > { %241 = vst.msk [vmem:[#allocation3 + $0x100] sm:$0x3] %vm210_vm1, %v5499_v0  ;;  %244 = vst.msk [vmem:[#allocation3 + $0x118] sm:$0x3] %vm210_vm1, %v5499_v0 }
  0x40   : > { %247 = vst.msk [vmem:[#allocation3 + $0x130] sm:$0x3] %vm210_vm1, %v5499_v0  ;;  %250 = vst.msk [vmem:[#allocation3 + $0x148] sm:$0x3] %vm210_vm1, %v5499_v0 }
  0x41   : > { %253 = vst.msk [vmem:[#allocation3 + $0x160] sm:$0x3] %vm210_vm1, %v5499_v0  ;;  %256 = vst.msk [vmem:[#allocation3 + $0x178] sm:$0x3] %vm210_vm1, %v5499_v0 }
  0x42   : > { %259 = vst.msk [vmem:[#allocation3 + $0x190] sm:$0x3] %vm210_vm1, %v5499_v0  ;;  %262 = vst.msk [vmem:[#allocation3 + $0x1a8] sm:$0x3] %vm210_vm1, %v5499_v0 }
  0x43 PF: > { %v5185_v1 = vld [vmem:[%s7427_s1 + $0x8] sm:$0xff]   ;;  %v5186_v2 = vld [vmem:[%s7427_s1] sm:$0xff]   ;;  %vm359_vm2 = vcmask 261120   ;;  %v297_v8 = vld [vmem:[#allocation3 + $0x18] sm:$0xff]  ;;  %s5500_s22 = smov 32   ;;  %s5502_s23 = smov 64  }
  0x44   : > { %4813 = vmatprep.subr.bf16.mxu0 %v5185_v1  ;;  %5137 = vmatprep.subr.bf16.mxu1 %v5185_v1  ;;  %v295_v3 = vld [vmem:[#allocation3] sm:$0xff]  ;;  %v296_v4 = vld [vmem:[#allocation3 + $0x8] sm:$0xff]  ;;  %v313_v11 = vld [vmem:[#allocation3 + $0xd8] sm:$0xff]  ;;  %p4647_p8 = scmp.ne.s32.totalorder %s5481_s9, 7 }
  0x45   : > { %v311_v5 = vld [vmem:[#allocation3 + $0xc0] sm:$0xff]  ;;  %4814 = vmatpush3.bf16.msra.mxu0 %v5185_v1  ;;  %5139 = vmatpush3.bf16.msra.mxu1 %v5185_v1  ;;  %v327_v6 = vpack.c.bf16 %v296_v4, %v295_v3  ;;  %v312_v7 = vld [vmem:[#allocation3 + $0xc8] sm:$0xff]  ;;  %v5187_v13 = vld [vmem:[%s7427_s1 + $0x18] sm:$0xff]  }
  0x46   : > { %v298_v9 = vld [vmem:[#allocation3 + $0x20] sm:$0xff]  ;;  %4815 = vmatprep.subr.bf16.mxu0 %v5186_v2  ;;  %5138 = vmatprep.subr.bf16.mxu1 %v5186_v2  ;;  %v5741_v10 = vpack.c.bf16 %v312_v7, %v311_v5  ;;  %v5188_v16 = vld [vmem:[%s7427_s1 + $0x28] sm:$0xff]   ;;  %v299_v17 = vld [vmem:[#allocation3 + $0x30] sm:$0xff] }
  0x47   : > { %v314_v12 = vld [vmem:[#allocation3 + $0xe0] sm:$0xff]  ;;  %4817 = vmatprep.mubr.msk.bf16.mxu0 %vm359_vm2, %v327_v6  ;;  %v5749_v14 = vpack.c.bf16 %v298_v9, %v297_v8  ;;  %v300_v18 = vld [vmem:[#allocation3 + $0x38] sm:$0xff]  ;;  %v315_v19 = vld [vmem:[#allocation3 + $0xf0] sm:$0xff] }
  0x48   : > { %4833 = vmatprep.mubr.msk.bf16.mxu1 %vm359_vm2, %v5741_v10  ;;  %v5751_v15 = vpack.c.bf16 %v314_v12, %v313_v11  ;;  %v316_v20 = vld [vmem:[#allocation3 + $0xf8] sm:$0xff]  ;;  %v5756_v21 = vpack.c.bf16 %v300_v18, %v299_v17  ;;  %v301_v23 = vld [vmem:[#allocation3 + $0x48] sm:$0xff]  ;;  %v302_v24 = vld [vmem:[#allocation3 + $0x50] sm:$0xff] }
  0x49   : > { %4816 = vmatpush3.bf16.msra.mxu0 %v5186_v2  ;;  %5140 = vmatpush3.bf16.msra.mxu1 %v5186_v2  ;;  %v5758_v22 = vpack.c.bf16 %v316_v20, %v315_v19  ;;  %v317_v25 = vld [vmem:[#allocation3 + $0x108] sm:$0xff]  ;;  %v318_v26 = vld [vmem:[#allocation3 + $0x110] sm:$0xff]  ;;  %v303_v27 = vld [vmem:[#allocation3 + $0x60] sm:$0xff]  ;;  %v5774_v33 = vpack.c.bf16 %v302_v24, %v301_v23 }
  0x4a   : > { %4849 = vmatprep.subr.bf16.mxu1 %v5187_v13  ;;  %4885 = vmatprep.subr.bf16.mxu0 %v5188_v16  ;;  %v304_v28 = vld [vmem:[#allocation3 + $0x68] sm:$0xff]  ;;  %v319_v29 = vld [vmem:[#allocation3 + $0x120] sm:$0xff]  ;;  %v5189_v31 = vld [vmem:[%s7427_s1 + $0x10] sm:$0xff]   ;;  %v5776_v34 = vpack.c.bf16 %v318_v26, %v317_v25 }
  0x4b   : > { %v320_v30 = vld [vmem:[#allocation3 + $0x128] sm:$0xff]  ;;  %v5190_v32 = vld [vmem:[%s7427_s1 + $0x20] sm:$0xff]   ;;  %v5778_v35 = vpack.c.bf16 %v304_v28, %v303_v27  ;;  %v305_v37 = vld [vmem:[#allocation3 + $0x78] sm:$0xff] }
  0x4c   : > { %4818 = vmatmul.mubr.msk.bf16.vlgmr.msra.gmra.mxu0 %vm359_vm2, %v5749_v14  ;;  %4834 = vmatmul.mubr.msk.bf16.vlgmr.msra.gmra.mxu1 %vm359_vm2, %v5751_v15  ;;  %v5780_v36 = vpack.c.bf16 %v320_v30, %v319_v29  ;;  %v306_v38 = vld [vmem:[#allocation3 + $0x80] sm:$0xff]  ;;  %v321_v39 = vld [vmem:[#allocation3 + $0x138] sm:$0xff]  ;;  %v307_v41 = vld [vmem:[#allocation3 + $0x90] sm:$0xff] }
  0x4d   : > { %4850 = vmatpush3.bf16.msra.mxu1 %v5187_v13  ;;  %4886 = vmatpush3.bf16.msra.mxu0 %v5188_v16  ;;  %v322_v40 = vld [vmem:[#allocation3 + $0x140] sm:$0xff]  ;;  %v308_v42 = vld [vmem:[#allocation3 + $0x98] sm:$0xff]  ;;  %v323_v43 = vld [vmem:[#allocation3 + $0x150] sm:$0xff]  ;;  %v5796_v47 = vpack.c.bf16 %v306_v38, %v305_v37 }
  0x4e   : > { %4821 = vmatprep.mubr.msk.bf16.mxu0 %vm359_vm2, %v5756_v21  ;;  %4837 = vmatprep.mubr.msk.bf16.mxu1 %vm359_vm2, %v5758_v22  ;;  %v324_v44 = vld [vmem:[#allocation3 + $0x158] sm:$0xff]  ;;  %v5192_v46 = vld [vmem:[%s7427_s1 + $0x48] sm:$0xff]   ;;  %v5798_v48 = vpack.c.bf16 %v322_v40, %v321_v39  ;;  %v5800_v49 = vpack.c.bf16 %v308_v42, %v307_v41  ;;  %v310_v52 = vld [vmem:[#allocation3 + $0xb0] sm:$0xff] }
  0x4f   : > { %4851 = vmatprep.subr.bf16.mxu1 %v5189_v31  ;;  %4887 = vmatprep.subr.bf16.mxu0 %v5190_v32  ;;  %v5191_v45 = vld [vmem:[%s7427_s1 + $0x38] sm:$0xff]   ;;  %v5802_v50 = vpack.c.bf16 %v324_v44, %v323_v43  ;;  %v309_v51 = vld [vmem:[#allocation3 + $0xa8] sm:$0xff]  ;;  %v326_v54 = vld [vmem:[#allocation3 + $0x170] sm:$0xff] }
  0x50   : > { %v325_v53 = vld [vmem:[#allocation3 + $0x168] sm:$0xff]  ;;  %v5812_v59 = vpack.c.bf16 %v310_v52, %v309_v51  ;;  %v603_v63 = vld [vmem:[#allocation3 + $0x19] sm:$0xff]  ;;  %v605_v3 = vld [vmem:[#allocation3 + $0x31] sm:$0xff] }
  0x51   : > { %4852 = vmatpush3.bf16.msra.mxu1 %v5189_v31  ;;  %4888 = vmatpush3.bf16.msra.mxu0 %v5190_v32  ;;  %v601_v55 = vld [vmem:[#allocation3 + $0x1] sm:$0xff]  ;;  %v602_v56 = vld [vmem:[#allocation3 + $0x9] sm:$0xff]  ;;  %v5814_v60 = vpack.c.bf16 %v326_v54, %v325_v53  ;;  %v606_v4 = vld [vmem:[#allocation3 + $0x39] sm:$0xff] }
  0x52   : > { %4921 = vmatprep.subr.bf16.mxu1 %v5191_v45  ;;  %4957 = vmatprep.subr.bf16.mxu0 %v5192_v46  ;;  %v907_v57 = vld [vmem:[#allocation3 + $0x2] sm:$0xff]  ;;  %v908_v58 = vld [vmem:[#allocation3 + $0xa] sm:$0xff]  ;;  %v633_v61 = vpack.c.bf16 %v602_v56, %v601_v55  ;;  %v909_v1 = vld [vmem:[#allocation3 + $0x1a] sm:$0xff]  ;;  %v5826_v9 = vpack.c.bf16 %v606_v4, %v605_v3 }
  0x53   : > { %v939_v62 = vpack.c.bf16 %v908_v58, %v907_v57  ;;  %v604_v0 = vld [vmem:[#allocation3 + $0x21] sm:$0xff]  ;;  %v911_v5 = vld [vmem:[#allocation3 + $0x32] sm:$0xff]  ;;  %v607_v12 = vld [vmem:[#allocation3 + $0x49] sm:$0xff] }
  0x54   : > { %4822 = vmatmul.mubr.msk.bf16.gmra.mxu0 %vm359_vm2, %v5774_v33  ;;  %4838 = vmatmul.mubr.msk.bf16.gmra.mxu1 %vm359_vm2, %v5776_v34  ;;  %v910_v2 = vld [vmem:[#allocation3 + $0x22] sm:$0xff]  ;;  %v912_v6 = vld [vmem:[#allocation3 + $0x3a] sm:$0xff]  ;;  %v5822_v7 = vpack.c.bf16 %v604_v0, %v603_v63  ;;  %v608_v13 = vld [vmem:[#allocation3 + $0x51] sm:$0xff] }
  0x55   : > { %4825 = vmatprep.mubr.msk.bf16.mxu0 %vm359_vm2, %v5778_v35  ;;  %4841 = vmatprep.mubr.msk.bf16.mxu1 %vm359_vm2, %v5780_v36  ;;  %v5824_v8 = vpack.c.bf16 %v910_v2, %v909_v1  ;;  %v5828_v11 = vpack.c.bf16 %v912_v6, %v911_v5  ;;  %v913_v16 = vld [vmem:[#allocation3 + $0x4a] sm:$0xff]  ;;  %v914_v17 = vld [vmem:[#allocation3 + $0x52] sm:$0xff]  ;;  %v5194_v19 = vld [vmem:[%s7427_s1 + $0x40] sm:$0xff]   ;;  %v5854_v28 = vpack.c.bf16 %v608_v13, %v607_v12 }
  0x56   : > { %v5193_v18 = vld [vmem:[%s7427_s1 + $0x30] sm:$0xff]   ;;  %v609_v20 = vld [vmem:[#allocation3 + $0x61] sm:$0xff]  ;;  %v5843_v26 = vld [vmem:[%s7427_s1 + $0x58] sm:$0xff]   ;;  %v5856_v29 = vpack.c.bf16 %v914_v17, %v913_v16 }
  0x57   : > { %v610_v23 = vld [vmem:[#allocation3 + $0x69] sm:$0xff]  ;;  %v611_v32 = vld [vmem:[#allocation3 + $0x79] sm:$0xff]  ;;  %v612_v37 = vld [vmem:[#allocation3 + $0x81] sm:$0xff] }
  0x58   : > { %v915_v24 = vld [vmem:[#allocation3 + $0x62] sm:$0xff]  ;;  %v916_v25 = vld [vmem:[#allocation3 + $0x6a] sm:$0xff]  ;;  %v5858_v30 = vpack.c.bf16 %v610_v23, %v609_v20  ;;  %v917_v38 = vld [vmem:[#allocation3 + $0x7a] sm:$0xff]  ;;  %v5872_v44 = vpack.c.bf16 %v612_v37, %v611_v32 }
  0x59   : > { %v5852_v27 = vld [vmem:[%s7427_s1 + $0x68] sm:$0xff]   ;;  %v5860_v31 = vpack.c.bf16 %v916_v25, %v915_v24  ;;  %v613_v40 = vld [vmem:[#allocation3 + $0x91] sm:$0xff]  ;;  %v614_v41 = vld [vmem:[#allocation3 + $0x99] sm:$0xff] }
  0x5a   : > { %v918_v39 = vld [vmem:[#allocation3 + $0x82] sm:$0xff]  ;;  %v919_v42 = vld [vmem:[#allocation3 + $0x92] sm:$0xff]  ;;  %v920_v43 = vld [vmem:[#allocation3 + $0x9a] sm:$0xff] }
  0x5b   : > { %v5878_v51 = vpack.c.bf16 %v920_v43, %v919_v42  ;;  %v615_v52 = vld [vmem:[#allocation3 + $0xa9] sm:$0xff]  ;;  %v616_v53 = vld [vmem:[#allocation3 + $0xb1] sm:$0xff]  ;;  %v617_v56 = vld [vmem:[#allocation3 + $0xc1] sm:$0xff] }
  0x5c   : > { %4826 = vmatmul.mubr.msk.bf16.gmra.mxu0 %vm359_vm2, %v5796_v47  ;;  %4842 = vmatmul.mubr.msk.bf16.gmra.mxu1 %vm359_vm2, %v5798_v48  ;;  %v921_v54 = vld [vmem:[#allocation3 + $0xaa] sm:$0xff]  ;;  %v922_v55 = vld [vmem:[#allocation3 + $0xb2] sm:$0xff]  ;;  %v923_v58 = vld [vmem:[#allocation3 + $0xc2] sm:$0xff] }
  0x5d   : > { %4829 = vmatprep.mubr.msk.bf16.mxu0 %vm359_vm2, %v5800_v49  ;;  %4845 = vmatprep.mubr.msk.bf16.mxu1 %vm359_vm2, %v5802_v50  ;;  %v618_v57 = vld [vmem:[#allocation3 + $0xc9] sm:$0xff]  ;;  %v5890_v63 = vpack.c.bf16 %v922_v55, %v921_v54  ;;  %v619_v2 = vld [vmem:[#allocation3 + $0xd9] sm:$0xff]  ;;  %v620_v3 = vld [vmem:[#allocation3 + $0xe1] sm:$0xff] }
  0x5e   : > { %v5892_v0 = vpack.c.bf16 %v618_v57, %v617_v56  ;;  %v925_v4 = vld [vmem:[#allocation3 + $0xda] sm:$0xff]  ;;  %v926_v5 = vld [vmem:[#allocation3 + $0xe2] sm:$0xff]  ;;  %v621_v6 = vld [vmem:[#allocation3 + $0xf1] sm:$0xff]  ;;  %v5904_v17 = vpack.c.bf16 %v620_v3, %v619_v2 }
  0x5f   : > { %v622_v12 = vld [vmem:[#allocation3 + $0xf9] sm:$0xff]  ;;  %v623_v23 = vld [vmem:[#allocation3 + $0x109] sm:$0xff]  ;;  %v624_v24 = vld [vmem:[#allocation3 + $0x111] sm:$0xff] }
  0x60   : > { %v927_v13 = vld [vmem:[#allocation3 + $0xf2] sm:$0xff]  ;;  %v928_v16 = vld [vmem:[#allocation3 + $0xfa] sm:$0xff]  ;;  %v929_v25 = vld [vmem:[#allocation3 + $0x10a] sm:$0xff] }
  0x61   : > { %v5910_v20 = vpack.c.bf16 %v928_v16, %v927_v13  ;;  %v930_v32 = vld [vmem:[#allocation3 + $0x112] sm:$0xff]  ;;  %v625_v37 = vld [vmem:[#allocation3 + $0x121] sm:$0xff]  ;;  %v937_v16 = vld [vmem:[#allocation3 + $0x16a] sm:$0xff] }
  0x62   : > { %v5922_v42 = vpack.c.bf16 %v930_v32, %v929_v25  ;;  %v628_v54 = vld [vmem:[#allocation3 + $0x141] sm:$0xff]  ;;  %v629_v57 = vld [vmem:[#allocation3 + $0x151] sm:$0xff] }
  0x63   : > { %v933_v55 = vld [vmem:[#allocation3 + $0x13a] sm:$0xff]  ;;  %v934_v56 = vld [vmem:[#allocation3 + $0x142] sm:$0xff]  ;;  %v632_v13 = vld [vmem:[#allocation3 + $0x171] sm:$0xff] }
  0x64   : > { %4830 = vmatmul.mubr.msk.bf16.gmra.mxu0 %vm359_vm2, %v5812_v59  ;;  %4846 = vmatmul.mubr.msk.bf16.gmra.mxu1 %vm359_vm2, %v5814_v60  ;;  %v936_v2 = vld [vmem:[#allocation3 + $0x15a] sm:$0xff]  ;;  %v5197_v32 = vld [vmem:[%s7427_s1 + $0x50] sm:$0xff]  }
  0x65   : > { %4853 = vmatprep.mubr.msk.bf16.mxu1 %vm359_vm2, %v633_v61  ;;  %4889 = vmatprep.mubr.msk.bf16.mxu0 %vm359_vm2, %v939_v62  ;;  %v924_v61 = vld [vmem:[#allocation3 + $0xca] sm:$0xff]  ;;  %v5888_v62 = vpack.c.bf16 %v616_v53, %v615_v52  ;;  %v627_v53 = vld [vmem:[#allocation3 + $0x139] sm:$0xff] }
  0x66   : > { %v5894_v1 = vpack.c.bf16 %v924_v61, %v923_v58  ;;  %v630_v58 = vld [vmem:[#allocation3 + $0x159] sm:$0xff]  ;;  %v646_v3 = vpack.c.bf16 %v628_v54, %v627_v53 }
  0x67   : > { %v935_v61 = vld [vmem:[#allocation3 + $0x152] sm:$0xff] }
  0x6c   : > { %4854 = vmatmul.mubr.msk.bf16.vlgmr.msra.gmra.mxu1 %vm359_vm2, %v5822_v7  ;;  %4890 = vmatmul.mubr.msk.bf16.vlgmr.msra.gmra.mxu0 %vm359_vm2, %v5824_v8 }
  0x6d   : > { %4922 = vmatpush3.bf16.msra.mxu1 %v5191_v45  ;;  %4958 = vmatpush3.bf16.msra.mxu0 %v5192_v46  ;;  %v5874_v45 = vpack.c.bf16 %v918_v39, %v917_v38  ;;  %v5876_v46 = vpack.c.bf16 %v614_v41, %v613_v40  ;;  %v626_v38 = vld [vmem:[#allocation3 + $0x129] sm:$0xff]  ;;  %v5920_v41 = vpack.c.bf16 %v624_v24, %v623_v23  ;;  %v938_v23 = vld [vmem:[#allocation3 + $0x172] sm:$0xff] }
  0x6e   : > { %4857 = vmatprep.mubr.msk.bf16.mxu1 %vm359_vm2, %v5826_v9  ;;  %4893 = vmatprep.mubr.msk.bf16.mxu0 %vm359_vm2, %v5828_v11  ;;  %v931_v39 = vld [vmem:[#allocation3 + $0x122] sm:$0xff]  ;;  %v932_v40 = vld [vmem:[#allocation3 + $0x12a] sm:$0xff]  ;;  %v5924_v43 = vpack.c.bf16 %v626_v38, %v625_v37  ;;  %v5946_v25 = vpack.c.bf16 %v938_v23, %v937_v16 }
  0x6f   : > { %4923 = vmatprep.subr.bf16.mxu1 %v5193_v18  ;;  %4959 = vmatprep.subr.bf16.mxu0 %v5194_v19  ;;  %v5926_v52 = vpack.c.bf16 %v932_v40, %v931_v39  ;;  %v5198_v37 = vld [vmem:[%s7427_s1 + $0x60] sm:$0xff]   ;;  %v3280_v16 = vld [vmem:[#allocation2 + $0x28] sm:$0xff]  ;;  %v3281_v23 = vld [vmem:[#allocation2 + $0x30] sm:$0xff] }
  0x70   : > { %v2440_v40 = vld [vmem:[#allocation3 + $0x39] sm:$0xff] }
  0x71   : > { %4924 = vmatpush3.bf16.msra.mxu1 %v5193_v18  ;;  %4960 = vmatpush3.bf16.msra.mxu0 %v5194_v19  ;;  %v5906_v18 = vpack.c.bf16 %v926_v5, %v925_v4  ;;  %v5908_v19 = vpack.c.bf16 %v622_v12, %v621_v6  ;;  %v5936_v4 = vpack.c.bf16 %v934_v56, %v933_v55  ;;  %v631_v12 = vld [vmem:[#allocation3 + $0x169] sm:$0xff]  ;;  %v3278_v56 = vld [vmem:[#allocation2 + $0x18] sm:$0xff] }
  0x72   : > { %4993 = vmatprep.subr.bf16.mxu1 %v5843_v26  ;;  %5029 = vmatprep.subr.bf16.mxu0 %v5852_v27  ;;  %v647_v5 = vpack.c.bf16 %v630_v58, %v629_v57  ;;  %v5938_v6 = vpack.c.bf16 %v936_v2, %v935_v61  ;;  %v648_v24 = vpack.c.bf16 %v632_v13, %v631_v12  ;;  %v3279_v57 = vld [vmem:[#allocation2 + $0x20] sm:$0xff]  ;;  %v2441_v2 = vld [vmem:[#allocation3 + $0x49] sm:$0xff]  ;;  %v2748_v12 = vld [vmem:[#allocation3 + $0x52] sm:$0xff] }
  0x73   : > { %v2443_v13 = vld [vmem:[#allocation3 + $0x61] sm:$0xff] }
  0x74   : > { %4858 = vmatmul.mubr.msk.bf16.gmra.mxu1 %vm359_vm2, %v5854_v28  ;;  %4894 = vmatmul.mubr.msk.bf16.gmra.mxu0 %vm359_vm2, %v5856_v29 }
  0x75   : > { %4861 = vmatprep.mubr.msk.bf16.mxu1 %vm359_vm2, %v5858_v30  ;;  %4897 = vmatprep.mubr.msk.bf16.mxu0 %vm359_vm2, %v5860_v31 }
  0x7c   : > { %4862 = vmatmul.mubr.msk.bf16.gmra.mxu1 %vm359_vm2, %v5872_v44  ;;  %4898 = vmatmul.mubr.msk.bf16.gmra.mxu0 %vm359_vm2, %v5874_v45 }
  0x7d   : > { %4865 = vmatprep.mubr.msk.bf16.mxu1 %vm359_vm2, %v5876_v46  ;;  %4901 = vmatprep.mubr.msk.bf16.mxu0 %vm359_vm2, %v5878_v51 }
  0x84   : > { %4866 = vmatmul.mubr.msk.bf16.gmra.mxu1 %vm359_vm2, %v5888_v62  ;;  %4902 = vmatmul.mubr.msk.bf16.gmra.mxu0 %vm359_vm2, %v5890_v63 }
  0x85   : > { %4869 = vmatprep.mubr.msk.bf16.mxu1 %vm359_vm2, %v5892_v0  ;;  %4905 = vmatprep.mubr.msk.bf16.mxu0 %vm359_vm2, %v5894_v1 }
  0x8c   : > { %4870 = vmatmul.mubr.msk.bf16.gmra.mxu1 %vm359_vm2, %v5904_v17  ;;  %4906 = vmatmul.mubr.msk.bf16.gmra.mxu0 %vm359_vm2, %v5906_v18 }
  0x8d   : > { %4873 = vmatprep.mubr.msk.bf16.mxu1 %vm359_vm2, %v5908_v19  ;;  %4909 = vmatprep.mubr.msk.bf16.mxu0 %vm359_vm2, %v5910_v20 }
  0x94   : > { %4874 = vmatmul.mubr.msk.bf16.gmra.mxu1 %vm359_vm2, %v5920_v41  ;;  %4910 = vmatmul.mubr.msk.bf16.gmra.mxu0 %vm359_vm2, %v5922_v42 }
  0x95   : > { %4877 = vmatprep.mubr.msk.bf16.mxu1 %vm359_vm2, %v5924_v43  ;;  %4913 = vmatprep.mubr.msk.bf16.mxu0 %vm359_vm2, %v5926_v52 }
  0x9c   : > { %4878 = vmatmul.mubr.msk.bf16.gmra.mxu1 %vm359_vm2, %v646_v3  ;;  %4914 = vmatmul.mubr.msk.bf16.gmra.mxu0 %vm359_vm2, %v5936_v4 }
  0x9d   : > { %4881 = vmatprep.mubr.msk.bf16.mxu1 %vm359_vm2, %v647_v5  ;;  %4917 = vmatprep.mubr.msk.bf16.mxu0 %vm359_vm2, %v5938_v6 }
  0xa4   : > { %4882 = vmatmul.mubr.msk.bf16.gmra.mxu1 %vm359_vm2, %v648_v24  ;;  %4918 = vmatmul.mubr.msk.bf16.gmra.mxu0 %vm359_vm2, %v5946_v25 }
  0xa5   : > { %4925 = vmatprep.mubr.msk.bf16.mxu1 %vm359_vm2, %v5749_v14  ;;  %4961 = vmatprep.mubr.msk.bf16.mxu0 %vm359_vm2, %v5822_v7  ;;  %v5199_v14 = vld [vmem:[%s7427_s1 + $0x78] sm:$0xff]   ;;  %v5200_v7 = vld [vmem:[%s7427_s1 + $0x88] sm:$0xff]  }
  0xac   : > { %4926 = vmatmul.mubr.msk.bf16.vlgmr.msra.gmra.mxu1 %vm359_vm2, %v5756_v21  ;;  %4962 = vmatmul.mubr.msk.bf16.vlgmr.msra.gmra.mxu0 %vm359_vm2, %v5826_v9  ;;  %v1244_v9 = vld [vmem:[#allocation3 + $0x180] sm:$0xff] }
  0xad   : > { %4994 = vmatpush3.bf16.msra.mxu1 %v5843_v26  ;;  %5030 = vmatpush3.bf16.msra.mxu0 %v5852_v27  ;;  %v1245_v26 = vld [vmem:[#allocation3 + $0x188] sm:$0xff] }
  0xae   : > { %4929 = vmatprep.mubr.msk.bf16.mxu1 %vm359_vm2, %v5774_v33  ;;  %4965 = vmatprep.mubr.msk.bf16.mxu0 %vm359_vm2, %v5854_v28  ;;  %v1550_v27 = vld [vmem:[#allocation3 + $0x181] sm:$0xff]  ;;  %v1551_v28 = vld [vmem:[#allocation3 + $0x189] sm:$0xff] }
  0xaf   : > { %4995 = vmatprep.subr.bf16.mxu1 %v5197_v32  ;;  %5031 = vmatprep.subr.bf16.mxu0 %v5198_v37 }
  0xb1   : > { %4996 = vmatpush3.bf16.msra.mxu1 %v5197_v32  ;;  %5032 = vmatpush3.bf16.msra.mxu0 %v5198_v37  ;;  %v2444_v32 = vld [vmem:[#allocation3 + $0x69] sm:$0xff] }
  0xb2   : > { %5065 = vmatprep.subr.bf16.mxu1 %v5199_v14  ;;  %5101 = vmatprep.subr.bf16.mxu0 %v5200_v7  ;;  %v2749_v37 = vld [vmem:[#allocation3 + $0x62] sm:$0xff] }
  0xb4   : > { %4930 = vmatmul.mubr.msk.bf16.gmra.mxu1 %vm359_vm2, %v5778_v35  ;;  %4966 = vmatmul.mubr.msk.bf16.gmra.mxu0 %vm359_vm2, %v5858_v30  ;;  %v6022_v30 = vpack.c.bf16 %v1245_v26, %v1244_v9 }
  0xb5   : > { %4933 = vmatprep.mubr.msk.bf16.mxu1 %vm359_vm2, %v5796_v47  ;;  %4969 = vmatprep.mubr.msk.bf16.mxu0 %vm359_vm2, %v5872_v44  ;;  %v6024_v44 = vpack.c.bf16 %v1551_v28, %v1550_v27 }
  0xbc   : > { %4934 = vmatmul.mubr.msk.bf16.gmra.mxu1 %vm359_vm2, %v5800_v49  ;;  %4970 = vmatmul.mubr.msk.bf16.gmra.mxu0 %vm359_vm2, %v5876_v46  ;;  %v5201_v46 = vld [vmem:[%s7427_s1 + $0x70] sm:$0xff]  }
  0xbd   : > { %4937 = vmatprep.mubr.msk.bf16.mxu1 %vm359_vm2, %v5812_v59  ;;  %4973 = vmatprep.mubr.msk.bf16.mxu0 %vm359_vm2, %v5888_v62  ;;  %v5202_v62 = vld [vmem:[%s7427_s1 + $0x80] sm:$0xff]  }
  0xc4   : > { %4938 = vmatmul.mubr.msk.bf16.gmra.mxu1 %vm359_vm2, %v5741_v10  ;;  %4974 = vmatmul.mubr.msk.bf16.gmra.mxu0 %vm359_vm2, %v5892_v0  ;;  %v1857_v0 = vld [vmem:[#allocation3 + $0x18a] sm:$0xff] }
  0xc5   : > { %4941 = vmatprep.mubr.msk.bf16.mxu1 %vm359_vm2, %v5751_v15  ;;  %4977 = vmatprep.mubr.msk.bf16.mxu0 %vm359_vm2, %v5904_v17  ;;  %v2164_v17 = vld [vmem:[#allocation3 + $0x1a0] sm:$0xff] }
  0xcc   : > { %4942 = vmatmul.mubr.msk.bf16.gmra.mxu1 %vm359_vm2, %v5758_v22  ;;  %4978 = vmatmul.mubr.msk.bf16.gmra.mxu0 %vm359_vm2, %v5908_v19  ;;  %v3277_v19 = vld [vmem:[#allocation2 + $0x10] sm:$0xff] }
  0xcd   : > { %4945 = vmatprep.mubr.msk.bf16.mxu1 %vm359_vm2, %v5776_v34  ;;  %4981 = vmatprep.mubr.msk.bf16.mxu0 %vm359_vm2, %v5920_v41  ;;  %v2745_v41 = vld [vmem:[#allocation3 + $0x32] sm:$0xff] }
  0xce   : > { %3343 = vrot.lane.b32.xlu1 %v3277_v19, %s5500_s22  ;;  %v2445_v19 = vld [vmem:[#allocation3 + $0x79] sm:$0xff] }
  0xd2   : > { %3345 = vrot.lane.b32.xlu1 %v3278_v56, %s5500_s22 }
  0xd4   : > { %4946 = vmatmul.mubr.msk.bf16.gmra.mxu1 %vm359_vm2, %v5780_v36  ;;  %4982 = vmatmul.mubr.msk.bf16.gmra.mxu0 %vm359_vm2, %v5924_v43 }
  0xd5   : > { %4949 = vmatprep.mubr.msk.bf16.mxu1 %vm359_vm2, %v5798_v48  ;;  %4985 = vmatprep.mubr.msk.bf16.mxu0 %vm359_vm2, %v646_v3 }
  0xd6   : > { %3349 = vrot.lane.b32.xlu1 %v3280_v16, %s5500_s22  ;;  %v2754_v16 = vld [vmem:[#allocation3 + $0x9a] sm:$0xff] }
  0xdc   : > { %4950 = vmatmul.mubr.msk.bf16.gmra.mxu1 %vm359_vm2, %v5802_v50  ;;  %4986 = vmatmul.mubr.msk.bf16.gmra.mxu0 %vm359_vm2, %v647_v5  ;;  %v2442_v5 = vld [vmem:[#allocation3 + $0x51] sm:$0xff] }
  0xdd   : > { %4953 = vmatprep.mubr.msk.bf16.mxu1 %vm359_vm2, %v5814_v60  ;;  %4989 = vmatprep.mubr.msk.bf16.mxu0 %vm359_vm2, %v648_v24  ;;  %v2472_v27 = vpack.c.bf16 %v2442_v5, %v2441_v2  ;;  %v3285_v2 = vld [vmem:[#allocation2 + $0x50] sm:$0xff]  ;;  %v264_v5 = vld [vmem:[%s5560_s26 + $0x8] sm:$0xff] }
  0xe4   : > { %4954 = vmatmul.mubr.msk.bf16.gmra.mxu1 %vm359_vm2, %v6022_v30  ;;  %4990 = vmatmul.mubr.msk.bf16.gmra.mxu0 %vm359_vm2, %v6024_v44 }
  0xe5   : > { %4997 = vmatprep.mubr.msk.bf16.mxu1 %vm359_vm2, %v5824_v8  ;;  %5033 = vmatprep.mubr.msk.bf16.mxu0 %vm359_vm2, %v5756_v21 }
  0xec   : > { %4998 = vmatmul.mubr.msk.bf16.vlgmr.msra.gmra.mxu1 %vm359_vm2, %v5828_v11  ;;  %5034 = vmatmul.mubr.msk.bf16.vlgmr.msra.gmra.mxu0 %vm359_vm2, %v5774_v33 }
  0xed   : > { %5066 = vmatpush3.bf16.msra.mxu1 %v5199_v14  ;;  %5102 = vmatpush3.bf16.msra.mxu0 %v5200_v7  ;;  %v2750_v14 = vld [vmem:[#allocation3 + $0x6a] sm:$0xff] }
  0xee   : > { %5001 = vmatprep.mubr.msk.bf16.mxu1 %vm359_vm2, %v5856_v29  ;;  %5037 = vmatprep.mubr.msk.bf16.mxu0 %vm359_vm2, %v5778_v35  ;;  %v265_v7 = vld [vmem:[%s5560_s26 + $0x10] sm:$0xff] }
  0xef   : > { %5067 = vmatprep.subr.bf16.mxu1 %v5201_v46  ;;  %5103 = vmatprep.subr.bf16.mxu0 %v5202_v62 }
  0xf1   : > { %5068 = vmatpush3.bf16.msra.mxu1 %v5201_v46  ;;  %5104 = vmatpush3.bf16.msra.mxu0 %v5202_v62  ;;  %v2779_v46 = vpack.c.bf16 %v2750_v14, %v2749_v37  ;;  %v3282_v62 = vld [vmem:[#allocation2 + $0x38] sm:$0xff]  ;;  %v269_v37 = vld [vmem:[%s5560_s26 + $0x30] sm:$0xff] }
  0xf2   : > { %3353 = vrot.lane.b32.xlu1 %v3282_v62, %s5500_s22 }
  0xf4   : > { %5002 = vmatmul.mubr.msk.bf16.gmra.mxu1 %vm359_vm2, %v5860_v31  ;;  %5038 = vmatmul.mubr.msk.bf16.gmra.mxu0 %vm359_vm2, %v5796_v47  ;;  %v3275_v31 = vld [vmem:[#allocation2] sm:$0xff] }
  0xf5   : > { %5005 = vmatprep.mubr.msk.bf16.mxu1 %vm359_vm2, %v5874_v45  ;;  %5041 = vmatprep.mubr.msk.bf16.mxu0 %vm359_vm2, %v5800_v49 }
  0xf6   : > { %3339 = vrot.lane.b32.xlu0 %v3275_v31, %s5500_s22  ;;  %v3283_v31 = vld [vmem:[#allocation2 + $0x40] sm:$0xff] }
  0xfc   : > { %5006 = vmatmul.mubr.msk.bf16.gmra.mxu1 %vm359_vm2, %v5878_v51  ;;  %5042 = vmatmul.mubr.msk.bf16.gmra.mxu0 %vm359_vm2, %v5812_v59 }
  0xfd   : > { %5009 = vmatprep.mubr.msk.bf16.mxu1 %vm359_vm2, %v5890_v63  ;;  %5045 = vmatprep.mubr.msk.bf16.mxu0 %vm359_vm2, %v5741_v10 }
 0x104   : > { %5010 = vmatmul.mubr.msk.bf16.gmra.mxu1 %vm359_vm2, %v5894_v1  ;;  %5046 = vmatmul.mubr.msk.bf16.gmra.mxu0 %vm359_vm2, %v5751_v15  ;;  %v2163_v1 = vld [vmem:[#allocation3 + $0x198] sm:$0xff] }
 0x105   : > { %5013 = vmatprep.mubr.msk.bf16.mxu1 %vm359_vm2, %v5906_v18  ;;  %5049 = vmatprep.mubr.msk.bf16.mxu0 %vm359_vm2, %v5758_v22  ;;  %v2439_v18 = vld [vmem:[#allocation3 + $0x31] sm:$0xff]  ;;  %v2180_v53 = vpack.c.bf16 %v2164_v17, %v2163_v1 }
 0x106   : > { %v2471_v54 = vpack.c.bf16 %v2440_v40, %v2439_v18  ;;  %v266_v18 = vld [vmem:[%s5560_s26 + $0x18] sm:$0xff] }
 0x10c   : > { %v6072_v21 = vpop.f32.mrf.mxu0  ;;  %v6074_v33 = vpop.f32.mrf.mxu1  ;;  %5014 = vmatmul.mubr.msk.bf16.gmra.mxu1 %vm359_vm2, %v5910_v20  ;;  %5050 = vmatmul.mubr.msk.bf16.gmra.mxu0 %vm359_vm2, %v5776_v34  ;;  %v3276_v20 = vld [vmem:[#allocation2 + $0x8] sm:$0xff] }
 0x10d   : > { %5017 = vmatprep.mubr.msk.bf16.mxu1 %vm359_vm2, %v5922_v42  ;;  %5053 = vmatprep.mubr.msk.bf16.mxu0 %vm359_vm2, %v5780_v36  ;;  %v2746_v42 = vld [vmem:[#allocation3 + $0x3a] sm:$0xff]  ;;  %v571_v17 = vadd.f32 %v6072_v21, %v265_v7 }
 0x10e   : > { %v6084_v10 = vpop.f32.mrf.mxu0  ;;  %v6086_v15 = vpop.f32.mrf.mxu1  ;;  %3341 = vrot.lane.b32.xlu0 %v3276_v20, %s5500_s22  ;;  %v2777_v55 = vpack.c.bf16 %v2746_v42, %v2745_v41  ;;  %v2446_v20 = vld [vmem:[#allocation3 + $0x81] sm:$0xff]  ;;  %v2448_v21 = vld [vmem:[#allocation3 + $0x99] sm:$0xff] }
 0x10f   : > { %v2751_v42 = vld [vmem:[#allocation3 + $0x7a] sm:$0xff] }
 0x110   : > { %v6088_v22 = vpop.f32.mrf.mxu0  ;;  %v6090_v35 = vpop.f32.mrf.mxu1 }
 0x112   : > { %v6092_v47 = vpop.f32.mrf.mxu0  ;;  %v6094_v49 = vpop.f32.mrf.mxu1  ;;  %3347 = vrot.lane.b32.xlu0 %v3279_v57, %s5500_s22  ;;  %v3284_v57 = vld [vmem:[#allocation2 + $0x48] sm:$0xff] }
 0x113   : > { %3357 = vrot.lane.b32.xlu1 %v3284_v57, %s5500_s22  ;;  %v267_v57 = vld [vmem:[%s5560_s26 + $0x20] sm:$0xff] }
 0x114   : > { %v6096_v59 = vpop.f32.mrf.mxu0  ;;  %v6098_v34 = vpop.f32.mrf.mxu1  ;;  %5018 = vmatmul.mubr.msk.bf16.gmra.mxu1 %vm359_vm2, %v5926_v52  ;;  %5054 = vmatmul.mubr.msk.bf16.gmra.mxu0 %vm359_vm2, %v5798_v48  ;;  %v1856_v48 = vld [vmem:[#allocation3 + $0x182] sm:$0xff] }
 0x115   : > { %5021 = vmatprep.mubr.msk.bf16.mxu1 %vm359_vm2, %v5936_v4  ;;  %5057 = vmatprep.mubr.msk.bf16.mxu0 %vm359_vm2, %v5802_v50  ;;  %v6143_v52 = vpack.c.bf16 %v1857_v0, %v1856_v48  ;;  %v263_v48 = vld [vmem:[%s5560_s26] sm:$0xff] }
 0x116   : > { %v6108_v36 = vpop.f32.mrf.mxu0  ;;  %v6110_v8 = vpop.f32.mrf.mxu1  ;;  %3351 = vrot.lane.b32.xlu0 %v3281_v23, %s5500_s22 }
 0x118   : > { %v6112_v11 = vpop.f32.mrf.mxu0  ;;  %v6114_v29 = vpop.f32.mrf.mxu1 }
 0x11a   : > { %v6116_v45 = vpop.f32.mrf.mxu0  ;;  %v6118_v51 = vpop.f32.mrf.mxu1  ;;  %3355 = vrot.lane.b32.xlu0 %v3283_v31, %s5500_s22 }
 0x11c   : > { %v6121_v63 = vpop.f32.mrf.mxu0  ;;  %v6123_v50 = vpop.f32.mrf.mxu1  ;;  %5022 = vmatmul.mubr.msk.bf16.gmra.mxu1 %vm359_vm2, %v5938_v6  ;;  %5058 = vmatmul.mubr.msk.bf16.gmra.mxu0 %vm359_vm2, %v5814_v60  ;;  %v2747_v6 = vld [vmem:[#allocation3 + $0x4a] sm:$0xff] }
 0x11d   : > { %5025 = vmatprep.mubr.msk.bf16.mxu1 %vm359_vm2, %v5946_v25  ;;  %5061 = vmatprep.mubr.msk.bf16.mxu0 %vm359_vm2, %v6022_v30  ;;  %v2778_v28 = vpack.c.bf16 %v2748_v12, %v2747_v6  ;;  %v2473_v30 = vpack.c.bf16 %v2444_v32, %v2443_v13  ;;  %v2753_v13 = vld [vmem:[#allocation3 + $0x92] sm:$0xff] }
 0x11e   : > { %v6133_v38 = vpop.f32.mrf.mxu0  ;;  %v6135_v39 = vpop.f32.mrf.mxu1  ;;  %3359 = vrot.lane.b32.xlu0 %v3285_v2, %s5500_s22  ;;  %v2451_v2 = vld [vmem:[#allocation3 + $0xc1] sm:$0xff] }
 0x120   : > { %v6139_v60 = vpop.f32.mrf.mxu0  ;;  %v6141_v43 = vpop.f32.mrf.mxu1 }
 0x122   : > { %v6145_v58 = vpop.f32.mrf.mxu0  ;;  %v6147_v61 = vpop.f32.mrf.mxu1 }
 0x124   : > { %v6151_v3 = vpop.f32.mrf.mxu0  ;;  %v6153_v4 = vpop.f32.mrf.mxu1  ;;  %5026 = vmatmul.mubr.msk.bf16.gmra.mxu1 %vm359_vm2, %v6143_v52  ;;  %5062 = vmatmul.mubr.msk.bf16.gmra.mxu0 %vm359_vm2, %v2180_v53  ;;  %v2752_v53 = vld [vmem:[#allocation3 + $0x82] sm:$0xff] }
 0x125   : > { %5069 = vmatprep.mubr.msk.bf16.mxu1 %vm359_vm2, %v2471_v54  ;;  %5105 = vmatprep.mubr.msk.bf16.mxu0 %vm359_vm2, %v2777_v55  ;;  %v2447_v54 = vld [vmem:[#allocation3 + $0x91] sm:$0xff]  ;;  %v569_v55 = vadd.f32 %v6084_v10, %v263_v48  ;;  %v572_v10 = vadd.f32 %v6088_v22, %v266_v18  ;;  %v2781_v48 = vpack.c.bf16 %v2754_v16, %v2753_v13  ;;  %v3288_v13 = vld [vmem:[#allocation2 + $0x68] sm:$0xff] }
 0x126   : > { %v6160_v24 = vpop.f32.mrf.mxu0  ;;  %v6162_v25 = vpop.f32.mrf.mxu1  ;;  %v3289_v16 = vld [vmem:[#allocation2 + $0x70] sm:$0xff] }
 0x128   : > { %v6167_v9 = vpop.f32.mrf.mxu0  ;;  %v6169_v26 = vpop.f32.mrf.mxu1 }
 0x12a   : > { %v6172_v0 = vpop.f32.mrf.mxu0  ;;  %v6174_v1 = vpop.f32.mrf.mxu1 }
 0x12c   : > { %v4855_v40 = vpop.f32.mrf.mxu1  ;;  %v4891_v41 = vpop.f32.mrf.mxu0  ;;  %5070 = vmatmul.mubr.msk.bf16.vlgmr.msra.gmra.mxu1 %vm359_vm2, %v2472_v27  ;;  %5106 = vmatmul.mubr.msk.bf16.vlgmr.msra.gmra.mxu0 %vm359_vm2, %v2778_v28  ;;  %v2474_v27 = vpack.c.bf16 %v2446_v20, %v2445_v19  ;;  %v2780_v28 = vpack.c.bf16 %v2752_v53, %v2751_v42  ;;  %v270_v19 = vld [vmem:[%s5560_s26 + $0x38] sm:$0xff] }
 0x12d   : > { %v877_v56 = vadd.f32 %v4855_v40, %v571_v17  ;;  %5073 = vmatprep.mubr.msk.bf16.mxu1 %vm359_vm2, %v2473_v30  ;;  %5109 = vmatprep.mubr.msk.bf16.mxu0 %vm359_vm2, %v2779_v46  ;;  %v2475_v30 = vpack.c.bf16 %v2448_v21, %v2447_v54  ;;  %v570_v46 = vadd.f32 %v6092_v47, %v264_v5  ;;  %v3286_v17 = vld [vmem:[#allocation2 + $0x58] sm:$0xff]  ;;  %v3287_v40 = vld [vmem:[#allocation2 + $0x60] sm:$0xff]  ;;  %v2449_v47 = vld [vmem:[#allocation3 + $0xa9] sm:$0xff] }
 0x12e   : > { %v748_v6 = vpop.f32.mrf.mxu1  ;;  %v1054_v12 = vpop.f32.mrf.mxu0  ;;  %3361 = vrot.lane.b32.xlu1 %v3286_v17, %s5500_s22  ;;  %3363 = vrot.lane.b32.xlu0 %v3287_v40, %s5500_s22  ;;  %v2450_v53 = vld [vmem:[#allocation3 + $0xb1] sm:$0xff]  ;;  %v573_v5 = vadd.f32 %v6108_v36, %v267_v57  ;;  %v576_v36 = vadd.f32 %v6112_v11, %v270_v19 }
 0x12f   : > { %v6189_v23 = vadd.f32 %v4891_v41, %v877_v56  ;;  %v875_v32 = vadd.f32 %v748_v6, %v569_v55  ;;  %v575_v41 = vadd.f32 %v6096_v59, %v269_v37  ;;  %v2755_v56 = vld [vmem:[#allocation3 + $0xaa] sm:$0xff]  ;;  %v2756_v21 = vld [vmem:[#allocation3 + $0xb2] sm:$0xff] }
 0x130   : > { %v4856_v14 = vpop.f32.mrf.mxu1  ;;  %v4892_v7 = vpop.f32.mrf.mxu0  ;;  %v2782_v17 = vpack.c.bf16 %v2756_v21, %v2755_v56  ;;  %v2454_v21 = vld [vmem:[#allocation3 + $0xe1] sm:$0xff] }
 0x131   : > { %v6193_v62 = vadd.f32 %v1054_v12, %v875_v32  ;;  %v878_v31 = vadd.f32 %v4856_v14, %v572_v10  ;;  %v2452_v12 = vld [vmem:[#allocation3 + $0xc9] sm:$0xff] }
 0x132   : > { %v751_v22 = vpop.f32.mrf.mxu1  ;;  %v1057_v18 = vpop.f32.mrf.mxu0  ;;  %v268_v10 = vld [vmem:[%s5560_s26 + $0x28] sm:$0xff]  ;;  %3365 = vrot.lane.b32.xlu1 %v3288_v13, %s5500_s22  ;;  %3367 = vrot.lane.b32.xlu0 %v3289_v16, %s5500_s22  ;;  %v2477_v40 = vpack.c.bf16 %v2452_v12, %v2451_v2  ;;  %v271_v13 = vld [vmem:[%s5560_s26 + $0x40] sm:$0xff]  ;;  %v2455_v16 = vld [vmem:[#allocation3 + $0xf1] sm:$0xff] }
 0x133   : > { %v6200_v20 = vadd.f32 %v4892_v7, %v878_v31  ;;  %v876_v42 = vadd.f32 %v751_v22, %v570_v46  ;;  %v2757_v14 = vld [vmem:[#allocation3 + $0xc2] sm:$0xff]  ;;  %v2758_v7 = vld [vmem:[#allocation3 + $0xca] sm:$0xff]  ;;  %v574_v57 = vadd.f32 %v6116_v45, %v268_v10  ;;  %v2453_v45 = vld [vmem:[#allocation3 + $0xd9] sm:$0xff]  ;;  %v577_v10 = vadd.f32 %v6133_v38, %v271_v13 }
 0x134   : > { %v4859_v54 = vpop.f32.mrf.mxu1  ;;  %v4895_v55 = vpop.f32.mrf.mxu0  ;;  %5074 = vmatmul.mubr.msk.bf16.gmra.mxu1 %vm359_vm2, %v2474_v27  ;;  %5110 = vmatmul.mubr.msk.bf16.gmra.mxu0 %vm359_vm2, %v2780_v28  ;;  %v2760_v12 = vld [vmem:[#allocation3 + $0xe2] sm:$0xff] }
 0x135   : > { %v6205_v6 = vadd.f32 %v1057_v18, %v876_v42  ;;  %v881_v59 = vadd.f32 %v4859_v54, %v575_v41  ;;  %5077 = vmatprep.mubr.msk.bf16.mxu1 %vm359_vm2, %v2475_v30  ;;  %5113 = vmatprep.mubr.msk.bf16.mxu0 %vm359_vm2, %v2781_v48  ;;  %v273_v30 = vld [vmem:[%s5560_s26 + $0x50] sm:$0xff]  ;;  %v2476_v48 = vpack.c.bf16 %v2450_v53, %v2449_v47  ;;  %v3290_v42 = vld [vmem:[#allocation2 + $0x78] sm:$0xff]  ;;  %v3291_v54 = vld [vmem:[#allocation2 + $0x80] sm:$0xff] }
 0x136   : > { %v764_v32 = vpop.f32.mrf.mxu1  ;;  %v1070_v37 = vpop.f32.mrf.mxu0  ;;  %v2783_v41 = vpack.c.bf16 %v2758_v7, %v2757_v14  ;;  %3369 = vrot.lane.b32.xlu1 %v3290_v42, %s5500_s22  ;;  %3371 = vrot.lane.b32.xlu0 %v3291_v54, %s5500_s22  ;;  %v274_v47 = vld [vmem:[%s5560_s26 + $0x58] sm:$0xff]  ;;  %v3292_v14 = vld [vmem:[#allocation2 + $0x88] sm:$0xff]  ;;  %v3293_v7 = vld [vmem:[#allocation2 + $0x90] sm:$0xff] }
 0x137   : > { %v6213_v27 = vadd.f32 %v4895_v55, %v881_v59  ;;  %v879_v28 = vadd.f32 %v764_v32, %v573_v5  ;;  %v579_v55 = vadd.f32 %v6121_v63, %v273_v30  ;;  %v2759_v59 = vld [vmem:[#allocation3 + $0xda] sm:$0xff]  ;;  %v580_v38 = vadd.f32 %v6139_v60, %v274_v47 }
 0x138   : > { %v4860_v46 = vpop.f32.mrf.mxu1  ;;  %v4896_v31 = vpop.f32.mrf.mxu0  ;;  %v2784_v42 = vpack.c.bf16 %v2760_v12, %v2759_v59  ;;  %v2458_v12 = vld [vmem:[#allocation3 + $0x111] sm:$0xff] }
 0x139   : > { %v6217_v22 = vadd.f32 %v1070_v37, %v879_v28  ;;  %v882_v18 = vadd.f32 %v4860_v46, %v576_v36  ;;  %v2456_v37 = vld [vmem:[#allocation3 + $0xf9] sm:$0xff]  ;;  %v272_v36 = vld [vmem:[%s5560_s26 + $0x48] sm:$0xff] }
 0x13a   : > { %v767_v11 = vpop.f32.mrf.mxu1  ;;  %v1073_v19 = vpop.f32.mrf.mxu0  ;;  %v2761_v46 = vld [vmem:[#allocation3 + $0xf2] sm:$0xff]  ;;  %3373 = vrot.lane.b32.xlu1 %v3292_v14, %s5500_s22  ;;  %3375 = vrot.lane.b32.xlu0 %v3293_v7, %s5500_s22  ;;  %v2479_v54 = vpack.c.bf16 %v2456_v37, %v2455_v16  ;;  %v578_v13 = vadd.f32 %v6145_v58, %v272_v36  ;;  %v275_v14 = vld [vmem:[%s5560_s26 + $0x60] sm:$0xff]  ;;  %v2457_v58 = vld [vmem:[#allocation3 + $0x109] sm:$0xff] }
 0x13b   : > { %v6224_v53 = vadd.f32 %v4896_v31, %v882_v18  ;;  %v880_v56 = vadd.f32 %v767_v11, %v574_v57  ;;  %v2762_v31 = vld [vmem:[#allocation3 + $0xfa] sm:$0xff]  ;;  %v2764_v37 = vld [vmem:[#allocation3 + $0x112] sm:$0xff]  ;;  %v581_v36 = vadd.f32 %v6160_v24, %v275_v14 }
 0x13c   : > { %v4863_v2 = vpop.f32.mrf.mxu1  ;;  %v4899_v5 = vpop.f32.mrf.mxu0  ;;  %5078 = vmatmul.mubr.msk.bf16.gmra.mxu1 %vm359_vm2, %v2476_v48  ;;  %5114 = vmatmul.mubr.msk.bf16.gmra.mxu0 %vm359_vm2, %v2782_v17  ;;  %v2459_v7 = vld [vmem:[#allocation3 + $0x121] sm:$0xff] }
 0x13d   : > { %v6229_v32 = vadd.f32 %v1073_v19, %v880_v56  ;;  %v885_v63 = vadd.f32 %v4863_v2, %v579_v55  ;;  %5081 = vmatprep.mubr.msk.bf16.mxu1 %vm359_vm2, %v2477_v40  ;;  %5117 = vmatprep.mubr.msk.bf16.mxu0 %vm359_vm2, %v2783_v41  ;;  %v277_v40 = vld [vmem:[%s5560_s26 + $0x70] sm:$0xff]  ;;  %v2478_v41 = vpack.c.bf16 %v2454_v21, %v2453_v45  ;;  %v3294_v56 = vld [vmem:[#allocation2 + $0x98] sm:$0xff]  ;;  %v3295_v2 = vld [vmem:[#allocation2 + $0xa0] sm:$0xff] }
 0x13e   : > { %v780_v28 = vpop.f32.mrf.mxu1  ;;  %v1086_v30 = vpop.f32.mrf.mxu0  ;;  %v2785_v55 = vpack.c.bf16 %v2762_v31, %v2761_v46  ;;  %3377 = vrot.lane.b32.xlu1 %v3294_v56, %s5500_s22  ;;  %3379 = vrot.lane.b32.xlu0 %v3295_v2, %s5500_s22  ;;  %v278_v45 = vld [vmem:[%s5560_s26 + $0x78] sm:$0xff]  ;;  %v3296_v46 = vld [vmem:[#allocation2 + $0xa8] sm:$0xff]  ;;  %v3297_v31 = vld [vmem:[#allocation2 + $0xb0] sm:$0xff] }
 0x13f   : > { %v6237_v48 = vadd.f32 %v4899_v5, %v885_v63  ;;  %v883_v17 = vadd.f32 %v780_v28, %v577_v10  ;;  %v583_v5 = vadd.f32 %v6151_v3, %v277_v40  ;;  %v2763_v63 = vld [vmem:[#allocation3 + $0x10a] sm:$0xff]  ;;  %v584_v24 = vadd.f32 %v6167_v9, %v278_v45 }
 0x140   : > { %v4864_v57 = vpop.f32.mrf.mxu1  ;;  %v4900_v18 = vpop.f32.mrf.mxu0  ;;  %v2786_v56 = vpack.c.bf16 %v2764_v37, %v2763_v63  ;;  %v2462_v37 = vld [vmem:[#allocation3 + $0x141] sm:$0xff] }
 0x141   : > { %v6241_v11 = vadd.f32 %v1086_v30, %v883_v17  ;;  %v886_v19 = vadd.f32 %v4864_v57, %v580_v38  ;;  %v2460_v30 = vld [vmem:[#allocation3 + $0x129] sm:$0xff] }
 0x142   : > { %v783_v60 = vpop.f32.mrf.mxu1  ;;  %v1089_v47 = vpop.f32.mrf.mxu0  ;;  %v276_v38 = vld [vmem:[%s5560_s26 + $0x68] sm:$0xff]  ;;  %3381 = vrot.lane.b32.xlu1 %v3296_v46, %s5500_s22  ;;  %3383 = vrot.lane.b32.xlu0 %v3297_v31, %s5500_s22  ;;  %v2481_v2 = vpack.c.bf16 %v2460_v30, %v2459_v7  ;;  %v279_v46 = vld [vmem:[%s5560_s26 + $0x80] sm:$0xff]  ;;  %v2463_v31 = vld [vmem:[#allocation3 + $0x151] sm:$0xff] }
 0x143   : > { %v6248_v21 = vadd.f32 %v4900_v18, %v886_v19  ;;  %v884_v59 = vadd.f32 %v783_v60, %v578_v13  ;;  %v2765_v57 = vld [vmem:[#allocation3 + $0x122] sm:$0xff]  ;;  %v2766_v18 = vld [vmem:[#allocation3 + $0x12a] sm:$0xff]  ;;  %v582_v14 = vadd.f32 %v6172_v0, %v276_v38  ;;  %v2461_v0 = vld [vmem:[#allocation3 + $0x139] sm:$0xff]  ;;  %v585_v38 = vadd.f32 %v6086_v15, %v279_v46 }
 0x144   : > { %v4867_v16 = vpop.f32.mrf.mxu1  ;;  %v4903_v10 = vpop.f32.mrf.mxu0  ;;  %5082 = vmatmul.mubr.msk.bf16.gmra.mxu1 %vm359_vm2, %v2478_v41  ;;  %5118 = vmatmul.mubr.msk.bf16.gmra.mxu0 %vm359_vm2, %v2784_v42  ;;  %v2768_v30 = vld [vmem:[#allocation3 + $0x142] sm:$0xff] }
 0x145   : > { %v6253_v28 = vadd.f32 %v1089_v47, %v884_v59  ;;  %v889_v3 = vadd.f32 %v4867_v16, %v583_v5  ;;  %5085 = vmatprep.mubr.msk.bf16.mxu1 %vm359_vm2, %v2479_v54  ;;  %5121 = vmatprep.mubr.msk.bf16.mxu0 %vm359_vm2, %v2785_v55  ;;  %v281_v54 = vld [vmem:[%s5560_s26 + $0x90] sm:$0xff]  ;;  %v2480_v55 = vpack.c.bf16 %v2458_v12, %v2457_v58  ;;  %v3298_v59 = vld [vmem:[#allocation2 + $0xb8] sm:$0xff]  ;;  %v3299_v16 = vld [vmem:[#allocation2 + $0xc0] sm:$0xff] }
 0x146   : > { %v796_v17 = vpop.f32.mrf.mxu1  ;;  %v1102_v40 = vpop.f32.mrf.mxu0  ;;  %v2787_v5 = vpack.c.bf16 %v2766_v18, %v2765_v57  ;;  %3385 = vrot.lane.b32.xlu1 %v3298_v59, %s5500_s22  ;;  %3387 = vrot.lane.b32.xlu0 %v3299_v16, %s5500_s22  ;;  %v282_v58 = vld [vmem:[%s5560_s26 + $0x98] sm:$0xff]  ;;  %v3300_v57 = vld [vmem:[#allocation2 + $0xc8] sm:$0xff]  ;;  %v3301_v18 = vld [vmem:[#allocation2 + $0xd0] sm:$0xff] }
 0x147   : > { %v6261_v41 = vadd.f32 %v4903_v10, %v889_v3  ;;  %v887_v42 = vadd.f32 %v796_v17, %v581_v36  ;;  %v587_v10 = vadd.f32 %v6074_v33, %v281_v54  ;;  %v2767_v3 = vld [vmem:[#allocation3 + $0x13a] sm:$0xff]  ;;  %v588_v15 = vadd.f32 %v6090_v35, %v282_v58 }
 0x148   : > { %v4868_v13 = vpop.f32.mrf.mxu1  ;;  %v4904_v19 = vpop.f32.mrf.mxu0  ;;  %v2788_v59 = vpack.c.bf16 %v2768_v30, %v2767_v3 }
 0x149   : > { %v6265_v60 = vadd.f32 %v1102_v40, %v887_v42  ;;  %v890_v47 = vadd.f32 %v4868_v13, %v584_v24  ;;  %v2464_v40 = vld [vmem:[#allocation3 + $0x159] sm:$0xff]  ;;  %v280_v24 = vld [vmem:[%s5560_s26 + $0x88] sm:$0xff] }
 0x14a   : > { %v799_v9 = vpop.f32.mrf.mxu1  ;;  %v1105_v45 = vpop.f32.mrf.mxu0  ;;  %v2769_v13 = vld [vmem:[#allocation3 + $0x152] sm:$0xff]  ;;  %3389 = vrot.lane.b32.xlu1 %v3300_v57, %s5500_s22  ;;  %3391 = vrot.lane.b32.xlu0 %v3301_v18, %s5500_s22  ;;  %v2483_v16 = vpack.c.bf16 %v2464_v40, %v2463_v31  ;;  %v586_v46 = vadd.f32 %v6094_v49, %v280_v24  ;;  %v283_v57 = vld [vmem:[%s5560_s26 + $0xa0] sm:$0xff]  ;;  %v2465_v31 = vld [vmem:[#allocation3 + $0x169] sm:$0xff] }
 0x14b   : > { %v6272_v12 = vadd.f32 %v4904_v19, %v890_v47  ;;  %v888_v63 = vadd.f32 %v799_v9, %v582_v14  ;;  %v2770_v19 = vld [vmem:[#allocation3 + $0x15a] sm:$0xff]  ;;  %v589_v40 = vadd.f32 %v6110_v8, %v283_v57  ;;  %v2772_v24 = vld [vmem:[#allocation3 + $0x172] sm:$0xff] }
 0x14c   : > { %v4871_v7 = vpop.f32.mrf.mxu1  ;;  %v4907_v36 = vpop.f32.mrf.mxu0  ;;  %5086 = vmatmul.mubr.msk.bf16.gmra.mxu1 %vm359_vm2, %v2480_v55  ;;  %5122 = vmatmul.mubr.msk.bf16.gmra.mxu0 %vm359_vm2, %v2786_v56 }
 0x14d   : > { %v6277_v17 = vadd.f32 %v1105_v45, %v888_v63  ;;  %v893_v33 = vadd.f32 %v4871_v7, %v587_v10  ;;  %5089 = vmatprep.mubr.msk.bf16.mxu1 %vm359_vm2, %v2481_v2  ;;  %5125 = vmatprep.mubr.msk.bf16.mxu0 %vm359_vm2, %v2787_v5  ;;  %v285_v2 = vld [vmem:[%s5560_s26 + $0xb0] sm:$0xff]  ;;  %v2482_v5 = vpack.c.bf16 %v2462_v37, %v2461_v0  ;;  %v3302_v63 = vld [vmem:[#allocation2 + $0xd8] sm:$0xff]  ;;  %v3303_v7 = vld [vmem:[#allocation2 + $0xe0] sm:$0xff] }
 0x14e   : > { %v812_v42 = vpop.f32.mrf.mxu1  ;;  %v1118_v54 = vpop.f32.mrf.mxu0  ;;  %v2789_v10 = vpack.c.bf16 %v2770_v19, %v2769_v13  ;;  %3393 = vrot.lane.b32.xlu1 %v3302_v63, %s5500_s22  ;;  %3395 = vrot.lane.b32.xlu0 %v3303_v7, %s5500_s22  ;;  %v286_v0 = vld [vmem:[%s5560_s26 + $0xb8] sm:$0xff]  ;;  %v284_v13 = vld [vmem:[%s5560_s26 + $0xa8] sm:$0xff] }
 0x14f   : > { %v6285_v55 = vadd.f32 %v4907_v36, %v893_v33  ;;  %v891_v56 = vadd.f32 %v812_v42, %v585_v38  ;;  %v591_v36 = vadd.f32 %v6098_v34, %v285_v2  ;;  %v2466_v38 = vld [vmem:[#allocation3 + $0x171] sm:$0xff]  ;;  %v3304_v42 = vld [vmem:[#allocation2 + $0xe8] sm:$0xff]  ;;  %v592_v8 = vadd.f32 %v6114_v29, %v286_v0  ;;  %v287_v7 = vld [vmem:[%s5560_s26 + $0xc0] sm:$0xff] }
 0x150   : > { %v4872_v14 = vpop.f32.mrf.mxu1  ;;  %v4908_v47 = vpop.f32.mrf.mxu0  ;;  %v2771_v33 = vld [vmem:[#allocation3 + $0x16a] sm:$0xff]  ;;  %v3306_v63 = vld [vmem:[#allocation2 + $0xf8] sm:$0xff] }
 0x151   : > { %v6289_v9 = vadd.f32 %v1118_v54, %v891_v56  ;;  %v894_v45 = vadd.f32 %v4872_v14, %v588_v15  ;;  %v3305_v54 = vld [vmem:[#allocation2 + $0xf0] sm:$0xff]  ;;  %v290_v0 = vld [vmem:[%s5560_s26 + $0xd8] sm:$0xff] }
 0x152   : > { %v815_v35 = vpop.f32.mrf.mxu1  ;;  %v1121_v58 = vpop.f32.mrf.mxu0  ;;  %3397 = vrot.lane.b32.xlu1 %v3304_v42, %s5500_s22  ;;  %3399 = vrot.lane.b32.xlu0 %v3305_v54, %s5500_s22  ;;  %v289_v14 = vld [vmem:[%s5560_s26 + $0xd0] sm:$0xff]  ;;  %v596_v54 = vadd.f32 %v6141_v43, %v290_v0 }
 0x153   : > { %v6296_v37 = vadd.f32 %v4908_v47, %v894_v45  ;;  %v892_v3 = vadd.f32 %v815_v35, %v586_v46  ;;  %v590_v46 = vadd.f32 %v6118_v51, %v284_v13  ;;  %v595_v29 = vadd.f32 %v6123_v50, %v289_v14  ;;  %v2469_v51 = vld [vmem:[#allocation3 + $0x199] sm:$0xff]  ;;  %v2470_v50 = vld [vmem:[#allocation3 + $0x1a1] sm:$0xff] }
 0x154   : > { %v4875_v49 = vpop.f32.mrf.mxu1  ;;  %v4911_v30 = vpop.f32.mrf.mxu0  ;;  %5090 = vmatmul.mubr.msk.bf16.gmra.mxu1 %vm359_vm2, %v2482_v5  ;;  %5126 = vmatmul.mubr.msk.bf16.gmra.mxu0 %vm359_vm2, %v2788_v59  ;;  %v2484_v59 = vpack.c.bf16 %v2466_v38, %v2465_v31 }
 0x155   : > { %v6301_v18 = vadd.f32 %v1121_v58, %v892_v3  ;;  %v897_v34 = vadd.f32 %v4875_v49, %v591_v36  ;;  %5093 = vmatprep.mubr.msk.bf16.mxu1 %vm359_vm2, %v2483_v16  ;;  %5129 = vmatprep.mubr.msk.bf16.mxu0 %vm359_vm2, %v2789_v10  ;;  %v2790_v16 = vpack.c.bf16 %v2772_v24, %v2771_v33  ;;  %v2775_v33 = vld [vmem:[#allocation3 + $0x19a] sm:$0xff] }
 0x156   : > { %v828_v19 = vpop.f32.mrf.mxu1  ;;  %v1134_v15 = vpop.f32.mrf.mxu0  ;;  %3401 = vrot.lane.b32.xlu1 %v3306_v63, %s5500_s22  ;;  %v294_v63 = vld [vmem:[%s5560_s26 + $0xf8] sm:$0xff] }
 0x157   : > { %v6309_v56 = vadd.f32 %v4911_v30, %v897_v34  ;;  %v895_v2 = vadd.f32 %v828_v19, %v589_v40  ;;  %v593_v30 = vadd.f32 %v6135_v39, %v287_v7  ;;  %v2776_v40 = vld [vmem:[#allocation3 + $0x1a2] sm:$0xff]  ;;  %v293_v19 = vld [vmem:[%s5560_s26 + $0xf0] sm:$0xff] }
 0x158   : > { %v4876_v47 = vpop.f32.mrf.mxu1  ;;  %v4912_v5 = vpop.f32.mrf.mxu0  ;;  %v288_v34 = vld [vmem:[%s5560_s26 + $0xc8] sm:$0xff]  ;;  %v599_v43 = vadd.f32 %v6153_v4, %v293_v19  ;;  %v600_v4 = vadd.f32 %v6169_v26, %v294_v63 }
 0x159   : > { %v6313_v45 = vadd.f32 %v1134_v15, %v895_v2  ;;  %v898_v10 = vadd.f32 %v4876_v47, %v592_v8  ;;  %v2792_v2 = vpack.c.bf16 %v2776_v40, %v2775_v33  ;;  %v594_v14 = vadd.f32 %v6147_v61, %v288_v34 }
 0x15a   : > { %v831_v57 = vpop.f32.mrf.mxu1  ;;  %v1137_v35 = vpop.f32.mrf.mxu0 }
 0x15b   : > { %v6318_v58 = vadd.f32 %v4912_v5, %v898_v10  ;;  %v896_v36 = vadd.f32 %v831_v57, %v590_v46  ;;  %v291_v5 = vld [vmem:[%s5560_s26 + $0xe0] sm:$0xff] }
 0x15c   : > { %v4879_v3 = vpop.f32.mrf.mxu1  ;;  %v4915_v49 = vpop.f32.mrf.mxu0  ;;  %5094 = vmatmul.mubr.msk.bf16.gmra.mxu1 %vm359_vm2, %v2484_v59  ;;  %5130 = vmatmul.mubr.msk.bf16.gmra.mxu0 %vm359_vm2, %v2790_v16  ;;  %v597_v61 = vadd.f32 %v6162_v25, %v291_v5 }
 0x15d   : > { %v6324_v31 = vadd.f32 %v1137_v35, %v896_v36  ;;  %v901_v38 = vadd.f32 %v4879_v3, %v595_v29  ;;  %5097 = vmatprep.mubr.msk.bf16.mxu1 %vm359_vm2, %v6024_v44  ;;  %5133 = vmatprep.mubr.msk.bf16.mxu0 %vm359_vm2, %v6143_v52  ;;  %v2486_v44 = vpack.c.bf16 %v2470_v50, %v2469_v51  ;;  %v292_v36 = vld [vmem:[%s5560_s26 + $0xe8] sm:$0xff]  ;;  %s5501_s26 = smov 96  }
 0x15e   : > { %v844_v24 = vpop.f32.mrf.mxu1  ;;  %v1150_v42 = vpop.f32.mrf.mxu0  ;;  %v598_v50 = vadd.f32 %v6174_v1, %v292_v36 }
 0x15f   : > { %v6332_v13 = vadd.f32 %v4915_v49, %v901_v38  ;;  %v899_v39 = vadd.f32 %v844_v24, %v593_v30 }
 0x160   : > { %v4880_v15 = vpop.f32.mrf.mxu1  ;;  %v4916_v8 = vpop.f32.mrf.mxu0 }
 0x161   : > { %v6336_v52 = vadd.f32 %v1150_v42, %v899_v39  ;;  %v902_v47 = vadd.f32 %v4880_v15, %v596_v54 }
 0x162   : > { %v847_v59 = vpop.f32.mrf.mxu1  ;;  %v1153_v16 = vpop.f32.mrf.mxu0 }
 0x163   : > { %v6340_v46 = vadd.f32 %v4916_v8, %v902_v47  ;;  %v900_v10 = vadd.f32 %v847_v59, %v594_v14 }
 0x164   : > { %v4883_v7 = vpop.f32.mrf.mxu1  ;;  %v4919_v57 = vpop.f32.mrf.mxu0  ;;  %5098 = vmatmul.mubr.msk.bf16.gmra.mxu1 %vm359_vm2, %v2486_v44  ;;  %5134 = vmatmul.mubr.msk.bf16.gmra.mxu0 %vm359_vm2, %v2792_v2 }
 0x165   : > { %v6346_v35 = vadd.f32 %v1153_v16, %v900_v10  ;;  %v905_v29 = vadd.f32 %v4883_v7, %v599_v43 }
 0x166   : > { %v860_v0 = vpop.f32.mrf.mxu1  ;;  %v1166_v3 = vpop.f32.mrf.mxu0 }
 0x167   : > { %v6350_v49 = vadd.f32 %v4919_v57, %v905_v29  ;;  %v903_v51 = vadd.f32 %v860_v0, %v597_v61 }
 0x168   : > { %v4884_v30 = vpop.f32.mrf.mxu1  ;;  %v4920_v38 = vpop.f32.mrf.mxu0 }
 0x169   : > { %v6353_v33 = vadd.f32 %v1166_v3, %v903_v51  ;;  %v906_v40 = vadd.f32 %v4884_v30, %v600_v4 }
 0x16a   : > { %v863_v34 = vpop.f32.mrf.mxu1  ;;  %v1169_v25 = vpop.f32.mrf.mxu0 }
 0x16b   : > { %v6355_v24 = vadd.f32 %v4920_v38, %v906_v40  ;;  %v904_v42 = vadd.f32 %v863_v34, %v598_v50 }
 0x16c   : > { %v4927_v54 = vpop.f32.mrf.mxu1  ;;  %v4963_v39 = vpop.f32.mrf.mxu0 }
 0x16d   : > { %v6357_v19 = vadd.f32 %v1169_v25, %v904_v42  ;;  %v1490_v26 = vadd.f32 %v4927_v54, %v6189_v23 }
 0x16e   : > { %v1361_v15 = vpop.f32.mrf.mxu1  ;;  %v1667_v8 = vpop.f32.mrf.mxu0 }
 0x16f   : > { %v6360_v44 = vadd.f32 %v4963_v39, %v1490_v26  ;;  %v1488_v1 = vadd.f32 %v1361_v15, %v6193_v62 }
 0x170   : > { %v4928_v2 = vpop.f32.mrf.mxu1  ;;  %v4964_v14 = vpop.f32.mrf.mxu0 }
 0x171   : > { %v6363_v47 = vadd.f32 %v1667_v8, %v1488_v1  ;;  %v1491_v5 = vadd.f32 %v4928_v2, %v6200_v20 }
 0x172   : > { %v1364_v59 = vpop.f32.mrf.mxu1  ;;  %v1670_v16 = vpop.f32.mrf.mxu0 }
 0x173   : > { %v6366_v43 = vadd.f32 %v4964_v14, %v1491_v5  ;;  %v1489_v10 = vadd.f32 %v1364_v59, %v6205_v6 }
 0x174   : > { %v4931_v63 = vpop.f32.mrf.mxu1  ;;  %v4967_v23 = vpop.f32.mrf.mxu0 }
 0x175   : > { %v6369_v7 = vadd.f32 %v1670_v16, %v1489_v10  ;;  %v1494_v57 = vadd.f32 %v4931_v63, %v6213_v27 }
 0x176   : > { %v1377_v61 = vpop.f32.mrf.mxu1  ;;  %v1683_v62 = vpop.f32.mrf.mxu0 }
 0x177   : > { %v6372_v29 = vadd.f32 %v4967_v23, %v1494_v57  ;;  %v1492_v36 = vadd.f32 %v1377_v61, %v6217_v22 }
 0x178   : > { %v4932_v0 = vpop.f32.mrf.mxu1  ;;  %v4968_v20 = vpop.f32.mrf.mxu0 }
 0x179   : > { %v6375_v3 = vadd.f32 %v1683_v62, %v1492_v36  ;;  %v1495_v4 = vadd.f32 %v4932_v0, %v6224_v53 }
 0x17a   : > { %v1380_v51 = vpop.f32.mrf.mxu1  ;;  %v1686_v6 = vpop.f32.mrf.mxu0 }
 0x17b   : > { %v6378_v30 = vadd.f32 %v4968_v20, %v1495_v4  ;;  %v1493_v38 = vadd.f32 %v1380_v51, %v6229_v32 }
 0x17c   : > { %v4935_v50 = vpop.f32.mrf.mxu1  ;;  %v4971_v27 = vpop.f32.mrf.mxu0 }
 0x17d   : > { %v6381_v40 = vadd.f32 %v1686_v6, %v1493_v38  ;;  %v1498_v34 = vadd.f32 %v4935_v50, %v6237_v48 }
 0x17e   : > { %v1393_v25 = vpop.f32.mrf.mxu1  ;;  %v1699_v22 = vpop.f32.mrf.mxu0 }
 0x17f   : > { %v6384_v42 = vadd.f32 %v4971_v27, %v1498_v34  ;;  %v1496_v54 = vadd.f32 %v1393_v25, %v6241_v11 }
 0x180   : > { %v4936_v39 = vpop.f32.mrf.mxu1  ;;  %v4972_v53 = vpop.f32.mrf.mxu0 }
 0x181   : > { %v6387_v26 = vadd.f32 %v1699_v22, %v1496_v54  ;;  %v1499_v15 = vadd.f32 %v4936_v39, %v6248_v21 }
 0x182   : > { %v1396_v8 = vpop.f32.mrf.mxu1  ;;  %v1702_v32 = vpop.f32.mrf.mxu0 }
 0x183   : > { %v6390_v1 = vadd.f32 %v4972_v53, %v1499_v15  ;;  %v1497_v2 = vadd.f32 %v1396_v8, %v6253_v28 }
 0x184   : > { %v4939_v14 = vpop.f32.mrf.mxu1  ;;  %v4975_v48 = vpop.f32.mrf.mxu0 }
 0x185   : > { %v6393_v5 = vadd.f32 %v1702_v32, %v1497_v2  ;;  %v1502_v59 = vadd.f32 %v4939_v14, %v6261_v41 }
 0x186   : > { %v1409_v16 = vpop.f32.mrf.mxu1  ;;  %v1715_v11 = vpop.f32.mrf.mxu0 }
 0x187   : > { %v6396_v10 = vadd.f32 %v4975_v48, %v1502_v59  ;;  %v1500_v63 = vadd.f32 %v1409_v16, %v6265_v60 }
 0x188   : > { %v4940_v23 = vpop.f32.mrf.mxu1  ;;  %v4976_v21 = vpop.f32.mrf.mxu0 }
 0x189   : > { %v6399_v57 = vadd.f32 %v1715_v11, %v1500_v63  ;;  %v1503_v61 = vadd.f32 %v4940_v23, %v6272_v12 }
 0x18a   : > { %v1412_v62 = vpop.f32.mrf.mxu1  ;;  %v1718_v28 = vpop.f32.mrf.mxu0 }
 0x18b   : > { %v6402_v36 = vadd.f32 %v4976_v21, %v1503_v61  ;;  %v1501_v0 = vadd.f32 %v1412_v62, %v6277_v17 }
 0x18c   : > { %v4943_v20 = vpop.f32.mrf.mxu1  ;;  %v4979_v41 = vpop.f32.mrf.mxu0 }
 0x18d   : > { %v6405_v4 = vadd.f32 %v1718_v28, %v1501_v0  ;;  %v1506_v51 = vadd.f32 %v4943_v20, %v6285_v55 }
 0x18e   : > { %v1425_v6 = vpop.f32.mrf.mxu1  ;;  %v1731_v60 = vpop.f32.mrf.mxu0 }
 0x18f   : > { %v6408_v38 = vadd.f32 %v4979_v41, %v1506_v51  ;;  %v1504_v50 = vadd.f32 %v1425_v6, %v6289_v9 }
 0x190   : > { %v4944_v27 = vpop.f32.mrf.mxu1  ;;  %v4980_v12 = vpop.f32.mrf.mxu0 }
 0x191   : > { %v6411_v34 = vadd.f32 %v1731_v60, %v1504_v50  ;;  %v1507_v25 = vadd.f32 %v4944_v27, %v6296_v37 }
 0x192   : > { %v1428_v22 = vpop.f32.mrf.mxu1  ;;  %v1734_v17 = vpop.f32.mrf.mxu0 }
 0x193   : > { %v6414_v54 = vadd.f32 %v4980_v12, %v1507_v25  ;;  %v1505_v39 = vadd.f32 %v1428_v22, %v6301_v18 }
 0x194   : > { %v4947_v53 = vpop.f32.mrf.mxu1  ;;  %v4983_v55 = vpop.f32.mrf.mxu0 }
 0x195   : > { %v6417_v15 = vadd.f32 %v1734_v17, %v1505_v39  ;;  %v1510_v8 = vadd.f32 %v4947_v53, %v6309_v56 }
 0x196   : > { %v1441_v32 = vpop.f32.mrf.mxu1  ;;  %v1747_v9 = vpop.f32.mrf.mxu0 }
 0x197   : > { %v6420_v2 = vadd.f32 %v4983_v55, %v1510_v8  ;;  %v1508_v14 = vadd.f32 %v1441_v32, %v6313_v45 }
 0x198   : > { %v4948_v48 = vpop.f32.mrf.mxu1  ;;  %v4984_v37 = vpop.f32.mrf.mxu0 }
 0x199   : > { %v6423_v59 = vadd.f32 %v1747_v9, %v1508_v14  ;;  %v1511_v16 = vadd.f32 %v4948_v48, %v6318_v58 }
 0x19a   : > { %v1444_v11 = vpop.f32.mrf.mxu1  ;;  %v1750_v18 = vpop.f32.mrf.mxu0 }
 0x19b   : > { %v6426_v63 = vadd.f32 %v4984_v37, %v1511_v16  ;;  %v1509_v23 = vadd.f32 %v1444_v11, %v6324_v31 }
 0x19c   : > { %v4951_v21 = vpop.f32.mrf.mxu1  ;;  %v4987_v56 = vpop.f32.mrf.mxu0 }
 0x19d   : > { %v6429_v61 = vadd.f32 %v1750_v18, %v1509_v23  ;;  %v1514_v62 = vadd.f32 %v4951_v21, %v6332_v13 }
 0x19e   : > { %v1457_v28 = vpop.f32.mrf.mxu1  ;;  %v1763_v45 = vpop.f32.mrf.mxu0 }
 0x19f   : > { %v6432_v0 = vadd.f32 %v4987_v56, %v1514_v62  ;;  %v1512_v20 = vadd.f32 %v1457_v28, %v6336_v52 }
 0x1a0   : > { %v4952_v41 = vpop.f32.mrf.mxu1  ;;  %v4988_v58 = vpop.f32.mrf.mxu0 }
 0x1a1   : > { %v6435_v51 = vadd.f32 %v1763_v45, %v1512_v20  ;;  %v1515_v6 = vadd.f32 %v4952_v41, %v6340_v46 }
 0x1a2   : > { %v1460_v60 = vpop.f32.mrf.mxu1  ;;  %v1766_v31 = vpop.f32.mrf.mxu0 }
 0x1a3   : > { %v6438_v50 = vadd.f32 %v4988_v58, %v1515_v6  ;;  %v1513_v27 = vadd.f32 %v1460_v60, %v6346_v35 }
 0x1a4   : > { %v4955_v12 = vpop.f32.mrf.mxu1  ;;  %v4991_v13 = vpop.f32.mrf.mxu0 }
 0x1a5   : > { %v6441_v25 = vadd.f32 %v1766_v31, %v1513_v27  ;;  %v1518_v22 = vadd.f32 %v4955_v12, %v6350_v49 }
 0x1a6   : > { %v1473_v17 = vpop.f32.mrf.mxu1  ;;  %v1779_v52 = vpop.f32.mrf.mxu0 }
 0x1a7   : > { %v6444_v39 = vadd.f32 %v4991_v13, %v1518_v22  ;;  %v1516_v53 = vadd.f32 %v1473_v17, %v6353_v33 }
 0x1a8   : > { %v4956_v55 = vpop.f32.mrf.mxu1  ;;  %v4992_v46 = vpop.f32.mrf.mxu0 }
 0x1a9   : > { %v6447_v8 = vadd.f32 %v1779_v52, %v1516_v53  ;;  %v1519_v32 = vadd.f32 %v4956_v55, %v6355_v24 }
 0x1aa   : > { %v1476_v9 = vpop.f32.mrf.mxu1  ;;  %v1782_v35 = vpop.f32.mrf.mxu0 }
 0x1ab   : > { %v6450_v14 = vadd.f32 %v4992_v46, %v1519_v32  ;;  %v1517_v48 = vadd.f32 %v1476_v9, %v6357_v19 }
 0x1ac   : > { %v6453_v37 = vpop.f32.mrf.mxu1  ;;  %v6455_v49 = vpop.f32.mrf.mxu0 }
 0x1ad   : > { %v6457_v16 = vadd.f32 %v1782_v35, %v1517_v48 }
 0x1ae   : > { %v6459_v11 = vpop.f32.mrf.mxu1  ;;  %v6461_v33 = vpop.f32.mrf.mxu0 }
 0x1b0   : > { %v6463_v18 = vpop.f32.mrf.mxu1  ;;  %v6465_v23 = vpop.f32.mrf.mxu0 }
 0x1b2   : > { %v6467_v24 = vpop.f32.mrf.mxu1  ;;  %v6469_v21 = vpop.f32.mrf.mxu0 }
 0x1b4   : > { %v6471_v56 = vpop.f32.mrf.mxu1  ;;  %v6473_v19 = vpop.f32.mrf.mxu0 }
 0x1b6   : > { %v6475_v62 = vpop.f32.mrf.mxu1  ;;  %v6477_v28 = vpop.f32.mrf.mxu0 }
 0x1b8   : > { %v6479_v45 = vpop.f32.mrf.mxu1  ;;  %v6481_v20 = vpop.f32.mrf.mxu0 }
 0x1ba   : > { %v6483_v41 = vpop.f32.mrf.mxu1  ;;  %v6485_v58 = vpop.f32.mrf.mxu0 }
 0x1bb   : > { %7437 = vst [vmem:[#allocation4_spill] sm:$0xff] %v6485_v58 }
 0x1bc   : > { %v6487_v6 = vpop.f32.mrf.mxu1  ;;  %v6489_v60 = vpop.f32.mrf.mxu0 }
 0x1bd   : > { %7438 = vst [vmem:[#allocation5_spill] sm:$0xff] %v6489_v60 }
 0x1be   : > { %v2005_v31 = vpop.f32.mrf.mxu1  ;;  %v2312_v27 = vpop.f32.mrf.mxu0 }
 0x1bf   : > { %v2108_v12 = vadd.f32 %v2005_v31, %v6387_v26 }
 0x1c0   : > { %v5008_v13 = vpop.f32.mrf.mxu1  ;;  %v5044_v22 = vpop.f32.mrf.mxu0 }
 0x1c1   : > { %v6492_v17 = vadd.f32 %v2312_v27, %v2108_v12  ;;  %v2111_v52 = vadd.f32 %v5008_v13, %v6390_v1 }
 0x1c2   : > { %v2008_v53 = vpop.f32.mrf.mxu1  ;;  %v2315_v55 = vpop.f32.mrf.mxu0 }
 0x1c3   : > { %v6495_v46 = vadd.f32 %v5044_v22, %v2111_v52  ;;  %v2109_v32 = vadd.f32 %v2008_v53, %v6393_v5 }
 0x1c4   : > { %v5011_v9 = vpop.f32.mrf.mxu1  ;;  %v5047_v35 = vpop.f32.mrf.mxu0 }
 0x1c5   : > { %v6498_v48 = vadd.f32 %v2315_v55, %v2109_v32  ;;  %v2114_v60 = vadd.f32 %v5011_v9, %v6396_v10 }
 0x1c6   : > { %v2021_v58 = vpop.f32.mrf.mxu1  ;;  %v2328_v26 = vpop.f32.mrf.mxu0 }
 0x1c7   : > { %v6501_v31 = vadd.f32 %v5047_v35, %v2114_v60  ;;  %v2112_v27 = vadd.f32 %v2021_v58, %v6399_v57 }
 0x1c8   : > { %v5012_v12 = vpop.f32.mrf.mxu1  ;;  %v5048_v1 = vpop.f32.mrf.mxu0 }
 0x1c9   : > { %v6504_v13 = vadd.f32 %v2328_v26, %v2112_v27  ;;  %v2115_v22 = vadd.f32 %v5012_v12, %v6402_v36 }
 0x1ca   : > { %v2024_v52 = vpop.f32.mrf.mxu1  ;;  %v2331_v5 = vpop.f32.mrf.mxu0 }
 0x1cb   : > { %v6507_v53 = vadd.f32 %v5048_v1, %v2115_v22  ;;  %v2113_v55 = vadd.f32 %v2024_v52, %v6405_v4 }
 0x1cc   : > { %v5015_v32 = vpop.f32.mrf.mxu1  ;;  %v5051_v10 = vpop.f32.mrf.mxu0 }
 0x1cd   : > { %v6510_v9 = vadd.f32 %v2331_v5, %v2113_v55  ;;  %v2118_v60 = vadd.f32 %v5015_v32, %v6408_v38 }
 0x1ce   : > { %v2037_v35 = vpop.f32.mrf.mxu1  ;;  %v2344_v57 = vpop.f32.mrf.mxu0 }
 0x1cf   : > { %v6513_v58 = vadd.f32 %v5051_v10, %v2118_v60  ;;  %v2116_v26 = vadd.f32 %v2037_v35, %v6411_v34 }
 0x1d0   : > { %v5016_v27 = vpop.f32.mrf.mxu1  ;;  %v5052_v36 = vpop.f32.mrf.mxu0 }
 0x1d1   : > { %v6516_v12 = vadd.f32 %v2344_v57, %v2116_v26  ;;  %v2119_v1 = vadd.f32 %v5016_v27, %v6414_v54 }
 0x1d2   : > { %v2040_v22 = vpop.f32.mrf.mxu1  ;;  %v2347_v4 = vpop.f32.mrf.mxu0 }
 0x1d3   : > { %v6519_v52 = vadd.f32 %v5052_v36, %v2119_v1  ;;  %v2117_v5 = vadd.f32 %v2040_v22, %v6417_v15 }
 0x1d4   : > { %v5019_v55 = vpop.f32.mrf.mxu1  ;;  %v5055_v38 = vpop.f32.mrf.mxu0 }
 0x1d5   : > { %v6522_v32 = vadd.f32 %v2347_v4, %v2117_v5  ;;  %v2122_v10 = vadd.f32 %v5019_v55, %v6420_v2 }
 0x1d6   : > { %v2053_v60 = vpop.f32.mrf.mxu1  ;;  %v2360_v34 = vpop.f32.mrf.mxu0 }
 0x1d7   : > { %v6525_v35 = vadd.f32 %v5055_v38, %v2122_v10  ;;  %v2120_v57 = vadd.f32 %v2053_v60, %v6423_v59 }
 0x1d8   : > { %v5020_v26 = vpop.f32.mrf.mxu1  ;;  %v5056_v54 = vpop.f32.mrf.mxu0 }
 0x1d9   : > { %v6528_v27 = vadd.f32 %v2360_v34, %v2120_v57  ;;  %v2123_v36 = vadd.f32 %v5020_v26, %v6426_v63 }
 0x1da   : > { %v2056_v1 = vpop.f32.mrf.mxu1  ;;  %v2363_v15 = vpop.f32.mrf.mxu0 }
 0x1db   : > { %v6531_v22 = vadd.f32 %v5056_v54, %v2123_v36  ;;  %v2121_v4 = vadd.f32 %v2056_v1, %v6429_v61 }
 0x1dc   : > { %v5023_v5 = vpop.f32.mrf.mxu1  ;;  %v5059_v2 = vpop.f32.mrf.mxu0 }
 0x1dd   : > { %v6534_v55 = vadd.f32 %v2363_v15, %v2121_v4  ;;  %v2126_v38 = vadd.f32 %v5023_v5, %v6432_v0 }
 0x1de   : > { %v2069_v10 = vpop.f32.mrf.mxu1  ;;  %v2376_v59 = vpop.f32.mrf.mxu0 }
 0x1df   : > { %v6537_v60 = vadd.f32 %v5059_v2, %v2126_v38  ;;  %v2124_v34 = vadd.f32 %v2069_v10, %v6435_v51  ;;  %v2102_v10 = vadd.f32 %v6453_v37, %v6360_v44  ;;  %v2103_v44 = vadd.f32 %v6463_v18, %v6366_v43 }
 0x1e0   : > { %v5024_v57 = vpop.f32.mrf.mxu1  ;;  %v5060_v63 = vpop.f32.mrf.mxu0  ;;  %v2106_v43 = vadd.f32 %v6471_v56, %v6372_v29  ;;  %v2107_v29 = vadd.f32 %v6479_v45, %v6378_v30  ;;  %v2110_v45 = vadd.f32 %v6487_v6, %v6384_v42 }
 0x1e1   : > { %v6540_v26 = vadd.f32 %v2376_v59, %v2124_v34  ;;  %v2127_v54 = vadd.f32 %v5024_v57, %v6438_v50 }
 0x1e2   : > { %v2072_v36 = vpop.f32.mrf.mxu1  ;;  %v2379_v61 = vpop.f32.mrf.mxu0  ;;  %v2414_v30 = vadd.f32 %v6481_v20, %v2107_v29  ;;  %v7440_v20 = vld [vmem:[#allocation5_spill] sm:$0xff] }
 0x1e3   : > { %v6543_v1 = vadd.f32 %v5060_v63, %v2127_v54  ;;  %v2125_v15 = vadd.f32 %v2072_v36, %v6441_v25  ;;  %v2100_v25 = vadd.f32 %v6459_v11, %v6363_v47  ;;  %v2101_v47 = vadd.f32 %v6467_v24, %v6369_v7 }
 0x1e4   : > { %v5027_v4 = vpop.f32.mrf.mxu1  ;;  %v5063_v0 = vpop.f32.mrf.mxu0 }
 0x1e5   : > { %v6546_v5 = vadd.f32 %v2379_v61, %v2125_v15  ;;  %v2130_v2 = vadd.f32 %v5027_v4, %v6444_v39  ;;  %v2409_v61 = vadd.f32 %v6455_v49, %v2102_v10  ;;  %v2410_v49 = vadd.f32 %v6465_v23, %v2103_v44 }
 0x1e6   : > { %v2085_v38 = vpop.f32.mrf.mxu1  ;;  %v2392_v51 = vpop.f32.mrf.mxu0  ;;  %v2408_v7 = vadd.f32 %v6469_v21, %v2101_v47  ;;  %v2105_v21 = vadd.f32 %v6483_v41, %v6381_v40  ;;  %v7439_v40 = vld [vmem:[#allocation4_spill] sm:$0xff] }
 0x1e7   : > { %v6551_v59 = vadd.f32 %v5063_v0, %v2130_v2  ;;  %v2128_v50 = vadd.f32 %v2085_v38, %v6447_v8  ;;  %v2407_v0 = vadd.f32 %v6461_v33, %v2100_v25 }
 0x1e8   : > { %v5028_v34 = vpop.f32.mrf.mxu1  ;;  %v5064_v57 = vpop.f32.mrf.mxu0  ;;  %v2412_v41 = vadd.f32 %v7439_v40, %v2105_v21 }
 0x1e9   : > { %v6556_v63 = vadd.f32 %v2392_v51, %v2128_v50  ;;  %v2131_v54 = vadd.f32 %v5028_v34, %v6450_v14  ;;  %v2104_v51 = vadd.f32 %v6475_v62, %v6375_v3 }
 0x1ea   : > { %v2088_v36 = vpop.f32.mrf.mxu1  ;;  %v2395_v39 = vpop.f32.mrf.mxu0 }
 0x1eb   : > { %v6562_v37 = vadd.f32 %v5064_v57, %v2131_v54  ;;  %v2129_v8 = vadd.f32 %v2088_v36, %v6457_v16  ;;  %v2413_v57 = vadd.f32 %v6473_v19, %v2106_v43  ;;  %v2411_v3 = vadd.f32 %v6477_v28, %v2104_v51 }
 0x1ec   : > { %v5071_v15 = vpop.f32.mrf.mxu1  ;;  %v5107_v4 = vpop.f32.mrf.mxu0 }
 0x1ed   : > { %v6568_v11 = vadd.f32 %v2395_v39, %v2129_v8  ;;  %v2715_v14 = vadd.f32 %v5071_v15, %v2409_v61 }
 0x1ee   : > { %v2586_v2 = vpop.f32.mrf.mxu1  ;;  %v2892_v38 = vpop.f32.mrf.mxu0 }
 0x1ef   : > { %v6573_v18 = vadd.f32 %v5107_v4, %v2715_v14  ;;  %v2713_v16 = vadd.f32 %v2586_v2, %v2407_v0  ;;  %v2417_v2 = vadd.f32 %v7440_v20, %v2110_v45 }
 0x1f0   : > { %v5072_v33 = vpop.f32.mrf.mxu1  ;;  %v5108_v10 = vpop.f32.mrf.mxu0 }
 0x1f1   : > { %5203 = vtanh.f32 %v6573_v18  ;;  %v6579_v24 = vadd.f32 %v2892_v38, %v2713_v16  ;;  %v2716_v50 = vadd.f32 %v5072_v33, %v2410_v49 }
 0x1f2   : > { %v2589_v34 = vpop.f32.mrf.mxu1  ;;  %v2895_v23 = vpop.f32.mrf.mxu0 }
 0x1f3   : > { %v6584_v56 = vadd.f32 %v5108_v10, %v2716_v50  ;;  %v2714_v25 = vadd.f32 %v2589_v34, %v2408_v7  ;;  %5205 = vtanh.f32 %v6579_v24 }
 0x1f4   : > { %v5075_v62 = vpop.f32.mrf.mxu1  ;;  %v5111_v54 = vpop.f32.mrf.mxu0 }
 0x1f5   : > { %v6590_v36 = vadd.f32 %v2895_v23, %v2714_v25  ;;  %v2719_v39 = vadd.f32 %v5075_v62, %v2413_v57  ;;  %5207 = vtanh.f32 %v6584_v56 }
 0x1f6   : > { %v2602_v19 = vpop.f32.mrf.mxu1  ;;  %v2908_v61 = vpop.f32.mrf.mxu0 }
 0x1f7   : > { %v6596_v28 = vadd.f32 %v5111_v54, %v2719_v39  ;;  %v2717_v44 = vadd.f32 %v2602_v19, %v2411_v3  ;;  %5209 = vtanh.f32 %v6590_v36 }
 0x1f8   : > { %v5076_v8 = vpop.f32.mrf.mxu1  ;;  %v5112_v15 = vpop.f32.mrf.mxu0 }
 0x1f9   : > { %v6600_v4 = vadd.f32 %v2908_v61, %v2717_v44  ;;  %v2720_v0 = vadd.f32 %v5076_v8, %v2414_v30  ;;  %5211 = vtanh.f32 %v6596_v28 }
 0x1fa   : > { %v2605_v47 = vpop.f32.mrf.mxu1  ;;  %v2911_v14 = vpop.f32.mrf.mxu0 }
 0x1fb   : > { %v6604_v38 = vadd.f32 %v5112_v15, %v2720_v0  ;;  %v2718_v42 = vadd.f32 %v2605_v47, %v2412_v41  ;;  %5213 = vtanh.f32 %v6600_v4 }
 0x1fc   : > { %v5079_v6 = vpop.f32.mrf.mxu1  ;;  %v5115_v49 = vpop.f32.mrf.mxu0 }
 0x1fd   : > { %v6607_v43 = vadd.f32 %v2911_v14, %v2718_v42  ;;  %v2723_v16 = vadd.f32 %v5079_v6, %v2417_v2  ;;  %5215 = vtanh.f32 %v6604_v38 }
 0x1fe   : > { %v5204_v51 = vpop.eup %5203  ;;  %v2618_v33 = vpop.f32.mrf.mxu1 }
 0x1ff   : > { %v2924_v10 = vpop.f32.mrf.mxu0  ;;  %v6610_v7 = vadd.f32 %v5115_v49, %v2723_v16  ;;  %3503 = vrot.lane.b32.xlu0 %v5204_v51, %s5500_s22  ;;  %v2721_v50 = vadd.f32 %v2618_v33, %v6492_v17  ;;  %5217 = vtanh.f32 %v6607_v43 }
 0x200   : > { %v5080_v34 = vpop.f32.mrf.mxu1  ;;  %v5206_v57 = vpop.eup %5205 }
 0x201   : > { %v5116_v23 = vpop.f32.mrf.mxu0  ;;  %5219 = vtanh.f32 %v6610_v7  ;;  %v2724_v62 = vadd.f32 %v5080_v34, %v6495_v46  ;;  %v6618_v54 = vadd.f32 %v2924_v10, %v2721_v50 }
 0x202   : > { %v2621_v29 = vpop.f32.mrf.mxu1  ;;  %v5208_v3 = vpop.eup %5207 }
 0x203   : > { %v2927_v25 = vpop.f32.mrf.mxu0  ;;  %3499 = vrot.lane.b32.xlu0 %v5206_v57, %s5500_s22  ;;  %3505 = vrot.lane.b32.xlu1 %v5208_v3, %s5500_s22  ;;  %5221 = vtanh.f32 %v6618_v54  ;;  %v2722_v45 = vadd.f32 %v2621_v29, %v6498_v48  ;;  %v6623_v44 = vadd.f32 %v5116_v23, %v2724_v62  ;;  %v6643_v23 = vpop.permute.xlu0 %3339 }
 0x204   : > { %v5083_v21 = vpop.f32.mrf.mxu1  ;;  %v5210_v39 = vpop.eup %5209 }
 0x205   : > { %v5119_v17 = vpop.f32.mrf.mxu0  ;;  %v2727_v47 = vadd.f32 %v5083_v21, %v6501_v31  ;;  %5223 = vtanh.f32 %v6623_v44  ;;  %v6629_v14 = vadd.f32 %v2927_v25, %v2722_v45  ;;  %v6651_v62 = vpop.permute.xlu1 %3343 }
 0x206   : > { %v2634_v19 = vpop.f32.mrf.mxu1  ;;  %v5212_v30 = vpop.eup %5211 }
 0x207   : > { %v2940_v61 = vpop.f32.mrf.mxu0  ;;  %3501 = vrot.lane.b32.xlu1 %v5210_v39, %s5500_s22  ;;  %3511 = vrot.lane.b32.xlu0 %v5212_v30, %s5500_s22  ;;  %v2725_v16 = vadd.f32 %v2634_v19, %v6504_v13  ;;  %v6634_v51 = vadd.f32 %v5119_v17, %v2727_v47  ;;  %5225 = vtanh.f32 %v6629_v14  ;;  %v6656_v39 = vpop.permute.xlu0 %3341 }
 0x208   : > { %v5084_v46 = vpop.f32.mrf.mxu1  ;;  %v5214_v15 = vpop.eup %5213 }
 0x209   : > { %v5120_v8 = vpop.f32.mrf.mxu0  ;;  %v2728_v33 = vadd.f32 %v5084_v46, %v6507_v53  ;;  %5227 = vtanh.f32 %v6634_v51  ;;  %v6641_v34 = vadd.f32 %v2940_v61, %v2725_v16  ;;  %v6664_v46 = vpop.permute.xlu1 %3345 }
 0x20a   : > { %v2637_v40 = vpop.f32.mrf.mxu1  ;;  %v5216_v0 = vpop.eup %5215 }
 0x20b   : > { %v2943_v41 = vpop.f32.mrf.mxu0  ;;  %3513 = vrot.lane.b32.xlu1 %v5216_v0, %s5500_s22  ;;  %3507 = vrot.lane.b32.xlu0 %v5214_v15, %s5500_s22  ;;  %v2726_v57 = vadd.f32 %v2637_v40, %v6510_v9  ;;  %v6646_v29 = vadd.f32 %v5120_v8, %v2728_v33  ;;  %5229 = vtanh.f32 %v6641_v34 }
 0x20c   : > { %v5087_v48 = vpop.f32.mrf.mxu1  ;;  %v5218_v2 = vpop.eup %5217 }
 0x20d   : > { %v5123_v20 = vpop.f32.mrf.mxu0  ;;  %v2731_v53 = vadd.f32 %v5087_v48, %v6513_v58  ;;  %5231 = vtanh.f32 %v6646_v29  ;;  %v6654_v17 = vadd.f32 %v2943_v41, %v2726_v57  ;;  %v6670_v41 = vpop.permute.xlu0 %3347 }
 0x20e   : > { %v2650_v42 = vpop.f32.mrf.mxu1  ;;  %v5220_v49 = vpop.eup %5219 }
 0x20f   : > { %v2956_v6 = vpop.f32.mrf.mxu0  ;;  %3509 = vrot.lane.b32.xlu1 %v5218_v2, %s5500_s22  ;;  %3519 = vrot.lane.b32.xlu0 %v5220_v49, %s5500_s22  ;;  %v2729_v61 = vadd.f32 %v2650_v42, %v6516_v12  ;;  %v6660_v30 = vadd.f32 %v5123_v20, %v2731_v53  ;;  %5233 = vtanh.f32 %v6654_v17  ;;  %v6678_v2 = vpop.permute.xlu1 %3349 }
 0x210   : > { %v5088_v31 = vpop.f32.mrf.mxu1  ;;  %v5222_v13 = vpop.eup %5221 }
 0x211   : > { %v5124_v50 = vpop.f32.mrf.mxu0  ;;  %v2732_v45 = vadd.f32 %v5088_v31, %v6519_v52  ;;  %5235 = vtanh.f32 %v6660_v30  ;;  %v6668_v40 = vadd.f32 %v2956_v6, %v2729_v61  ;;  %v6683_v49 = vpop.permute.xlu0 %3351 }
 0x212   : > { %v2653_v10 = vpop.f32.mrf.mxu1  ;;  %v5224_v21 = vpop.eup %5223 }
 0x213   : > { %3515 = vrot.lane.b32.xlu0 %v5222_v13, %s5500_s22  ;;  %v2959_v3 = vpop.f32.mrf.mxu0  ;;  %3521 = vrot.lane.b32.xlu1 %v5224_v21, %s5500_s22  ;;  %v2730_v0 = vadd.f32 %v2653_v10, %v6522_v32  ;;  %v6673_v47 = vadd.f32 %v5124_v50, %v2732_v45  ;;  %5237 = vtanh.f32 %v6668_v40  ;;  %v6692_v50 = vpop.permute.xlu1 %3353 }
 0x214   : > { %v5091_v25 = vpop.f32.mrf.mxu1  ;;  %v5226_v58 = vpop.eup %5225 }
 0x215   : > { %v5127_v19 = vpop.f32.mrf.mxu0  ;;  %v2735_v52 = vadd.f32 %v5091_v25, %v6525_v35  ;;  %5239 = vtanh.f32 %v6673_v47  ;;  %v6681_v6 = vadd.f32 %v2959_v3, %v2730_v0 }
 0x216   : > { %v2666_v9 = vpop.f32.mrf.mxu1  ;;  %v5228_v12 = vpop.eup %5227 }
 0x217   : > { %3517 = vrot.lane.b32.xlu1 %v5226_v58, %s5500_s22  ;;  %v2972_v15 = vpop.f32.mrf.mxu0  ;;  %3527 = vrot.lane.b32.xlu0 %v5228_v12, %s5500_s22  ;;  %v2733_v16 = vadd.f32 %v2666_v9, %v6528_v27  ;;  %v6687_v31 = vadd.f32 %v5127_v19, %v2735_v52  ;;  %5241 = vtanh.f32 %v6681_v6  ;;  %v6697_v27 = vpop.permute.xlu0 %3355 }
 0x218   : > { %v5092_v8 = vpop.f32.mrf.mxu1  ;;  %v5230_v42 = vpop.eup %5229 }
 0x219   : > { %v5128_v20 = vpop.f32.mrf.mxu0  ;;  %v2736_v10 = vadd.f32 %v5092_v8, %v6531_v22  ;;  %5243 = vtanh.f32 %v6687_v31  ;;  %v6695_v57 = vadd.f32 %v2972_v15, %v2733_v16  ;;  %v6706_v45 = vpop.permute.xlu1 %3357 }
 0x21a   : > { %v2669_v48 = vpop.f32.mrf.mxu1  ;;  %v5232_v32 = vpop.eup %5231 }
 0x21b   : > { %3523 = vrot.lane.b32.xlu0 %v5230_v42, %s5500_s22  ;;  %v2975_v33 = vpop.f32.mrf.mxu0  ;;  %3529 = vrot.lane.b32.xlu1 %v5232_v32, %s5500_s22  ;;  %v2734_v21 = vadd.f32 %v2669_v48, %v6534_v55  ;;  %v6701_v9 = vadd.f32 %v5128_v20, %v2736_v10  ;;  %5245 = vtanh.f32 %v6695_v57  ;;  %v6711_v12 = vpop.permute.xlu0 %3359 }
 0x21c   : > { %v5095_v35 = vpop.f32.mrf.mxu1  ;;  %v5234_v13 = vpop.eup %5233 }
 0x21d   : > { %v5131_v3 = vpop.f32.mrf.mxu0  ;;  %v2739_v61 = vadd.f32 %v5095_v35, %v6537_v60  ;;  %5247 = vtanh.f32 %v6701_v9  ;;  %v6709_v15 = vadd.f32 %v2975_v33, %v2734_v21  ;;  %v6720_v42 = vpop.permute.xlu1 %3361 }
 0x21e   : > { %v2682_v25 = vpop.f32.mrf.mxu1  ;;  %v5236_v53 = vpop.eup %5235 }
 0x21f   : > { %3525 = vrot.lane.b32.xlu1 %v5234_v13, %s5500_s22  ;;  %3535 = vrot.lane.b32.xlu0 %v5236_v53, %s5500_s22  ;;  %v2988_v19 = vpop.f32.mrf.mxu0  ;;  %v2737_v52 = vadd.f32 %v2682_v25, %v6540_v26  ;;  %v6716_v48 = vadd.f32 %v5131_v3, %v2739_v61  ;;  %5249 = vtanh.f32 %v6709_v15  ;;  %v6726_v10 = vpop.permute.xlu0 %3363 }
 0x220   : > { %v5096_v22 = vpop.f32.mrf.mxu1  ;;  %v5238_v58 = vpop.eup %5237 }
 0x221   : > { %v5132_v0 = vpop.f32.mrf.mxu0  ;;  %v2740_v20 = vadd.f32 %v5096_v22, %v6543_v1  ;;  %5251 = vtanh.f32 %v6716_v48  ;;  %v6724_v33 = vadd.f32 %v2988_v19, %v2737_v52  ;;  %v6734_v21 = vpop.permute.xlu1 %3365 }
 0x222   : > { %v5240_v8 = vpop.eup %5239  ;;  %v2685_v55 = vpop.f32.mrf.mxu1 }
 0x223   : > { %3531 = vrot.lane.b32.xlu0 %v5238_v58, %s5500_s22  ;;  %3537 = vrot.lane.b32.xlu1 %v5240_v8, %s5500_s22  ;;  %v2991_v16 = vpop.f32.mrf.mxu0  ;;  %v2738_v26 = vadd.f32 %v2685_v55, %v6546_v5  ;;  %v6730_v13 = vadd.f32 %v5132_v0, %v2740_v20  ;;  %5253 = vtanh.f32 %v6724_v33  ;;  %v6740_v19 = vpop.permute.xlu0 %3367 }
 0x224   : > { %v5242_v60 = vpop.eup %5241  ;;  %v5099_v32 = vpop.f32.mrf.mxu1 }
 0x225   : > { %v5135_v25 = vpop.f32.mrf.mxu0  ;;  %v2743_v53 = vadd.f32 %v5099_v32, %v6551_v59  ;;  %5255 = vtanh.f32 %v6730_v13  ;;  %v6738_v22 = vadd.f32 %v2991_v16, %v2738_v26  ;;  %v6748_v0 = vpop.permute.xlu1 %3369 }
 0x226   : > { %v5244_v35 = vpop.eup %5243  ;;  %v2698_v1 = vpop.f32.mrf.mxu1 }
 0x227   : > { %3533 = vrot.lane.b32.xlu1 %v5242_v60, %s5500_s22  ;;  %3543 = vrot.lane.b32.xlu0 %v5244_v35, %s5500_s22  ;;  %v3004_v58 = vpop.f32.mrf.mxu0  ;;  %v2741_v8 = vadd.f32 %v2698_v1, %v6556_v63  ;;  %v6743_v55 = vadd.f32 %v5135_v25, %v2743_v53  ;;  %5257 = vtanh.f32 %v6738_v22  ;;  %v6753_v16 = vpop.permute.xlu0 %3371 }
 0x228   : > { %v5246_v3 = vpop.eup %5245  ;;  %v5100_v61 = vpop.f32.mrf.mxu1 }
 0x229   : > { %v2744_v59 = vadd.f32 %v5100_v61, %v6562_v37  ;;  %v5136_v20 = vpop.f32.mrf.mxu0  ;;  %5259 = vtanh.f32 %v6743_v55  ;;  %v6751_v32 = vadd.f32 %v3004_v58, %v2741_v8  ;;  %v6761_v25 = vpop.permute.xlu1 %3373 }
 0x22a   : > { %v5248_v5 = vpop.eup %5247  ;;  %v2701_v60 = vpop.f32.mrf.mxu1 }
 0x22b   : > { %3539 = vrot.lane.b32.xlu0 %v5246_v3, %s5500_s22  ;;  %3545 = vrot.lane.b32.xlu1 %v5248_v5, %s5500_s22  ;;  %v2742_v35 = vadd.f32 %v2701_v60, %v6568_v11  ;;  %v6757_v26 = vadd.f32 %v5136_v20, %v2744_v59  ;;  %v3007_v37 = vpop.f32.mrf.mxu0  ;;  %5261 = vtanh.f32 %v6751_v32  ;;  %v6766_v53 = vpop.permute.xlu0 %3375  ;;  %v4617_v11 = vmul.f32 -1.442695, %v6573_v18 }
 0x22c   : > { %v5250_v52 = vpop.eup %5249  ;;  %v4618_v60 = vmul.f32 -1.442695, %v6584_v56  ;;  %v4616_v18 = vmul.f32 -1.442695, %v6590_v36  ;;  %v4622_v56 = vmul.f32 -1.442695, %v6604_v38 }
 0x22d   : > { %5263 = vtanh.f32 %v6757_v26  ;;  %v6764_v3 = vadd.f32 %v3007_v37, %v2742_v35  ;;  %v6772_v58 = vpop.permute.xlu1 %3377  ;;  %v4621_v35 = vmul.f32 -1.442695, %v6596_v28  ;;  %v4620_v28 = vmul.f32 -1.442695, %v6607_v43 }
 0x22e   : > { %v5252_v63 = vpop.eup %5251 }
 0x22f   : > { %3541 = vrot.lane.b32.xlu1 %v5250_v52, %s5500_s22  ;;  %3551 = vrot.lane.b32.xlu0 %v5252_v63, %s5500_s22  ;;  %5265 = vtanh.f32 %v6764_v3  ;;  %v6774_v8 = vpop.permute.xlu0 %3379  ;;  %v4615_v52 = vmul.f32 -1.442695, %v6579_v24  ;;  %v4619_v24 = vmul.f32 -1.442695, %v6600_v4 }
 0x230   : > { %v5254_v1 = vpop.eup %5253  ;;  %5267 = vpow2.f32 %v4617_v11 }
 0x231   : > { %5269 = vpow2.f32 %v4615_v52  ;;  %v6781_v63 = vpop.permute.xlu1 %3381 }
 0x232   : > { %v5256_v5 = vpop.eup %5255  ;;  %5271 = vpow2.f32 %v4618_v60 }
 0x233   : > { %3547 = vrot.lane.b32.xlu0 %v5254_v1, %s5500_s22  ;;  %3553 = vrot.lane.b32.xlu1 %v5256_v5, %s5500_s22  ;;  %v6784_v37 = vpop.permute.xlu0 %3383  ;;  %5273 = vpow2.f32 %v4616_v18  ;;  %v4623_v18 = vmul.f32 -1.442695, %v6618_v54  ;;  %v4624_v54 = vmul.f32 -1.442695, %v6629_v14 }
 0x234   : > { %v5258_v61 = vpop.eup %5257  ;;  %5275 = vpow2.f32 %v4621_v35 }
 0x235   : > { %v6790_v36 = vpop.permute.xlu1 %3385  ;;  %5277 = vpow2.f32 %v4619_v24 }
 0x236   : > { %v5260_v59 = vpop.eup %5259  ;;  %5279 = vpow2.f32 %v4622_v56 }
 0x237   : > { %3549 = vrot.lane.b32.xlu1 %v5258_v61, %s5500_s22  ;;  %3559 = vrot.lane.b32.xlu0 %v5260_v59, %s5500_s22  ;;  %v6792_v11 = vpop.permute.xlu0 %3387  ;;  %v4625_v59 = vmul.f32 -1.442695, %v6610_v7  ;;  %5281 = vpow2.f32 %v4620_v28  ;;  %v4626_v7 = vmul.f32 -1.442695, %v6623_v44 }
 0x238   : > { %v5262_v20 = vpop.eup %5261 }
 0x239   : > { %v6797_v4 = vpop.permute.xlu1 %3389  ;;  %5283 = vpow2.f32 %v4625_v59 }
 0x23a   : > { %v5264_v1 = vpop.eup %5263  ;;  %7441 = vst [vmem:[#allocation4_spill] sm:$0xff] %v6797_v4 }
 0x23b   : > { %3555 = vrot.lane.b32.xlu0 %v5262_v20, %s5500_s22  ;;  %3561 = vrot.lane.b32.xlu1 %v5264_v1, %s5500_s22  ;;  %v6799_v38 = vpop.permute.xlu0 %3391 }
 0x23c   : > { %v5266_v5 = vpop.eup %5265 }
 0x23d   : > { %v5268_v61 = vpop.eup %5267  ;;  %v6802_v56 = vpop.permute.xlu1 %3393 }
 0x23e   : > { %v3149_v52 = vadd.f32 1.0, %v5268_v61  ;;  %v5270_v60 = vpop.eup %5269  ;;  %7442 = vst [vmem:[#allocation5_spill] sm:$0xff] %v6802_v56 }
 0x23f   : > { %3557 = vrot.lane.b32.xlu1 %v5266_v5, %s5500_s22  ;;  %v5272_v20 = vpop.eup %5271  ;;  %v3147_v35 = vadd.f32 1.0, %v5270_v60  ;;  %v6805_v5 = vpop.permute.xlu0 %3395 }
 0x240   : > { %5285 = vrcp.f32 %v3149_v52  ;;  %v5274_v1 = vpop.eup %5273  ;;  %v3150_v24 = vadd.f32 1.0, %v5272_v20  ;;  %7443 = vst [vmem:[#allocation6_spill] sm:$0xff] %v6805_v5 }
 0x241   : > { %v5276_v43 = vpop.eup %5275  ;;  %5287 = vpow2.f32 %v4623_v18  ;;  %v3148_v28 = vadd.f32 1.0, %v5274_v1  ;;  %v6808_v60 = vpop.permute.xlu1 %3397 }
 0x242   : > { %5289 = vrcp.f32 %v3147_v35  ;;  %v5278_v61 = vpop.eup %5277  ;;  %v3153_v59 = vadd.f32 1.0, %v5276_v43  ;;  %7444 = vst [vmem:[#allocation7_spill] sm:$0xff] %v6808_v60  ;;  %v4629_v35 = vmul.f32 -1.442695, %v6634_v51 }
 0x243   : > { %5291 = vrcp.f32 %v3150_v24  ;;  %v5280_v4 = vpop.eup %5279  ;;  %v3151_v52 = vadd.f32 1.0, %v5278_v61  ;;  %v6810_v56 = vpop.permute.xlu0 %3399 }
 0x244   : > { %5293 = vpow2.f32 %v4626_v7  ;;  %v5282_v20 = vpop.eup %5281  ;;  %v3154_v18 = vadd.f32 1.0, %v5280_v4  ;;  %7445 = vst [vmem:[#allocation8_spill] sm:$0xff] %v6810_v56  ;;  %v4627_v7 = vmul.f32 -1.442695, %v6641_v34 }
 0x245   : > { %5295 = vrcp.f32 %v3148_v28  ;;  %v3152_v1 = vadd.f32 1.0, %v5282_v20  ;;  %v6816_v28 = vpop.permute.xlu1 %3401 }
 0x246   : > { %5297 = vrcp.f32 %v3153_v59  ;;  %v5284_v44 = vpop.eup %5283  ;;  %7446 = vst [vmem:[#allocation9_spill] sm:$0xff] %v6816_v28  ;;  %v4630_v59 = vmul.f32 -1.442695, %v6646_v29 }
 0x247   : > { %5299 = vpow2.f32 %v4624_v54  ;;  %v3157_v14 = vadd.f32 1.0, %v5284_v44  ;;  %v4628_v44 = vmul.f32 -1.442695, %v6654_v17 }
 0x248   : > { %5301 = vrcp.f32 %v3151_v52 }
 0x249   : > { %5303 = vrcp.f32 %v3154_v18 }
 0x24a   : > { %5305 = vpow2.f32 %v4629_v35 }
 0x24b   : > { %5307 = vrcp.f32 %v3152_v1 }
 0x24c   : > { %5309 = vrcp.f32 %v3157_v14 }
 0x24d   : > { %v6813_v24 = vpop.eup %5285  ;;  %5311 = vpow2.f32 %v4627_v7 }
 0x24e   : > { %v5288_v61 = vpop.eup %5287  ;;  %5313 = vpow2.f32 %v4630_v59 }
 0x24f   : > { %v6821_v51 = vpop.eup %5289  ;;  %v3155_v20 = vadd.f32 1.0, %v5288_v61 }
 0x250   : > { %v6823_v52 = vpop.eup %5291 }
 0x251   : > { %v5294_v1 = vpop.eup %5293  ;;  %5315 = vrcp.f32 %v3155_v20 }
 0x252   : > { %v6829_v29 = vpop.eup %5295  ;;  %5317 = vpow2.f32 %v4628_v44  ;;  %v4634_v44 = vmul.f32 -1.442695, %v6673_v47  ;;  %v4632_v47 = vmul.f32 -1.442695, %v6681_v6  ;;  %v4635_v6 = vmul.f32 -1.442695, %v6695_v57 }
 0x253   : > { %v6832_v14 = vpop.eup %5297  ;;  %v4636_v57 = vmul.f32 -1.442695, %v6709_v15 }
 0x254   : > { %v5300_v61 = vpop.eup %5299 }
 0x271   : > { %v3504_v43 = vpop.permute.xlu0 %3503 }
 0x272   : > { %v3597_v4 = vmul.f32 %v6813_v24, %v3504_v43  ;;  %v4633_v43 = vmul.f32 -1.442695, %v6660_v30  ;;  %v3156_v30 = vadd.f32 1.0, %v5300_v61 }
 0x274   : > { %3663 = vrot.lane.b32.xlu0 %v3597_v4, %s5500_s22  ;;  %5319 = vpow2.f32 %v4633_v43 }
 0x275   : > { %v3500_v54 = vpop.permute.xlu0 %3499  ;;  %v3506_v18 = vpop.permute.xlu1 %3505 }
 0x276   : > { %v3595_v34 = vmul.f32 %v6821_v51, %v3500_v54  ;;  %v3598_v35 = vmul.f32 %v6823_v52, %v3506_v18  ;;  %v3158_v54 = vadd.f32 1.0, %v5294_v1  ;;  %v6837_v18 = vpop.eup %5301 }
 0x277   : > { %v6842_v20 = vpop.eup %5303 }
 0x278   : > { %3659 = vrot.lane.b32.xlu0 %v3595_v34, %s5500_s22  ;;  %3665 = vrot.lane.b32.xlu1 %v3598_v35, %s5500_s22  ;;  %v4631_v34 = vmul.f32 -1.442695, %v6668_v40  ;;  %v5306_v1 = vpop.eup %5305  ;;  %5321 = vrcp.f32 %v3158_v54 }
 0x279   : > { %v3502_v7 = vpop.permute.xlu1 %3501  ;;  %v3512_v4 = vpop.permute.xlu0 %3511  ;;  %v3161_v43 = vadd.f32 1.0, %v5306_v1 }
 0x27a   : > { %v3596_v17 = vmul.f32 %v6829_v29, %v3502_v7  ;;  %v3601_v59 = vmul.f32 %v6832_v14, %v3512_v4  ;;  %v6847_v28 = vpop.eup %5307  ;;  %5323 = vpow2.f32 %v4631_v34  ;;  %v4637_v34 = vmul.f32 -1.442695, %v6687_v31 }
 0x27b   : > { %v6851_v40 = vpop.eup %5309  ;;  %5325 = vrcp.f32 %v3156_v30 }
 0x27c   : > { %3661 = vrot.lane.b32.xlu1 %v3596_v17, %s5500_s22  ;;  %3671 = vrot.lane.b32.xlu0 %v3601_v59, %s5500_s22  ;;  %v5312_v54 = vpop.eup %5311  ;;  %5327 = vpow2.f32 %v4634_v44 }
 0x27d   : > { %v3514_v35 = vpop.permute.xlu1 %3513  ;;  %v3508_v60 = vpop.permute.xlu0 %3507  ;;  %5329 = vrcp.f32 %v3161_v43  ;;  %v3159_v30 = vadd.f32 1.0, %v5312_v54  ;;  %v4638_v43 = vmul.f32 -1.442695, %v6701_v9  ;;  %v4641_v9 = vmul.f32 -1.442695, %v6716_v48 }
 0x27e   : > { %v3602_v7 = vmul.f32 %v6842_v20, %v3514_v35  ;;  %v3599_v4 = vmul.f32 %v6837_v18, %v3508_v60  ;;  %v5314_v35 = vpop.eup %5313  ;;  %5331 = vpow2.f32 %v4632_v47 }
 0x27f   : > { %v6859_v1 = vpop.eup %5315  ;;  %v3162_v44 = vadd.f32 1.0, %v5314_v35  ;;  %5333 = vpow2.f32 %v4637_v34 }
 0x280   : > { %3673 = vrot.lane.b32.xlu1 %v3602_v7, %s5500_s22  ;;  %3667 = vrot.lane.b32.xlu0 %v3599_v4, %s5500_s22  ;;  %v5318_v7 = vpop.eup %5317  ;;  %5335 = vrcp.f32 %v3159_v30 }
 0x281   : > { %v3510_v61 = vpop.permute.xlu1 %3509  ;;  %v3520_v17 = vpop.permute.xlu0 %3519  ;;  %v3160_v31 = vadd.f32 1.0, %v5318_v7  ;;  %5337 = vrcp.f32 %v3162_v44 }
 0x282   : > { %v3600_v59 = vmul.f32 %v6847_v28, %v3510_v61  ;;  %v3605_v60 = vmul.f32 %v6851_v40, %v3520_v17  ;;  %v5320_v17 = vpop.eup %5319  ;;  %5339 = vpow2.f32 %v4635_v6 }
 0x283   : > { %v3165_v35 = vadd.f32 1.0, %v5320_v17  ;;  %5341 = vrcp.f32 %v3160_v31 }
 0x284   : > { %3669 = vrot.lane.b32.xlu1 %v3600_v59, %s5500_s22  ;;  %3679 = vrot.lane.b32.xlu0 %v3605_v60, %s5500_s22  ;;  %5343 = vpow2.f32 %v4638_v43  ;;  %v4639_v43 = vmul.f32 -1.442695, %v6724_v33 }
 0x285   : > { %v3516_v4 = vpop.permute.xlu0 %3515  ;;  %v6864_v59 = vpop.eup %5321  ;;  %5345 = vrcp.f32 %v3165_v35  ;;  %v4642_v35 = vmul.f32 -1.442695, %v6730_v13 }
 0x286   : > { %v3603_v61 = vmul.f32 %v6859_v1, %v3516_v4  ;;  %v3522_v54 = vpop.permute.xlu1 %3521  ;;  %5347 = vpow2.f32 %v4636_v57 }
 0x287   : > { %v3606_v47 = vmul.f32 %v6864_v59, %v3522_v54  ;;  %v5324_v60 = vpop.eup %5323 }
 0x288   : > { %3675 = vrot.lane.b32.xlu0 %v3603_v61, %s5500_s22  ;;  %v6868_v34 = vpop.eup %5325  ;;  %v3163_v4 = vadd.f32 1.0, %v5324_v60 }
 0x289   : > { %3681 = vrot.lane.b32.xlu1 %v3606_v47, %s5500_s22  ;;  %v5328_v30 = vpop.eup %5327  ;;  %v3528_v17 = vpop.permute.xlu0 %3527 }
 0x28a   : > { %v3518_v7 = vpop.permute.xlu1 %3517  ;;  %v6874_v6 = vpop.eup %5329  ;;  %v3166_v61 = vadd.f32 1.0, %v5328_v30  ;;  %5349 = vrcp.f32 %v3163_v4 }
 0x28b   : > { %v3604_v44 = vmul.f32 %v6868_v34, %v3518_v7  ;;  %v5332_v31 = vpop.eup %5331  ;;  %v3609_v15 = vmul.f32 %v6874_v6, %v3528_v17  ;;  %5351 = vpow2.f32 %v4641_v9 }
 0x28c   : > { %v5334_v54 = vpop.eup %5333  ;;  %5353 = vrcp.f32 %v3166_v61  ;;  %v3164_v48 = vadd.f32 1.0, %v5332_v31  ;;  %v4640_v61 = vmul.f32 -1.442695, %v6738_v22 }
 0x28d   : > { %3677 = vrot.lane.b32.xlu1 %v3604_v44, %s5500_s22  ;;  %3687 = vrot.lane.b32.xlu0 %v3609_v15, %s5500_s22  ;;  %v6880_v47 = vpop.eup %5335  ;;  %v3524_v60 = vpop.permute.xlu0 %3523  ;;  %v3169_v7 = vadd.f32 1.0, %v5334_v54  ;;  %5355 = vpow2.f32 %v4639_v43  ;;  %v4645_v15 = vmul.f32 -1.442695, %v6743_v55 }
 0x28e   : > { %v3607_v57 = vmul.f32 %v6880_v47, %v3524_v60  ;;  %v6884_v30 = vpop.eup %5337  ;;  %v3530_v44 = vpop.permute.xlu1 %3529  ;;  %5357 = vrcp.f32 %v3164_v48 }
 0x28f   : > { %v5340_v4 = vpop.eup %5339  ;;  %v3610_v9 = vmul.f32 %v6884_v30, %v3530_v44  ;;  %5359 = vpow2.f32 %v4642_v35 }
 0x290   : > { %v6888_v33 = vpop.eup %5341  ;;  %5361 = vrcp.f32 %v3169_v7  ;;  %v3167_v17 = vadd.f32 1.0, %v5340_v4  ;;  %v4643_v7 = vmul.f32 -1.442695, %v6751_v32 }
 0x291   : > { %3683 = vrot.lane.b32.xlu0 %v3607_v57, %s5500_s22  ;;  %3689 = vrot.lane.b32.xlu1 %v3610_v9, %s5500_s22  ;;  %v5344_v13 = vpop.eup %5343  ;;  %v3536_v60 = vpop.permute.xlu0 %3535  ;;  %5363 = vpow2.f32 %v4640_v61  ;;  %v4646_v61 = vmul.f32 -1.442695, %v6757_v26 }
 0x292   : > { %v3526_v31 = vpop.permute.xlu1 %3525  ;;  %v6894_v43 = vpop.eup %5345  ;;  %v3170_v48 = vadd.f32 1.0, %v5344_v13  ;;  %5365 = vrcp.f32 %v3167_v17 }
 0x293   : > { %v3608_v54 = vmul.f32 %v6888_v33, %v3526_v31  ;;  %v5348_v57 = vpop.eup %5347  ;;  %v3613_v35 = vmul.f32 %v6894_v43, %v3536_v60  ;;  %5367 = vpow2.f32 %v4645_v15  ;;  %v4644_v60 = vmul.f32 -1.442695, %v6764_v3 }
 0x294   : > { %v3168_v44 = vadd.f32 1.0, %v5348_v57  ;;  %5369 = vrcp.f32 %v3170_v48 }
 0x295   : > { %3685 = vrot.lane.b32.xlu1 %v3608_v54, %s5500_s22  ;;  %3695 = vrot.lane.b32.xlu0 %v3613_v35, %s5500_s22  ;;  %v3532_v4 = vpop.permute.xlu0 %3531  ;;  %5371 = vpow2.f32 %v4643_v7 }
 0x296   : > { %v3538_v13 = vpop.permute.xlu1 %3537  ;;  %5373 = vrcp.f32 %v3168_v44 }
 0x297   : > { %v6898_v22 = vpop.eup %5349  ;;  %5375 = vpow2.f32 %v4646_v61 }
 0x298   : > { %v5352_v55 = vpop.eup %5351  ;;  %v3611_v31 = vmul.f32 %v6898_v22, %v3532_v4 }
 0x299   : > { %v6902_v9 = vpop.eup %5353  ;;  %v3173_v54 = vadd.f32 1.0, %v5352_v55  ;;  %v3544_v7 = vpop.permute.xlu0 %3543 }
 0x29a   : > { %v3614_v17 = vmul.f32 %v6902_v9, %v3538_v13  ;;  %3691 = vrot.lane.b32.xlu0 %v3611_v31, %s5500_s22  ;;  %v5356_v32 = vpop.eup %5355  ;;  %v3534_v57 = vpop.permute.xlu1 %3533 }
 0x29b   : > { %v6909_v15 = vpop.eup %5357  ;;  %5377 = vrcp.f32 %v3173_v54  ;;  %v3171_v55 = vadd.f32 1.0, %v5356_v32 }
 0x29c   : > { %3697 = vrot.lane.b32.xlu1 %v3614_v17, %s5500_s22  ;;  %v5360_v26 = vpop.eup %5359  ;;  %v3612_v48 = vmul.f32 %v6909_v15, %v3534_v57  ;;  %5379 = vpow2.f32 %v4644_v60 }
 0x29d   : > { %v6913_v35 = vpop.eup %5361  ;;  %v3174_v44 = vadd.f32 1.0, %v5360_v26  ;;  %5381 = vrcp.f32 %v3171_v55  ;;  %v3540_v3 = vpop.permute.xlu0 %3539 }
 0x29e   : > { %v3617_v4 = vmul.f32 %v6913_v35, %v3544_v7  ;;  %v5364_v13 = vpop.eup %5363  ;;  %v3546_v57 = vpop.permute.xlu1 %3545 }
 0x29f   : > { %v6918_v61 = vpop.eup %5365  ;;  %5383 = vrcp.f32 %v3174_v44  ;;  %v3172_v54 = vadd.f32 1.0, %v5364_v13 }
 0x2a0   : > { %3693 = vrot.lane.b32.xlu1 %v3612_v48, %s5500_s22  ;;  %3703 = vrot.lane.b32.xlu0 %v3617_v4, %s5500_s22  ;;  %v5368_v31 = vpop.eup %5367  ;;  %v3615_v17 = vmul.f32 %v6918_v61, %v3540_v3 }
 0x2a1   : > { %v6921_v32 = vpop.eup %5369  ;;  %v3177_v48 = vadd.f32 1.0, %v5368_v31  ;;  %5385 = vrcp.f32 %v3172_v54  ;;  %v3552_v5 = vpop.permute.xlu0 %3551 }
 0x2a2   : > { %v3618_v60 = vmul.f32 %v6921_v32, %v3546_v57  ;;  %v5372_v26 = vpop.eup %5371  ;;  %v3542_v4 = vpop.permute.xlu1 %3541 }
 0x2a3   : > { %v6925_v7 = vpop.eup %5373  ;;  %5387 = vrcp.f32 %v3177_v48  ;;  %v3175_v3 = vadd.f32 1.0, %v5372_v26 }
 0x2a4   : > { %3699 = vrot.lane.b32.xlu0 %v3615_v17, %s5500_s22  ;;  %3705 = vrot.lane.b32.xlu1 %v3618_v60, %s5500_s22  ;;  %v5376_v55 = vpop.eup %5375  ;;  %v3616_v44 = vmul.f32 %v6925_v7, %v3542_v4 }
 0x2a5   : > { %v3178_v56 = vadd.f32 1.0, %v5376_v55  ;;  %5389 = vrcp.f32 %v3175_v3  ;;  %v3548_v57 = vpop.permute.xlu0 %3547 }
 0x2a6   : > { %v3554_v4 = vpop.permute.xlu1 %3553 }
 0x2a7   : > { %5391 = vrcp.f32 %v3178_v56 }
 0x2a8   : > { %v6929_v13 = vpop.eup %5377  ;;  %3701 = vrot.lane.b32.xlu1 %v3616_v44, %s5500_s22 }
 0x2a9   : > { %v3621_v31 = vmul.f32 %v6929_v13, %v3552_v5  ;;  %v5380_v17 = vpop.eup %5379  ;;  %v3560_v56 = vpop.permute.xlu0 %3559 }
 0x2aa   : > { %v6934_v54 = vpop.eup %5381  ;;  %v3176_v48 = vadd.f32 1.0, %v5380_v17  ;;  %v3550_v3 = vpop.permute.xlu1 %3549 }
 0x2ab   : > { %3711 = vrot.lane.b32.xlu0 %v3621_v31, %s5500_s22  ;;  %v3619_v60 = vmul.f32 %v6934_v54, %v3548_v57 }
 0x2ac   : > { %v6937_v26 = vpop.eup %5383  ;;  %5393 = vrcp.f32 %v3176_v48 }
 0x2ad   : > { %7447 = vst [vmem:[#allocation10_spill] sm:$0xff] %v6937_v26  ;;  %v3622_v55 = vmul.f32 %v6937_v26, %v3554_v4 }
 0x2ae   : > { %v6942_v5 = vpop.eup %5385 }
 0x2af   : > { %3707 = vrot.lane.b32.xlu0 %v3619_v60, %s5500_s22  ;;  %3713 = vrot.lane.b32.xlu1 %v3622_v55, %s5500_s22  ;;  %v3620_v44 = vmul.f32 %v6942_v5, %v3550_v3  ;;  %v3556_v60 = vpop.permute.xlu0 %3555  ;;  %v3562_v55 = vpop.permute.xlu1 %3561 }
 0x2b0   : > { %v6945_v31 = vpop.eup %5387 }
 0x2b1   : > { %7448 = vst [vmem:[#allocation11_spill] sm:$0xff] %v6945_v31  ;;  %v3625_v17 = vmul.f32 %v6945_v31, %v3560_v56  ;;  %v3435_v31 = vmul.f32 %v6821_v51, %v6643_v23 }
 0x2b2   : > { %v6950_v57 = vpop.eup %5389 }
 0x2b3   : > { %3709 = vrot.lane.b32.xlu1 %v3620_v44, %s5500_s22  ;;  %3719 = vrot.lane.b32.xlu0 %v3625_v17, %s5500_s22  ;;  %7449 = vst [vmem:[#allocation12_spill] sm:$0xff] %v6950_v57  ;;  %v3623_v48 = vmul.f32 %v6950_v57, %v3556_v60  ;;  %v3558_v56 = vpop.permute.xlu1 %3557  ;;  %v3437_v17 = vmul.f32 %v6813_v24, %v6651_v62 }
 0x2b4   : > { %v6953_v4 = vpop.eup %5391  ;;  %v3436_v62 = vmul.f32 %v6829_v29, %v6656_v39 }
 0x2b5   : > { %7450 = vst [vmem:[#allocation13_spill] sm:$0xff] %v6953_v4  ;;  %v3626_v26 = vmul.f32 %v6953_v4, %v3562_v55 }
 0x2b7   : > { %3715 = vrot.lane.b32.xlu0 %v3623_v48, %s5500_s22  ;;  %3721 = vrot.lane.b32.xlu1 %v3626_v26, %s5500_s22  ;;  %v3438_v26 = vmul.f32 %v6823_v52, %v6664_v46 }
 0x2b9   : > { %v6958_v3 = vpop.eup %5393 }
 0x2ba   : > { %v3624_v44 = vmul.f32 %v6958_v3, %v3558_v56 }
 0x2bc   : > { %3717 = vrot.lane.b32.xlu1 %v3624_v44, %s5500_s22  ;;  %v3441_v44 = vmul.f32 %v6832_v14, %v6683_v49 }
 0x2e6   : > { %v3664_v60 = vpop.permute.xlu0 %3663 }
 0x2e7   : > { %v3757_v57 = vadd.f32 %v3664_v60, %v3437_v17 }
 0x2e9   : > { %4015 = vrot.lane.b32.xlu0 %v3757_v57, %s5501_s26  ;;  %5395 = vtanh.f32 %v3757_v57  ;;  %v3442_v57 = vmul.f32 %v6842_v20, %v6692_v50 }
 0x2ea   : > { %v3660_v48 = vpop.permute.xlu0 %3659  ;;  %v3666_v55 = vpop.permute.xlu1 %3665 }
 0x2eb   : > { %v3755_v4 = vadd.f32 %v3660_v48, %v3435_v31  ;;  %v3758_v56 = vadd.f32 %v3666_v55, %v3438_v26  ;;  %v3439_v31 = vmul.f32 %v6837_v18, %v6670_v41  ;;  %v3440_v48 = vmul.f32 %v6847_v28, %v6678_v2 }
 0x2ed   : > { %4011 = vrot.lane.b32.xlu0 %v3755_v4, %s5501_s26  ;;  %4017 = vrot.lane.b32.xlu1 %v3758_v56, %s5501_s26  ;;  %5397 = vtanh.f32 %v3755_v4 }
 0x2ee   : > { %v3662_v23 = vpop.permute.xlu1 %3661  ;;  %v3672_v17 = vpop.permute.xlu0 %3671  ;;  %5399 = vtanh.f32 %v3758_v56 }
 0x2ef   : > { %v3756_v46 = vadd.f32 %v3662_v23, %v3436_v62  ;;  %v3761_v60 = vadd.f32 %v3672_v17, %v3441_v44  ;;  %v3445_v23 = vmul.f32 %v6851_v40, %v6711_v12 }
 0x2f1   : > { %4013 = vrot.lane.b32.xlu1 %v3756_v46, %s5501_s26  ;;  %4023 = vrot.lane.b32.xlu0 %v3761_v60, %s5501_s26  ;;  %5401 = vtanh.f32 %v3756_v46 }
 0x2f2   : > { %v3674_v39 = vpop.permute.xlu1 %3673  ;;  %v3668_v49 = vpop.permute.xlu0 %3667  ;;  %5403 = vtanh.f32 %v3761_v60  ;;  %v3446_v60 = vmul.f32 %v6864_v59, %v6720_v42 }
 0x2f3   : > { %v3762_v26 = vadd.f32 %v3674_v39, %v3442_v57  ;;  %v3759_v4 = vadd.f32 %v3668_v49, %v3439_v31  ;;  %v3443_v57 = vmul.f32 %v6859_v1, %v6697_v27 }
 0x2f5   : > { %4025 = vrot.lane.b32.xlu1 %v3762_v26, %s5501_s26  ;;  %4019 = vrot.lane.b32.xlu0 %v3759_v4, %s5501_s26  ;;  %5405 = vtanh.f32 %v3762_v26  ;;  %v3444_v26 = vmul.f32 %v6868_v34, %v6706_v45 }
 0x2f6   : > { %v3670_v41 = vpop.permute.xlu1 %3669  ;;  %v5396_v56 = vpop.eup %5395  ;;  %5407 = vtanh.f32 %v3759_v4 }
 0x2f7   : > { %v3760_v55 = vadd.f32 %v3670_v41, %v3440_v48  ;;  %v3680_v50 = vpop.permute.xlu0 %3679 }
 0x2f8   : > { %v3765_v2 = vadd.f32 %v3680_v50, %v3445_v23  ;;  %v3450_v23 = vmul.f32 %v6884_v30, %v6748_v0 }
 0x2f9   : > { %4021 = vrot.lane.b32.xlu1 %v3760_v55, %s5501_s26  ;;  %3855 = vrot.lane.b32.xlu0 %v5396_v56, %s5500_s22  ;;  %5409 = vtanh.f32 %v3760_v55  ;;  %v3449_v55 = vmul.f32 %v6874_v6, %v6740_v19 }
 0x2fa   : > { %v5398_v62 = vpop.eup %5397  ;;  %5411 = vtanh.f32 %v3765_v2 }
 0x2fb   : > { %v5400_v44 = vpop.eup %5399  ;;  %v3682_v46 = vpop.permute.xlu1 %3681 }
 0x2fc   : > { %v3676_v31 = vpop.permute.xlu0 %3675  ;;  %v3766_v12 = vadd.f32 %v3682_v46, %v3446_v60  ;;  %v3448_v46 = vmul.f32 %v6888_v33, %v6734_v21 }
 0x2fd   : > { %3857 = vrot.lane.b32.xlu1 %v5400_v44, %s5500_s22  ;;  %3851 = vrot.lane.b32.xlu0 %v5398_v62, %s5500_s22  ;;  %v3763_v39 = vadd.f32 %v3676_v31, %v3443_v57  ;;  %v3447_v44 = vmul.f32 %v6880_v47, %v6726_v10 }
 0x2fe   : > { %v5402_v17 = vpop.eup %5401 }
 0x2ff   : > { %v3678_v49 = vpop.permute.xlu1 %3677  ;;  %v5404_v27 = vpop.eup %5403  ;;  %5413 = vtanh.f32 %v3763_v39 }
 0x300   : > { %v3764_v4 = vadd.f32 %v3678_v49, %v3444_v26  ;;  %v3688_v42 = vpop.permute.xlu0 %3687  ;;  %5415 = vtanh.f32 %v3766_v12 }
 0x301   : > { %3853 = vrot.lane.b32.xlu1 %v5402_v17, %s5500_s22  ;;  %4031 = vrot.lane.b32.xlu0 %v3765_v2, %s5501_s26  ;;  %v3769_v56 = vadd.f32 %v3688_v42, %v3449_v55 }
 0x302   : > { %v5406_v48 = vpop.eup %5405  ;;  %5417 = vtanh.f32 %v3764_v4 }
 0x303   : > { %v5408_v41 = vpop.eup %5407  ;;  %v3690_v45 = vpop.permute.xlu1 %3689  ;;  %5419 = vtanh.f32 %v3769_v56 }
 0x304   : > { %v3684_v62 = vpop.permute.xlu0 %3683  ;;  %v3770_v19 = vadd.f32 %v3690_v45, %v3450_v23 }
 0x305   : > { %4033 = vrot.lane.b32.xlu1 %v3766_v12, %s5501_s26  ;;  %4027 = vrot.lane.b32.xlu0 %v3763_v39, %s5501_s26  ;;  %v3767_v2 = vadd.f32 %v3684_v62, %v3447_v44  ;;  %v3453_v12 = vmul.f32 %v6894_v43, %v6766_v53 }
 0x306   : > { %v5410_v50 = vpop.eup %5409 }
 0x307   : > { %v3686_v17 = vpop.permute.xlu1 %3685  ;;  %v5412_v10 = vpop.eup %5411  ;;  %5421 = vtanh.f32 %v3767_v2 }
 0x308   : > { %v3768_v31 = vadd.f32 %v3686_v17, %v3448_v46  ;;  %v3696_v0 = vpop.permute.xlu0 %3695  ;;  %5423 = vtanh.f32 %v3770_v19 }
 0x309   : > { %4029 = vrot.lane.b32.xlu1 %v3764_v4, %s5501_s26  ;;  %3863 = vrot.lane.b32.xlu0 %v5404_v27, %s5500_s22  ;;  %v3773_v39 = vadd.f32 %v3696_v0, %v3453_v12  ;;  %v3451_v4 = vmul.f32 %v6898_v22, %v6753_v16  ;;  %v3454_v27 = vmul.f32 %v6902_v9, %v6772_v58 }
 0x30a   : > { %5425 = vtanh.f32 %v3768_v31 }
 0x30b   : > { %5427 = vtanh.f32 %v3773_v39 }
 0x30c   : > { %v5414_v57 = vpop.eup %5413  ;;  %v3692_v26 = vpop.permute.xlu0 %3691 }
 0x30d   : > { %3865 = vrot.lane.b32.xlu1 %v5406_v48, %s5500_s22  ;;  %3859 = vrot.lane.b32.xlu0 %v5408_v41, %s5500_s22  ;;  %v5416_v60 = vpop.eup %5415  ;;  %v3771_v42 = vadd.f32 %v3692_v26, %v3451_v4  ;;  %v3452_v41 = vmul.f32 %v6909_v15, %v6761_v25  ;;  %v7451_v26 = vld [vmem:[#allocation5_spill] sm:$0xff]  ;;  %v7452_v4 = vld [vmem:[#allocation10_spill] sm:$0xff] }
 0x30e   : > { %v3698_v21 = vpop.permute.xlu1 %3697 }
 0x30f   : > { %v5418_v49 = vpop.eup %5417  ;;  %v3774_v53 = vadd.f32 %v3698_v21, %v3454_v27  ;;  %5429 = vtanh.f32 %v3771_v42  ;;  %v3462_v27 = vmul.f32 %v7452_v4, %v7451_v26 }
 0x310   : > { %v5420_v16 = vpop.eup %5419 }
 0x311   : > { %3861 = vrot.lane.b32.xlu1 %v5410_v50, %s5500_s22  ;;  %4039 = vrot.lane.b32.xlu0 %v3769_v56, %s5501_s26  ;;  %v3457_v50 = vmul.f32 %v6913_v35, %v6784_v37  ;;  %5431 = vtanh.f32 %v3774_v53 }
 0x312   : > { %v3694_v48 = vpop.permute.xlu1 %3693  ;;  %v3704_v58 = vpop.permute.xlu0 %3703 }
 0x313   : > { %v3772_v55 = vadd.f32 %v3694_v48, %v3452_v41  ;;  %v3777_v62 = vadd.f32 %v3704_v58, %v3457_v50  ;;  %v7453_v48 = vld [vmem:[#allocation4_spill] sm:$0xff]  ;;  %v7455_v50 = vld [vmem:[#allocation11_spill] sm:$0xff] }
 0x314   : > { %v5422_v45 = vpop.eup %5421  ;;  %v3460_v41 = vmul.f32 %v6942_v5, %v7453_v48 }
 0x315   : > { %4041 = vrot.lane.b32.xlu1 %v3770_v19, %s5501_s26  ;;  %4035 = vrot.lane.b32.xlu0 %v3767_v2, %s5501_s26  ;;  %v5424_v56 = vpop.eup %5423  ;;  %v3455_v19 = vmul.f32 %v6918_v61, %v6774_v8  ;;  %v3458_v2 = vmul.f32 %v6921_v32, %v6790_v36  ;;  %5433 = vtanh.f32 %v3772_v55 }
 0x316   : > { %v3706_v25 = vpop.permute.xlu1 %3705  ;;  %v3700_v23 = vpop.permute.xlu0 %3699  ;;  %5435 = vtanh.f32 %v3777_v62 }
 0x317   : > { %v5426_v44 = vpop.eup %5425  ;;  %v3778_v37 = vadd.f32 %v3706_v25, %v3458_v2  ;;  %v3775_v17 = vadd.f32 %v3700_v23, %v3455_v19  ;;  %v7456_v2 = vld [vmem:[#allocation6_spill] sm:$0xff] }
 0x318   : > { %v5428_v8 = vpop.eup %5427 }
 0x319   : > { %4037 = vrot.lane.b32.xlu1 %v3768_v31, %s5501_s26  ;;  %3871 = vrot.lane.b32.xlu0 %v5412_v10, %s5500_s22  ;;  %v3456_v31 = vmul.f32 %v6925_v7, %v6781_v63  ;;  %5437 = vtanh.f32 %v3775_v17 }
 0x31a   : > { %v3702_v46 = vpop.permute.xlu1 %3701  ;;  %5439 = vtanh.f32 %v3778_v37 }
 0x31b   : > { %v3776_v10 = vadd.f32 %v3702_v46, %v3456_v31  ;;  %v7458_v46 = vld [vmem:[#allocation9_spill] sm:$0xff] }
 0x31c   : > { %v5430_v0 = vpop.eup %5429  ;;  %v7459_v31 = vld [vmem:[#allocation13_spill] sm:$0xff] }
 0x31d   : > { %3873 = vrot.lane.b32.xlu1 %v5416_v60, %s5500_s22  ;;  %3867 = vrot.lane.b32.xlu0 %v5414_v57, %s5500_s22  ;;  %v3712_v36 = vpop.permute.xlu0 %3711  ;;  %v3461_v60 = vmul.f32 %v6929_v13, %v6799_v38  ;;  %5441 = vtanh.f32 %v3776_v10 }
 0x31e   : > { %v5432_v57 = vpop.eup %5431 }
 0x31f   : > { %v3781_v12 = vadd.f32 %v3712_v36, %v3461_v60 }
 0x321   : > { %3869 = vrot.lane.b32.xlu1 %v5418_v49, %s5500_s22  ;;  %4047 = vrot.lane.b32.xlu0 %v3773_v39, %s5501_s26  ;;  %v3714_v63 = vpop.permute.xlu1 %3713  ;;  %v3708_v39 = vpop.permute.xlu0 %3707  ;;  %v3459_v49 = vmul.f32 %v6934_v54, %v6792_v11  ;;  %5443 = vtanh.f32 %v3781_v12 }
 0x322   : > { %v5434_v21 = vpop.eup %5433  ;;  %v3782_v38 = vadd.f32 %v3714_v63, %v3462_v27 }
 0x323   : > { %v5436_v11 = vpop.eup %5435 }
 0x325   : > { %4049 = vrot.lane.b32.xlu1 %v3774_v53, %s5501_s26  ;;  %4043 = vrot.lane.b32.xlu0 %v3771_v42, %s5501_s26  ;;  %v3779_v53 = vadd.f32 %v3708_v39, %v3459_v49  ;;  %v3710_v42 = vpop.permute.xlu1 %3709 }
 0x326   : > { %v5438_v58 = vpop.eup %5437 }
 0x327   : > { %5445 = vtanh.f32 %v3779_v53 }
 0x328   : > { %5447 = vtanh.f32 %v3782_v38 }
 0x329   : > { %4045 = vrot.lane.b32.xlu1 %v3772_v55, %s5501_s26  ;;  %3879 = vrot.lane.b32.xlu0 %v5420_v16, %s5500_s22  ;;  %v3780_v55 = vadd.f32 %v3710_v42, %v3460_v41  ;;  %v3720_v16 = vpop.permute.xlu0 %3719 }
 0x32b   : > { %5449 = vtanh.f32 %v3780_v55 }
 0x32d   : > { %3881 = vrot.lane.b32.xlu1 %v5424_v56, %s5500_s22  ;;  %3875 = vrot.lane.b32.xlu0 %v5422_v45, %s5500_s22  ;;  %v5440_v45 = vpop.eup %5439  ;;  %v7454_v56 = vld [vmem:[#allocation8_spill] sm:$0xff]  ;;  %v3716_v23 = vpop.permute.xlu0 %3715 }
 0x32e   : > { %v3465_v25 = vmul.f32 %v7455_v50, %v7454_v56  ;;  %v5442_v19 = vpop.eup %5441 }
 0x331   : > { %3877 = vrot.lane.b32.xlu1 %v5426_v44, %s5500_s22  ;;  %4055 = vrot.lane.b32.xlu0 %v3777_v62, %s5501_s26  ;;  %v3722_v62 = vpop.permute.xlu1 %3721  ;;  %v3785_v44 = vadd.f32 %v3720_v16, %v3465_v25 }
 0x333   : > { %5451 = vtanh.f32 %v3785_v44 }
 0x335   : > { %4057 = vrot.lane.b32.xlu1 %v3778_v37, %s5501_s26  ;;  %4051 = vrot.lane.b32.xlu0 %v3775_v17, %s5501_s26  ;;  %v7457_v37 = vld [vmem:[#allocation12_spill] sm:$0xff] }
 0x336   : > { %v3463_v17 = vmul.f32 %v7457_v37, %v7456_v2 }
 0x339   : > { %4053 = vrot.lane.b32.xlu1 %v3776_v10, %s5501_s26  ;;  %3887 = vrot.lane.b32.xlu0 %v5428_v8, %s5500_s22  ;;  %v3466_v10 = vmul.f32 %v7459_v31, %v7458_v46  ;;  %v3783_v8 = vadd.f32 %v3716_v23, %v3463_v17 }
 0x33b   : > { %v3786_v36 = vadd.f32 %v3722_v62, %v3466_v10  ;;  %5453 = vtanh.f32 %v3783_v8 }
 0x33d   : > { %3889 = vrot.lane.b32.xlu1 %v5432_v57, %s5500_s22  ;;  %3883 = vrot.lane.b32.xlu0 %v5430_v0, %s5500_s22  ;;  %v3718_v0 = vpop.permute.xlu1 %3717  ;;  %v7460_v57 = vld [vmem:[#allocation7_spill] sm:$0xff]  ;;  %5455 = vtanh.f32 %v3786_v36 }
 0x33e   : > { %v3464_v60 = vmul.f32 %v6958_v3, %v7460_v57 }
 0x340   : > { %v3784_v63 = vadd.f32 %v3718_v0, %v3464_v60 }
 0x341   : > { %3885 = vrot.lane.b32.xlu1 %v5434_v21, %s5500_s22  ;;  %4063 = vrot.lane.b32.xlu0 %v3781_v12, %s5501_s26  ;;  %v5444_v12 = vpop.eup %5443 }
 0x342   : > { %v5446_v39 = vpop.eup %5445  ;;  %5457 = vtanh.f32 %v3784_v63 }
 0x343   : > { %v5448_v49 = vpop.eup %5447 }
 0x344   : > { %v5450_v27 = vpop.eup %5449 }
 0x345   : > { %4065 = vrot.lane.b32.xlu1 %v3782_v38, %s5501_s26  ;;  %4059 = vrot.lane.b32.xlu0 %v3779_v53, %s5501_s26  ;;  %v5452_v53 = vpop.eup %5451 }
 0x348   : > { %v5454_v42 = vpop.eup %5453 }
 0x349   : > { %4061 = vrot.lane.b32.xlu1 %v3780_v55, %s5501_s26  ;;  %3895 = vrot.lane.b32.xlu0 %v5436_v11, %s5500_s22 }
 0x34a   : > { %v5456_v55 = vpop.eup %5455 }
 0x34d   : > { %3897 = vrot.lane.b32.xlu1 %v5440_v45, %s5500_s22  ;;  %3891 = vrot.lane.b32.xlu0 %v5438_v58, %s5500_s22 }
 0x34f   : > { %v5458_v58 = vpop.eup %5457 }
 0x351   : > { %3893 = vrot.lane.b32.xlu1 %v5442_v19, %s5500_s22  ;;  %4071 = vrot.lane.b32.xlu0 %v3785_v44, %s5501_s26 }
 0x355   : > { %4073 = vrot.lane.b32.xlu1 %v3786_v36, %s5501_s26  ;;  %4067 = vrot.lane.b32.xlu0 %v3783_v8, %s5501_s26 }
 0x359   : > { %4069 = vrot.lane.b32.xlu1 %v3784_v63, %s5501_s26  ;;  %3903 = vrot.lane.b32.xlu0 %v5444_v12, %s5500_s22 }
 0x35b   : > { %v7083_v21 = vpop.permute.xlu0 %4015 }
 0x35c   : > { %4109 = vst.msk [vmem:[#allocation2 + $0x10] sm:$0xff] %vm359_vm2, %v7083_v21 }
 0x35d   : > { %3905 = vrot.lane.b32.xlu1 %v5448_v49, %s5500_s22  ;;  %3899 = vrot.lane.b32.xlu0 %v5446_v39, %s5500_s22 }
 0x35f   : > { %v7089_v26 = vpop.permute.xlu0 %4011  ;;  %v7091_v38 = vpop.permute.xlu1 %4017 }
 0x360   : > { %4107 = vst.msk [vmem:[#allocation2] sm:$0xff] %vm359_vm2, %v7089_v26  ;;  %4110 = vst.msk [vmem:[#allocation2 + $0x18] sm:$0xff] %vm359_vm2, %v7091_v38 }
 0x361   : > { %3901 = vrot.lane.b32.xlu1 %v5450_v27, %s5500_s22  ;;  %3911 = vrot.lane.b32.xlu0 %v5452_v53, %s5500_s22 }
 0x363   : > { %v7099_v48 = vpop.permute.xlu1 %4013  ;;  %v7101_v41 = vpop.permute.xlu0 %4023 }
 0x364   : > { %4108 = vst.msk [vmem:[#allocation2 + $0x8] sm:$0xff] %vm359_vm2, %v7099_v48  ;;  %4113 = vst.msk [vmem:[#allocation2 + $0x30] sm:$0xff] %vm359_vm2, %v7101_v41 }
 0x365   : > { %3913 = vrot.lane.b32.xlu1 %v5456_v55, %s5500_s22  ;;  %3907 = vrot.lane.b32.xlu0 %v5454_v42, %s5500_s22 }
 0x367   : > { %v7109_v11 = vpop.permute.xlu1 %4025  ;;  %v7111_v16 = vpop.permute.xlu0 %4019 }
 0x368   : > { %4114 = vst.msk [vmem:[#allocation2 + $0x38] sm:$0xff] %vm359_vm2, %v7109_v11  ;;  %4111 = vst.msk [vmem:[#allocation2 + $0x20] sm:$0xff] %vm359_vm2, %v7111_v16 }
 0x369   : > { %3909 = vrot.lane.b32.xlu1 %v5458_v58, %s5500_s22 }
 0x36b   : > { %v7118_v45 = vpop.permute.xlu1 %4021  ;;  %v3856_v56 = vpop.permute.xlu0 %3855 }
 0x36c   : > { %4112 = vst.msk [vmem:[#allocation2 + $0x28] sm:$0xff] %vm359_vm2, %v7118_v45  ;;  %v3949_v25 = vmul.f32 %v6813_v24, %v3856_v56 }
 0x36e   : > { %4175 = vrot.lane.b32.xlu0 %v3949_v25, %s5502_s23 }
 0x36f   : > { %v3858_v62 = vpop.permute.xlu1 %3857  ;;  %v3852_v44 = vpop.permute.xlu0 %3851 }
 0x370   : > { %v3950_v23 = vmul.f32 %v6823_v52, %v3858_v62  ;;  %v3947_v19 = vmul.f32 %v6821_v51, %v3852_v44 }
 0x372   : > { %4177 = vrot.lane.b32.xlu1 %v3950_v23, %s5502_s23  ;;  %4171 = vrot.lane.b32.xlu0 %v3947_v19, %s5502_s23 }
 0x373   : > { %v3854_v2 = vpop.permute.xlu1 %3853  ;;  %v7128_v17 = vpop.permute.xlu0 %4031 }
 0x374   : > { %v3948_v46 = vmul.f32 %v6829_v29, %v3854_v2  ;;  %4117 = vst.msk [vmem:[#allocation2 + $0x50] sm:$0xff] %vm359_vm2, %v7128_v17 }
 0x376   : > { %4173 = vrot.lane.b32.xlu1 %v3948_v46, %s5502_s23 }
 0x377   : > { %v7134_v24 = vpop.permute.xlu1 %4033  ;;  %v7136_v10 = vpop.permute.xlu0 %4027 }
 0x378   : > { %4118 = vst.msk [vmem:[#allocation2 + $0x58] sm:$0xff] %vm359_vm2, %v7134_v24  ;;  %4115 = vst.msk [vmem:[#allocation2 + $0x40] sm:$0xff] %vm359_vm2, %v7136_v10 }
 0x37b   : > { %v7142_v51 = vpop.permute.xlu1 %4029  ;;  %v3864_v52 = vpop.permute.xlu0 %3863 }
 0x37c   : > { %4116 = vst.msk [vmem:[#allocation2 + $0x48] sm:$0xff] %vm359_vm2, %v7142_v51  ;;  %v3953_v29 = vmul.f32 %v6832_v14, %v3864_v52 }
 0x37e   : > { %4183 = vrot.lane.b32.xlu0 %v3953_v29, %s5502_s23 }
 0x37f   : > { %v3866_v8 = vpop.permute.xlu1 %3865  ;;  %v3860_v36 = vpop.permute.xlu0 %3859 }
 0x380   : > { %v3954_v0 = vmul.f32 %v6842_v20, %v3866_v8  ;;  %v3951_v57 = vmul.f32 %v6837_v18, %v3860_v36 }
 0x382   : > { %4185 = vrot.lane.b32.xlu1 %v3954_v0, %s5502_s23  ;;  %4179 = vrot.lane.b32.xlu0 %v3951_v57, %s5502_s23 }
 0x383   : > { %v3862_v60 = vpop.permute.xlu1 %3861  ;;  %v7152_v63 = vpop.permute.xlu0 %4039 }
 0x384   : > { %v3952_v12 = vmul.f32 %v6847_v28, %v3862_v60  ;;  %4121 = vst.msk [vmem:[#allocation2 + $0x70] sm:$0xff] %vm359_vm2, %v7152_v63 }
 0x386   : > { %4181 = vrot.lane.b32.xlu1 %v3952_v12, %s5502_s23 }
 0x387   : > { %v7158_v14 = vpop.permute.xlu1 %4041  ;;  %v7160_v39 = vpop.permute.xlu0 %4035 }
 0x388   : > { %4122 = vst.msk [vmem:[#allocation2 + $0x78] sm:$0xff] %vm359_vm2, %v7158_v14  ;;  %4119 = vst.msk [vmem:[#allocation2 + $0x60] sm:$0xff] %vm359_vm2, %v7160_v39 }
 0x38b   : > { %v7166_v18 = vpop.permute.xlu1 %4037  ;;  %v3872_v20 = vpop.permute.xlu0 %3871 }
 0x38c   : > { %4120 = vst.msk [vmem:[#allocation2 + $0x68] sm:$0xff] %vm359_vm2, %v7166_v18  ;;  %v3957_v28 = vmul.f32 %v6851_v40, %v3872_v20 }
 0x38e   : > { %4191 = vrot.lane.b32.xlu0 %v3957_v28, %s5502_s23 }
 0x38f   : > { %v3874_v49 = vpop.permute.xlu1 %3873  ;;  %v3868_v27 = vpop.permute.xlu0 %3867 }
 0x390   : > { %v3958_v53 = vmul.f32 %v6864_v59, %v3874_v49  ;;  %v3955_v42 = vmul.f32 %v6859_v1, %v3868_v27 }
 0x392   : > { %4193 = vrot.lane.b32.xlu1 %v3958_v53, %s5502_s23  ;;  %4187 = vrot.lane.b32.xlu0 %v3955_v42, %s5502_s23 }
 0x393   : > { %v3870_v55 = vpop.permute.xlu1 %3869  ;;  %v7176_v58 = vpop.permute.xlu0 %4047 }
 0x394   : > { %v3956_v56 = vmul.f32 %v6868_v34, %v3870_v55  ;;  %4125 = vst.msk [vmem:[#allocation2 + $0x90] sm:$0xff] %vm359_vm2, %v7176_v58 }
 0x396   : > { %4189 = vrot.lane.b32.xlu1 %v3956_v56, %s5502_s23 }
 0x397   : > { %v7182_v40 = vpop.permute.xlu1 %4049  ;;  %v7184_v25 = vpop.permute.xlu0 %4043 }
 0x398   : > { %4126 = vst.msk [vmem:[#allocation2 + $0x98] sm:$0xff] %vm359_vm2, %v7182_v40  ;;  %4123 = vst.msk [vmem:[#allocation2 + $0x80] sm:$0xff] %vm359_vm2, %v7184_v25 }
 0x39b   : > { %v7190_v1 = vpop.permute.xlu1 %4045  ;;  %v3880_v59 = vpop.permute.xlu0 %3879 }
 0x39c   : > { %4124 = vst.msk [vmem:[#allocation2 + $0x88] sm:$0xff] %vm359_vm2, %v7190_v1  ;;  %v3961_v34 = vmul.f32 %v6874_v6, %v3880_v59 }
 0x39e   : > { %4199 = vrot.lane.b32.xlu0 %v3961_v34, %s5502_s23 }
 0x39f   : > { %v3882_v62 = vpop.permute.xlu1 %3881  ;;  %v3876_v44 = vpop.permute.xlu0 %3875 }
 0x3a0   : > { %v3962_v23 = vmul.f32 %v6884_v30, %v3882_v62  ;;  %v3959_v19 = vmul.f32 %v6880_v47, %v3876_v44 }
 0x3a2   : > { %4201 = vrot.lane.b32.xlu1 %v3962_v23, %s5502_s23  ;;  %4195 = vrot.lane.b32.xlu0 %v3959_v19, %s5502_s23 }
 0x3a3   : > { %v3878_v2 = vpop.permute.xlu1 %3877  ;;  %v7200_v46 = vpop.permute.xlu0 %4055 }
 0x3a4   : > { %v3960_v52 = vmul.f32 %v6888_v33, %v3878_v2  ;;  %4129 = vst.msk [vmem:[#allocation2 + $0xb0] sm:$0xff] %vm359_vm2, %v7200_v46 }
 0x3a6   : > { %4197 = vrot.lane.b32.xlu1 %v3960_v52, %s5502_s23 }
 0x3a7   : > { %v7206_v6 = vpop.permute.xlu1 %4057  ;;  %v7208_v29 = vpop.permute.xlu0 %4051 }
 0x3a8   : > { %4130 = vst.msk [vmem:[#allocation2 + $0xb8] sm:$0xff] %vm359_vm2, %v7206_v6  ;;  %4127 = vst.msk [vmem:[#allocation2 + $0xa0] sm:$0xff] %vm359_vm2, %v7208_v29 }
 0x3ab   : > { %v7214_v47 = vpop.permute.xlu1 %4053  ;;  %v3888_v30 = vpop.permute.xlu0 %3887 }
 0x3ac   : > { %4128 = vst.msk [vmem:[#allocation2 + $0xa8] sm:$0xff] %vm359_vm2, %v7214_v47  ;;  %v3965_v33 = vmul.f32 %v6894_v43, %v3888_v30 }
 0x3ae   : > { %4207 = vrot.lane.b32.xlu0 %v3965_v33, %s5502_s23 }
 0x3af   : > { %v3890_v8 = vpop.permute.xlu1 %3889  ;;  %v3884_v36 = vpop.permute.xlu0 %3883 }
 0x3b0   : > { %v3966_v0 = vmul.f32 %v6902_v9, %v3890_v8  ;;  %v3963_v57 = vmul.f32 %v6898_v22, %v3884_v36 }
 0x3b2   : > { %4209 = vrot.lane.b32.xlu1 %v3966_v0, %s5502_s23  ;;  %4203 = vrot.lane.b32.xlu0 %v3963_v57, %s5502_s23 }
 0x3b3   : > { %v3886_v60 = vpop.permute.xlu1 %3885  ;;  %v7224_v12 = vpop.permute.xlu0 %4063 }
 0x3b4   : > { %v3964_v20 = vmul.f32 %v6909_v15, %v3886_v60  ;;  %4133 = vst.msk [vmem:[#allocation2 + $0xd0] sm:$0xff] %vm359_vm2, %v7224_v12 }
 0x3b6   : > { %4205 = vrot.lane.b32.xlu1 %v3964_v20, %s5502_s23 }
 0x3b7   : > { %v7230_v43 = vpop.permute.xlu1 %4065  ;;  %v7232_v28 = vpop.permute.xlu0 %4059 }
 0x3b8   : > { %4134 = vst.msk [vmem:[#allocation2 + $0xd8] sm:$0xff] %vm359_vm2, %v7230_v43  ;;  %4131 = vst.msk [vmem:[#allocation2 + $0xc0] sm:$0xff] %vm359_vm2, %v7232_v28 }
 0x3bb   : > { %v7238_v22 = vpop.permute.xlu1 %4061  ;;  %v3896_v9 = vpop.permute.xlu0 %3895 }
 0x3bc   : > { %4132 = vst.msk [vmem:[#allocation2 + $0xc8] sm:$0xff] %vm359_vm2, %v7238_v22  ;;  %v3969_v15 = vmul.f32 %v6913_v35, %v3896_v9 }
 0x3be   : > { %4215 = vrot.lane.b32.xlu0 %v3969_v15, %s5502_s23 }
 0x3bf   : > { %v3898_v49 = vpop.permute.xlu1 %3897  ;;  %v3892_v27 = vpop.permute.xlu0 %3891 }
 0x3c0   : > { %v3970_v53 = vmul.f32 %v6921_v32, %v3898_v49  ;;  %v3967_v42 = vmul.f32 %v6918_v61, %v3892_v27 }
 0x3c2   : > { %4217 = vrot.lane.b32.xlu1 %v3970_v53, %s5502_s23  ;;  %4211 = vrot.lane.b32.xlu0 %v3967_v42, %s5502_s23 }
 0x3c3   : > { %v3894_v55 = vpop.permute.xlu1 %3893  ;;  %v7248_v56 = vpop.permute.xlu0 %4071 }
 0x3c4   : > { %v3968_v59 = vmul.f32 %v6925_v7, %v3894_v55  ;;  %4137 = vst.msk [vmem:[#allocation2 + $0xf0] sm:$0xff] %vm359_vm2, %v7248_v56 }
 0x3c6   : > { %4213 = vrot.lane.b32.xlu1 %v3968_v59, %s5502_s23 }
 0x3c7   : > { %v7254_v35 = vpop.permute.xlu1 %4073  ;;  %v7256_v34 = vpop.permute.xlu0 %4067 }
 0x3c8   : > { %4138 = vst.msk [vmem:[#allocation2 + $0xf8] sm:$0xff] %vm359_vm2, %v7254_v35  ;;  %4135 = vst.msk [vmem:[#allocation2 + $0xe0] sm:$0xff] %vm359_vm2, %v7256_v34 }
 0x3cb   : > { %v7262_v61 = vpop.permute.xlu1 %4069  ;;  %v3904_v32 = vpop.permute.xlu0 %3903 }
 0x3cc   : > { %4136 = vst.msk [vmem:[#allocation2 + $0xe8] sm:$0xff] %vm359_vm2, %v7262_v61  ;;  %v3973_v7 = vmul.f32 %v6929_v13, %v3904_v32 }
 0x3ce   : > { %4223 = vrot.lane.b32.xlu0 %v3973_v7, %s5502_s23 }
 0x3cf   : > { %v3906_v62 = vpop.permute.xlu1 %3905  ;;  %v3900_v44 = vpop.permute.xlu0 %3899 }
 0x3d0   : > { %v3974_v23 = vmul.f32 %v7452_v4, %v3906_v62  ;;  %v3971_v19 = vmul.f32 %v6934_v54, %v3900_v44 }
 0x3d2   : > { %4225 = vrot.lane.b32.xlu1 %v3974_v23, %s5502_s23  ;;  %4219 = vrot.lane.b32.xlu0 %v3971_v19, %s5502_s23 }
 0x3d3   : > { %v3902_v2 = vpop.permute.xlu1 %3901  ;;  %v3912_v52 = vpop.permute.xlu0 %3911 }
 0x3d4   : > { %v3972_v30 = vmul.f32 %v6942_v5, %v3902_v2  ;;  %v3977_v4 = vmul.f32 %v7455_v50, %v3912_v52 }
 0x3d6   : > { %4221 = vrot.lane.b32.xlu1 %v3972_v30, %s5502_s23 }
 0x3d7   : > { %v3914_v33 = vpop.permute.xlu1 %3913  ;;  %v3908_v13 = vpop.permute.xlu0 %3907 }
 0x3d8   : > { %v3975_v8 = vmul.f32 %v7457_v37, %v3908_v13  ;;  %v3978_v0 = vmul.f32 %v7459_v31, %v3914_v33 }
 0x3da   : > { %4227 = vrot.lane.b32.xlu0 %v3975_v8, %s5502_s23 }
 0x3db   : > { %v3910_v36 = vpop.permute.xlu1 %3909 }
 0x3dc   : > { %v3976_v54 = vmul.f32 %v6958_v3, %v3910_v36 }
 0x3de   : > { %4229 = vrot.lane.b32.xlu1 %v3976_v54, %s5502_s23  ;;  %4231 = vrot.lane.b32.xlu0 %v3977_v4, %s5502_s23 }
 0x3e0   : > { %v4176_v5 = vpop.permute.xlu0 %4175 }
 0x3e1   : > { %4269 = vst.msk [vmem:[#allocation3 + $0x31] sm:$0xff] %vm359_vm2, %v4176_v5 }
 0x3e2   : > { %4233 = vrot.lane.b32.xlu1 %v3978_v0, %s5502_s23 }
 0x3e4   : > { %v4178_v57 = vpop.permute.xlu1 %4177  ;;  %v4172_v37 = vpop.permute.xlu0 %4171 }
 0x3e5   : > { %4270 = vst.msk [vmem:[#allocation3 + $0x39] sm:$0xff] %vm359_vm2, %v4178_v57  ;;  %4267 = vst.msk [vmem:[#allocation3 + $0x19] sm:$0xff] %vm359_vm2, %v4172_v37 }
 0x3e8   : > { %v4174_v50 = vpop.permute.xlu1 %4173 }
 0x3e9   : > { %4268 = vst.msk [vmem:[#allocation3 + $0x21] sm:$0xff] %vm359_vm2, %v4174_v50 }
 0x3f0   : > { %v4184_v3 = vpop.permute.xlu0 %4183 }
 0x3f1   : > { %4273 = vst.msk [vmem:[#allocation3 + $0x61] sm:$0xff] %vm359_vm2, %v4184_v3 }
 0x3f4   : > { %v4186_v60 = vpop.permute.xlu1 %4185  ;;  %v4180_v20 = vpop.permute.xlu0 %4179 }
 0x3f5   : > { %4274 = vst.msk [vmem:[#allocation3 + $0x69] sm:$0xff] %vm359_vm2, %v4186_v60  ;;  %4271 = vst.msk [vmem:[#allocation3 + $0x49] sm:$0xff] %vm359_vm2, %v4180_v20 }
 0x3f8   : > { %v4182_v31 = vpop.permute.xlu1 %4181 }
 0x3f9   : > { %4272 = vst.msk [vmem:[#allocation3 + $0x51] sm:$0xff] %vm359_vm2, %v4182_v31 }
 0x400   : > { %v4192_v9 = vpop.permute.xlu0 %4191 }
 0x401   : > { %4277 = vst.msk [vmem:[#allocation3 + $0x91] sm:$0xff] %vm359_vm2, %v4192_v9 }
 0x404   : > { %v4194_v15 = vpop.permute.xlu1 %4193  ;;  %v4188_v49 = vpop.permute.xlu0 %4187 }
 0x405   : > { %4278 = vst.msk [vmem:[#allocation3 + $0x99] sm:$0xff] %vm359_vm2, %v4194_v15  ;;  %4275 = vst.msk [vmem:[#allocation3 + $0x79] sm:$0xff] %vm359_vm2, %v4188_v49 }
 0x408   : > { %v4190_v27 = vpop.permute.xlu1 %4189 }
 0x409   : > { %4276 = vst.msk [vmem:[#allocation3 + $0x81] sm:$0xff] %vm359_vm2, %v4190_v27 }
 0x410   : > { %v4200_v53 = vpop.permute.xlu0 %4199 }
 0x411   : > { %4281 = vst.msk [vmem:[#allocation3 + $0xc1] sm:$0xff] %vm359_vm2, %v4200_v53 }
 0x414   : > { %v4202_v42 = vpop.permute.xlu1 %4201  ;;  %v4196_v55 = vpop.permute.xlu0 %4195 }
 0x415   : > { %4282 = vst.msk [vmem:[#allocation3 + $0xc9] sm:$0xff] %vm359_vm2, %v4202_v42  ;;  %4279 = vst.msk [vmem:[#allocation3 + $0xa9] sm:$0xff] %vm359_vm2, %v4196_v55 }
 0x418   : > { %v4198_v59 = vpop.permute.xlu1 %4197 }
 0x419   : > { %4280 = vst.msk [vmem:[#allocation3 + $0xb1] sm:$0xff] %vm359_vm2, %v4198_v59 }
 0x420   : > { %v4208_v32 = vpop.permute.xlu0 %4207 }
 0x421   : > { %4285 = vst.msk [vmem:[#allocation3 + $0xf1] sm:$0xff] %vm359_vm2, %v4208_v32 }
 0x424   : > { %v4210_v7 = vpop.permute.xlu1 %4209  ;;  %v4204_v62 = vpop.permute.xlu0 %4203 }
 0x425   : > { %4286 = vst.msk [vmem:[#allocation3 + $0xf9] sm:$0xff] %vm359_vm2, %v4210_v7  ;;  %4283 = vst.msk [vmem:[#allocation3 + $0xd9] sm:$0xff] %vm359_vm2, %v4204_v62 }
 0x428   : > { %v4206_v44 = vpop.permute.xlu1 %4205 }
 0x429   : > { %4284 = vst.msk [vmem:[#allocation3 + $0xe1] sm:$0xff] %vm359_vm2, %v4206_v44 }
 0x430   : > { %v4216_v23 = vpop.permute.xlu0 %4215 }
 0x431   : > { %4289 = vst.msk [vmem:[#allocation3 + $0x121] sm:$0xff] %vm359_vm2, %v4216_v23 }
 0x434   : > { %v4218_v19 = vpop.permute.xlu1 %4217  ;;  %v4212_v2 = vpop.permute.xlu0 %4211 }
 0x435   : > { %4290 = vst.msk [vmem:[#allocation3 + $0x129] sm:$0xff] %vm359_vm2, %v4218_v19  ;;  %4287 = vst.msk [vmem:[#allocation3 + $0x109] sm:$0xff] %vm359_vm2, %v4212_v2 }
 0x438   : > { %v4214_v52 = vpop.permute.xlu1 %4213 }
 0x439   : > { %4288 = vst.msk [vmem:[#allocation3 + $0x111] sm:$0xff] %vm359_vm2, %v4214_v52 }
 0x440   : > { %v4224_v30 = vpop.permute.xlu0 %4223 }
 0x441   : > { %4293 = vst.msk [vmem:[#allocation3 + $0x151] sm:$0xff] %vm359_vm2, %v4224_v30 }
 0x444   : > { %v4226_v33 = vpop.permute.xlu1 %4225  ;;  %v4220_v13 = vpop.permute.xlu0 %4219 }
 0x445   : > { %4294 = vst.msk [vmem:[#allocation3 + $0x159] sm:$0xff] %vm359_vm2, %v4226_v33  ;;  %4291 = vst.msk [vmem:[#allocation3 + $0x139] sm:$0xff] %vm359_vm2, %v4220_v13 }
 0x448   : > { %v4222_v8 = vpop.permute.xlu1 %4221 }
 0x449   : > { %4292 = vst.msk [vmem:[#allocation3 + $0x141] sm:$0xff] %vm359_vm2, %v4222_v8 }
 0x44c   : > { %v4228_v36 = vpop.permute.xlu0 %4227 }
 0x44d   : > { %4295 = vst.msk [vmem:[#allocation3 + $0x169] sm:$0xff] %vm359_vm2, %v4228_v36 }
 0x450   : > { %v4230_v4 = vpop.permute.xlu1 %4229  ;;  %v4232_v54 = vpop.permute.xlu0 %4231 }
 0x451   : > { %4296 = vst.msk [vmem:[#allocation3 + $0x171] sm:$0xff] %vm359_vm2, %v4230_v4  ;;  %4297 = vst.msk [vmem:[#allocation3 + $0x181] sm:$0xff] %vm359_vm2, %v4232_v54  ;;  %4302 = sbr.rel (%p4647_p8) target bundleno = 1126 (0x466), region = 36 }
 0x454   : > { %v4234_v0 = vpop.permute.xlu1 %4233 }
 0x455   : > { %4298 = vst.msk [vmem:[#allocation3 + $0x189] sm:$0xff] %vm359_vm2, %v4234_v0 }
 0x456   : > { %4303 = vst.msk [vmem:[%s5555_s21] sm:$0xff] %vm359_vm2, %v7089_v26  ;;  %4304 = vst.msk [vmem:[%s5555_s21 + $0x8] sm:$0xff] %vm359_vm2, %v7099_v48 }
 0x457   : > { %4305 = vst.msk [vmem:[%s5555_s21 + $0x10] sm:$0xff] %vm359_vm2, %v7083_v21  ;;  %4306 = vst.msk [vmem:[%s5555_s21 + $0x18] sm:$0xff] %vm359_vm2, %v7091_v38 }
 0x458   : > { %4307 = vst.msk [vmem:[%s5555_s21 + $0x20] sm:$0xff] %vm359_vm2, %v7111_v16  ;;  %4308 = vst.msk [vmem:[%s5555_s21 + $0x28] sm:$0xff] %vm359_vm2, %v7118_v45 }
 0x459   : > { %4309 = vst.msk [vmem:[%s5555_s21 + $0x30] sm:$0xff] %vm359_vm2, %v7101_v41  ;;  %4310 = vst.msk [vmem:[%s5555_s21 + $0x38] sm:$0xff] %vm359_vm2, %v7109_v11 }
 0x45a   : > { %4311 = vst.msk [vmem:[%s5555_s21 + $0x40] sm:$0xff] %vm359_vm2, %v7136_v10  ;;  %4312 = vst.msk [vmem:[%s5555_s21 + $0x48] sm:$0xff] %vm359_vm2, %v7142_v51 }
 0x45b   : > { %4313 = vst.msk [vmem:[%s5555_s21 + $0x50] sm:$0xff] %vm359_vm2, %v7128_v17  ;;  %4314 = vst.msk [vmem:[%s5555_s21 + $0x58] sm:$0xff] %vm359_vm2, %v7134_v24 }
 0x45c   : > { %4315 = vst.msk [vmem:[%s5555_s21 + $0x60] sm:$0xff] %vm359_vm2, %v7160_v39  ;;  %4316 = vst.msk [vmem:[%s5555_s21 + $0x68] sm:$0xff] %vm359_vm2, %v7166_v18 }
 0x45d   : > { %4317 = vst.msk [vmem:[%s5555_s21 + $0x70] sm:$0xff] %vm359_vm2, %v7152_v63  ;;  %4318 = vst.msk [vmem:[%s5555_s21 + $0x78] sm:$0xff] %vm359_vm2, %v7158_v14 }
 0x45e   : > { %4319 = vst.msk [vmem:[%s5555_s21 + $0x80] sm:$0xff] %vm359_vm2, %v7184_v25  ;;  %4320 = vst.msk [vmem:[%s5555_s21 + $0x88] sm:$0xff] %vm359_vm2, %v7190_v1 }
 0x45f   : > { %4321 = vst.msk [vmem:[%s5555_s21 + $0x90] sm:$0xff] %vm359_vm2, %v7176_v58  ;;  %4322 = vst.msk [vmem:[%s5555_s21 + $0x98] sm:$0xff] %vm359_vm2, %v7182_v40 }
 0x460   : > { %4323 = vst.msk [vmem:[%s5555_s21 + $0xa0] sm:$0xff] %vm359_vm2, %v7208_v29  ;;  %4324 = vst.msk [vmem:[%s5555_s21 + $0xa8] sm:$0xff] %vm359_vm2, %v7214_v47 }
 0x461   : > { %4325 = vst.msk [vmem:[%s5555_s21 + $0xb0] sm:$0xff] %vm359_vm2, %v7200_v46  ;;  %4326 = vst.msk [vmem:[%s5555_s21 + $0xb8] sm:$0xff] %vm359_vm2, %v7206_v6 }
 0x462   : > { %4327 = vst.msk [vmem:[%s5555_s21 + $0xc0] sm:$0xff] %vm359_vm2, %v7232_v28  ;;  %4328 = vst.msk [vmem:[%s5555_s21 + $0xc8] sm:$0xff] %vm359_vm2, %v7238_v22 }
 0x463   : > { %4329 = vst.msk [vmem:[%s5555_s21 + $0xd0] sm:$0xff] %vm359_vm2, %v7224_v12  ;;  %4330 = vst.msk [vmem:[%s5555_s21 + $0xd8] sm:$0xff] %vm359_vm2, %v7230_v43 }
 0x464   : > { %4331 = vst.msk [vmem:[%s5555_s21 + $0xe0] sm:$0xff] %vm359_vm2, %v7256_v34  ;;  %4332 = vst.msk [vmem:[%s5555_s21 + $0xe8] sm:$0xff] %vm359_vm2, %v7262_v61 }
 0x465   : > { %4333 = vst.msk [vmem:[%s5555_s21 + $0xf0] sm:$0xff] %vm359_vm2, %v7248_v56  ;;  %4334 = vst.msk [vmem:[%s5555_s21 + $0xf8] sm:$0xff] %vm359_vm2, %v7254_v35 }
 0x466 PF: > { %s12_s13 = sadd.s32 1, %s5497_s13   ;;  %s7461_s9 = smov %s5489_s11 }
 0x467   : > { %p9_p9 = scmp.ge.s32.totalorder %s12_s13, 18   ;;  %s7462_s10 = smov %s5493_s12 }
 0x468   : > { %s7463_s11 = smov %s7466_s14  ;;  %s7464_s12 = smov %s7470_s15 }
 0x469   :  { %11 = sbr.rel (!%p9_p9) target bundleno = 3 (0x3), region = 76 }

// kernel: convlstm_seg_forward.5
= control target key start
LH: loop header
LB: loop body
LE: loop exit
PB: predicated region body
PF: predicated region fallthrough
CT: control target
= control target key end

     0   :  { %vm18_vm0 = vcmask 261120   ;;  %vm21_vm1 = vcmask 254976   ;;  %v7079_v1 = vmov 0.0   ;;  %s10519_s1 = inlined_call_operand.vmem [shape: bf16[3,3,32,128], index: 1, kind: input, shape index: {}]   ;;  %s10520_s0 = inlined_call_operand.vmem [shape: f32[2,256,32], index: 0, kind: input, shape index: {}]   ;;  %s10521_s2 = inlined_call_operand.vmem [shape: f32[1,128], index: 2, kind: input, shape index: {}]   ;;  %s10522_s3 = inlined_call_operand.vmem [shape: f32[1,128], index: 3, kind: input, shape index: {}]   ;;  %s10523_s4 = inlined_call_operand.vmem [shape: f32[2,256,128], index: 4, kind: output, shape index: {}]  }
   0x1   :  { %v7108_v0 = vld [vmem:[%s10519_s1 + $0x18] sm:$0xff]   ;;  %19 = vst.msk [vmem:[#allocation2] sm:$0xff] %vm18_vm0, %v7079_v1  ;;  %20 = vst.msk [vmem:[#allocation2 + $0x8] sm:$0xff] %vm18_vm0, %v7079_v1  ;;  %v7060_v2 = vld [vmem:[%s10519_s1 + $0x10] sm:$0xff]  }
   0x2   :  { %22 = vst.msk [vmem:[#allocation2 + $0x10] sm:$0x3] %vm21_vm1, %v7079_v1  ;;  %25 = vst.msk [vmem:[#allocation2 + $0x28] sm:$0x3] %vm21_vm1, %v7079_v1  ;;  %6442 = vmatprep.subr.bf16.mxu0 %v7108_v0  ;;  %7054 = vmatprep.subr.bf16.mxu1 %v7108_v0  ;;  %v128_v3 = vld [vmem:[%s10520_s0] sm:$0xff]  ;;  %v129_v4 = vld [vmem:[%s10520_s0 + $0x8] sm:$0xff] }
   0x3   :  { %23 = vst.msk [vmem:[#allocation2 + $0x18] sm:$0xff] %vm18_vm0, %v7079_v1  ;;  %24 = vst.msk [vmem:[#allocation2 + $0x20] sm:$0xff] %vm18_vm0, %v7079_v1  ;;  %v160_v5 = vld [vmem:[%s10520_s0 + $0x100] sm:$0xff]  ;;  %6443 = vmatpush3.bf16.msra.mxu0 %v7108_v0  ;;  %7056 = vmatpush3.bf16.msra.mxu1 %v7108_v0  ;;  %v161_v6 = vld [vmem:[%s10520_s0 + $0x108] sm:$0xff] }
   0x4   :  { %26 = vst.msk [vmem:[#allocation2 + $0x30] sm:$0xff] %vm18_vm0, %v7079_v1  ;;  %27 = vst.msk [vmem:[#allocation2 + $0x38] sm:$0xff] %vm18_vm0, %v7079_v1  ;;  %6444 = vmatprep.subr.bf16.mxu0 %v7060_v2  ;;  %7055 = vmatprep.subr.bf16.mxu1 %v7060_v2  ;;  %v7061_v7 = vld [vmem:[%s10519_s1 + $0x8] sm:$0xff]   ;;  %v130_v9 = vld [vmem:[%s10520_s0 + $0x10] sm:$0xff] }
   0x5   :  { %28 = vst.msk [vmem:[#allocation2 + $0x40] sm:$0x3] %vm21_vm1, %v7079_v1  ;;  %31 = vst.msk [vmem:[#allocation2 + $0x58] sm:$0x3] %vm21_vm1, %v7079_v1  ;;  %v7062_v8 = vld [vmem:[%s10519_s1 + $0x28] sm:$0xff]   ;;  %v131_v10 = vld [vmem:[%s10520_s0 + $0x18] sm:$0xff] }
   0x6   :  { %29 = vst.msk [vmem:[#allocation2 + $0x48] sm:$0xff] %vm18_vm0, %v7079_v1  ;;  %30 = vst.msk [vmem:[#allocation2 + $0x50] sm:$0xff] %vm18_vm0, %v7079_v1  ;;  %v162_v11 = vld [vmem:[%s10520_s0 + $0x110] sm:$0xff]  ;;  %v163_v12 = vld [vmem:[%s10520_s0 + $0x118] sm:$0xff] }
   0x7   :  { %32 = vst.msk [vmem:[#allocation2 + $0x60] sm:$0xff] %vm18_vm0, %v7079_v1  ;;  %33 = vst.msk [vmem:[#allocation2 + $0x68] sm:$0xff] %vm18_vm0, %v7079_v1  ;;  %v132_v13 = vld [vmem:[%s10520_s0 + $0x20] sm:$0xff]  ;;  %6445 = vmatpush3.bf16.msra.mxu0 %v7060_v2  ;;  %7057 = vmatpush3.bf16.msra.mxu1 %v7060_v2  ;;  %v133_v19 = vld [vmem:[%s10520_s0 + $0x28] sm:$0xff] }
   0x8   :  { %34 = vst.msk [vmem:[#allocation2 + $0x70] sm:$0x3] %vm21_vm1, %v7079_v1  ;;  %37 = vst.msk [vmem:[#allocation2 + $0x88] sm:$0x3] %vm21_vm1, %v7079_v1  ;;  %v357_v14 = vld [vmem:[#allocation2 + $0x1] sm:$0xff]  ;;  %6510 = vmatprep.subr.bf16.mxu1 %v7061_v7  ;;  %6578 = vmatprep.subr.bf16.mxu0 %v7062_v8  ;;  %v134_v23 = vld [vmem:[%s10520_s0 + $0x30] sm:$0xff] }
   0x9   :  { %35 = vst.msk [vmem:[#allocation2 + $0x78] sm:$0xff] %vm18_vm0, %v7079_v1  ;;  %36 = vst.msk [vmem:[#allocation2 + $0x80] sm:$0xff] %vm18_vm0, %v7079_v1  ;;  %v358_v15 = vld [vmem:[#allocation2 + $0x9] sm:$0xff]  ;;  %v164_v20 = vld [vmem:[%s10520_s0 + $0x120] sm:$0xff] }
   0xa   :  { %38 = vst.msk [vmem:[#allocation2 + $0x90] sm:$0xff] %vm18_vm0, %v7079_v1  ;;  %39 = vst.msk [vmem:[#allocation2 + $0x98] sm:$0xff] %vm18_vm0, %v7079_v1  ;;  %v421_v17 = vpack.c.bf16 %v358_v15, %v357_v14  ;;  %v165_v22 = vld [vmem:[%s10520_s0 + $0x128] sm:$0xff]  ;;  %v135_v24 = vld [vmem:[%s10520_s0 + $0x38] sm:$0xff] }
   0xb   :  { %40 = vst.msk [vmem:[#allocation2 + $0xa0] sm:$0x3] %vm21_vm1, %v7079_v1  ;;  %43 = vst.msk [vmem:[#allocation2 + $0xb8] sm:$0x3] %vm21_vm1, %v7079_v1  ;;  %v166_v30 = vld [vmem:[%s10520_s0 + $0x130] sm:$0xff]  ;;  %v167_v31 = vld [vmem:[%s10520_s0 + $0x138] sm:$0xff] }
   0xc   :  { %41 = vst.msk [vmem:[#allocation2 + $0xa8] sm:$0xff] %vm18_vm0, %v7079_v1  ;;  %42 = vst.msk [vmem:[#allocation2 + $0xb0] sm:$0xff] %vm18_vm0, %v7079_v1  ;;  %6446 = vmatprep.mubr.msk.bf16.mxu0 %vm18_vm0, %v421_v17  ;;  %v136_v33 = vld [vmem:[%s10520_s0 + $0x40] sm:$0xff]  ;;  %v137_v34 = vld [vmem:[%s10520_s0 + $0x48] sm:$0xff] }
   0xd   :  { %44 = vst.msk [vmem:[#allocation2 + $0xc0] sm:$0xff] %vm18_vm0, %v7079_v1  ;;  %45 = vst.msk [vmem:[#allocation2 + $0xc8] sm:$0xff] %vm18_vm0, %v7079_v1  ;;  %v168_v35 = vld [vmem:[%s10520_s0 + $0x140] sm:$0xff]  ;;  %v169_v38 = vld [vmem:[%s10520_s0 + $0x148] sm:$0xff] }
   0xe   :  { %46 = vst.msk [vmem:[#allocation2 + $0xd0] sm:$0x3] %vm21_vm1, %v7079_v1  ;;  %49 = vst.msk [vmem:[#allocation2 + $0xe8] sm:$0x3] %vm21_vm1, %v7079_v1  ;;  %v138_v44 = vld [vmem:[%s10520_s0 + $0x50] sm:$0xff]  ;;  %v139_v45 = vld [vmem:[%s10520_s0 + $0x58] sm:$0xff] }
   0xf   :  { %47 = vst.msk [vmem:[#allocation2 + $0xd8] sm:$0xff] %vm18_vm0, %v7079_v1  ;;  %48 = vst.msk [vmem:[#allocation2 + $0xe0] sm:$0xff] %vm18_vm0, %v7079_v1  ;;  %v170_v46 = vld [vmem:[%s10520_s0 + $0x150] sm:$0xff]  ;;  %v171_v49 = vld [vmem:[%s10520_s0 + $0x158] sm:$0xff] }
  0x10   :  { %50 = vst.msk [vmem:[#allocation2 + $0xf0] sm:$0xff] %vm18_vm0, %v7079_v1  ;;  %51 = vst.msk [vmem:[#allocation2 + $0xf8] sm:$0xff] %vm18_vm0, %v7079_v1  ;;  %v140_v56 = vld [vmem:[%s10520_s0 + $0x60] sm:$0xff]  ;;  %v141_v57 = vld [vmem:[%s10520_s0 + $0x68] sm:$0xff] }
  0x11   :  { %52 = vst.msk [vmem:[#allocation2 + $0x100] sm:$0x3] %vm21_vm1, %v7079_v1  ;;  %55 = vst.msk [vmem:[#allocation2 + $0x118] sm:$0x3] %vm21_vm1, %v7079_v1  ;;  %v172_v58 = vld [vmem:[%s10520_s0 + $0x160] sm:$0xff]  ;;  %v173_v61 = vld [vmem:[%s10520_s0 + $0x168] sm:$0xff] }
  0x12   :  { %53 = vst.msk [vmem:[#allocation2 + $0x108] sm:$0xff] %vm18_vm0, %v7079_v1  ;;  %54 = vst.msk [vmem:[#allocation2 + $0x110] sm:$0xff] %vm18_vm0, %v7079_v1  ;;  %v177_v15 = vld [vmem:[%s10520_s0 + $0x188] sm:$0xff] }
  0x13   :  { %56 = vst.msk [vmem:[#allocation2 + $0x120] sm:$0xff] %vm18_vm0, %v7079_v1  ;;  %57 = vst.msk [vmem:[#allocation2 + $0x128] sm:$0xff] %vm18_vm0, %v7079_v1 }
  0x14   :  { %58 = vst.msk [vmem:[#allocation2 + $0x130] sm:$0x3] %vm21_vm1, %v7079_v1  ;;  %61 = vst.msk [vmem:[#allocation2 + $0x148] sm:$0x3] %vm21_vm1, %v7079_v1 }
  0x15   :  { %59 = vst.msk [vmem:[#allocation2 + $0x138] sm:$0xff] %vm18_vm0, %v7079_v1  ;;  %60 = vst.msk [vmem:[#allocation2 + $0x140] sm:$0xff] %vm18_vm0, %v7079_v1 }
  0x16   :  { %62 = vst.msk [vmem:[#allocation2 + $0x150] sm:$0xff] %vm18_vm0, %v7079_v1  ;;  %63 = vst.msk [vmem:[#allocation2 + $0x158] sm:$0xff] %vm18_vm0, %v7079_v1 }
  0x17   :  { %64 = vst.msk [vmem:[#allocation2 + $0x160] sm:$0x3] %vm21_vm1, %v7079_v1  ;;  %67 = vst.msk [vmem:[#allocation2 + $0x178] sm:$0x3] %vm21_vm1, %v7079_v1 }
  0x18   :  { %65 = vst.msk [vmem:[#allocation2 + $0x168] sm:$0xff] %vm18_vm0, %v7079_v1  ;;  %66 = vst.msk [vmem:[#allocation2 + $0x170] sm:$0xff] %vm18_vm0, %v7079_v1 }
  0x19   :  { %68 = vst.msk [vmem:[#allocation2 + $0x180] sm:$0xff] %vm18_vm0, %v7079_v1  ;;  %69 = vst.msk [vmem:[#allocation2 + $0x188] sm:$0xff] %vm18_vm0, %v7079_v1 }
  0x1a   :  { %70 = vst.msk [vmem:[#allocation2 + $0x190] sm:$0x3] %vm21_vm1, %v7079_v1  ;;  %73 = vst.msk [vmem:[#allocation2 + $0x1a8] sm:$0x3] %vm21_vm1, %v7079_v1 }
  0x1b   :  { %71 = vst.msk [vmem:[#allocation2 + $0x198] sm:$0xff] %vm18_vm0, %v7079_v1  ;;  %72 = vst.msk [vmem:[#allocation2 + $0x1a0] sm:$0xff] %vm18_vm0, %v7079_v1 }
  0x1c   :  { %74 = vst.msk [vmem:[#allocation2 + $0x1b0] sm:$0xff] %vm18_vm0, %v7079_v1  ;;  %75 = vst.msk [vmem:[#allocation2 + $0x1b8] sm:$0xff] %vm18_vm0, %v7079_v1 }
  0x1d   :  { %76 = vst.msk [vmem:[#allocation2 + $0x1c0] sm:$0x3] %vm21_vm1, %v7079_v1  ;;  %79 = vst.msk [vmem:[#allocation2 + $0x1d8] sm:$0x3] %vm21_vm1, %v7079_v1 }
  0x1e   :  { %77 = vst.msk [vmem:[#allocation2 + $0x1c8] sm:$0xff] %vm18_vm0, %v7079_v1  ;;  %78 = vst.msk [vmem:[#allocation2 + $0x1d0] sm:$0xff] %vm18_vm0, %v7079_v1 }
  0x1f   :  { %80 = vst.msk [vmem:[#allocation2 + $0x1e0] sm:$0xff] %vm18_vm0, %v7079_v1  ;;  %81 = vst.msk [vmem:[#allocation2 + $0x1e8] sm:$0xff] %vm18_vm0, %v7079_v1 }
  0x20   :  { %82 = vst.msk [vmem:[#allocation2 + $0x1f0] sm:$0x3] %vm21_vm1, %v7079_v1  ;;  %85 = vst.msk [vmem:[#allocation2 + $0x208] sm:$0x3] %vm21_vm1, %v7079_v1 }
  0x21   :  { %83 = vst.msk [vmem:[#allocation2 + $0x1f8] sm:$0xff] %vm18_vm0, %v7079_v1  ;;  %84 = vst.msk [vmem:[#allocation2 + $0x200] sm:$0xff] %vm18_vm0, %v7079_v1 }
  0x22   :  { %86 = vst.msk [vmem:[#allocation2 + $0x210] sm:$0xff] %vm18_vm0, %v7079_v1  ;;  %87 = vst.msk [vmem:[#allocation2 + $0x218] sm:$0xff] %vm18_vm0, %v7079_v1 }
  0x23   :  { %88 = vst.msk [vmem:[#allocation2 + $0x220] sm:$0x3] %vm21_vm1, %v7079_v1  ;;  %91 = vst.msk [vmem:[#allocation2 + $0x238] sm:$0x3] %vm21_vm1, %v7079_v1  ;;  %v389_v16 = vld [vmem:[#allocation2 + $0x1b1] sm:$0xff] }
  0x24   :  { %89 = vst.msk [vmem:[#allocation2 + $0x228] sm:$0xff] %vm18_vm0, %v7079_v1  ;;  %90 = vst.msk [vmem:[#allocation2 + $0x230] sm:$0xff] %vm18_vm0, %v7079_v1  ;;  %v390_v18 = vld [vmem:[#allocation2 + $0x1b9] sm:$0xff] }
  0x25   :  { %92 = vst.msk [vmem:[#allocation2 + $0x240] sm:$0xff] %vm18_vm0, %v7079_v1  ;;  %93 = vst.msk [vmem:[#allocation2 + $0x248] sm:$0xff] %vm18_vm0, %v7079_v1  ;;  %v437_v21 = vpack.c.bf16 %v390_v18, %v389_v16 }
  0x26   :  { %94 = vst.msk [vmem:[#allocation2 + $0x250] sm:$0x3] %vm21_vm1, %v7079_v1  ;;  %97 = vst.msk [vmem:[#allocation2 + $0x268] sm:$0x3] %vm21_vm1, %v7079_v1 }
  0x27   :  { %95 = vst.msk [vmem:[#allocation2 + $0x258] sm:$0xff] %vm18_vm0, %v7079_v1  ;;  %96 = vst.msk [vmem:[#allocation2 + $0x260] sm:$0xff] %vm18_vm0, %v7079_v1  ;;  %6478 = vmatprep.mubr.msk.bf16.mxu1 %vm18_vm0, %v437_v21  ;;  %v7064_v21 = vld [vmem:[%s10519_s1 + $0x20] sm:$0xff]  }
  0x28   :  { %98 = vst.msk [vmem:[#allocation2 + $0x270] sm:$0xff] %vm18_vm0, %v7079_v1  ;;  %99 = vst.msk [vmem:[#allocation2 + $0x278] sm:$0xff] %vm18_vm0, %v7079_v1 }
  0x29   :  { %100 = vst.msk [vmem:[#allocation2 + $0x280] sm:$0x3] %vm21_vm1, %v7079_v1  ;;  %103 = vst.msk [vmem:[#allocation2 + $0x298] sm:$0x3] %vm21_vm1, %v7079_v1 }
  0x2a   :  { %101 = vst.msk [vmem:[#allocation2 + $0x288] sm:$0xff] %vm18_vm0, %v7079_v1  ;;  %102 = vst.msk [vmem:[#allocation2 + $0x290] sm:$0xff] %vm18_vm0, %v7079_v1 }
  0x2b   :  { %104 = vst.msk [vmem:[#allocation2 + $0x2a0] sm:$0xff] %vm18_vm0, %v7079_v1  ;;  %105 = vst.msk [vmem:[#allocation2 + $0x2a8] sm:$0xff] %vm18_vm0, %v7079_v1 }
  0x2c   :  { %106 = vst.msk [vmem:[#allocation2 + $0x2b0] sm:$0x3] %vm21_vm1, %v7079_v1  ;;  %109 = vst.msk [vmem:[#allocation2 + $0x2c8] sm:$0x3] %vm21_vm1, %v7079_v1 }
  0x2d   :  { %107 = vst.msk [vmem:[#allocation2 + $0x2b8] sm:$0xff] %vm18_vm0, %v7079_v1  ;;  %108 = vst.msk [vmem:[#allocation2 + $0x2c0] sm:$0xff] %vm18_vm0, %v7079_v1 }
  0x2e   :  { %110 = vst.msk [vmem:[#allocation2 + $0x2d0] sm:$0xff] %vm18_vm0, %v7079_v1  ;;  %111 = vst.msk [vmem:[#allocation2 + $0x2d8] sm:$0xff] %vm18_vm0, %v7079_v1 }
  0x2f   :  { %112 = vst.msk [vmem:[#allocation2 + $0x2e0] sm:$0x3] %vm21_vm1, %v7079_v1  ;;  %115 = vst.msk [vmem:[#allocation2 + $0x2f8] sm:$0x3] %vm21_vm1, %v7079_v1 }
  0x30   :  { %113 = vst.msk [vmem:[#allocation2 + $0x2e8] sm:$0xff] %vm18_vm0, %v7079_v1  ;;  %114 = vst.msk [vmem:[#allocation2 + $0x2f0] sm:$0xff] %vm18_vm0, %v7079_v1 }
  0x31   :  { %116 = vst.msk [vmem:[#allocation2 + $0x300] sm:$0xff] %vm18_vm0, %v7079_v1  ;;  %117 = vst.msk [vmem:[#allocation2 + $0x308] sm:$0xff] %vm18_vm0, %v7079_v1 }
  0x32   :  { %118 = vst.msk [vmem:[#allocation2 + $0x310] sm:$0x3] %vm21_vm1, %v7079_v1  ;;  %121 = vst.msk [vmem:[#allocation2 + $0x328] sm:$0x3] %vm21_vm1, %v7079_v1 }
  0x33   :  { %119 = vst.msk [vmem:[#allocation2 + $0x318] sm:$0xff] %vm18_vm0, %v7079_v1  ;;  %120 = vst.msk [vmem:[#allocation2 + $0x320] sm:$0xff] %vm18_vm0, %v7079_v1 }
  0x34   :  { %122 = vst.msk [vmem:[#allocation2 + $0x330] sm:$0xff] %vm18_vm0, %v7079_v1  ;;  %123 = vst.msk [vmem:[#allocation2 + $0x338] sm:$0xff] %vm18_vm0, %v7079_v1 }
  0x35   :  { %124 = vst.msk [vmem:[#allocation2 + $0x340] sm:$0x3] %vm21_vm1, %v7079_v1  ;;  %127 = vst.msk [vmem:[#allocation2 + $0x358] sm:$0x3] %vm21_vm1, %v7079_v1 }
  0x36   :  { %125 = vst.msk [vmem:[#allocation2 + $0x348] sm:$0xff] %vm18_vm0, %v7079_v1  ;;  %126 = vst.msk [vmem:[#allocation2 + $0x350] sm:$0xff] %vm18_vm0, %v7079_v1 }
  0x37   :  { %193 = vst.msk [vmem:[#allocation2 + $0x19] sm:$0xff] %vm18_vm0, %v128_v3  ;;  %194 = vst.msk [vmem:[#allocation2 + $0x21] sm:$0xff] %vm18_vm0, %v129_v4  ;;  %v142_v3 = vld [vmem:[%s10520_s0 + $0x70] sm:$0xff]  ;;  %v143_v4 = vld [vmem:[%s10520_s0 + $0x78] sm:$0xff] }
  0x38   :  { %225 = vst.msk [vmem:[#allocation2 + $0x1c9] sm:$0xff] %vm18_vm0, %v160_v5  ;;  %226 = vst.msk [vmem:[#allocation2 + $0x1d1] sm:$0xff] %vm18_vm0, %v161_v6  ;;  %v174_v5 = vld [vmem:[%s10520_s0 + $0x170] sm:$0xff]  ;;  %v175_v6 = vld [vmem:[%s10520_s0 + $0x178] sm:$0xff] }
  0x39   :  { %195 = vst.msk [vmem:[#allocation2 + $0x31] sm:$0xff] %vm18_vm0, %v130_v9  ;;  %196 = vst.msk [vmem:[#allocation2 + $0x39] sm:$0xff] %vm18_vm0, %v131_v10 }
  0x3a   :  { %227 = vst.msk [vmem:[#allocation2 + $0x1e1] sm:$0xff] %vm18_vm0, %v162_v11  ;;  %228 = vst.msk [vmem:[#allocation2 + $0x1e9] sm:$0xff] %vm18_vm0, %v163_v12  ;;  %v145_v12 = vld [vmem:[%s10520_s0 + $0x88] sm:$0xff] }
  0x3b   :  { %197 = vst.msk [vmem:[#allocation2 + $0x49] sm:$0xff] %vm18_vm0, %v132_v13  ;;  %198 = vst.msk [vmem:[#allocation2 + $0x51] sm:$0xff] %vm18_vm0, %v133_v19  ;;  %v176_v13 = vld [vmem:[%s10520_s0 + $0x180] sm:$0xff] }
  0x3c   :  { %229 = vst.msk [vmem:[#allocation2 + $0x1f9] sm:$0xff] %vm18_vm0, %v164_v20  ;;  %230 = vst.msk [vmem:[#allocation2 + $0x201] sm:$0xff] %vm18_vm0, %v165_v22  ;;  %v7063_v19 = vld [vmem:[%s10519_s1] sm:$0xff]   ;;  %v146_v22 = vld [vmem:[%s10520_s0 + $0x90] sm:$0xff] }
  0x3d   :  { %199 = vst.msk [vmem:[#allocation2 + $0x61] sm:$0xff] %vm18_vm0, %v134_v23  ;;  %200 = vst.msk [vmem:[#allocation2 + $0x69] sm:$0xff] %vm18_vm0, %v135_v24 }
  0x3e   :  { %v359_v25 = vld [vmem:[#allocation2 + $0x19] sm:$0xff]  ;;  %v360_v26 = vld [vmem:[#allocation2 + $0x21] sm:$0xff]  ;;  %231 = vst.msk [vmem:[#allocation2 + $0x211] sm:$0xff] %vm18_vm0, %v166_v30  ;;  %232 = vst.msk [vmem:[#allocation2 + $0x219] sm:$0xff] %vm18_vm0, %v167_v31 }
  0x3f   :  { %v391_v27 = vld [vmem:[#allocation2 + $0x1c9] sm:$0xff]  ;;  %v422_v28 = vpack.c.bf16 %v360_v26, %v359_v25  ;;  %v392_v29 = vld [vmem:[#allocation2 + $0x1d1] sm:$0xff]  ;;  %201 = vst.msk [vmem:[#allocation2 + $0x79] sm:$0xff] %vm18_vm0, %v136_v33  ;;  %202 = vst.msk [vmem:[#allocation2 + $0x81] sm:$0xff] %vm18_vm0, %v137_v34 }
  0x40   :  { %v438_v32 = vpack.c.bf16 %v392_v29, %v391_v27  ;;  %v361_v36 = vld [vmem:[#allocation2 + $0x31] sm:$0xff]  ;;  %v362_v37 = vld [vmem:[#allocation2 + $0x39] sm:$0xff]  ;;  %233 = vst.msk [vmem:[#allocation2 + $0x229] sm:$0xff] %vm18_vm0, %v168_v35  ;;  %234 = vst.msk [vmem:[#allocation2 + $0x231] sm:$0xff] %vm18_vm0, %v169_v38 }
  0x41   :  { %6447 = vmatmul.mubr.msk.bf16.vlgmr.msra.gmra.mxu0 %vm18_vm0, %v422_v28  ;;  %v423_v39 = vpack.c.bf16 %v362_v37, %v361_v36  ;;  %v393_v40 = vld [vmem:[#allocation2 + $0x1e1] sm:$0xff]  ;;  %v394_v41 = vld [vmem:[#allocation2 + $0x1e9] sm:$0xff]  ;;  %203 = vst.msk [vmem:[#allocation2 + $0x91] sm:$0xff] %vm18_vm0, %v138_v44  ;;  %204 = vst.msk [vmem:[#allocation2 + $0x99] sm:$0xff] %vm18_vm0, %v139_v45 }
  0x42   :  { %6479 = vmatmul.mubr.msk.bf16.vlgmr.msra.gmra.mxu1 %vm18_vm0, %v438_v32  ;;  %6579 = vmatpush3.bf16.msra.mxu0 %v7062_v8  ;;  %v363_v42 = vld [vmem:[#allocation2 + $0x49] sm:$0xff]  ;;  %v439_v43 = vpack.c.bf16 %v394_v41, %v393_v40  ;;  %v364_v47 = vld [vmem:[#allocation2 + $0x51] sm:$0xff]  ;;  %235 = vst.msk [vmem:[#allocation2 + $0x241] sm:$0xff] %vm18_vm0, %v170_v46  ;;  %236 = vst.msk [vmem:[#allocation2 + $0x249] sm:$0xff] %vm18_vm0, %v171_v49 }
  0x43   :  { %6511 = vmatpush3.bf16.msra.mxu1 %v7061_v7  ;;  %6450 = vmatprep.mubr.msk.bf16.mxu0 %vm18_vm0, %v423_v39  ;;  %v395_v48 = vld [vmem:[#allocation2 + $0x1f9] sm:$0xff]  ;;  %v424_v50 = vpack.c.bf16 %v364_v47, %v363_v42  ;;  %v396_v51 = vld [vmem:[#allocation2 + $0x201] sm:$0xff]  ;;  %205 = vst.msk [vmem:[#allocation2 + $0xa9] sm:$0xff] %vm18_vm0, %v140_v56  ;;  %206 = vst.msk [vmem:[#allocation2 + $0xb1] sm:$0xff] %vm18_vm0, %v141_v57 }
  0x44   :  { %6482 = vmatprep.mubr.msk.bf16.mxu1 %vm18_vm0, %v439_v43  ;;  %v365_v52 = vld [vmem:[#allocation2 + $0x61] sm:$0xff]  ;;  %v366_v53 = vld [vmem:[#allocation2 + $0x69] sm:$0xff]  ;;  %v440_v54 = vpack.c.bf16 %v396_v51, %v395_v48  ;;  %237 = vst.msk [vmem:[#allocation2 + $0x259] sm:$0xff] %vm18_vm0, %v172_v58  ;;  %238 = vst.msk [vmem:[#allocation2 + $0x261] sm:$0xff] %vm18_vm0, %v173_v61  ;;  %6512 = vmatprep.subr.bf16.mxu1 %v7063_v19 }
  0x45   :  { %v425_v55 = vpack.c.bf16 %v366_v53, %v365_v52  ;;  %v397_v59 = vld [vmem:[#allocation2 + $0x211] sm:$0xff]  ;;  %v398_v60 = vld [vmem:[#allocation2 + $0x219] sm:$0xff]  ;;  %207 = vst.msk [vmem:[#allocation2 + $0xc1] sm:$0xff] %vm18_vm0, %v142_v3  ;;  %208 = vst.msk [vmem:[#allocation2 + $0xc9] sm:$0xff] %vm18_vm0, %v143_v4  ;;  %6580 = vmatprep.subr.bf16.mxu0 %v7064_v21 }
  0x46   :  { %v441_v62 = vpack.c.bf16 %v398_v60, %v397_v59  ;;  %v367_v63 = vld [vmem:[#allocation2 + $0x79] sm:$0xff]  ;;  %v368_v0 = vld [vmem:[#allocation2 + $0x81] sm:$0xff]  ;;  %239 = vst.msk [vmem:[#allocation2 + $0x271] sm:$0xff] %vm18_vm0, %v174_v5  ;;  %240 = vst.msk [vmem:[#allocation2 + $0x279] sm:$0xff] %vm18_vm0, %v175_v6  ;;  %6581 = vmatpush3.bf16.msra.mxu0 %v7064_v21 }
  0x47   :  { %v399_v1 = vld [vmem:[#allocation2 + $0x229] sm:$0xff]  ;;  %v400_v2 = vld [vmem:[#allocation2 + $0x231] sm:$0xff]  ;;  %v144_v7 = vld [vmem:[%s10520_s0 + $0x80] sm:$0xff]  ;;  %v426_v14 = vpack.c.bf16 %v368_v0, %v367_v63  ;;  %210 = vst.msk [vmem:[#allocation2 + $0xe1] sm:$0xff] %vm18_vm0, %v145_v12  ;;  %6513 = vmatpush3.bf16.msra.mxu1 %v7063_v19 }
  0x48   :  { %v369_v8 = vld [vmem:[#allocation2 + $0x91] sm:$0xff]  ;;  %v370_v9 = vld [vmem:[#allocation2 + $0x99] sm:$0xff]  ;;  %209 = vst.msk [vmem:[#allocation2 + $0xd9] sm:$0xff] %vm18_vm0, %v144_v7  ;;  %241 = vst.msk [vmem:[#allocation2 + $0x289] sm:$0xff] %vm18_vm0, %v176_v13  ;;  %v442_v16 = vpack.c.bf16 %v400_v2, %v399_v1 }
  0x49   :  { %6451 = vmatmul.mubr.msk.bf16.gmra.mxu0 %vm18_vm0, %v424_v50  ;;  %v401_v10 = vld [vmem:[#allocation2 + $0x241] sm:$0xff]  ;;  %v402_v11 = vld [vmem:[#allocation2 + $0x249] sm:$0xff]  ;;  %v427_v17 = vpack.c.bf16 %v370_v9, %v369_v8  ;;  %242 = vst.msk [vmem:[#allocation2 + $0x291] sm:$0xff] %vm18_vm0, %v177_v15  ;;  %v147_v25 = vld [vmem:[%s10520_s0 + $0x98] sm:$0xff] }
  0x4a   :  { %6483 = vmatmul.mubr.msk.bf16.gmra.mxu1 %vm18_vm0, %v440_v54  ;;  %6454 = vmatprep.mubr.msk.bf16.mxu0 %vm18_vm0, %v425_v55  ;;  %v443_v18 = vpack.c.bf16 %v402_v11, %v401_v10  ;;  %v371_v20 = vld [vmem:[#allocation2 + $0xa9] sm:$0xff]  ;;  %v372_v23 = vld [vmem:[#allocation2 + $0xb1] sm:$0xff]  ;;  %211 = vst.msk [vmem:[#allocation2 + $0xf1] sm:$0xff] %vm18_vm0, %v146_v22  ;;  %212 = vst.msk [vmem:[#allocation2 + $0xf9] sm:$0xff] %vm18_vm0, %v147_v25 }
  0x4b   :  { %6486 = vmatprep.mubr.msk.bf16.mxu1 %vm18_vm0, %v441_v62  ;;  %v403_v24 = vld [vmem:[#allocation2 + $0x259] sm:$0xff]  ;;  %v404_v26 = vld [vmem:[#allocation2 + $0x261] sm:$0xff]  ;;  %v178_v29 = vld [vmem:[%s10520_s0 + $0x190] sm:$0xff]  ;;  %v7526_v35 = vpack.c.bf16 %v372_v23, %v371_v20 }
  0x4c   :  { %v373_v27 = vld [vmem:[#allocation2 + $0xc1] sm:$0xff]  ;;  %v374_v28 = vld [vmem:[#allocation2 + $0xc9] sm:$0xff]  ;;  %v179_v30 = vld [vmem:[%s10520_s0 + $0x198] sm:$0xff]  ;;  %243 = vst.msk [vmem:[#allocation2 + $0x2a1] sm:$0xff] %vm18_vm0, %v178_v29  ;;  %v444_v38 = vpack.c.bf16 %v404_v26, %v403_v24 }
  0x4d   :  { %v148_v31 = vld [vmem:[%s10520_s0 + $0xa0] sm:$0xff]  ;;  %v405_v32 = vld [vmem:[#allocation2 + $0x271] sm:$0xff]  ;;  %244 = vst.msk [vmem:[#allocation2 + $0x2a9] sm:$0xff] %vm18_vm0, %v179_v30  ;;  %v149_v34 = vld [vmem:[%s10520_s0 + $0xa8] sm:$0xff]  ;;  %v7535_v39 = vpack.c.bf16 %v374_v28, %v373_v27 }
  0x4e   :  { %v406_v33 = vld [vmem:[#allocation2 + $0x279] sm:$0xff]  ;;  %213 = vst.msk [vmem:[#allocation2 + $0x109] sm:$0xff] %vm18_vm0, %v148_v31  ;;  %214 = vst.msk [vmem:[#allocation2 + $0x111] sm:$0xff] %vm18_vm0, %v149_v34  ;;  %v181_v37 = vld [vmem:[%s10520_s0 + $0x1a8] sm:$0xff] }
  0x4f   :  { %v180_v36 = vld [vmem:[%s10520_s0 + $0x1a0] sm:$0xff]  ;;  %246 = vst.msk [vmem:[#allocation2 + $0x2c1] sm:$0xff] %vm18_vm0, %v181_v37  ;;  %v150_v40 = vld [vmem:[%s10520_s0 + $0xb0] sm:$0xff]  ;;  %v151_v41 = vld [vmem:[%s10520_s0 + $0xb8] sm:$0xff]  ;;  %v445_v43 = vpack.c.bf16 %v406_v33, %v405_v32 }
  0x50   :  { %245 = vst.msk [vmem:[#allocation2 + $0x2b9] sm:$0xff] %vm18_vm0, %v180_v36  ;;  %v182_v42 = vld [vmem:[%s10520_s0 + $0x1b0] sm:$0xff]  ;;  %215 = vst.msk [vmem:[#allocation2 + $0x121] sm:$0xff] %vm18_vm0, %v150_v40  ;;  %v183_v44 = vld [vmem:[%s10520_s0 + $0x1b8] sm:$0xff] }
  0x51   :  { %6455 = vmatmul.mubr.msk.bf16.gmra.mxu0 %vm18_vm0, %v426_v14  ;;  %216 = vst.msk [vmem:[#allocation2 + $0x129] sm:$0xff] %vm18_vm0, %v151_v41  ;;  %247 = vst.msk [vmem:[#allocation2 + $0x2d1] sm:$0xff] %vm18_vm0, %v182_v42  ;;  %v152_v45 = vld [vmem:[%s10520_s0 + $0xc0] sm:$0xff]  ;;  %v153_v46 = vld [vmem:[%s10520_s0 + $0xc8] sm:$0xff] }
  0x52   :  { %6487 = vmatmul.mubr.msk.bf16.gmra.mxu1 %vm18_vm0, %v442_v16  ;;  %6458 = vmatprep.mubr.msk.bf16.mxu0 %vm18_vm0, %v427_v17  ;;  %v375_v47 = vld [vmem:[#allocation2 + $0xd9] sm:$0xff]  ;;  %v376_v48 = vld [vmem:[#allocation2 + $0xe1] sm:$0xff]  ;;  %248 = vst.msk [vmem:[#allocation2 + $0x2d9] sm:$0xff] %vm18_vm0, %v183_v44  ;;  %217 = vst.msk [vmem:[#allocation2 + $0x139] sm:$0xff] %vm18_vm0, %v152_v45 }
  0x53   :  { %6490 = vmatprep.mubr.msk.bf16.mxu1 %vm18_vm0, %v443_v18  ;;  %218 = vst.msk [vmem:[#allocation2 + $0x141] sm:$0xff] %vm18_vm0, %v153_v46  ;;  %v184_v49 = vld [vmem:[%s10520_s0 + $0x1c0] sm:$0xff]  ;;  %v185_v50 = vld [vmem:[%s10520_s0 + $0x1c8] sm:$0xff]  ;;  %v408_v52 = vld [vmem:[#allocation2 + $0x291] sm:$0xff]  ;;  %v7603_v0 = vpack.c.bf16 %v376_v48, %v375_v47 }
  0x54   :  { %v407_v51 = vld [vmem:[#allocation2 + $0x289] sm:$0xff]  ;;  %249 = vst.msk [vmem:[#allocation2 + $0x2e9] sm:$0xff] %vm18_vm0, %v184_v49  ;;  %250 = vst.msk [vmem:[#allocation2 + $0x2f1] sm:$0xff] %vm18_vm0, %v185_v50  ;;  %v155_v54 = vld [vmem:[%s10520_s0 + $0xd8] sm:$0xff] }
  0x55   :  { %v154_v53 = vld [vmem:[%s10520_s0 + $0xd0] sm:$0xff]  ;;  %220 = vst.msk [vmem:[#allocation2 + $0x159] sm:$0xff] %vm18_vm0, %v155_v54  ;;  %v187_v56 = vld [vmem:[%s10520_s0 + $0x1d8] sm:$0xff]  ;;  %v156_v57 = vld [vmem:[%s10520_s0 + $0xe0] sm:$0xff]  ;;  %v446_v2 = vpack.c.bf16 %v408_v52, %v407_v51 }
  0x56   :  { %219 = vst.msk [vmem:[#allocation2 + $0x151] sm:$0xff] %vm18_vm0, %v154_v53  ;;  %v186_v55 = vld [vmem:[%s10520_s0 + $0x1d0] sm:$0xff]  ;;  %v378_v59 = vld [vmem:[#allocation2 + $0xf9] sm:$0xff]  ;;  %v409_v60 = vld [vmem:[#allocation2 + $0x2a1] sm:$0xff] }
  0x57   :  { %v377_v58 = vld [vmem:[#allocation2 + $0xf1] sm:$0xff]  ;;  %251 = vst.msk [vmem:[#allocation2 + $0x301] sm:$0xff] %vm18_vm0, %v186_v55  ;;  %252 = vst.msk [vmem:[#allocation2 + $0x309] sm:$0xff] %vm18_vm0, %v187_v56  ;;  %v410_v61 = vld [vmem:[#allocation2 + $0x2a9] sm:$0xff] }
  0x58   :  { %221 = vst.msk [vmem:[#allocation2 + $0x169] sm:$0xff] %vm18_vm0, %v156_v57  ;;  %v157_v62 = vld [vmem:[%s10520_s0 + $0xe8] sm:$0xff]  ;;  %v188_v63 = vld [vmem:[%s10520_s0 + $0x1e0] sm:$0xff]  ;;  %v7610_v3 = vpack.c.bf16 %v378_v59, %v377_v58  ;;  %v447_v4 = vpack.c.bf16 %v410_v61, %v409_v60  ;;  %v380_v6 = vld [vmem:[#allocation2 + $0x111] sm:$0xff] }
  0x59   :  { %6459 = vmatmul.mubr.msk.bf16.gmra.mxu0 %vm18_vm0, %v7526_v35  ;;  %222 = vst.msk [vmem:[#allocation2 + $0x171] sm:$0xff] %vm18_vm0, %v157_v62  ;;  %v189_v1 = vld [vmem:[%s10520_s0 + $0x1e8] sm:$0xff]  ;;  %253 = vst.msk [vmem:[#allocation2 + $0x319] sm:$0xff] %vm18_vm0, %v188_v63  ;;  %v411_v7 = vld [vmem:[#allocation2 + $0x2b9] sm:$0xff] }
  0x5a   :  { %6491 = vmatmul.mubr.msk.bf16.gmra.mxu1 %vm18_vm0, %v444_v38  ;;  %6462 = vmatprep.mubr.msk.bf16.mxu0 %vm18_vm0, %v7535_v39  ;;  %254 = vst.msk [vmem:[#allocation2 + $0x321] sm:$0xff] %vm18_vm0, %v189_v1  ;;  %v379_v5 = vld [vmem:[#allocation2 + $0x109] sm:$0xff]  ;;  %v412_v8 = vld [vmem:[#allocation2 + $0x2c1] sm:$0xff]  ;;  %v413_v11 = vld [vmem:[#allocation2 + $0x2d1] sm:$0xff] }
  0x5b   :  { %6494 = vmatprep.mubr.msk.bf16.mxu1 %vm18_vm0, %v445_v43  ;;  %v381_v9 = vld [vmem:[#allocation2 + $0x121] sm:$0xff]  ;;  %v382_v10 = vld [vmem:[#allocation2 + $0x129] sm:$0xff]  ;;  %v414_v12 = vld [vmem:[#allocation2 + $0x2d9] sm:$0xff]  ;;  %v7619_v13 = vpack.c.bf16 %v380_v6, %v379_v5  ;;  %v448_v14 = vpack.c.bf16 %v412_v8, %v411_v7 }
  0x5c   :  { %v7621_v15 = vpack.c.bf16 %v382_v10, %v381_v9  ;;  %v7065_v16 = vld [vmem:[%s10519_s1 + $0x38] sm:$0xff]   ;;  %v449_v17 = vpack.c.bf16 %v414_v12, %v413_v11  ;;  %v7066_v18 = vld [vmem:[%s10519_s1 + $0x48] sm:$0xff]   ;;  %v257_v38 = vld [vmem:[#allocation2] sm:$0xff] }
  0x5d   :  { %6646 = vmatprep.subr.bf16.mxu1 %v7065_v16  ;;  %6714 = vmatprep.subr.bf16.mxu0 %v7066_v18  ;;  %v383_v19 = vld [vmem:[#allocation2 + $0x139] sm:$0xff]  ;;  %v384_v20 = vld [vmem:[#allocation2 + $0x141] sm:$0xff]  ;;  %v415_v21 = vld [vmem:[#allocation2 + $0x2e9] sm:$0xff] }
  0x5e   :  { %v416_v22 = vld [vmem:[#allocation2 + $0x2f1] sm:$0xff]  ;;  %v386_v24 = vld [vmem:[#allocation2 + $0x159] sm:$0xff]  ;;  %v417_v25 = vld [vmem:[#allocation2 + $0x301] sm:$0xff]  ;;  %v7635_v27 = vpack.c.bf16 %v384_v20, %v383_v19 }
  0x5f   :  { %v385_v23 = vld [vmem:[#allocation2 + $0x151] sm:$0xff]  ;;  %v418_v26 = vld [vmem:[#allocation2 + $0x309] sm:$0xff]  ;;  %v450_v28 = vpack.c.bf16 %v416_v22, %v415_v21  ;;  %v1254_v45 = vld [vmem:[#allocation2 + $0x1a] sm:$0xff] }
  0x60   :  { %v7637_v29 = vpack.c.bf16 %v386_v24, %v385_v23  ;;  %v451_v30 = vpack.c.bf16 %v418_v26, %v417_v25  ;;  %v387_v31 = vld [vmem:[#allocation2 + $0x169] sm:$0xff]  ;;  %v388_v32 = vld [vmem:[#allocation2 + $0x171] sm:$0xff]  ;;  %v419_v34 = vld [vmem:[#allocation2 + $0x319] sm:$0xff] }
  0x61   :  { %6463 = vmatmul.mubr.msk.bf16.gmra.mxu0 %vm18_vm0, %v7603_v0  ;;  %v1252_v33 = vld [vmem:[#allocation2 + $0x2] sm:$0xff]  ;;  %v1253_v37 = vld [vmem:[#allocation2 + $0xa] sm:$0xff]  ;;  %v7645_v41 = vpack.c.bf16 %v388_v32, %v387_v31  ;;  %v259_v47 = vld [vmem:[#allocation2 + $0x18] sm:$0xff] }
  0x62   :  { %6495 = vmatmul.mubr.msk.bf16.gmra.mxu1 %vm18_vm0, %v446_v2  ;;  %6466 = vmatprep.mubr.msk.bf16.mxu0 %vm18_vm0, %v7610_v3  ;;  %v420_v36 = vld [vmem:[#allocation2 + $0x321] sm:$0xff]  ;;  %v1316_v43 = vpack.c.bf16 %v1253_v37, %v1252_v33  ;;  %v261_v49 = vld [vmem:[#allocation2 + $0x30] sm:$0xff]  ;;  %v262_v50 = vld [vmem:[#allocation2 + $0x38] sm:$0xff] }
  0x63   :  { %6498 = vmatprep.mubr.msk.bf16.mxu1 %vm18_vm0, %v447_v4  ;;  %v258_v40 = vld [vmem:[#allocation2 + $0x8] sm:$0xff]  ;;  %v452_v42 = vpack.c.bf16 %v420_v36, %v419_v34  ;;  %v260_v48 = vld [vmem:[#allocation2 + $0x20] sm:$0xff]  ;;  %v1256_v51 = vld [vmem:[#allocation2 + $0x32] sm:$0xff]  ;;  %v7654_v55 = vpack.c.bf16 %v262_v50, %v261_v49 }
  0x64   :  { %v321_v44 = vpack.c.bf16 %v258_v40, %v257_v38  ;;  %v1255_v46 = vld [vmem:[#allocation2 + $0x22] sm:$0xff]  ;;  %v1257_v53 = vld [vmem:[#allocation2 + $0x3a] sm:$0xff]  ;;  %v7652_v54 = vpack.c.bf16 %v260_v48, %v259_v47  ;;  %v7067_v57 = vld [vmem:[%s10519_s1 + $0x30] sm:$0xff]  }
  0x65   :  { %v1317_v52 = vpack.c.bf16 %v1255_v46, %v1254_v45  ;;  %v1318_v56 = vpack.c.bf16 %v1257_v53, %v1256_v51  ;;  %v7068_v58 = vld [vmem:[%s10519_s1 + $0x40] sm:$0xff]   ;;  %v263_v59 = vld [vmem:[#allocation2 + $0x48] sm:$0xff]  ;;  %v1259_v61 = vld [vmem:[#allocation2 + $0x52] sm:$0xff] }
  0x66   :  { %v1258_v60 = vld [vmem:[#allocation2 + $0x4a] sm:$0xff]  ;;  %v1260_v63 = vld [vmem:[#allocation2 + $0x62] sm:$0xff]  ;;  %v267_v9 = vld [vmem:[#allocation2 + $0x78] sm:$0xff] }
  0x67   :  { %v264_v62 = vld [vmem:[#allocation2 + $0x50] sm:$0xff]  ;;  %v265_v2 = vld [vmem:[#allocation2 + $0x60] sm:$0xff]  ;;  %v266_v4 = vld [vmem:[#allocation2 + $0x68] sm:$0xff]  ;;  %v1319_v5 = vpack.c.bf16 %v1259_v61, %v1258_v60 }
  0x68   :  { %v1261_v1 = vld [vmem:[#allocation2 + $0x6a] sm:$0xff]  ;;  %v7668_v6 = vpack.c.bf16 %v264_v62, %v263_v59  ;;  %v7670_v8 = vpack.c.bf16 %v266_v4, %v265_v2  ;;  %v1262_v10 = vld [vmem:[#allocation2 + $0x7a] sm:$0xff]  ;;  %v1263_v11 = vld [vmem:[#allocation2 + $0x82] sm:$0xff] }
  0x69   :  { %6467 = vmatmul.mubr.msk.bf16.gmra.mxu0 %vm18_vm0, %v7619_v13  ;;  %v1320_v7 = vpack.c.bf16 %v1261_v1, %v1260_v63  ;;  %v268_v12 = vld [vmem:[#allocation2 + $0x80] sm:$0xff]  ;;  %v1321_v19 = vpack.c.bf16 %v1263_v11, %v1262_v10  ;;  %v271_v23 = vld [vmem:[#allocation2 + $0xa8] sm:$0xff]  ;;  %v272_v24 = vld [vmem:[#allocation2 + $0xb0] sm:$0xff] }
  0x6a   :  { %6499 = vmatmul.mubr.msk.bf16.gmra.mxu1 %vm18_vm0, %v448_v14  ;;  %6470 = vmatprep.mubr.msk.bf16.mxu0 %vm18_vm0, %v7621_v15  ;;  %v1264_v14 = vld [vmem:[#allocation2 + $0x92] sm:$0xff]  ;;  %v7678_v20 = vpack.c.bf16 %v268_v12, %v267_v9  ;;  %v1266_v25 = vld [vmem:[#allocation2 + $0xaa] sm:$0xff]  ;;  %v1268_v31 = vld [vmem:[#allocation2 + $0xc2] sm:$0xff]  ;;  %v7698_v37 = vpack.c.bf16 %v272_v24, %v271_v23 }
  0x6b   :  { %6502 = vmatprep.mubr.msk.bf16.mxu1 %vm18_vm0, %v449_v17  ;;  %v269_v17 = vld [vmem:[#allocation2 + $0x90] sm:$0xff]  ;;  %v7691_v33 = vld [vmem:[%s10519_s1 + $0x58] sm:$0xff]   ;;  %v7696_v36 = vld [vmem:[%s10519_s1 + $0x68] sm:$0xff]  }
  0x6c   :  { %v1267_v26 = vld [vmem:[#allocation2 + $0xb2] sm:$0xff]  ;;  %v1269_v32 = vld [vmem:[#allocation2 + $0xca] sm:$0xff]  ;;  %v276_v45 = vld [vmem:[#allocation2 + $0xe0] sm:$0xff] }
  0x6d   :  { %v1323_v34 = vpack.c.bf16 %v1267_v26, %v1266_v25  ;;  %v1324_v38 = vpack.c.bf16 %v1269_v32, %v1268_v31  ;;  %v1272_v46 = vld [vmem:[#allocation2 + $0xf2] sm:$0xff]  ;;  %v1273_v47 = vld [vmem:[#allocation2 + $0xfa] sm:$0xff]  ;;  %v1276_v60 = vld [vmem:[#allocation2 + $0x122] sm:$0xff] }
  0x6e   :  { %v277_v48 = vld [vmem:[#allocation2 + $0xf0] sm:$0xff]  ;;  %v278_v49 = vld [vmem:[#allocation2 + $0xf8] sm:$0xff]  ;;  %v281_v62 = vld [vmem:[#allocation2 + $0x120] sm:$0xff] }
  0x6f   :  { %v7712_v53 = vpack.c.bf16 %v278_v49, %v277_v48  ;;  %v280_v59 = vld [vmem:[#allocation2 + $0x110] sm:$0xff]  ;;  %v282_v63 = vld [vmem:[#allocation2 + $0x128] sm:$0xff]  ;;  %v1278_v9 = vld [vmem:[#allocation2 + $0x13a] sm:$0xff] }
  0x70   :  { %v1277_v61 = vld [vmem:[#allocation2 + $0x12a] sm:$0xff]  ;;  %v1279_v10 = vld [vmem:[#allocation2 + $0x142] sm:$0xff]  ;;  %v1280_v12 = vld [vmem:[#allocation2 + $0x152] sm:$0xff] }
  0x71   :  { %6471 = vmatmul.mubr.msk.bf16.gmra.mxu0 %vm18_vm0, %v7635_v27  ;;  %v1328_v4 = vpack.c.bf16 %v1277_v61, %v1276_v60  ;;  %v284_v11 = vld [vmem:[#allocation2 + $0x140] sm:$0xff]  ;;  %v158_v24 = vld [vmem:[%s10520_s0 + $0xf0] sm:$0xff]  ;;  %v159_v25 = vld [vmem:[%s10520_s0 + $0xf8] sm:$0xff] }
  0x72   :  { %6503 = vmatmul.mubr.msk.bf16.gmra.mxu1 %vm18_vm0, %v450_v28  ;;  %6474 = vmatprep.mubr.msk.bf16.mxu0 %vm18_vm0, %v7637_v29  ;;  %v273_v28 = vld [vmem:[#allocation2 + $0xc0] sm:$0xff]  ;;  %223 = vst.msk [vmem:[#allocation2 + $0x181] sm:$0xff] %vm18_vm0, %v158_v24  ;;  %224 = vst.msk [vmem:[#allocation2 + $0x189] sm:$0xff] %vm18_vm0, %v159_v25  ;;  %v287_v26 = vld [vmem:[#allocation2 + $0x168] sm:$0xff] }
  0x73   :  { %6506 = vmatprep.mubr.msk.bf16.mxu1 %vm18_vm0, %v451_v30  ;;  %v274_v30 = vld [vmem:[#allocation2 + $0xc8] sm:$0xff]  ;;  %v288_v31 = vld [vmem:[#allocation2 + $0x170] sm:$0xff] }
  0x74   :  { %v7701_v40 = vpack.c.bf16 %v274_v30, %v273_v28  ;;  %v1282_v28 = vld [vmem:[#allocation2 + $0x16a] sm:$0xff]  ;;  %v1283_v30 = vld [vmem:[#allocation2 + $0x172] sm:$0xff] }
  0x75   :  { %v1284_v32 = vld [vmem:[#allocation2 + $0x1b2] sm:$0xff]  ;;  %v1286_v48 = vld [vmem:[#allocation2 + $0x1ca] sm:$0xff] }
  0x76   :  { %v1287_v49 = vld [vmem:[#allocation2 + $0x1d2] sm:$0xff]  ;;  %v1294_v24 = vld [vmem:[#allocation2 + $0x22a] sm:$0xff] }
  0x77   :  { %v1295_v25 = vld [vmem:[#allocation2 + $0x232] sm:$0xff] }
  0x79   :  { %6475 = vmatmul.mubr.msk.bf16.gmra.mxu0 %vm18_vm0, %v7645_v41 }
  0x7a   :  { %6507 = vmatmul.mubr.msk.bf16.gmra.mxu1 %vm18_vm0, %v452_v42  ;;  %6582 = vmatprep.mubr.msk.bf16.mxu0 %vm18_vm0, %v1316_v43  ;;  %v1270_v42 = vld [vmem:[#allocation2 + $0xda] sm:$0xff]  ;;  %v1271_v43 = vld [vmem:[#allocation2 + $0xe2] sm:$0xff] }
  0x7b   :  { %6514 = vmatprep.mubr.msk.bf16.mxu1 %vm18_vm0, %v321_v44  ;;  %v275_v44 = vld [vmem:[#allocation2 + $0xd8] sm:$0xff]  ;;  %v1325_v50 = vpack.c.bf16 %v1271_v43, %v1270_v42  ;;  %v1331_v43 = vpack.c.bf16 %v1283_v30, %v1282_v28  ;;  %v1296_v28 = vld [vmem:[#allocation2 + $0x242] sm:$0xff]  ;;  %v1297_v30 = vld [vmem:[#allocation2 + $0x24a] sm:$0xff] }
  0x7c   :  { %v7710_v51 = vpack.c.bf16 %v276_v45, %v275_v44  ;;  %v290_v42 = vld [vmem:[#allocation2 + $0x1b8] sm:$0xff]  ;;  %v7748_v44 = vpack.c.bf16 %v288_v31, %v287_v26  ;;  %v300_v26 = vld [vmem:[#allocation2 + $0x230] sm:$0xff]  ;;  %v301_v31 = vld [vmem:[#allocation2 + $0x240] sm:$0xff] }
  0x81   :  { %6583 = vmatmul.mubr.msk.bf16.vlgmr.msra.gmra.mxu0 %vm18_vm0, %v1317_v52  ;;  %v1326_v52 = vpack.c.bf16 %v1273_v47, %v1272_v46  ;;  %v291_v47 = vld [vmem:[#allocation2 + $0x1c8] sm:$0xff] }
  0x82   :  { %6515 = vmatmul.mubr.msk.bf16.vlgmr.msra.gmra.mxu1 %vm18_vm0, %v7652_v54  ;;  %6715 = vmatpush3.bf16.msra.mxu0 %v7066_v18  ;;  %v270_v18 = vld [vmem:[#allocation2 + $0x98] sm:$0xff] }
  0x83   :  { %6647 = vmatpush3.bf16.msra.mxu1 %v7065_v16  ;;  %6518 = vmatprep.mubr.msk.bf16.mxu1 %vm18_vm0, %v7654_v55  ;;  %v1265_v16 = vld [vmem:[#allocation2 + $0x9a] sm:$0xff]  ;;  %v7680_v22 = vpack.c.bf16 %v270_v18, %v269_v17  ;;  %v1329_v18 = vpack.c.bf16 %v1279_v10, %v1278_v9  ;;  %v1292_v9 = vld [vmem:[#allocation2 + $0x212] sm:$0xff] }
  0x84   :  { %6586 = vmatprep.mubr.msk.bf16.mxu0 %vm18_vm0, %v1318_v56  ;;  %6648 = vmatprep.subr.bf16.mxu1 %v7067_v57  ;;  %v1322_v21 = vpack.c.bf16 %v1265_v16, %v1264_v14  ;;  %v279_v56 = vld [vmem:[#allocation2 + $0x108] sm:$0xff]  ;;  %v1281_v14 = vld [vmem:[#allocation2 + $0x15a] sm:$0xff]  ;;  %v285_v16 = vld [vmem:[#allocation2 + $0x150] sm:$0xff] }
  0x85   :  { %6716 = vmatprep.subr.bf16.mxu0 %v7068_v58  ;;  %v7720_v2 = vpack.c.bf16 %v280_v59, %v279_v56  ;;  %v286_v17 = vld [vmem:[#allocation2 + $0x158] sm:$0xff]  ;;  %v1289_v56 = vld [vmem:[#allocation2 + $0x1ea] sm:$0xff]  ;;  %v1333_v59 = vpack.c.bf16 %v1287_v49, %v1286_v48  ;;  %v304_v48 = vld [vmem:[#allocation2 + $0x260] sm:$0xff] }
  0x86   :  { %6717 = vmatpush3.bf16.msra.mxu0 %v7068_v58  ;;  %v1275_v58 = vld [vmem:[#allocation2 + $0x112] sm:$0xff]  ;;  %v7732_v23 = vpack.c.bf16 %v286_v17, %v285_v16  ;;  %v1293_v10 = vld [vmem:[#allocation2 + $0x21a] sm:$0xff] }
  0x87   :  { %6649 = vmatpush3.bf16.msra.mxu1 %v7067_v57  ;;  %6850 = vmatprep.subr.bf16.mxu0 %v7696_v36  ;;  %v1274_v57 = vld [vmem:[#allocation2 + $0x10a] sm:$0xff]  ;;  %v1336_v17 = vpack.c.bf16 %v1293_v10, %v1292_v9  ;;  %v1300_v49 = vld [vmem:[#allocation2 + $0x272] sm:$0xff]  ;;  %v1304_v9 = vld [vmem:[#allocation2 + $0x2a2] sm:$0xff] }
  0x88   :  { %6782 = vmatprep.subr.bf16.mxu1 %v7691_v33  ;;  %v1327_v1 = vpack.c.bf16 %v1275_v58, %v1274_v57  ;;  %v293_v57 = vld [vmem:[#allocation2 + $0x1e0] sm:$0xff]  ;;  %v294_v58 = vld [vmem:[#allocation2 + $0x1e8] sm:$0xff] }
  0x89   :  { %6587 = vmatmul.mubr.msk.bf16.gmra.mxu0 %vm18_vm0, %v1319_v5  ;;  %v7722_v5 = vpack.c.bf16 %v282_v63, %v281_v62  ;;  %v7757_v62 = vpack.c.bf16 %v294_v58, %v293_v57  ;;  %v295_v63 = vld [vmem:[#allocation2 + $0x1f8] sm:$0xff]  ;;  %v1305_v10 = vld [vmem:[#allocation2 + $0x2aa] sm:$0xff] }
  0x8a   :  { %6519 = vmatmul.mubr.msk.bf16.gmra.mxu1 %vm18_vm0, %v7668_v6  ;;  %6590 = vmatprep.mubr.msk.bf16.mxu0 %vm18_vm0, %v1320_v7  ;;  %v283_v7 = vld [vmem:[#allocation2 + $0x138] sm:$0xff] }
  0x8b   :  { %6522 = vmatprep.mubr.msk.bf16.mxu1 %vm18_vm0, %v7670_v8 }
  0x91   :  { %6591 = vmatmul.mubr.msk.bf16.gmra.mxu0 %vm18_vm0, %v1321_v19  ;;  %v7730_v19 = vpack.c.bf16 %v284_v11, %v283_v7  ;;  %v296_v7 = vld [vmem:[#allocation2 + $0x200] sm:$0xff]  ;;  %v297_v11 = vld [vmem:[#allocation2 + $0x210] sm:$0xff] }
  0x92   :  { %6523 = vmatmul.mubr.msk.bf16.gmra.mxu1 %vm18_vm0, %v7678_v20  ;;  %6594 = vmatprep.mubr.msk.bf16.mxu0 %vm18_vm0, %v1322_v21  ;;  %v1330_v21 = vpack.c.bf16 %v1281_v14, %v1280_v12  ;;  %v298_v12 = vld [vmem:[#allocation2 + $0x218] sm:$0xff]  ;;  %v7765_v16 = vpack.c.bf16 %v296_v7, %v295_v63  ;;  %v307_v63 = vld [vmem:[#allocation2 + $0x288] sm:$0xff]  ;;  %v308_v7 = vld [vmem:[#allocation2 + $0x290] sm:$0xff] }
  0x93   :  { %6526 = vmatprep.mubr.msk.bf16.mxu1 %vm18_vm0, %v7680_v22 }
  0x99   :  { %6595 = vmatmul.mubr.msk.bf16.gmra.mxu0 %vm18_vm0, %v1323_v34  ;;  %v1285_v34 = vld [vmem:[#allocation2 + $0x1ba] sm:$0xff] }
  0x9a   :  { %6527 = vmatmul.mubr.msk.bf16.gmra.mxu1 %vm18_vm0, %v7698_v37  ;;  %6598 = vmatprep.mubr.msk.bf16.mxu0 %vm18_vm0, %v1324_v38  ;;  %v289_v38 = vld [vmem:[#allocation2 + $0x1b0] sm:$0xff]  ;;  %v1332_v45 = vpack.c.bf16 %v1285_v34, %v1284_v32  ;;  %v302_v32 = vld [vmem:[#allocation2 + $0x248] sm:$0xff]  ;;  %v1337_v34 = vpack.c.bf16 %v1295_v25, %v1294_v24  ;;  %v311_v25 = vld [vmem:[#allocation2 + $0x2b8] sm:$0xff] }
  0x9b   :  { %6530 = vmatprep.mubr.msk.bf16.mxu1 %vm18_vm0, %v7701_v40  ;;  %v337_v46 = vpack.c.bf16 %v290_v42, %v289_v38  ;;  %v1338_v42 = vpack.c.bf16 %v1297_v30, %v1296_v28  ;;  %v1307_v28 = vld [vmem:[#allocation2 + $0x2c2] sm:$0xff] }
  0x9c   :  { %v312_v30 = vld [vmem:[#allocation2 + $0x2c0] sm:$0xff] }
  0xa1   :  { %6599 = vmatmul.mubr.msk.bf16.gmra.mxu0 %vm18_vm0, %v1325_v50  ;;  %v292_v50 = vld [vmem:[#allocation2 + $0x1d0] sm:$0xff] }
  0xa2   :  { %6531 = vmatmul.mubr.msk.bf16.gmra.mxu1 %vm18_vm0, %v7710_v51  ;;  %6602 = vmatprep.mubr.msk.bf16.mxu0 %vm18_vm0, %v1326_v52  ;;  %v1288_v52 = vld [vmem:[#allocation2 + $0x1e2] sm:$0xff]  ;;  %v7755_v60 = vpack.c.bf16 %v292_v50, %v291_v47  ;;  %v1301_v50 = vld [vmem:[#allocation2 + $0x27a] sm:$0xff] }
  0xa3   :  { %6534 = vmatprep.mubr.msk.bf16.mxu1 %vm18_vm0, %v7712_v53  ;;  %v1334_v61 = vpack.c.bf16 %v1289_v56, %v1288_v52  ;;  %v1299_v47 = vld [vmem:[#allocation2 + $0x262] sm:$0xff]  ;;  %v305_v52 = vld [vmem:[#allocation2 + $0x270] sm:$0xff]  ;;  %v306_v56 = vld [vmem:[#allocation2 + $0x278] sm:$0xff] }
  0xa9   :  { %6603 = vmatmul.mubr.msk.bf16.gmra.mxu0 %vm18_vm0, %v1327_v1  ;;  %v1290_v1 = vld [vmem:[#allocation2 + $0x1fa] sm:$0xff] }
  0xaa   :  { %6535 = vmatmul.mubr.msk.bf16.gmra.mxu1 %vm18_vm0, %v7720_v2  ;;  %6606 = vmatprep.mubr.msk.bf16.mxu0 %vm18_vm0, %v1328_v4  ;;  %v1291_v4 = vld [vmem:[#allocation2 + $0x202] sm:$0xff] }
  0xab   :  { %6538 = vmatprep.mubr.msk.bf16.mxu1 %vm18_vm0, %v7722_v5  ;;  %v1335_v14 = vpack.c.bf16 %v1291_v4, %v1290_v1  ;;  %v1302_v1 = vld [vmem:[#allocation2 + $0x28a] sm:$0xff]  ;;  %v1303_v4 = vld [vmem:[#allocation2 + $0x292] sm:$0xff] }
  0xb1   :  { %6607 = vmatmul.mubr.msk.bf16.gmra.mxu0 %vm18_vm0, %v1329_v18  ;;  %v7767_v18 = vpack.c.bf16 %v298_v12, %v297_v11  ;;  %v309_v11 = vld [vmem:[#allocation2 + $0x2a0] sm:$0xff]  ;;  %v310_v12 = vld [vmem:[#allocation2 + $0x2a8] sm:$0xff] }
  0xb2   :  { %6539 = vmatmul.mubr.msk.bf16.gmra.mxu1 %vm18_vm0, %v7730_v19  ;;  %6610 = vmatprep.mubr.msk.bf16.mxu0 %vm18_vm0, %v1330_v21  ;;  %v299_v21 = vld [vmem:[#allocation2 + $0x228] sm:$0xff]  ;;  %v7797_v24 = vpack.c.bf16 %v310_v12, %v309_v11  ;;  %v190_v11 = vld [vmem:[%s10520_s0 + $0x1f0] sm:$0xff]  ;;  %v191_v12 = vld [vmem:[%s10520_s0 + $0x1f8] sm:$0xff] }
  0xb3   :  { %6542 = vmatprep.mubr.msk.bf16.mxu1 %vm18_vm0, %v7732_v23  ;;  %v7775_v38 = vpack.c.bf16 %v300_v26, %v299_v21  ;;  %v1342_v21 = vpack.c.bf16 %v1305_v10, %v1304_v9  ;;  %v1306_v26 = vld [vmem:[#allocation2 + $0x2ba] sm:$0xff]  ;;  %255 = vst.msk [vmem:[#allocation2 + $0x331] sm:$0xff] %vm18_vm0, %v190_v11  ;;  %256 = vst.msk [vmem:[#allocation2 + $0x339] sm:$0xff] %vm18_vm0, %v191_v12 }
  0xb4   :  { %v2385_v11 = vld [vmem:[#allocation2 + $0x81] sm:$0xff] }
  0xb9   :  { %6611 = vmatmul.mubr.msk.bf16.gmra.mxu0 %vm18_vm0, %v1331_v43  ;;  %v7777_v43 = vpack.c.bf16 %v302_v32, %v301_v31  ;;  %v1308_v31 = vld [vmem:[#allocation2 + $0x2d2] sm:$0xff]  ;;  %v1309_v32 = vld [vmem:[#allocation2 + $0x2da] sm:$0xff] }
  0xba   :  { %6543 = vmatmul.mubr.msk.bf16.gmra.mxu1 %vm18_vm0, %v7748_v44  ;;  %6614 = vmatprep.mubr.msk.bf16.mxu0 %vm18_vm0, %v1332_v45  ;;  %v303_v45 = vld [vmem:[#allocation2 + $0x258] sm:$0xff] }
  0xbb   :  { %6546 = vmatprep.mubr.msk.bf16.mxu1 %vm18_vm0, %v337_v46  ;;  %v1298_v46 = vld [vmem:[#allocation2 + $0x25a] sm:$0xff]  ;;  %v7785_v58 = vpack.c.bf16 %v304_v48, %v303_v45  ;;  %v1343_v45 = vpack.c.bf16 %v1307_v28, %v1306_v26 }
  0xbc   :  { %v1339_v57 = vpack.c.bf16 %v1299_v47, %v1298_v46  ;;  %v7805_v46 = vpack.c.bf16 %v312_v30, %v311_v25  ;;  %v1344_v47 = vpack.c.bf16 %v1309_v32, %v1308_v31  ;;  %v1315_v25 = vld [vmem:[#allocation2 + $0x322] sm:$0xff]  ;;  %v2376_v28 = vld [vmem:[#allocation2 + $0x19] sm:$0xff] }
  0xbd   :  { %v320_v26 = vld [vmem:[#allocation2 + $0x320] sm:$0xff] }
  0xbe   :  { %v2377_v30 = vld [vmem:[#allocation2 + $0x21] sm:$0xff] }
  0xc1   :  { %6615 = vmatmul.mubr.msk.bf16.gmra.mxu0 %vm18_vm0, %v1333_v59  ;;  %v1340_v59 = vpack.c.bf16 %v1301_v50, %v1300_v49  ;;  %v315_v49 = vld [vmem:[#allocation2 + $0x2e8] sm:$0xff] }
  0xc2   :  { %6547 = vmatmul.mubr.msk.bf16.gmra.mxu1 %vm18_vm0, %v7755_v60  ;;  %6618 = vmatprep.mubr.msk.bf16.mxu0 %vm18_vm0, %v1334_v61  ;;  %v7787_v61 = vpack.c.bf16 %v306_v56, %v305_v52  ;;  %v1310_v50 = vld [vmem:[#allocation2 + $0x2ea] sm:$0xff]  ;;  %v1311_v52 = vld [vmem:[#allocation2 + $0x2f2] sm:$0xff] }
  0xc3   :  { %6550 = vmatprep.mubr.msk.bf16.mxu1 %vm18_vm0, %v7757_v62  ;;  %v316_v56 = vld [vmem:[#allocation2 + $0x2f0] sm:$0xff] }
  0xc9   :  { %6619 = vmatmul.mubr.msk.bf16.gmra.mxu0 %vm18_vm0, %v1335_v14  ;;  %v1341_v14 = vpack.c.bf16 %v1303_v4, %v1302_v1  ;;  %v318_v1 = vld [vmem:[#allocation2 + $0x308] sm:$0xff]  ;;  %v1345_v4 = vpack.c.bf16 %v1311_v52, %v1310_v50  ;;  %v2381_v50 = vld [vmem:[#allocation2 + $0x51] sm:$0xff] }
  0xca   :  { %6551 = vmatmul.mubr.msk.bf16.gmra.mxu1 %vm18_vm0, %v7765_v16  ;;  %6622 = vmatprep.mubr.msk.bf16.mxu0 %vm18_vm0, %v1336_v17  ;;  %v7795_v17 = vpack.c.bf16 %v308_v7, %v307_v63  ;;  %v317_v63 = vld [vmem:[#allocation2 + $0x300] sm:$0xff]  ;;  %v7815_v7 = vpack.c.bf16 %v316_v56, %v315_v49  ;;  %v2380_v49 = vld [vmem:[#allocation2 + $0x49] sm:$0xff] }
  0xcb   :  { %6554 = vmatprep.mubr.msk.bf16.mxu1 %vm18_vm0, %v7767_v18  ;;  %v7817_v10 = vpack.c.bf16 %v318_v1, %v317_v63  ;;  %v2442_v52 = vpack.c.bf16 %v2381_v50, %v2380_v49  ;;  %v7071_v56 = vld [vmem:[%s10519_s1 + $0x50] sm:$0xff]  }
  0xcc   :  { %v2383_v1 = vld [vmem:[#allocation2 + $0x69] sm:$0xff] }
  0xd1   :  { %6623 = vmatmul.mubr.msk.bf16.gmra.mxu0 %vm18_vm0, %v1337_v34  ;;  %v313_v34 = vld [vmem:[#allocation2 + $0x2d0] sm:$0xff] }
  0xd2   :  { %6555 = vmatmul.mubr.msk.bf16.gmra.mxu1 %vm18_vm0, %v7775_v38  ;;  %6626 = vmatprep.mubr.msk.bf16.mxu0 %vm18_vm0, %v1338_v42  ;;  %v314_v42 = vld [vmem:[#allocation2 + $0x2d8] sm:$0xff] }
  0xd3   :  { %6558 = vmatprep.mubr.msk.bf16.mxu1 %vm18_vm0, %v7777_v43  ;;  %v7807_v48 = vpack.c.bf16 %v314_v42, %v313_v34  ;;  %v2440_v34 = vpack.c.bf16 %v2377_v30, %v2376_v28  ;;  %v2378_v42 = vld [vmem:[#allocation2 + $0x31] sm:$0xff] }
  0xd9   :  { %6627 = vmatmul.mubr.msk.bf16.gmra.mxu0 %vm18_vm0, %v1339_v57  ;;  %v1312_v57 = vld [vmem:[#allocation2 + $0x302] sm:$0xff] }
  0xda   :  { %6559 = vmatmul.mubr.msk.bf16.gmra.mxu1 %vm18_vm0, %v7785_v58  ;;  %6630 = vmatprep.mubr.msk.bf16.mxu0 %vm18_vm0, %v1340_v59  ;;  %v1313_v59 = vld [vmem:[#allocation2 + $0x30a] sm:$0xff] }
  0xdb   :  { %6562 = vmatprep.mubr.msk.bf16.mxu1 %vm18_vm0, %v7787_v61  ;;  %v1346_v9 = vpack.c.bf16 %v1313_v59, %v1312_v57  ;;  %v7072_v59 = vld [vmem:[%s10519_s1 + $0x60] sm:$0xff]  }
  0xe1   :  { %6631 = vmatmul.mubr.msk.bf16.gmra.mxu0 %vm18_vm0, %v1341_v14  ;;  %v319_v14 = vld [vmem:[#allocation2 + $0x318] sm:$0xff] }
  0xe2   :  { %6563 = vmatmul.mubr.msk.bf16.gmra.mxu1 %vm18_vm0, %v7795_v17  ;;  %6634 = vmatprep.mubr.msk.bf16.mxu0 %vm18_vm0, %v1342_v21  ;;  %v1314_v21 = vld [vmem:[#allocation2 + $0x31a] sm:$0xff]  ;;  %v7833_v32 = vpack.c.bf16 %v320_v26, %v319_v14 }
  0xe3   :  { %6566 = vmatprep.mubr.msk.bf16.mxu1 %vm18_vm0, %v7797_v24  ;;  %v1347_v31 = vpack.c.bf16 %v1315_v25, %v1314_v21  ;;  %v7877_v25 = vld [vmem:[%s10519_s1 + $0x88] sm:$0xff]  }
  0xe4   :  { %10586 = vst [vmem:[#allocation7_spill] sm:$0xff] %v7877_v25 }
  0xe9   :  { %6635 = vmatmul.mubr.msk.bf16.gmra.mxu0 %vm18_vm0, %v1343_v45  ;;  %v2379_v45 = vld [vmem:[#allocation2 + $0x39] sm:$0xff] }
  0xea   :  { %6567 = vmatmul.mubr.msk.bf16.gmra.mxu1 %vm18_vm0, %v7805_v46  ;;  %6638 = vmatprep.mubr.msk.bf16.mxu0 %vm18_vm0, %v1344_v47  ;;  %v2441_v47 = vpack.c.bf16 %v2379_v45, %v2378_v42 }
  0xeb   :  { %6570 = vmatprep.mubr.msk.bf16.mxu1 %vm18_vm0, %v7807_v48 }
  0xf1   :  { %6639 = vmatmul.mubr.msk.bf16.gmra.mxu0 %vm18_vm0, %v1345_v4 }
  0xf2   :  { %6571 = vmatmul.mubr.msk.bf16.gmra.mxu1 %vm18_vm0, %v7815_v7  ;;  %6642 = vmatprep.mubr.msk.bf16.mxu0 %vm18_vm0, %v1346_v9  ;;  %v2384_v9 = vld [vmem:[#allocation2 + $0x79] sm:$0xff] }
  0xf3   :  { %6574 = vmatprep.mubr.msk.bf16.mxu1 %vm18_vm0, %v7817_v10  ;;  %v2444_v21 = vpack.c.bf16 %v2385_v11, %v2384_v9 }
  0xf9   :  { %6643 = vmatmul.mubr.msk.bf16.gmra.mxu0 %vm18_vm0, %v1347_v31  ;;  %v2386_v31 = vld [vmem:[#allocation2 + $0x91] sm:$0xff] }
  0xfa   :  { %6575 = vmatmul.mubr.msk.bf16.gmra.mxu1 %vm18_vm0, %v7833_v32  ;;  %6718 = vmatprep.mubr.msk.bf16.mxu0 %vm18_vm0, %v2440_v34  ;;  %v2387_v34 = vld [vmem:[#allocation2 + $0x99] sm:$0xff] }
  0xfb   :  { %6650 = vmatprep.mubr.msk.bf16.mxu1 %vm18_vm0, %v7652_v54  ;;  %v2382_v54 = vld [vmem:[#allocation2 + $0x61] sm:$0xff]  ;;  %v2445_v49 = vpack.c.bf16 %v2387_v34, %v2386_v31 }
 0x101   :  { %v7844_v57 = vpop.f32.mrf.mxu0  ;;  %6719 = vmatmul.mubr.msk.bf16.vlgmr.msra.gmra.mxu0 %vm18_vm0, %v2441_v47 }
 0x102   :  { %v7850_v63 = vpop.f32.mrf.mxu1  ;;  %6651 = vmatmul.mubr.msk.bf16.vlgmr.msra.gmra.mxu1 %vm18_vm0, %v7654_v55  ;;  %6851 = vmatpush3.bf16.msra.mxu0 %v7696_v36  ;;  %v2443_v55 = vpack.c.bf16 %v2383_v1, %v2382_v54 }
 0x103   :  { %10582 = vst [vmem:[#allocation3_spill] sm:$0xff] %v7850_v63  ;;  %6783 = vmatpush3.bf16.msra.mxu1 %v7691_v33  ;;  %v7856_v4 = vpop.f32.mrf.mxu0  ;;  %6654 = vmatprep.mubr.msk.bf16.mxu1 %vm18_vm0, %v7668_v6  ;;  %v7868_v33 = vld [vmem:[%s10519_s1 + $0x78] sm:$0xff]  }
 0x104   :  { %v7860_v12 = vpop.f32.mrf.mxu1  ;;  %6722 = vmatprep.mubr.msk.bf16.mxu0 %vm18_vm0, %v2442_v52  ;;  %6784 = vmatprep.subr.bf16.mxu1 %v7071_v56  ;;  %10584 = vst [vmem:[#allocation5_spill] sm:$0xff] %v7868_v33 }
 0x105   :  { %10583 = vst [vmem:[#allocation4_spill] sm:$0xff] %v7860_v12  ;;  %v7863_v14 = vpop.f32.mrf.mxu0  ;;  %6852 = vmatprep.subr.bf16.mxu0 %v7072_v59 }
 0x106   :  { %v7870_v36 = vpop.f32.mrf.mxu1  ;;  %6853 = vmatpush3.bf16.msra.mxu0 %v7072_v59 }
 0x107   :  { %10585 = vst [vmem:[#allocation6_spill] sm:$0xff] %v7870_v36  ;;  %v7872_v6 = vpop.f32.mrf.mxu0  ;;  %6785 = vmatpush3.bf16.msra.mxu1 %v7071_v56  ;;  %6986 = vmatprep.subr.bf16.mxu0 %v7877_v25 }
 0x108   :  { %v7879_v26 = vpop.f32.mrf.mxu1  ;;  %6918 = vmatprep.subr.bf16.mxu1 %v7868_v33 }
 0x109   :  { %10587 = vst [vmem:[#allocation8_spill] sm:$0xff] %v7879_v26  ;;  %v7882_v28 = vpop.f32.mrf.mxu0  ;;  %6723 = vmatmul.mubr.msk.bf16.gmra.mxu0 %vm18_vm0, %v2443_v55 }
 0x10a   :  { %v7886_v30 = vpop.f32.mrf.mxu1  ;;  %6655 = vmatmul.mubr.msk.bf16.gmra.mxu1 %vm18_vm0, %v7670_v8  ;;  %6726 = vmatprep.mubr.msk.bf16.mxu0 %vm18_vm0, %v2444_v21 }
 0x10b   :  { %10588 = vst [vmem:[#allocation9_spill] sm:$0xff] %v7886_v30  ;;  %v7891_v42 = vpop.f32.mrf.mxu0  ;;  %6658 = vmatprep.mubr.msk.bf16.mxu1 %vm18_vm0, %v7678_v20 }
 0x10c   :  { %v7895_v45 = vpop.f32.mrf.mxu1 }
 0x10d   :  { %10589 = vst [vmem:[#allocation10_spill] sm:$0xff] %v7895_v45  ;;  %v7897_v47 = vpop.f32.mrf.mxu0 }
 0x10e   :  { %v7899_v50 = vpop.f32.mrf.mxu1 }
 0x10f   :  { %10590 = vst [vmem:[#allocation11_spill] sm:$0xff] %v7899_v50  ;;  %v7901_v52 = vpop.f32.mrf.mxu0 }
 0x110   :  { %v7903_v56 = vpop.f32.mrf.mxu1 }
 0x111   :  { %10591 = vst [vmem:[#allocation12_spill] sm:$0xff] %v7903_v56  ;;  %v7905_v8 = vpop.f32.mrf.mxu0  ;;  %6727 = vmatmul.mubr.msk.bf16.gmra.mxu0 %vm18_vm0, %v2445_v49 }
 0x112   :  { %v7908_v59 = vpop.f32.mrf.mxu1  ;;  %6659 = vmatmul.mubr.msk.bf16.gmra.mxu1 %vm18_vm0, %v7680_v22  ;;  %6730 = vmatprep.mubr.msk.bf16.mxu0 %vm18_vm0, %v7526_v35 }
 0x113   :  { %10592 = vst [vmem:[#allocation13_spill] sm:$0xff] %v7908_v59  ;;  %v7914_v20 = vpop.f32.mrf.mxu0  ;;  %6662 = vmatprep.mubr.msk.bf16.mxu1 %vm18_vm0, %v7698_v37 }
 0x114   :  { %v7918_v54 = vpop.f32.mrf.mxu1 }
 0x115   :  { %10593 = vst [vmem:[#allocation14_spill] sm:$0xff] %v7918_v54  ;;  %v7920_v1 = vpop.f32.mrf.mxu0 }
 0x116   :  { %v7922_v9 = vpop.f32.mrf.mxu1 }
 0x117   :  { %10594 = vst [vmem:[#allocation15_spill] sm:$0xff] %v7922_v9  ;;  %v7924_v11 = vpop.f32.mrf.mxu0  ;;  %v2409_v9 = vld [vmem:[#allocation2 + $0x1d1] sm:$0xff] }
 0x118   :  { %v7926_v55 = vpop.f32.mrf.mxu1 }
 0x119   :  { %10595 = vst [vmem:[#allocation16_spill] sm:$0xff] %v7926_v55  ;;  %v7928_v21 = vpop.f32.mrf.mxu0  ;;  %6731 = vmatmul.mubr.msk.bf16.gmra.mxu0 %vm18_vm0, %v7535_v39  ;;  %v2408_v55 = vld [vmem:[#allocation2 + $0x1c9] sm:$0xff] }
 0x11a   :  { %v7932_v35 = vpop.f32.mrf.mxu1  ;;  %6663 = vmatmul.mubr.msk.bf16.gmra.mxu1 %vm18_vm0, %v7701_v40  ;;  %6734 = vmatprep.mubr.msk.bf16.mxu0 %vm18_vm0, %v7603_v0 }
 0x11b   :  { %10596 = vst [vmem:[#allocation17_spill] sm:$0xff] %v7932_v35  ;;  %v7938_v22 = vpop.f32.mrf.mxu0  ;;  %6666 = vmatprep.mubr.msk.bf16.mxu1 %vm18_vm0, %v7710_v51 }
 0x11c   :  { %v7942_v37 = vpop.f32.mrf.mxu1 }
 0x11d   :  { %10597 = vst [vmem:[#allocation18_spill] sm:$0xff] %v7942_v37  ;;  %v7944_v31 = vpop.f32.mrf.mxu0 }
 0x11e   :  { %v7946_v34 = vpop.f32.mrf.mxu1 }
 0x11f   :  { %10598 = vst [vmem:[#allocation19_spill] sm:$0xff] %v7946_v34  ;;  %v7948_v39 = vpop.f32.mrf.mxu0 }
 0x120   :  { %v7950_v49 = vpop.f32.mrf.mxu1 }
 0x121   :  { %10599 = vst [vmem:[#allocation20_spill] sm:$0xff] %v7950_v49  ;;  %v7952_v35 = vpop.f32.mrf.mxu0  ;;  %6735 = vmatmul.mubr.msk.bf16.gmra.mxu0 %vm18_vm0, %v7610_v3 }
 0x122   :  { %v7956_v0 = vpop.f32.mrf.mxu1  ;;  %6667 = vmatmul.mubr.msk.bf16.gmra.mxu1 %vm18_vm0, %v7712_v53  ;;  %6738 = vmatprep.mubr.msk.bf16.mxu0 %vm18_vm0, %v7619_v13 }
 0x123   :  { %10600 = vst [vmem:[#allocation21_spill] sm:$0xff] %v7956_v0  ;;  %v7962_v40 = vpop.f32.mrf.mxu0  ;;  %6670 = vmatprep.mubr.msk.bf16.mxu1 %vm18_vm0, %v7720_v2 }
 0x124   :  { %v7966_v51 = vpop.f32.mrf.mxu1 }
 0x125   :  { %10601 = vst [vmem:[#allocation22_spill] sm:$0xff] %v7966_v51  ;;  %v7968_v49 = vpop.f32.mrf.mxu0 }
 0x126   :  { %v7970_v34 = vpop.f32.mrf.mxu1 }
 0x127   :  { %10602 = vst [vmem:[#allocation23_spill] sm:$0xff] %v7970_v34  ;;  %v7972_v3 = vpop.f32.mrf.mxu0 }
 0x128   :  { %v7974_v0 = vpop.f32.mrf.mxu1 }
 0x129   :  { %10603 = vst [vmem:[#allocation24_spill] sm:$0xff] %v7974_v0  ;;  %v7976_v37 = vpop.f32.mrf.mxu0  ;;  %6739 = vmatmul.mubr.msk.bf16.gmra.mxu0 %vm18_vm0, %v7621_v15 }
 0x12a   :  { %v7980_v13 = vpop.f32.mrf.mxu1  ;;  %6671 = vmatmul.mubr.msk.bf16.gmra.mxu1 %vm18_vm0, %v7722_v5  ;;  %6742 = vmatprep.mubr.msk.bf16.mxu0 %vm18_vm0, %v7635_v27  ;;  %v1844_v5 = vld [vmem:[#allocation2 + $0x180] sm:$0xff] }
 0x12b   :  { %10604 = vst [vmem:[#allocation25_spill] sm:$0xff] %v7980_v13  ;;  %v7986_v53 = vpop.f32.mrf.mxu0  ;;  %6674 = vmatprep.mubr.msk.bf16.mxu1 %vm18_vm0, %v7730_v19  ;;  %v2406_v19 = vld [vmem:[#allocation2 + $0x181] sm:$0xff] }
 0x12c   :  { %v7990_v2 = vpop.f32.mrf.mxu1 }
 0x12d   :  { %10605 = vst [vmem:[#allocation26_spill] sm:$0xff] %v7990_v2  ;;  %v7992_v0 = vpop.f32.mrf.mxu0 }
 0x12e   :  { %v7994_v34 = vpop.f32.mrf.mxu1 }
 0x12f   :  { %10606 = vst [vmem:[#allocation27_spill] sm:$0xff] %v7994_v34  ;;  %v7996_v15 = vpop.f32.mrf.mxu0  ;;  %v2407_v34 = vld [vmem:[#allocation2 + $0x189] sm:$0xff] }
 0x130   :  { %v7998_v13 = vpop.f32.mrf.mxu1  ;;  %v2455_v54 = vpack.c.bf16 %v2407_v34, %v2406_v19  ;;  %v2411_v34 = vld [vmem:[#allocation2 + $0x1e9] sm:$0xff] }
 0x131   :  { %10607 = vst [vmem:[#allocation28_spill] sm:$0xff] %v7998_v13  ;;  %v8000_v51 = vpop.f32.mrf.mxu0  ;;  %6743 = vmatmul.mubr.msk.bf16.gmra.mxu0 %vm18_vm0, %v7637_v29  ;;  %v1845_v13 = vld [vmem:[#allocation2 + $0x188] sm:$0xff] }
 0x132   :  { %v8004_v27 = vpop.f32.mrf.mxu1  ;;  %6675 = vmatmul.mubr.msk.bf16.gmra.mxu1 %vm18_vm0, %v7732_v23  ;;  %6746 = vmatprep.mubr.msk.bf16.mxu0 %vm18_vm0, %v7645_v41  ;;  %v1893_v59 = vpack.c.bf16 %v1845_v13, %v1844_v5  ;;  %v2456_v41 = vpack.c.bf16 %v2409_v9, %v2408_v55  ;;  %v2412_v9 = vld [vmem:[#allocation2 + $0x1f9] sm:$0xff]  ;;  %v2413_v55 = vld [vmem:[#allocation2 + $0x201] sm:$0xff] }
 0x133   :  { %10608 = vst [vmem:[#allocation29_spill] sm:$0xff] %v8004_v27  ;;  %v8010_v2 = vpop.f32.mrf.mxu0  ;;  %6678 = vmatprep.mubr.msk.bf16.mxu1 %vm18_vm0, %v7748_v44 }
 0x134   :  { %v8014_v29 = vpop.f32.mrf.mxu1 }
 0x135   :  { %10609 = vst [vmem:[#allocation30_spill] sm:$0xff] %v8014_v29  ;;  %v8016_v27 = vpop.f32.mrf.mxu0  ;;  %v2410_v29 = vld [vmem:[#allocation2 + $0x1e1] sm:$0xff] }
 0x136   :  { %v8018_v23 = vpop.f32.mrf.mxu1 }
 0x137   :  { %10610 = vst [vmem:[#allocation31_spill] sm:$0xff] %v8018_v23  ;;  %v8020_v56 = vpop.f32.mrf.mxu0 }
 0x138   :  { %v8022_v50 = vpop.f32.mrf.mxu1 }
 0x139   :  { %10611 = vst [vmem:[#allocation32_spill] sm:$0xff] %v8022_v50  ;;  %v8024_v45 = vpop.f32.mrf.mxu0  ;;  %6747 = vmatmul.mubr.msk.bf16.gmra.mxu0 %vm18_vm0, %v2455_v54  ;;  %v2457_v54 = vpack.c.bf16 %v2411_v34, %v2410_v29 }
 0x13a   :  { %v8027_v44 = vpop.f32.mrf.mxu1  ;;  %6679 = vmatmul.mubr.msk.bf16.gmra.mxu1 %vm18_vm0, %v1893_v59  ;;  %6750 = vmatprep.mubr.msk.bf16.mxu0 %vm18_vm0, %v2456_v41 }
 0x13b   :  { %10612 = vst [vmem:[#allocation33_spill] sm:$0xff] %v8027_v44  ;;  %v8031_v19 = vpop.f32.mrf.mxu0  ;;  %6682 = vmatprep.mubr.msk.bf16.mxu1 %vm18_vm0, %v7755_v60  ;;  %v2458_v44 = vpack.c.bf16 %v2413_v55, %v2412_v9  ;;  %v2414_v60 = vld [vmem:[#allocation2 + $0x211] sm:$0xff]  ;;  %v2416_v9 = vld [vmem:[#allocation2 + $0x229] sm:$0xff] }
 0x13c   :  { %v8035_v13 = vpop.f32.mrf.mxu1  ;;  %v2417_v55 = vld [vmem:[#allocation2 + $0x231] sm:$0xff] }
 0x13d   :  { %10613 = vst [vmem:[#allocation34_spill] sm:$0xff] %v8035_v13  ;;  %v8037_v5 = vpop.f32.mrf.mxu0  ;;  %v2415_v13 = vld [vmem:[#allocation2 + $0x219] sm:$0xff]  ;;  %v2460_v12 = vpack.c.bf16 %v2417_v55, %v2416_v9 }
 0x13e   :  { %v8039_v50 = vpop.f32.mrf.mxu1  ;;  %v2459_v36 = vpack.c.bf16 %v2415_v13, %v2414_v60  ;;  %v2419_v13 = vld [vmem:[#allocation2 + $0x249] sm:$0xff] }
 0x13f   :  { %10614 = vst [vmem:[#allocation35_spill] sm:$0xff] %v8039_v50  ;;  %v8041_v59 = vpop.f32.mrf.mxu0 }
 0x140   :  { %v8043_v41 = vpop.f32.mrf.mxu1 }
 0x141   :  { %10615 = vst [vmem:[#allocation36_spill] sm:$0xff] %v8043_v41  ;;  %v6584_v23 = vpop.f32.mrf.mxu0  ;;  %6751 = vmatmul.mubr.msk.bf16.gmra.mxu0 %vm18_vm0, %v2457_v54 }
 0x142   :  { %v6516_v30 = vpop.f32.mrf.mxu1  ;;  %6683 = vmatmul.mubr.msk.bf16.gmra.mxu1 %vm18_vm0, %v7757_v62  ;;  %6754 = vmatprep.mubr.msk.bf16.mxu0 %vm18_vm0, %v2458_v44 }
 0x143   :  { %v1006_v29 = vadd.f32 %v6516_v30, %v7844_v57  ;;  %v1495_v34 = vpop.f32.mrf.mxu0  ;;  %6686 = vmatprep.mubr.msk.bf16.mxu1 %vm18_vm0, %v7765_v16 }
 0x144   :  { %v997_v41 = vpop.f32.mrf.mxu1 }
 0x145   :  { %v8052_v50 = vadd.f32 %v6584_v23, %v1006_v29  ;;  %v998_v54 = vadd.f32 %v997_v41, %v7856_v4  ;;  %v6585_v26 = vpop.f32.mrf.mxu0  ;;  %v2418_v4 = vld [vmem:[#allocation2 + $0x241] sm:$0xff] }
 0x146   :  { %v6517_v62 = vpop.f32.mrf.mxu1 }
 0x147   :  { %v8055_v44 = vadd.f32 %v1495_v34, %v998_v54  ;;  %v1009_v33 = vadd.f32 %v6517_v62, %v7863_v14  ;;  %v1498_v57 = vpop.f32.mrf.mxu0  ;;  %v2461_v34 = vpack.c.bf16 %v2419_v13, %v2418_v4  ;;  %v2425_v13 = vld [vmem:[#allocation2 + $0x291] sm:$0xff] }
 0x148   :  { %v1000_v30 = vpop.f32.mrf.mxu1 }
 0x149   :  { %v8058_v63 = vadd.f32 %v6585_v26, %v1009_v33  ;;  %v1001_v16 = vadd.f32 %v1000_v30, %v7872_v6  ;;  %v6588_v25 = vpop.f32.mrf.mxu0  ;;  %6755 = vmatmul.mubr.msk.bf16.gmra.mxu0 %vm18_vm0, %v2459_v36  ;;  %v2420_v33 = vld [vmem:[#allocation2 + $0x259] sm:$0xff]  ;;  %v2421_v6 = vld [vmem:[#allocation2 + $0x261] sm:$0xff] }
 0x14a   :  { %v6520_v23 = vpop.f32.mrf.mxu1  ;;  %6687 = vmatmul.mubr.msk.bf16.gmra.mxu1 %vm18_vm0, %v7767_v18  ;;  %6758 = vmatprep.mubr.msk.bf16.mxu0 %vm18_vm0, %v2460_v12  ;;  %v2462_v9 = vpack.c.bf16 %v2421_v6, %v2420_v33 }
 0x14b   :  { %v8065_v41 = vadd.f32 %v1498_v57, %v1001_v16  ;;  %v1022_v14 = vadd.f32 %v6520_v23, %v7882_v28  ;;  %v1511_v60 = vpop.f32.mrf.mxu0  ;;  %6690 = vmatprep.mubr.msk.bf16.mxu1 %vm18_vm0, %v7775_v38  ;;  %v2423_v16 = vld [vmem:[#allocation2 + $0x279] sm:$0xff] }
 0x14c   :  { %v1013_v26 = vpop.f32.mrf.mxu1 }
 0x14d   :  { %v8070_v36 = vadd.f32 %v6588_v25, %v1022_v14  ;;  %v1014_v29 = vadd.f32 %v1013_v26, %v7891_v42  ;;  %v6589_v18 = vpop.f32.mrf.mxu0  ;;  %v2422_v42 = vld [vmem:[#allocation2 + $0x271] sm:$0xff] }
 0x14e   :  { %v6521_v12 = vpop.f32.mrf.mxu1  ;;  %v2463_v6 = vpack.c.bf16 %v2423_v16, %v2422_v42 }
 0x14f   :  { %v8073_v55 = vadd.f32 %v1511_v60, %v1014_v29  ;;  %v1025_v54 = vadd.f32 %v6521_v12, %v7897_v47  ;;  %v1514_v28 = vpop.f32.mrf.mxu0 }
 0x150   :  { %v1016_v62 = vpop.f32.mrf.mxu1 }
 0x151   :  { %v8076_v57 = vadd.f32 %v6589_v18, %v1025_v54  ;;  %v1017_v38 = vadd.f32 %v1016_v62, %v7901_v52  ;;  %v6592_v30 = vpop.f32.mrf.mxu0  ;;  %6759 = vmatmul.mubr.msk.bf16.gmra.mxu0 %vm18_vm0, %v2461_v34  ;;  %v2424_v52 = vld [vmem:[#allocation2 + $0x289] sm:$0xff] }
 0x152   :  { %v6524_v25 = vpop.f32.mrf.mxu1  ;;  %6691 = vmatmul.mubr.msk.bf16.gmra.mxu1 %vm18_vm0, %v7777_v43  ;;  %6762 = vmatprep.mubr.msk.bf16.mxu0 %vm18_vm0, %v2462_v9  ;;  %v2464_v29 = vpack.c.bf16 %v2425_v13, %v2424_v52  ;;  %v2427_v62 = vld [vmem:[#allocation2 + $0x2a9] sm:$0xff] }
 0x153   :  { %v8083_v23 = vadd.f32 %v1514_v28, %v1017_v38  ;;  %v1038_v47 = vadd.f32 %v6524_v25, %v7905_v8  ;;  %v1527_v4 = vpop.f32.mrf.mxu0  ;;  %6694 = vmatprep.mubr.msk.bf16.mxu1 %vm18_vm0, %v7785_v58  ;;  %v2429_v25 = vld [vmem:[#allocation2 + $0x2c1] sm:$0xff] }
 0x154   :  { %v1029_v14 = vpop.f32.mrf.mxu1 }
 0x155   :  { %v8088_v60 = vadd.f32 %v6592_v30, %v1038_v47  ;;  %v1030_v33 = vadd.f32 %v1029_v14, %v7914_v20  ;;  %v6593_v43 = vpop.f32.mrf.mxu0  ;;  %v2426_v20 = vld [vmem:[#allocation2 + $0x2a1] sm:$0xff] }
 0x156   :  { %v6525_v26 = vpop.f32.mrf.mxu1 }
 0x157   :  { %v8091_v18 = vadd.f32 %v1527_v4, %v1030_v33  ;;  %v1041_v34 = vadd.f32 %v6525_v26, %v7920_v1  ;;  %v1530_v8 = vpop.f32.mrf.mxu0  ;;  %v2465_v4 = vpack.c.bf16 %v2427_v62, %v2426_v20 }
 0x158   :  { %v1032_v12 = vpop.f32.mrf.mxu1 }
 0x159   :  { %v8094_v9 = vadd.f32 %v6593_v43, %v1041_v34  ;;  %v1033_v58 = vadd.f32 %v1032_v12, %v7924_v11  ;;  %v6596_v54 = vpop.f32.mrf.mxu0  ;;  %6763 = vmatmul.mubr.msk.bf16.gmra.mxu0 %vm18_vm0, %v2463_v6  ;;  %v2428_v11 = vld [vmem:[#allocation2 + $0x2b9] sm:$0xff] }
 0x15a   :  { %v6528_v28 = vpop.f32.mrf.mxu1  ;;  %6695 = vmatmul.mubr.msk.bf16.gmra.mxu1 %vm18_vm0, %v7787_v61  ;;  %6766 = vmatprep.mubr.msk.bf16.mxu0 %vm18_vm0, %v2464_v29  ;;  %v2466_v13 = vpack.c.bf16 %v2429_v25, %v2428_v11  ;;  %v2431_v34 = vld [vmem:[#allocation2 + $0x2d9] sm:$0xff] }
 0x15b   :  { %v8101_v38 = vadd.f32 %v1530_v8, %v1033_v58  ;;  %v1054_v1 = vadd.f32 %v6528_v28, %v7928_v21  ;;  %v1543_v30 = vpop.f32.mrf.mxu0  ;;  %6698 = vmatprep.mubr.msk.bf16.mxu1 %vm18_vm0, %v7795_v17  ;;  %v2433_v58 = vld [vmem:[#allocation2 + $0x2f1] sm:$0xff] }
 0x15c   :  { %v1045_v42 = vpop.f32.mrf.mxu1 }
 0x15d   :  { %v8106_v16 = vadd.f32 %v6596_v54, %v1054_v1  ;;  %v1046_v47 = vadd.f32 %v1045_v42, %v7938_v22  ;;  %v6597_v61 = vpop.f32.mrf.mxu0  ;;  %v2430_v22 = vld [vmem:[#allocation2 + $0x2d1] sm:$0xff] }
 0x15e   :  { %v6529_v52 = vpop.f32.mrf.mxu1  ;;  %v2467_v62 = vpack.c.bf16 %v2431_v34, %v2430_v22 }
 0x15f   :  { %v8109_v14 = vadd.f32 %v1543_v30, %v1046_v47  ;;  %v1057_v33 = vadd.f32 %v6529_v52, %v7944_v31  ;;  %v1546_v21 = vpop.f32.mrf.mxu0  ;;  %v2435_v52 = vld [vmem:[#allocation2 + $0x309] sm:$0xff] }
 0x160   :  { %v1048_v43 = vpop.f32.mrf.mxu1 }
 0x161   :  { %v8112_v6 = vadd.f32 %v6597_v61, %v1057_v33  ;;  %v1049_v17 = vadd.f32 %v1048_v43, %v7948_v39  ;;  %v6600_v26 = vpop.f32.mrf.mxu0  ;;  %6767 = vmatmul.mubr.msk.bf16.gmra.mxu0 %vm18_vm0, %v2465_v4  ;;  %v2432_v39 = vld [vmem:[#allocation2 + $0x2e9] sm:$0xff] }
 0x162   :  { %v6532_v29 = vpop.f32.mrf.mxu1  ;;  %6699 = vmatmul.mubr.msk.bf16.gmra.mxu1 %vm18_vm0, %v7797_v24  ;;  %6770 = vmatprep.mubr.msk.bf16.mxu0 %vm18_vm0, %v2466_v13  ;;  %v2468_v30 = vpack.c.bf16 %v2433_v58, %v2432_v39 }
 0x163   :  { %v8119_v8 = vadd.f32 %v1546_v21, %v1049_v17  ;;  %v1070_v31 = vadd.f32 %v6532_v29, %v7952_v35  ;;  %v1559_v12 = vpop.f32.mrf.mxu0  ;;  %6702 = vmatprep.mubr.msk.bf16.mxu1 %vm18_vm0, %v7805_v46  ;;  %v2437_v21 = vld [vmem:[#allocation2 + $0x321] sm:$0xff] }
 0x164   :  { %v1061_v54 = vpop.f32.mrf.mxu1 }
 0x165   :  { %v8124_v28 = vadd.f32 %v6600_v26, %v1070_v31  ;;  %v1062_v20 = vadd.f32 %v1061_v54, %v7962_v40  ;;  %v6601_v24 = vpop.f32.mrf.mxu0  ;;  %v2434_v40 = vld [vmem:[#allocation2 + $0x301] sm:$0xff] }
 0x166   :  { %v6533_v1 = vpop.f32.mrf.mxu1  ;;  %v2469_v29 = vpack.c.bf16 %v2435_v52, %v2434_v40 }
 0x167   :  { %v8127_v11 = vadd.f32 %v1559_v12, %v1062_v20  ;;  %v1073_v25 = vadd.f32 %v6533_v1, %v7968_v49  ;;  %v1562_v35 = vpop.f32.mrf.mxu0 }
 0x168   :  { %v1064_v42 = vpop.f32.mrf.mxu1 }
 0x169   :  { %v8130_v47 = vadd.f32 %v6601_v24, %v1073_v25  ;;  %v1065_v46 = vadd.f32 %v1064_v42, %v7972_v3  ;;  %v6604_v61 = vpop.f32.mrf.mxu0  ;;  %6771 = vmatmul.mubr.msk.bf16.gmra.mxu0 %vm18_vm0, %v2467_v62  ;;  %v2436_v3 = vld [vmem:[#allocation2 + $0x319] sm:$0xff]  ;;  %v2438_v24 = vld [vmem:[#allocation2 + $0x331] sm:$0xff] }
 0x16a   :  { %v6536_v4 = vpop.f32.mrf.mxu1  ;;  %6703 = vmatmul.mubr.msk.bf16.gmra.mxu1 %vm18_vm0, %v7807_v48  ;;  %6774 = vmatprep.mubr.msk.bf16.mxu0 %vm18_vm0, %v2468_v30  ;;  %v2470_v34 = vpack.c.bf16 %v2437_v21, %v2436_v3  ;;  %v2439_v62 = vld [vmem:[#allocation2 + $0x339] sm:$0xff]  ;;  %v3501_v25 = vld [vmem:[#allocation2 + $0x30] sm:$0xff] }
 0x16b   :  { %v8137_v13 = vadd.f32 %v1562_v35, %v1065_v46  ;;  %v1086_v49 = vadd.f32 %v6536_v4, %v7976_v37  ;;  %v1575_v33 = vpop.f32.mrf.mxu0  ;;  %6706 = vmatprep.mubr.msk.bf16.mxu1 %vm18_vm0, %v7815_v7  ;;  %v3502_v35 = vld [vmem:[#allocation2 + $0x38] sm:$0xff]  ;;  %v2471_v52 = vpack.c.bf16 %v2439_v62, %v2438_v24 }
 0x16c   :  { %v1077_v43 = vpop.f32.mrf.mxu1  ;;  %v2938_v46 = vld [vmem:[#allocation2 + $0x1a] sm:$0xff]  ;;  %v3565_v3 = vpack.c.bf16 %v3502_v35, %v3501_v25  ;;  %v3506_v25 = vld [vmem:[#allocation2 + $0x68] sm:$0xff] }
 0x16d   :  { %v8142_v17 = vadd.f32 %v6604_v61, %v1086_v49  ;;  %v1078_v26 = vadd.f32 %v1077_v43, %v7986_v53  ;;  %v6605_v48 = vpop.f32.mrf.mxu0  ;;  %v1876_v53 = vld [vmem:[#allocation2 + $0x330] sm:$0xff]  ;;  %v2939_v61 = vld [vmem:[#allocation2 + $0x22] sm:$0xff] }
 0x16e   :  { %v6537_v22 = vpop.f32.mrf.mxu1  ;;  %v3002_v43 = vpack.c.bf16 %v2939_v61, %v2938_v46 }
 0x16f   :  { %v8145_v31 = vadd.f32 %v1575_v33, %v1078_v26  ;;  %v1089_v12 = vadd.f32 %v6537_v22, %v7992_v0  ;;  %v1578_v37 = vpop.f32.mrf.mxu0 }
 0x170   :  { %v1080_v39 = vpop.f32.mrf.mxu1 }
 0x171   :  { %v8148_v58 = vadd.f32 %v6605_v48, %v1089_v12  ;;  %v1081_v7 = vadd.f32 %v1080_v39, %v7996_v15  ;;  %v6608_v54 = vpop.f32.mrf.mxu0  ;;  %6775 = vmatmul.mubr.msk.bf16.gmra.mxu0 %vm18_vm0, %v2469_v29  ;;  %v1877_v15 = vld [vmem:[#allocation2 + $0x338] sm:$0xff]  ;;  %v3504_v12 = vld [vmem:[#allocation2 + $0x50] sm:$0xff] }
 0x172   :  { %v6540_v20 = vpop.f32.mrf.mxu1  ;;  %6707 = vmatmul.mubr.msk.bf16.gmra.mxu1 %vm18_vm0, %v7817_v10  ;;  %6778 = vmatprep.mubr.msk.bf16.mxu0 %vm18_vm0, %v2470_v34  ;;  %v1909_v33 = vpack.c.bf16 %v1877_v15, %v1876_v53  ;;  %v3503_v34 = vld [vmem:[#allocation2 + $0x48] sm:$0xff]  ;;  %v2943_v53 = vld [vmem:[#allocation2 + $0x52] sm:$0xff]  ;;  %v3505_v15 = vld [vmem:[#allocation2 + $0x60] sm:$0xff] }
 0x173   :  { %v8155_v1 = vadd.f32 %v1578_v37, %v1081_v7  ;;  %v1102_v0 = vadd.f32 %v6540_v20, %v8000_v51  ;;  %v1591_v30 = vpop.f32.mrf.mxu0  ;;  %6710 = vmatprep.mubr.msk.bf16.mxu1 %vm18_vm0, %v7833_v32  ;;  %v2940_v7 = vld [vmem:[#allocation2 + $0x32] sm:$0xff]  ;;  %v2942_v20 = vld [vmem:[#allocation2 + $0x4a] sm:$0xff] }
 0x174   :  { %v1093_v42 = vpop.f32.mrf.mxu1 }
 0x175   :  { %v8160_v10 = vadd.f32 %v6608_v54, %v1102_v0  ;;  %v1094_v4 = vadd.f32 %v1093_v42, %v8010_v2  ;;  %v6609_v40 = vpop.f32.mrf.mxu0  ;;  %v2941_v54 = vld [vmem:[#allocation2 + $0x3a] sm:$0xff] }
 0x176   :  { %v6541_v49 = vpop.f32.mrf.mxu1  ;;  %v3003_v42 = vpack.c.bf16 %v2941_v54, %v2940_v7  ;;  %v3510_v7 = vld [vmem:[#allocation2 + $0x98] sm:$0xff] }
 0x177   :  { %v8163_v51 = vadd.f32 %v1591_v30, %v1094_v4  ;;  %v1105_v21 = vadd.f32 %v6541_v49, %v8016_v27  ;;  %v1594_v32 = vpop.f32.mrf.mxu0  ;;  %v3566_v30 = vpack.c.bf16 %v3504_v12, %v3503_v34  ;;  %v8182_v4 = vpack.c.bf16 %v2943_v53, %v2942_v20  ;;  %v7075_v49 = vld [vmem:[%s10519_s1 + $0x70] sm:$0xff]   ;;  %v2947_v20 = vld [vmem:[#allocation2 + $0x82] sm:$0xff] }
 0x178   :  { %v1096_v26 = vpop.f32.mrf.mxu1 }
 0x179   :  { %v8166_v48 = vadd.f32 %v6609_v40, %v1105_v21  ;;  %v1097_v29 = vadd.f32 %v1096_v26, %v8020_v56  ;;  %v6612_v22 = vpop.f32.mrf.mxu0  ;;  %6779 = vmatmul.mubr.msk.bf16.gmra.mxu0 %vm18_vm0, %v2471_v52  ;;  %v3567_v52 = vpack.c.bf16 %v3506_v25, %v3505_v15  ;;  %v3507_v26 = vld [vmem:[#allocation2 + $0x78] sm:$0xff] }
 0x17a   :  { %v6544_v2 = vpop.f32.mrf.mxu1  ;;  %6711 = vmatmul.mubr.msk.bf16.gmra.mxu1 %vm18_vm0, %v1909_v33  ;;  %6854 = vmatprep.mubr.msk.bf16.mxu0 %vm18_vm0, %v3565_v3 }
 0x17b   :  { %v8172_v37 = vadd.f32 %v1594_v32, %v1097_v29  ;;  %v1118_v27 = vadd.f32 %v6544_v2, %v8024_v45  ;;  %v1607_v39 = vpop.f32.mrf.mxu0  ;;  %6786 = vmatprep.mubr.msk.bf16.mxu1 %vm18_vm0, %v3002_v43  ;;  %v10616_v32 = vld [vmem:[#allocation7_spill] sm:$0xff] }
 0x17c   :  { %v1109_v56 = vpop.f32.mrf.mxu1  ;;  %v2944_v43 = vld [vmem:[#allocation2 + $0x62] sm:$0xff] }
 0x17d   :  { %v8176_v24 = vadd.f32 %v6612_v22, %v1118_v27  ;;  %v1110_v62 = vadd.f32 %v1109_v56, %v8031_v19  ;;  %v6613_v0 = vpop.f32.mrf.mxu0  ;;  %v3508_v29 = vld [vmem:[#allocation2 + $0x80] sm:$0xff]  ;;  %v2945_v27 = vld [vmem:[#allocation2 + $0x6a] sm:$0xff] }
 0x17e   :  { %v6545_v35 = vpop.f32.mrf.mxu1  ;;  %v10617_v2 = vld [vmem:[#allocation3_spill] sm:$0xff]  ;;  %v3568_v15 = vpack.c.bf16 %v3508_v29, %v3507_v26  ;;  %v3512_v29 = vld [vmem:[#allocation2 + $0xb0] sm:$0xff] }
 0x17f   :  { %v8179_v46 = vadd.f32 %v1607_v39, %v1110_v62  ;;  %v1121_v45 = vadd.f32 %v6545_v35, %v8037_v5  ;;  %v1610_v61 = vpop.f32.mrf.mxu0  ;;  %v7076_v5 = vld [vmem:[%s10519_s1 + $0x80] sm:$0xff]   ;;  %v3509_v39 = vld [vmem:[#allocation2 + $0x90] sm:$0xff]  ;;  %v10619_v62 = vld [vmem:[#allocation4_spill] sm:$0xff]  ;;  %v3005_v35 = vpack.c.bf16 %v2945_v27, %v2944_v43 }
 0x180   :  { %v1112_v40 = vpop.f32.mrf.mxu1  ;;  %v2946_v56 = vld [vmem:[#allocation2 + $0x7a] sm:$0xff]  ;;  %v3511_v43 = vld [vmem:[#allocation2 + $0xa8] sm:$0xff] }
 0x181   :  { %v8187_v19 = vadd.f32 %v6613_v0, %v1121_v45  ;;  %v1113_v33 = vadd.f32 %v1112_v40, %v8041_v59  ;;  %v6616_v3 = vpop.f32.mrf.mxu0  ;;  %6855 = vmatmul.mubr.msk.bf16.vlgmr.msra.gmra.mxu0 %vm18_vm0, %v3566_v30  ;;  %v10618_v59 = vld [vmem:[#allocation5_spill] sm:$0xff] }
 0x182   :  { %v6548_v21 = vpop.f32.mrf.mxu1  ;;  %6787 = vmatmul.mubr.msk.bf16.vlgmr.msra.gmra.mxu1 %vm18_vm0, %v3003_v42  ;;  %6987 = vmatpush3.bf16.msra.mxu0 %v10616_v32  ;;  %v3569_v42 = vpack.c.bf16 %v3510_v7, %v3509_v39  ;;  %v10623_v32 = vld [vmem:[#allocation8_spill] sm:$0xff]  ;;  %v2949_v39 = vld [vmem:[#allocation2 + $0x9a] sm:$0xff] }
 0x183   :  { %v8196_v22 = vadd.f32 %v1610_v61, %v1113_v33  ;;  %v1134_v34 = vadd.f32 %v6548_v21, %v10617_v2  ;;  %6919 = vmatpush3.bf16.msra.mxu1 %v10618_v59  ;;  %v1623_v12 = vpop.f32.mrf.mxu0  ;;  %6790 = vmatprep.mubr.msk.bf16.mxu1 %vm18_vm0, %v8182_v4  ;;  %v10620_v61 = vld [vmem:[#allocation6_spill] sm:$0xff]  ;;  %v3513_v7 = vld [vmem:[#allocation2 + $0xc0] sm:$0xff] }
 0x184   :  { %v1125_v54 = vpop.f32.mrf.mxu1  ;;  %6858 = vmatprep.mubr.msk.bf16.mxu0 %vm18_vm0, %v3567_v52  ;;  %6920 = vmatprep.subr.bf16.mxu1 %v7075_v49  ;;  %v8209_v52 = vpack.c.bf16 %v2947_v20, %v2946_v56  ;;  %v2950_v20 = vld [vmem:[#allocation2 + $0xaa] sm:$0xff] }
 0x185   :  { %v8203_v53 = vadd.f32 %v6616_v3, %v1134_v34  ;;  %v1126_v0 = vadd.f32 %v1125_v54, %v10619_v62  ;;  %v6617_v30 = vpop.f32.mrf.mxu0  ;;  %6988 = vmatprep.subr.bf16.mxu0 %v7076_v5  ;;  %v3514_v54 = vld [vmem:[#allocation2 + $0xc8] sm:$0xff]  ;;  %v2951_v62 = vld [vmem:[#allocation2 + $0xb2] sm:$0xff] }
 0x186   :  { %v6549_v25 = vpop.f32.mrf.mxu1  ;;  %6989 = vmatpush3.bf16.msra.mxu0 %v7076_v5  ;;  %10621 = vst [vmem:[#allocation7_spill] sm:$0xff] %v8209_v52  ;;  %v2948_v5 = vld [vmem:[#allocation2 + $0x92] sm:$0xff] }
 0x187   :  { %v8206_v45 = vadd.f32 %v1623_v12, %v1126_v0  ;;  %v1137_v40 = vadd.f32 %v6549_v25, %v10620_v61  ;;  %v1626_v33 = vpop.f32.mrf.mxu0  ;;  %6921 = vmatpush3.bf16.msra.mxu1 %v7075_v49  ;;  %v10625_v12 = vld [vmem:[#allocation9_spill] sm:$0xff]  ;;  %v3007_v61 = vpack.c.bf16 %v2949_v39, %v2948_v5  ;;  %v2952_v5 = vld [vmem:[#allocation2 + $0xc2] sm:$0xff] }
 0x188   :  { %v1128_v21 = vpop.f32.mrf.mxu1  ;;  %v10634_v39 = vld [vmem:[#allocation13_spill] sm:$0xff] }
 0x189   :  { %v8211_v3 = vadd.f32 %v6617_v30, %v1137_v40  ;;  %v1129_v2 = vadd.f32 %v1128_v21, %v10623_v32  ;;  %v6620_v34 = vpop.f32.mrf.mxu0  ;;  %6859 = vmatmul.mubr.msk.bf16.gmra.mxu0 %vm18_vm0, %v3568_v15  ;;  %v10627_v30 = vld [vmem:[#allocation10_spill] sm:$0xff]  ;;  %v3571_v40 = vpack.c.bf16 %v3514_v54, %v3513_v7  ;;  %v10629_v21 = vld [vmem:[#allocation11_spill] sm:$0xff] }
 0x18a   :  { %v6552_v26 = vpop.f32.mrf.mxu1  ;;  %6791 = vmatmul.mubr.msk.bf16.gmra.mxu1 %vm18_vm0, %v3005_v35  ;;  %6862 = vmatprep.mubr.msk.bf16.mxu0 %vm18_vm0, %v3569_v42  ;;  %v3570_v35 = vpack.c.bf16 %v3512_v29, %v3511_v43  ;;  %v3515_v43 = vld [vmem:[#allocation2 + $0xd8] sm:$0xff]  ;;  %v3516_v29 = vld [vmem:[#allocation2 + $0xe0] sm:$0xff] }
 0x18b   :  { %10622 = vst [vmem:[#allocation3_spill] sm:$0xff] %v8211_v3  ;;  %v8217_v59 = vadd.f32 %v1626_v33, %v1129_v2  ;;  %v1150_v49 = vadd.f32 %v6552_v26, %v10625_v12  ;;  %v1639_v27 = vpop.f32.mrf.mxu0  ;;  %6794 = vmatprep.mubr.msk.bf16.mxu1 %vm18_vm0, %v8209_v52  ;;  %v8228_v26 = vpack.c.bf16 %v2951_v62, %v2950_v20  ;;  %v3517_v20 = vld [vmem:[#allocation2 + $0xf0] sm:$0xff]  ;;  %v3518_v62 = vld [vmem:[#allocation2 + $0xf8] sm:$0xff] }
 0x18c   :  { %v1141_v56 = vpop.f32.mrf.mxu1 }
 0x18d   :  { %10624 = vst [vmem:[#allocation5_spill] sm:$0xff] %v8217_v59  ;;  %v8222_v0 = vadd.f32 %v6620_v34, %v1150_v49  ;;  %v1142_v15 = vadd.f32 %v1141_v56, %v10627_v30  ;;  %v6621_v25 = vpop.f32.mrf.mxu0  ;;  %10630 = vst [vmem:[#allocation8_spill] sm:$0xff] %v8228_v26  ;;  %v10632_v59 = vld [vmem:[#allocation12_spill] sm:$0xff] }
 0x18e   :  { %v6553_v42 = vpop.f32.mrf.mxu1 }
 0x18f   :  { %10626 = vst [vmem:[#allocation4_spill] sm:$0xff] %v8222_v0  ;;  %v8225_v33 = vadd.f32 %v1639_v27, %v1142_v15  ;;  %v1153_v32 = vadd.f32 %v6553_v42, %v10629_v21  ;;  %v1642_v2 = vpop.f32.mrf.mxu0  ;;  %v2954_v15 = vld [vmem:[#allocation2 + $0xda] sm:$0xff]  ;;  %v3572_v21 = vpack.c.bf16 %v3516_v29, %v3515_v43  ;;  %v10641_v0 = vld [vmem:[#allocation16_spill] sm:$0xff]  ;;  %v3520_v29 = vld [vmem:[#allocation2 + $0x110] sm:$0xff] }
 0x190   :  { %v1144_v12 = vpop.f32.mrf.mxu1  ;;  %v10636_v42 = vld [vmem:[#allocation14_spill] sm:$0xff]  ;;  %v3519_v43 = vld [vmem:[#allocation2 + $0x108] sm:$0xff] }
 0x191   :  { %10628 = vst [vmem:[#allocation6_spill] sm:$0xff] %v8225_v33  ;;  %v8230_v52 = vadd.f32 %v6621_v25, %v1153_v32  ;;  %v1145_v34 = vadd.f32 %v1144_v12, %v10632_v59  ;;  %v6624_v49 = vpop.f32.mrf.mxu0  ;;  %6863 = vmatmul.mubr.msk.bf16.gmra.mxu0 %vm18_vm0, %v3570_v35  ;;  %v2953_v59 = vld [vmem:[#allocation2 + $0xca] sm:$0xff]  ;;  %v2955_v25 = vld [vmem:[#allocation2 + $0xe2] sm:$0xff]  ;;  %v3573_v12 = vpack.c.bf16 %v3518_v62, %v3517_v20 }
 0x192   :  { %v6556_v56 = vpop.f32.mrf.mxu1  ;;  %6795 = vmatmul.mubr.msk.bf16.gmra.mxu1 %vm18_vm0, %v3007_v61  ;;  %6866 = vmatprep.mubr.msk.bf16.mxu0 %vm18_vm0, %v3571_v40 }
 0x193   :  { %10631 = vst [vmem:[#allocation9_spill] sm:$0xff] %v8230_v52  ;;  %v8236_v27 = vadd.f32 %v1642_v2, %v1145_v34  ;;  %v1166_v7 = vadd.f32 %v6556_v56, %v10634_v39  ;;  %v1655_v54 = vpop.f32.mrf.mxu0  ;;  %6798 = vmatprep.mubr.msk.bf16.mxu1 %vm18_vm0, %v8228_v26  ;;  %v3009_v2 = vpack.c.bf16 %v2953_v59, %v2952_v5  ;;  %v10638_v56 = vld [vmem:[#allocation15_spill] sm:$0xff]  ;;  %v2956_v5 = vld [vmem:[#allocation2 + $0xf2] sm:$0xff] }
 0x194   :  { %v1157_v30 = vpop.f32.mrf.mxu1  ;;  %v10643_v59 = vld [vmem:[#allocation17_spill] sm:$0xff] }
 0x195   :  { %10633 = vst [vmem:[#allocation10_spill] sm:$0xff] %v8236_v27  ;;  %v8241_v35 = vadd.f32 %v6624_v49, %v1166_v7  ;;  %v1158_v61 = vadd.f32 %v1157_v30, %v10636_v42  ;;  %v6625_v40 = vpop.f32.mrf.mxu0  ;;  %v8247_v27 = vpack.c.bf16 %v2955_v25, %v2954_v15  ;;  %v3522_v15 = vld [vmem:[#allocation2 + $0x128] sm:$0xff] }
 0x196   :  { %v6557_v32 = vpop.f32.mrf.mxu1  ;;  %v2958_v42 = vld [vmem:[#allocation2 + $0x10a] sm:$0xff] }
 0x197   :  { %10635 = vst [vmem:[#allocation11_spill] sm:$0xff] %v8241_v35  ;;  %v8244_v34 = vadd.f32 %v1655_v54, %v1158_v61  ;;  %v1169_v39 = vadd.f32 %v6557_v32, %v10638_v56  ;;  %v1658_v26 = vpop.f32.mrf.mxu0  ;;  %10639 = vst [vmem:[#allocation13_spill] sm:$0xff] %v8247_v27  ;;  %v2959_v61 = vld [vmem:[#allocation2 + $0x112] sm:$0xff]  ;;  %v10650_v35 = vld [vmem:[#allocation20_spill] sm:$0xff] }
 0x198   :  { %v1160_v52 = vpop.f32.mrf.mxu1 }
 0x199   :  { %10637 = vst [vmem:[#allocation12_spill] sm:$0xff] %v8244_v34  ;;  %v8249_v33 = vadd.f32 %v6625_v40, %v1169_v39  ;;  %v1161_v49 = vadd.f32 %v1160_v52, %v10641_v0  ;;  %v6628_v7 = vpop.f32.mrf.mxu0  ;;  %6867 = vmatmul.mubr.msk.bf16.gmra.mxu0 %vm18_vm0, %v3572_v21  ;;  %v2957_v52 = vld [vmem:[#allocation2 + $0xfa] sm:$0xff] }
 0x19a   :  { %v6560_v30 = vpop.f32.mrf.mxu1  ;;  %6799 = vmatmul.mubr.msk.bf16.gmra.mxu1 %vm18_vm0, %v3009_v2  ;;  %6870 = vmatprep.mubr.msk.bf16.mxu0 %vm18_vm0, %v3573_v12  ;;  %v3521_v0 = vld [vmem:[#allocation2 + $0x120] sm:$0xff]  ;;  %v10645_v21 = vld [vmem:[#allocation18_spill] sm:$0xff]  ;;  %v3574_v12 = vpack.c.bf16 %v3520_v29, %v3519_v43  ;;  %v3011_v56 = vpack.c.bf16 %v2957_v52, %v2956_v5  ;;  %v10652_v52 = vld [vmem:[#allocation21_spill] sm:$0xff] }
 0x19b   :  { %10640 = vst [vmem:[#allocation14_spill] sm:$0xff] %v8249_v33  ;;  %v8255_v54 = vadd.f32 %v1658_v26, %v1161_v49  ;;  %v1182_v20 = vadd.f32 %v6560_v30, %v10643_v59  ;;  %v1671_v62 = vpop.f32.mrf.mxu0  ;;  %6802 = vmatprep.mubr.msk.bf16.mxu1 %vm18_vm0, %v8247_v27  ;;  %v3575_v39 = vpack.c.bf16 %v3522_v15, %v3521_v0  ;;  %v10647_v30 = vld [vmem:[#allocation19_spill] sm:$0xff]  ;;  %v3523_v43 = vld [vmem:[#allocation2 + $0x138] sm:$0xff] }
 0x19c   :  { %v1173_v25 = vpop.f32.mrf.mxu1  ;;  %v2960_v5 = vld [vmem:[#allocation2 + $0x122] sm:$0xff] }
 0x19d   :  { %10642 = vst [vmem:[#allocation15_spill] sm:$0xff] %v8255_v54  ;;  %v8260_v40 = vadd.f32 %v6628_v7, %v1182_v20  ;;  %v1174_v32 = vadd.f32 %v1173_v25, %v10645_v21  ;;  %v6629_v2 = vpop.f32.mrf.mxu0  ;;  %v8266_v54 = vpack.c.bf16 %v2959_v61, %v2958_v42  ;;  %v3524_v29 = vld [vmem:[#allocation2 + $0x140] sm:$0xff]  ;;  %v3526_v42 = vld [vmem:[#allocation2 + $0x158] sm:$0xff] }
 0x19e   :  { %v6561_v26 = vpop.f32.mrf.mxu1  ;;  %v2962_v21 = vld [vmem:[#allocation2 + $0x13a] sm:$0xff] }
 0x19f   :  { %10644 = vst [vmem:[#allocation16_spill] sm:$0xff] %v8260_v40  ;;  %v8263_v49 = vadd.f32 %v1671_v62, %v1174_v32  ;;  %v1185_v59 = vadd.f32 %v6561_v26, %v10647_v30  ;;  %v1674_v27 = vpop.f32.mrf.mxu0  ;;  %10648 = vst [vmem:[#allocation18_spill] sm:$0xff] %v8266_v54  ;;  %v2963_v32 = vld [vmem:[#allocation2 + $0x142] sm:$0xff] }
 0x1a0   :  { %v1176_v33 = vpop.f32.mrf.mxu1  ;;  %v10659_v40 = vld [vmem:[#allocation24_spill] sm:$0xff] }
 0x1a1   :  { %10646 = vst [vmem:[#allocation17_spill] sm:$0xff] %v8263_v49  ;;  %v8268_v34 = vadd.f32 %v6629_v2, %v1185_v59  ;;  %v1177_v7 = vadd.f32 %v1176_v33, %v10650_v35  ;;  %v6632_v20 = vpop.f32.mrf.mxu0  ;;  %6871 = vmatmul.mubr.msk.bf16.gmra.mxu0 %vm18_vm0, %v3574_v12  ;;  %v2961_v33 = vld [vmem:[#allocation2 + $0x12a] sm:$0xff]  ;;  %v10654_v12 = vld [vmem:[#allocation22_spill] sm:$0xff] }
 0x1a2   :  { %v6564_v25 = vpop.f32.mrf.mxu1  ;;  %6803 = vmatmul.mubr.msk.bf16.gmra.mxu1 %vm18_vm0, %v3011_v56  ;;  %6874 = vmatprep.mubr.msk.bf16.mxu0 %vm18_vm0, %v3575_v39  ;;  %v3525_v35 = vld [vmem:[#allocation2 + $0x150] sm:$0xff]  ;;  %v3576_v39 = vpack.c.bf16 %v3524_v29, %v3523_v43  ;;  %v3013_v30 = vpack.c.bf16 %v2961_v33, %v2960_v5  ;;  %v3527_v43 = vld [vmem:[#allocation2 + $0x168] sm:$0xff] }
 0x1a3   :  { %10649 = vst [vmem:[#allocation19_spill] sm:$0xff] %v8268_v34  ;;  %v8274_v62 = vadd.f32 %v1674_v27, %v1177_v7  ;;  %v1198_v0 = vadd.f32 %v6564_v25, %v10652_v52  ;;  %v1687_v15 = vpop.f32.mrf.mxu0  ;;  %6806 = vmatprep.mubr.msk.bf16.mxu1 %vm18_vm0, %v8266_v54  ;;  %v3577_v59 = vpack.c.bf16 %v3526_v42, %v3525_v35  ;;  %v10656_v25 = vld [vmem:[#allocation23_spill] sm:$0xff]  ;;  %v2964_v5 = vld [vmem:[#allocation2 + $0x152] sm:$0xff] }
 0x1a4   :  { %v1189_v61 = vpop.f32.mrf.mxu1  ;;  %v3528_v29 = vld [vmem:[#allocation2 + $0x170] sm:$0xff] }
 0x1a5   :  { %10651 = vst [vmem:[#allocation20_spill] sm:$0xff] %v8274_v62  ;;  %v8279_v2 = vadd.f32 %v6632_v20, %v1198_v0  ;;  %v1190_v26 = vadd.f32 %v1189_v61, %v10654_v12  ;;  %v6633_v56 = vpop.f32.mrf.mxu0  ;;  %v8285_v62 = vpack.c.bf16 %v2963_v32, %v2962_v21  ;;  %v10661_v33 = vld [vmem:[#allocation25_spill] sm:$0xff]  ;;  %v3530_v21 = vld [vmem:[#allocation2 + $0x188] sm:$0xff] }
 0x1a6   :  { %v6565_v27 = vpop.f32.mrf.mxu1  ;;  %v2966_v12 = vld [vmem:[#allocation2 + $0x16a] sm:$0xff] }
 0x1a7   :  { %10653 = vst [vmem:[#allocation21_spill] sm:$0xff] %v8279_v2  ;;  %v8282_v7 = vadd.f32 %v1687_v15, %v1190_v26  ;;  %v1201_v52 = vadd.f32 %v6565_v27, %v10656_v25  ;;  %v1690_v54 = vpop.f32.mrf.mxu0  ;;  %10657 = vst [vmem:[#allocation23_spill] sm:$0xff] %v8285_v62  ;;  %v2967_v26 = vld [vmem:[#allocation2 + $0x172] sm:$0xff]  ;;  %v10668_v2 = vld [vmem:[#allocation28_spill] sm:$0xff] }
 0x1a8   :  { %v1192_v34 = vpop.f32.mrf.mxu1 }
 0x1a9   :  { %10655 = vst [vmem:[#allocation22_spill] sm:$0xff] %v8282_v7  ;;  %v8287_v49 = vadd.f32 %v6633_v56, %v1201_v52  ;;  %v1193_v20 = vadd.f32 %v1192_v34, %v10659_v40  ;;  %v6636_v0 = vpop.f32.mrf.mxu0  ;;  %6875 = vmatmul.mubr.msk.bf16.gmra.mxu0 %vm18_vm0, %v3576_v39  ;;  %v2965_v34 = vld [vmem:[#allocation2 + $0x15a] sm:$0xff] }
 0x1aa   :  { %v6568_v61 = vpop.f32.mrf.mxu1  ;;  %6807 = vmatmul.mubr.msk.bf16.gmra.mxu1 %vm18_vm0, %v3013_v30  ;;  %6878 = vmatprep.mubr.msk.bf16.mxu0 %vm18_vm0, %v3577_v59  ;;  %v3529_v40 = vld [vmem:[#allocation2 + $0x180] sm:$0xff]  ;;  %v10663_v39 = vld [vmem:[#allocation26_spill] sm:$0xff]  ;;  %v3578_v59 = vpack.c.bf16 %v3528_v29, %v3527_v43  ;;  %v3015_v25 = vpack.c.bf16 %v2965_v34, %v2964_v5  ;;  %v10670_v34 = vld [vmem:[#allocation29_spill] sm:$0xff] }
 0x1ab   :  { %10658 = vst [vmem:[#allocation37_spill] sm:$0xff] %v8287_v49  ;;  %v8293_v15 = vadd.f32 %v1690_v54, %v1193_v20  ;;  %v1214_v35 = vadd.f32 %v6568_v61, %v10661_v33  ;;  %v1703_v42 = vpop.f32.mrf.mxu0  ;;  %6810 = vmatprep.mubr.msk.bf16.mxu1 %vm18_vm0, %v8285_v62  ;;  %v3579_v52 = vpack.c.bf16 %v3530_v21, %v3529_v40  ;;  %v10665_v61 = vld [vmem:[#allocation27_spill] sm:$0xff]  ;;  %v3531_v43 = vld [vmem:[#allocation2 + $0x198] sm:$0xff] }
 0x1ac   :  { %v1205_v32 = vpop.f32.mrf.mxu1  ;;  %v2968_v5 = vld [vmem:[#allocation2 + $0x182] sm:$0xff] }
 0x1ad   :  { %10660 = vst [vmem:[#allocation24_spill] sm:$0xff] %v8293_v15  ;;  %v8298_v56 = vadd.f32 %v6636_v0, %v1214_v35  ;;  %v1206_v27 = vadd.f32 %v1205_v32, %v10663_v39  ;;  %v6637_v30 = vpop.f32.mrf.mxu0  ;;  %v8304_v15 = vpack.c.bf16 %v2967_v26, %v2966_v12  ;;  %v3532_v29 = vld [vmem:[#allocation2 + $0x1a0] sm:$0xff]  ;;  %v3534_v12 = vld [vmem:[#allocation2 + $0x1e8] sm:$0xff] }
 0x1ae   :  { %v6569_v54 = vpop.f32.mrf.mxu1  ;;  %v2970_v39 = vld [vmem:[#allocation2 + $0x1ca] sm:$0xff] }
 0x1af   :  { %10662 = vst [vmem:[#allocation25_spill] sm:$0xff] %v8298_v56  ;;  %v8301_v20 = vadd.f32 %v1703_v42, %v1206_v27  ;;  %v1217_v33 = vadd.f32 %v6569_v54, %v10665_v61  ;;  %v1706_v62 = vpop.f32.mrf.mxu0  ;;  %10666 = vst [vmem:[#allocation27_spill] sm:$0xff] %v8304_v15  ;;  %v2971_v27 = vld [vmem:[#allocation2 + $0x1d2] sm:$0xff]  ;;  %v10675_v56 = vld [vmem:[#allocation32_spill] sm:$0xff] }
 0x1b0   :  { %v1208_v49 = vpop.f32.mrf.mxu1 }
 0x1b1   :  { %10664 = vst [vmem:[#allocation26_spill] sm:$0xff] %v8301_v20  ;;  %v8306_v7 = vadd.f32 %v6637_v30, %v1217_v33  ;;  %v1209_v0 = vadd.f32 %v1208_v49, %v10668_v2  ;;  %v6640_v35 = vpop.f32.mrf.mxu0  ;;  %6879 = vmatmul.mubr.msk.bf16.gmra.mxu0 %vm18_vm0, %v3578_v59  ;;  %v2969_v49 = vld [vmem:[#allocation2 + $0x18a] sm:$0xff]  ;;  %v3533_v2 = vld [vmem:[#allocation2 + $0x1e0] sm:$0xff]  ;;  %v10671_v59 = vld [vmem:[#allocation30_spill] sm:$0xff] }
 0x1b2   :  { %v6572_v32 = vpop.f32.mrf.mxu1  ;;  %6811 = vmatmul.mubr.msk.bf16.gmra.mxu1 %vm18_vm0, %v3015_v25  ;;  %6882 = vmatprep.mubr.msk.bf16.mxu0 %vm18_vm0, %v3579_v52  ;;  %v3580_v52 = vpack.c.bf16 %v3532_v29, %v3531_v43  ;;  %v3017_v61 = vpack.c.bf16 %v2969_v49, %v2968_v5  ;;  %v3581_v33 = vpack.c.bf16 %v3534_v12, %v3533_v2  ;;  %v2972_v5 = vld [vmem:[#allocation2 + $0x1e2] sm:$0xff]  ;;  %v3535_v43 = vld [vmem:[#allocation2 + $0x1f8] sm:$0xff]  ;;  %v10677_v49 = vld [vmem:[#allocation33_spill] sm:$0xff] }
 0x1b3   :  { %10667 = vst [vmem:[#allocation38_spill] sm:$0xff] %v8306_v7  ;;  %v8312_v42 = vadd.f32 %v1706_v62, %v1209_v0  ;;  %v1230_v40 = vadd.f32 %v6572_v32, %v10670_v34  ;;  %v1719_v21 = vpop.f32.mrf.mxu0  ;;  %6814 = vmatprep.mubr.msk.bf16.mxu1 %vm18_vm0, %v8304_v15  ;;  %v10673_v32 = vld [vmem:[#allocation31_spill] sm:$0xff] }
 0x1b4   :  { %v1221_v26 = vpop.f32.mrf.mxu1  ;;  %v3536_v29 = vld [vmem:[#allocation2 + $0x200] sm:$0xff] }
 0x1b5   :  { %10669 = vst [vmem:[#allocation28_spill] sm:$0xff] %v8312_v42  ;;  %v8317_v30 = vadd.f32 %v6640_v35, %v1230_v40  ;;  %v1222_v54 = vadd.f32 %v1221_v26, %v10671_v59  ;;  %v6641_v25 = vpop.f32.mrf.mxu0  ;;  %v3018_v42 = vpack.c.bf16 %v2971_v27, %v2970_v39  ;;  %v2973_v26 = vld [vmem:[#allocation2 + $0x1ea] sm:$0xff]  ;;  %v2974_v27 = vld [vmem:[#allocation2 + $0x1fa] sm:$0xff]  ;;  %v2975_v59 = vld [vmem:[#allocation2 + $0x202] sm:$0xff] }
 0x1b6   :  { %v6573_v62 = vpop.f32.mrf.mxu1 }
 0x1b7   :  { %v8320_v0 = vadd.f32 %v1719_v21, %v1222_v54  ;;  %v1233_v34 = vadd.f32 %v6573_v62, %v10673_v32  ;;  %v1722_v15 = vpop.f32.mrf.mxu0 }
 0x1b8   :  { %v1224_v7 = vpop.f32.mrf.mxu1 }
 0x1b9   :  { %10672 = vst [vmem:[#allocation29_spill] sm:$0xff] %v8320_v0  ;;  %v8323_v20 = vadd.f32 %v6641_v25, %v1233_v34  ;;  %v1225_v3 = vadd.f32 %v1224_v7, %v10675_v56  ;;  %v6644_v35 = vpop.f32.mrf.mxu0  ;;  %6883 = vmatmul.mubr.msk.bf16.gmra.mxu0 %vm18_vm0, %v3580_v52  ;;  %v3537_v7 = vld [vmem:[#allocation2 + $0x210] sm:$0xff]  ;;  %v3538_v56 = vld [vmem:[#allocation2 + $0x218] sm:$0xff]  ;;  %v10679_v34 = vld [vmem:[#allocation35_spill] sm:$0xff] }
 0x1ba   :  { %v6576_v40 = vpop.f32.mrf.mxu1  ;;  %6815 = vmatmul.mubr.msk.bf16.gmra.mxu1 %vm18_vm0, %v3017_v61  ;;  %6886 = vmatprep.mubr.msk.bf16.mxu0 %vm18_vm0, %v3581_v33  ;;  %v10678_v25 = vld [vmem:[#allocation34_spill] sm:$0xff]  ;;  %v3582_v61 = vpack.c.bf16 %v3536_v29, %v3535_v43  ;;  %v10681_v0 = vld [vmem:[#allocation36_spill] sm:$0xff]  ;;  %v3540_v29 = vld [vmem:[#allocation2 + $0x230] sm:$0xff] }
 0x1bb   :  { %10674 = vst [vmem:[#allocation30_spill] sm:$0xff] %v8323_v20  ;;  %v8329_v21 = vadd.f32 %v1722_v15, %v1225_v3  ;;  %v1246_v2 = vadd.f32 %v6576_v40, %v10677_v49  ;;  %v1735_v12 = vpop.f32.mrf.mxu0  ;;  %6818 = vmatprep.mubr.msk.bf16.mxu1 %vm18_vm0, %v3018_v42  ;;  %v3019_v3 = vpack.c.bf16 %v2973_v26, %v2972_v5  ;;  %v2976_v5 = vld [vmem:[#allocation2 + $0x212] sm:$0xff]  ;;  %v3539_v43 = vld [vmem:[#allocation2 + $0x228] sm:$0xff] }
 0x1bc   :  { %v1237_v39 = vpop.f32.mrf.mxu1  ;;  %v3583_v15 = vpack.c.bf16 %v3538_v56, %v3537_v7  ;;  %v8339_v49 = vpack.c.bf16 %v2975_v59, %v2974_v27  ;;  %v3542_v56 = vld [vmem:[#allocation2 + $0x248] sm:$0xff] }
 0x1bd   :  { %10676 = vst [vmem:[#allocation31_spill] sm:$0xff] %v8329_v21  ;;  %v8333_v54 = vadd.f32 %v6644_v35, %v1246_v2  ;;  %v1238_v52 = vadd.f32 %v1237_v39, %v10678_v25  ;;  %v6645_v62 = vpop.f32.mrf.mxu0  ;;  %v2978_v59 = vld [vmem:[#allocation2 + $0x22a] sm:$0xff]  ;;  %v2979_v25 = vld [vmem:[#allocation2 + $0x232] sm:$0xff] }
 0x1be   :  { %v6577_v33 = vpop.f32.mrf.mxu1  ;;  %10680 = vst [vmem:[#allocation32_spill] sm:$0xff] %v8339_v49 }
 0x1bf   :  { %v8336_v32 = vadd.f32 %v1735_v12, %v1238_v52  ;;  %v1249_v40 = vadd.f32 %v6577_v33, %v10679_v34  ;;  %v1738_v42 = vpop.f32.mrf.mxu0  ;;  %v3584_v33 = vpack.c.bf16 %v3540_v29, %v3539_v43  ;;  %v3543_v43 = vld [vmem:[#allocation2 + $0x258] sm:$0xff] }
 0x1c0   :  { %v1240_v21 = vpop.f32.mrf.mxu1 }
 0x1c1   :  { %v8341_v20 = vadd.f32 %v6645_v62, %v1249_v40  ;;  %v1241_v35 = vadd.f32 %v1240_v21, %v10681_v0  ;;  %v6720_v2 = vpop.f32.mrf.mxu0  ;;  %6887 = vmatmul.mubr.msk.bf16.gmra.mxu0 %vm18_vm0, %v3582_v61  ;;  %v2977_v0 = vld [vmem:[#allocation2 + $0x21a] sm:$0xff] }
 0x1c2   :  { %v6652_v39 = vpop.f32.mrf.mxu1  ;;  %6819 = vmatmul.mubr.msk.bf16.gmra.mxu1 %vm18_vm0, %v3019_v3  ;;  %6890 = vmatprep.mubr.msk.bf16.mxu0 %vm18_vm0, %v3583_v15  ;;  %v3541_v21 = vld [vmem:[#allocation2 + $0x240] sm:$0xff]  ;;  %v8355_v15 = vpack.c.bf16 %v2977_v0, %v2976_v5 }
 0x1c3   :  { %v8347_v12 = vadd.f32 %v1738_v42, %v1241_v35  ;;  %v2314_v26 = vadd.f32 %v6652_v39, %v8052_v50  ;;  %v2619_v7 = vpop.f32.mrf.mxu0  ;;  %6822 = vmatprep.mubr.msk.bf16.mxu1 %vm18_vm0, %v8339_v49  ;;  %v3585_v50 = vpack.c.bf16 %v3542_v56, %v3541_v21  ;;  %v8360_v35 = vpack.c.bf16 %v2979_v25, %v2978_v59  ;;  %v2980_v5 = vld [vmem:[#allocation2 + $0x242] sm:$0xff]  ;;  %v3545_v21 = vld [vmem:[#allocation2 + $0x270] sm:$0xff]  ;;  %v3546_v56 = vld [vmem:[#allocation2 + $0x278] sm:$0xff] }
 0x1c4   :  { %v2057_v27 = vpop.f32.mrf.mxu1  ;;  %v2982_v59 = vld [vmem:[#allocation2 + $0x25a] sm:$0xff]  ;;  %v2983_v25 = vld [vmem:[#allocation2 + $0x262] sm:$0xff] }
 0x1c5   :  { %v8352_v52 = vadd.f32 %v6720_v2, %v2314_v26  ;;  %v2312_v62 = vadd.f32 %v2057_v27, %v8055_v44  ;;  %v6721_v61 = vpop.f32.mrf.mxu0  ;;  %10682 = vst [vmem:[#allocation33_spill] sm:$0xff] %v8360_v35 }
 0x1c6   :  { %v6653_v3 = vpop.f32.mrf.mxu1 }
 0x1c7   :  { %v8357_v34 = vadd.f32 %v2619_v7, %v2312_v62  ;;  %v2315_v40 = vadd.f32 %v6653_v3, %v8058_v63  ;;  %v2622_v42 = vpop.f32.mrf.mxu0  ;;  %v3544_v63 = vld [vmem:[#allocation2 + $0x260] sm:$0xff] }
 0x1c8   :  { %v2060_v39 = vpop.f32.mrf.mxu1  ;;  %v3586_v3 = vpack.c.bf16 %v3544_v63, %v3543_v43  ;;  %v3547_v43 = vld [vmem:[#allocation2 + $0x288] sm:$0xff] }
 0x1c9   :  { %v8362_v49 = vadd.f32 %v6721_v61, %v2315_v40  ;;  %v2313_v2 = vadd.f32 %v2060_v39, %v8065_v41  ;;  %v6724_v26 = vpop.f32.mrf.mxu0  ;;  %6891 = vmatmul.mubr.msk.bf16.gmra.mxu0 %vm18_vm0, %v3584_v33  ;;  %v2981_v41 = vld [vmem:[#allocation2 + $0x24a] sm:$0xff] }
 0x1ca   :  { %v6656_v44 = vpop.f32.mrf.mxu1  ;;  %6823 = vmatmul.mubr.msk.bf16.gmra.mxu1 %vm18_vm0, %v8355_v15  ;;  %6894 = vmatprep.mubr.msk.bf16.mxu0 %vm18_vm0, %v3585_v50  ;;  %v8377_v40 = vpack.c.bf16 %v2981_v41, %v2980_v5  ;;  %v2984_v5 = vld [vmem:[#allocation2 + $0x272] sm:$0xff] }
 0x1cb   :  { %v8369_v29 = vadd.f32 %v2622_v42, %v2313_v2  ;;  %v2318_v7 = vadd.f32 %v6656_v44, %v8070_v36  ;;  %v2635_v0 = vpop.f32.mrf.mxu0  ;;  %6826 = vmatprep.mubr.msk.bf16.mxu1 %vm18_vm0, %v8360_v35  ;;  %v3587_v36 = vpack.c.bf16 %v3546_v56, %v3545_v21  ;;  %v8382_v44 = vpack.c.bf16 %v2983_v25, %v2982_v59  ;;  %v3550_v21 = vld [vmem:[#allocation2 + $0x2a8] sm:$0xff]  ;;  %v2987_v59 = vld [vmem:[#allocation2 + $0x292] sm:$0xff] }
 0x1cc   :  { %v2073_v27 = vpop.f32.mrf.mxu1 }
 0x1cd   :  { %10683 = vst [vmem:[#allocation34_spill] sm:$0xff] %v8369_v29  ;;  %v8374_v62 = vadd.f32 %v6724_v26, %v2318_v7  ;;  %v2316_v61 = vadd.f32 %v2073_v27, %v8073_v55  ;;  %v6725_v33 = vpop.f32.mrf.mxu0  ;;  %10684 = vst [vmem:[#allocation35_spill] sm:$0xff] %v8382_v44  ;;  %v2986_v27 = vld [vmem:[#allocation2 + $0x28a] sm:$0xff] }
 0x1ce   :  { %v6657_v50 = vpop.f32.mrf.mxu1 }
 0x1cf   :  { %v8379_v42 = vadd.f32 %v2635_v0, %v2316_v61  ;;  %v2319_v39 = vadd.f32 %v6657_v50, %v8076_v57  ;;  %v2638_v2 = vpop.f32.mrf.mxu0  ;;  %v3548_v57 = vld [vmem:[#allocation2 + $0x290] sm:$0xff] }
 0x1d0   :  { %v2076_v35 = vpop.f32.mrf.mxu1 }
 0x1d1   :  { %v8384_v29 = vadd.f32 %v6725_v33, %v2319_v39  ;;  %v2317_v26 = vadd.f32 %v2076_v35, %v8083_v23  ;;  %v6728_v7 = vpop.f32.mrf.mxu0  ;;  %6895 = vmatmul.mubr.msk.bf16.gmra.mxu0 %vm18_vm0, %v3586_v3  ;;  %v2985_v23 = vld [vmem:[#allocation2 + $0x27a] sm:$0xff]  ;;  %v3588_v3 = vpack.c.bf16 %v3548_v57, %v3547_v43 }
 0x1d2   :  { %v6660_v55 = vpop.f32.mrf.mxu1  ;;  %6827 = vmatmul.mubr.msk.bf16.gmra.mxu1 %vm18_vm0, %v8377_v40  ;;  %6898 = vmatprep.mubr.msk.bf16.mxu0 %vm18_vm0, %v3587_v36  ;;  %v3549_v35 = vld [vmem:[#allocation2 + $0x2a0] sm:$0xff]  ;;  %v8399_v36 = vpack.c.bf16 %v2985_v23, %v2984_v5  ;;  %v3551_v43 = vld [vmem:[#allocation2 + $0x2b8] sm:$0xff] }
 0x1d3   :  { %v8391_v63 = vadd.f32 %v2638_v2, %v2317_v26  ;;  %v2322_v0 = vadd.f32 %v6660_v55, %v8088_v60  ;;  %v2651_v41 = vpop.f32.mrf.mxu0  ;;  %6830 = vmatprep.mubr.msk.bf16.mxu1 %vm18_vm0, %v8382_v44  ;;  %v3589_v60 = vpack.c.bf16 %v3550_v21, %v3549_v35  ;;  %v8404_v55 = vpack.c.bf16 %v2987_v59, %v2986_v27  ;;  %v2988_v5 = vld [vmem:[#allocation2 + $0x2a2] sm:$0xff]  ;;  %v3554_v35 = vld [vmem:[#allocation2 + $0x2d8] sm:$0xff] }
 0x1d4   :  { %v2089_v56 = vpop.f32.mrf.mxu1  ;;  %v2991_v27 = vld [vmem:[#allocation2 + $0x2c2] sm:$0xff] }
 0x1d5   :  { %10685 = vst [vmem:[#allocation36_spill] sm:$0xff] %v8391_v63  ;;  %v8396_v25 = vadd.f32 %v6728_v7, %v2322_v0  ;;  %v2320_v61 = vadd.f32 %v2089_v56, %v8091_v18  ;;  %v6729_v33 = vpop.f32.mrf.mxu0  ;;  %10686 = vst [vmem:[#allocation39_spill] sm:$0xff] %v8404_v55  ;;  %v2990_v56 = vld [vmem:[#allocation2 + $0x2ba] sm:$0xff] }
 0x1d6   :  { %v6661_v50 = vpop.f32.mrf.mxu1 }
 0x1d7   :  { %v8401_v39 = vadd.f32 %v2651_v41, %v2320_v61  ;;  %v2323_v2 = vadd.f32 %v6661_v50, %v8094_v9  ;;  %v2654_v26 = vpop.f32.mrf.mxu0  ;;  %v3552_v9 = vld [vmem:[#allocation2 + $0x2c0] sm:$0xff] }
 0x1d8   :  { %v2092_v44 = vpop.f32.mrf.mxu1 }
 0x1d9   :  { %v8406_v63 = vadd.f32 %v6729_v33, %v2323_v2  ;;  %v2321_v7 = vadd.f32 %v2092_v44, %v8101_v38  ;;  %v6732_v0 = vpop.f32.mrf.mxu0  ;;  %6899 = vmatmul.mubr.msk.bf16.gmra.mxu0 %vm18_vm0, %v3588_v3  ;;  %v2989_v38 = vld [vmem:[#allocation2 + $0x2aa] sm:$0xff]  ;;  %v3590_v3 = vpack.c.bf16 %v3552_v9, %v3551_v43 }
 0x1da   :  { %v6664_v18 = vpop.f32.mrf.mxu1  ;;  %6831 = vmatmul.mubr.msk.bf16.gmra.mxu1 %vm18_vm0, %v8399_v36  ;;  %6902 = vmatprep.mubr.msk.bf16.mxu0 %vm18_vm0, %v3589_v60  ;;  %v3553_v44 = vld [vmem:[#allocation2 + $0x2d0] sm:$0xff]  ;;  %v8421_v60 = vpack.c.bf16 %v2989_v38, %v2988_v5  ;;  %v3555_v43 = vld [vmem:[#allocation2 + $0x2e8] sm:$0xff] }
 0x1db   :  { %v8413_v57 = vadd.f32 %v2654_v26, %v2321_v7  ;;  %v2326_v41 = vadd.f32 %v6664_v18, %v8106_v16  ;;  %v2667_v23 = vpop.f32.mrf.mxu0  ;;  %6834 = vmatprep.mubr.msk.bf16.mxu1 %vm18_vm0, %v8404_v55  ;;  %v3591_v16 = vpack.c.bf16 %v3554_v35, %v3553_v44  ;;  %v8426_v18 = vpack.c.bf16 %v2991_v27, %v2990_v56  ;;  %v2992_v5 = vld [vmem:[#allocation2 + $0x2d2] sm:$0xff]  ;;  %v3558_v44 = vld [vmem:[#allocation2 + $0x308] sm:$0xff] }
 0x1dc   :  { %v2105_v21 = vpop.f32.mrf.mxu1  ;;  %v2995_v56 = vld [vmem:[#allocation2 + $0x2f2] sm:$0xff] }
 0x1dd   :  { %10687 = vst [vmem:[#allocation40_spill] sm:$0xff] %v8413_v57  ;;  %v8418_v59 = vadd.f32 %v6732_v0, %v2326_v41  ;;  %v2324_v61 = vadd.f32 %v2105_v21, %v8109_v14  ;;  %v6733_v33 = vpop.f32.mrf.mxu0  ;;  %10688 = vst [vmem:[#allocation41_spill] sm:$0xff] %v8426_v18  ;;  %v2994_v21 = vld [vmem:[#allocation2 + $0x2ea] sm:$0xff] }
 0x1de   :  { %v6665_v50 = vpop.f32.mrf.mxu1 }
 0x1df   :  { %v8423_v2 = vadd.f32 %v2667_v23, %v2324_v61  ;;  %v2327_v26 = vadd.f32 %v6665_v50, %v8112_v6  ;;  %v2670_v7 = vpop.f32.mrf.mxu0  ;;  %v3556_v6 = vld [vmem:[#allocation2 + $0x2f0] sm:$0xff] }
 0x1e0   :  { %v2108_v55 = vpop.f32.mrf.mxu1 }
 0x1e1   :  { %v8428_v57 = vadd.f32 %v6733_v33, %v2327_v26  ;;  %v2325_v0 = vadd.f32 %v2108_v55, %v8119_v8  ;;  %v6736_v41 = vpop.f32.mrf.mxu0  ;;  %6903 = vmatmul.mubr.msk.bf16.gmra.mxu0 %vm18_vm0, %v3590_v3  ;;  %v2993_v8 = vld [vmem:[#allocation2 + $0x2da] sm:$0xff]  ;;  %v3592_v3 = vpack.c.bf16 %v3556_v6, %v3555_v43 }
 0x1e2   :  { %v6668_v14 = vpop.f32.mrf.mxu1  ;;  %6835 = vmatmul.mubr.msk.bf16.gmra.mxu1 %vm18_vm0, %v8421_v60  ;;  %6906 = vmatprep.mubr.msk.bf16.mxu0 %vm18_vm0, %v3591_v16  ;;  %v3557_v55 = vld [vmem:[#allocation2 + $0x300] sm:$0xff]  ;;  %v8443_v16 = vpack.c.bf16 %v2993_v8, %v2992_v5  ;;  %v3559_v43 = vld [vmem:[#allocation2 + $0x318] sm:$0xff] }
 0x1e3   :  { %v8435_v9 = vadd.f32 %v2670_v7, %v2325_v0  ;;  %v2330_v23 = vadd.f32 %v6668_v14, %v8124_v28  ;;  %v2683_v38 = vpop.f32.mrf.mxu0  ;;  %6838 = vmatprep.mubr.msk.bf16.mxu1 %vm18_vm0, %v8426_v18  ;;  %v3593_v28 = vpack.c.bf16 %v3558_v44, %v3557_v55  ;;  %v8448_v14 = vpack.c.bf16 %v2995_v56, %v2994_v21  ;;  %v2996_v5 = vld [vmem:[#allocation2 + $0x302] sm:$0xff]  ;;  %v3562_v55 = vld [vmem:[#allocation2 + $0x338] sm:$0xff] }
 0x1e4   :  { %v2121_v35 = vpop.f32.mrf.mxu1  ;;  %v2999_v21 = vld [vmem:[#allocation2 + $0x322] sm:$0xff] }
 0x1e5   :  { %10689 = vst [vmem:[#allocation42_spill] sm:$0xff] %v8435_v9  ;;  %v8440_v27 = vadd.f32 %v6736_v41, %v2330_v23  ;;  %v2328_v61 = vadd.f32 %v2121_v35, %v8127_v11  ;;  %v6737_v33 = vpop.f32.mrf.mxu0  ;;  %10690 = vst [vmem:[#allocation43_spill] sm:$0xff] %v8448_v14  ;;  %v2998_v35 = vld [vmem:[#allocation2 + $0x31a] sm:$0xff] }
 0x1e6   :  { %v6669_v50 = vpop.f32.mrf.mxu1 }
 0x1e7   :  { %v8445_v26 = vadd.f32 %v2683_v38, %v2328_v61  ;;  %v2331_v7 = vadd.f32 %v6669_v50, %v8130_v47  ;;  %v2686_v0 = vpop.f32.mrf.mxu0  ;;  %v3560_v47 = vld [vmem:[#allocation2 + $0x320] sm:$0xff] }
 0x1e8   :  { %v2124_v18 = vpop.f32.mrf.mxu1 }
 0x1e9   :  { %v8450_v9 = vadd.f32 %v6737_v33, %v2331_v7  ;;  %v2329_v41 = vadd.f32 %v2124_v18, %v8137_v13  ;;  %v6740_v23 = vpop.f32.mrf.mxu0  ;;  %6907 = vmatmul.mubr.msk.bf16.gmra.mxu0 %vm18_vm0, %v3592_v3  ;;  %v2997_v13 = vld [vmem:[#allocation2 + $0x30a] sm:$0xff]  ;;  %v3594_v3 = vpack.c.bf16 %v3560_v47, %v3559_v43 }
 0x1ea   :  { %v6672_v11 = vpop.f32.mrf.mxu1  ;;  %6839 = vmatmul.mubr.msk.bf16.gmra.mxu1 %vm18_vm0, %v8443_v16  ;;  %6910 = vmatprep.mubr.msk.bf16.mxu0 %vm18_vm0, %v3593_v28  ;;  %v3561_v18 = vld [vmem:[#allocation2 + $0x330] sm:$0xff]  ;;  %v8465_v28 = vpack.c.bf16 %v2997_v13, %v2996_v5  ;;  %v3563_v43 = vld [vmem:[#allocation2 + $0x348] sm:$0xff] }
 0x1eb   :  { %v8457_v6 = vadd.f32 %v2686_v0, %v2329_v41  ;;  %v2334_v38 = vadd.f32 %v6672_v11, %v8142_v17  ;;  %v2699_v8 = vpop.f32.mrf.mxu0  ;;  %6842 = vmatprep.mubr.msk.bf16.mxu1 %vm18_vm0, %v8448_v14  ;;  %v3595_v17 = vpack.c.bf16 %v3562_v55, %v3561_v18  ;;  %v8470_v11 = vpack.c.bf16 %v2999_v21, %v2998_v35  ;;  %v3000_v5 = vld [vmem:[#allocation2 + $0x332] sm:$0xff]  ;;  %v4626_v18 = vld [vmem:[#allocation2 + $0x3a] sm:$0xff] }
 0x1ec   :  { %v2137_v44 = vpop.f32.mrf.mxu1  ;;  %v4064_v35 = vld [vmem:[#allocation2 + $0x39] sm:$0xff] }
 0x1ed   :  { %10691 = vst [vmem:[#allocation44_spill] sm:$0xff] %v8457_v6  ;;  %v8462_v56 = vadd.f32 %v6740_v23, %v2334_v38  ;;  %v2332_v61 = vadd.f32 %v2137_v44, %v8145_v31  ;;  %v6741_v33 = vpop.f32.mrf.mxu0  ;;  %10692 = vst [vmem:[#allocation45_spill] sm:$0xff] %v8470_v11  ;;  %v4063_v44 = vld [vmem:[#allocation2 + $0x31] sm:$0xff] }
 0x1ee   :  { %v6673_v50 = vpop.f32.mrf.mxu1 }
 0x1ef   :  { %v8467_v7 = vadd.f32 %v2699_v8, %v2332_v61  ;;  %v2335_v0 = vadd.f32 %v6673_v50, %v8148_v58  ;;  %v2702_v41 = vpop.f32.mrf.mxu0  ;;  %v3564_v58 = vld [vmem:[#allocation2 + $0x350] sm:$0xff] }
 0x1f0   :  { %v2140_v14 = vpop.f32.mrf.mxu1 }
 0x1f1   :  { %v8472_v6 = vadd.f32 %v6741_v33, %v2335_v0  ;;  %v2333_v23 = vadd.f32 %v2140_v14, %v8155_v1  ;;  %v6744_v38 = vpop.f32.mrf.mxu0  ;;  %6911 = vmatmul.mubr.msk.bf16.gmra.mxu0 %vm18_vm0, %v3594_v3  ;;  %v3001_v1 = vld [vmem:[#allocation2 + $0x33a] sm:$0xff]  ;;  %v4625_v14 = vld [vmem:[#allocation2 + $0x32] sm:$0xff]  ;;  %v3596_v3 = vpack.c.bf16 %v3564_v58, %v3563_v43 }
 0x1f2   :  { %v6676_v31 = vpop.f32.mrf.mxu1  ;;  %6843 = vmatmul.mubr.msk.bf16.gmra.mxu1 %vm18_vm0, %v8465_v28  ;;  %6914 = vmatprep.mubr.msk.bf16.mxu0 %vm18_vm0, %v3595_v17  ;;  %v8487_v17 = vpack.c.bf16 %v3001_v1, %v3000_v5  ;;  %v4065_v5 = vld [vmem:[#allocation2 + $0x49] sm:$0xff] }
 0x1f3   :  { %v8479_v47 = vadd.f32 %v2702_v41, %v2333_v23  ;;  %v2338_v8 = vadd.f32 %v6676_v31, %v8160_v10  ;;  %v2715_v13 = vpop.f32.mrf.mxu0  ;;  %6846 = vmatprep.mubr.msk.bf16.mxu1 %vm18_vm0, %v8470_v11  ;;  %v4689_v10 = vpack.c.bf16 %v4626_v18, %v4625_v14  ;;  %v4127_v31 = vpack.c.bf16 %v4064_v35, %v4063_v44  ;;  %v4629_v1 = vld [vmem:[#allocation2 + $0x62] sm:$0xff] }
 0x1f4   :  { %v2153_v55 = vpop.f32.mrf.mxu1  ;;  %v4067_v14 = vld [vmem:[#allocation2 + $0x61] sm:$0xff]  ;;  %v4068_v18 = vld [vmem:[#allocation2 + $0x69] sm:$0xff] }
 0x1f5   :  { %10693 = vst [vmem:[#allocation46_spill] sm:$0xff] %v8479_v47  ;;  %v8484_v21 = vadd.f32 %v6744_v38, %v2338_v8  ;;  %v2336_v61 = vadd.f32 %v2153_v55, %v8163_v51  ;;  %v6745_v33 = vpop.f32.mrf.mxu0 }
 0x1f6   :  { %v6677_v50 = vpop.f32.mrf.mxu1 }
 0x1f7   :  { %v8489_v0 = vadd.f32 %v2715_v13, %v2336_v61  ;;  %v2339_v41 = vadd.f32 %v6677_v50, %v8166_v48  ;;  %v2718_v23 = vpop.f32.mrf.mxu0  ;;  %v4066_v13 = vld [vmem:[#allocation2 + $0x51] sm:$0xff] }
 0x1f8   :  { %v2156_v11 = vpop.f32.mrf.mxu1 }
 0x1f9   :  { %v8492_v47 = vadd.f32 %v6745_v33, %v2339_v41  ;;  %v2337_v38 = vadd.f32 %v2156_v11, %v8172_v37  ;;  %v6748_v8 = vpop.f32.mrf.mxu0  ;;  %6915 = vmatmul.mubr.msk.bf16.gmra.mxu0 %vm18_vm0, %v3596_v3  ;;  %v4630_v37 = vld [vmem:[#allocation2 + $0x6a] sm:$0xff]  ;;  %v4128_v33 = vpack.c.bf16 %v4066_v13, %v4065_v5  ;;  %v4129_v41 = vpack.c.bf16 %v4068_v18, %v4067_v14  ;;  %v4633_v13 = vld [vmem:[#allocation2 + $0x92] sm:$0xff] }
 0x1fa   :  { %v6680_v51 = vpop.f32.mrf.mxu1  ;;  %6847 = vmatmul.mubr.msk.bf16.gmra.mxu1 %vm18_vm0, %v8487_v17  ;;  %6990 = vmatprep.mubr.msk.bf16.mxu0 %vm18_vm0, %v4689_v10  ;;  %v4691_v3 = vpack.c.bf16 %v4630_v37, %v4629_v1  ;;  %v4071_v37 = vld [vmem:[#allocation2 + $0x91] sm:$0xff] }
 0x1fb   :  { %v8499_v43 = vadd.f32 %v2718_v23, %v2337_v38  ;;  %v2342_v48 = vadd.f32 %v6680_v51, %v8176_v24  ;;  %v2731_v58 = vpop.f32.mrf.mxu0  ;;  %6922 = vmatprep.mubr.msk.bf16.mxu1 %vm18_vm0, %v4127_v31 }
 0x1fc   :  { %v2169_v11 = vpop.f32.mrf.mxu1 }
 0x1fd   :  { %v8503_v55 = vadd.f32 %v6748_v8, %v2342_v48  ;;  %v2340_v44 = vadd.f32 %v2169_v11, %v8179_v46  ;;  %v6749_v35 = vpop.f32.mrf.mxu0  ;;  %v4069_v8 = vld [vmem:[#allocation2 + $0x79] sm:$0xff] }
 0x1fe   :  { %v6681_v61 = vpop.f32.mrf.mxu1  ;;  %v4072_v11 = vld [vmem:[#allocation2 + $0x99] sm:$0xff] }
 0x1ff   :  { %v8506_v50 = vadd.f32 %v2731_v58, %v2340_v44  ;;  %v2343_v24 = vadd.f32 %v6681_v61, %v8187_v19  ;;  %v2734_v10 = vpop.f32.mrf.mxu0  ;;  %v4070_v58 = vld [vmem:[#allocation2 + $0x81] sm:$0xff] }
 0x200   :  { %v2172_v23 = vpop.f32.mrf.mxu1 }
 0x201   :  { %v8509_v31 = vadd.f32 %v6749_v35, %v2343_v24  ;;  %v2341_v38 = vadd.f32 %v2172_v23, %v8196_v22  ;;  %v6752_v51 = vpop.f32.mrf.mxu0  ;;  %6991 = vmatmul.mubr.msk.bf16.vlgmr.msra.gmra.mxu0 %vm18_vm0, %v8182_v4  ;;  %v4634_v22 = vld [vmem:[#allocation2 + $0x9a] sm:$0xff]  ;;  %v4130_v35 = vpack.c.bf16 %v4070_v58, %v4069_v8  ;;  %v4073_v8 = vld [vmem:[#allocation2 + $0xa9] sm:$0xff] }
 0x202   :  { %v6684_v46 = vpop.f32.mrf.mxu1  ;;  %6923 = vmatmul.mubr.msk.bf16.vlgmr.msra.gmra.mxu1 %vm18_vm0, %v4128_v33  ;;  %6994 = vmatprep.mubr.msk.bf16.mxu0 %vm18_vm0, %v4691_v3  ;;  %v4693_v61 = vpack.c.bf16 %v4634_v22, %v4633_v13  ;;  %v4074_v22 = vld [vmem:[#allocation2 + $0xb1] sm:$0xff] }
 0x203   :  { %10694 = vst [vmem:[#allocation47_spill] sm:$0xff] %v8509_v31  ;;  %v8516_v5 = vadd.f32 %v2734_v10, %v2341_v38  ;;  %v2346_v19 = vadd.f32 %v6684_v46, %v8203_v53  ;;  %v2747_v48 = vpop.f32.mrf.mxu0  ;;  %6926 = vmatprep.mubr.msk.bf16.mxu1 %vm18_vm0, %v4129_v41  ;;  %v10698_v53 = vld [vmem:[#allocation3_spill] sm:$0xff]  ;;  %v4131_v10 = vpack.c.bf16 %v4072_v11, %v4071_v37  ;;  %v10700_v38 = vld [vmem:[#allocation5_spill] sm:$0xff] }
 0x204   :  { %v2185_v1 = vpop.f32.mrf.mxu1  ;;  %v4638_v37 = vld [vmem:[#allocation2 + $0xca] sm:$0xff] }
 0x205   :  { %10695 = vst [vmem:[#allocation48_spill] sm:$0xff] %v8516_v5  ;;  %v8520_v4 = vadd.f32 %v6752_v51, %v2346_v19  ;;  %v2344_v14 = vadd.f32 %v2185_v1, %v8206_v45  ;;  %v6753_v18 = vpop.f32.mrf.mxu0  ;;  %v10701_v51 = vld [vmem:[#allocation7_spill] sm:$0xff] }
 0x206   :  { %v6685_v44 = vpop.f32.mrf.mxu1  ;;  %v4637_v1 = vld [vmem:[#allocation2 + $0xc2] sm:$0xff] }
 0x207   :  { %10696 = vst [vmem:[#allocation49_spill] sm:$0xff] %v8520_v4  ;;  %v8523_v33 = vadd.f32 %v2747_v48, %v2344_v14  ;;  %v2347_v3 = vadd.f32 %v6685_v44, %v10698_v53  ;;  %v2750_v24 = vpop.f32.mrf.mxu0  ;;  %v10703_v48 = vld [vmem:[#allocation4_spill] sm:$0xff]  ;;  %v10705_v53 = vld [vmem:[#allocation6_spill] sm:$0xff] }
 0x208   :  { %v2188_v41 = vpop.f32.mrf.mxu1  ;;  %v4075_v14 = vld [vmem:[#allocation2 + $0xc1] sm:$0xff] }
 0x209   :  { %10697 = vst [vmem:[#allocation50_spill] sm:$0xff] %v8523_v33  ;;  %v8526_v23 = vadd.f32 %v6753_v18, %v2347_v3  ;;  %v2345_v46 = vadd.f32 %v2188_v41, %v10700_v38  ;;  %v6756_v5 = vpop.f32.mrf.mxu0  ;;  %6995 = vmatmul.mubr.msk.bf16.gmra.mxu0 %vm18_vm0, %v10701_v51  ;;  %v4076_v18 = vld [vmem:[#allocation2 + $0xc9] sm:$0xff]  ;;  %v4132_v41 = vpack.c.bf16 %v4074_v22, %v4073_v8  ;;  %v4077_v8 = vld [vmem:[#allocation2 + $0xd9] sm:$0xff] }
 0x20a   :  { %v6688_v45 = vpop.f32.mrf.mxu1  ;;  %6927 = vmatmul.mubr.msk.bf16.gmra.mxu1 %vm18_vm0, %v4130_v35  ;;  %6998 = vmatprep.mubr.msk.bf16.mxu0 %vm18_vm0, %v4693_v61  ;;  %v10712_v22 = vld [vmem:[#allocation11_spill] sm:$0xff] }
 0x20b   :  { %10699 = vst [vmem:[#allocation3_spill] sm:$0xff] %v8526_v23  ;;  %v8533_v19 = vadd.f32 %v2750_v24, %v2345_v46  ;;  %v2350_v58 = vadd.f32 %v6688_v45, %v10703_v48  ;;  %v2763_v13 = vpop.f32.mrf.mxu0  ;;  %6930 = vmatprep.mubr.msk.bf16.mxu1 %vm18_vm0, %v4131_v10  ;;  %v4695_v24 = vpack.c.bf16 %v4638_v37, %v4637_v1  ;;  %v10707_v46 = vld [vmem:[#allocation9_spill] sm:$0xff]  ;;  %v10709_v23 = vld [vmem:[#allocation10_spill] sm:$0xff] }
 0x20c   :  { %v2201_v11 = vpop.f32.mrf.mxu1  ;;  %v4133_v10 = vpack.c.bf16 %v4076_v18, %v4075_v14  ;;  %v4641_v14 = vld [vmem:[#allocation2 + $0xf2] sm:$0xff] }
 0x20d   :  { %10702 = vst [vmem:[#allocation5_spill] sm:$0xff] %v8533_v19  ;;  %v8537_v44 = vadd.f32 %v6756_v5, %v2350_v58  ;;  %v2348_v35 = vadd.f32 %v2201_v11, %v10705_v53  ;;  %v6757_v3 = vpop.f32.mrf.mxu0  ;;  %v10710_v5 = vld [vmem:[#allocation8_spill] sm:$0xff]  ;;  %v4079_v53 = vld [vmem:[#allocation2 + $0xf1] sm:$0xff] }
 0x20e   :  { %v6689_v61 = vpop.f32.mrf.mxu1  ;;  %v4078_v11 = vld [vmem:[#allocation2 + $0xe1] sm:$0xff] }
 0x20f   :  { %10704 = vst [vmem:[#allocation7_spill] sm:$0xff] %v8537_v44  ;;  %v8540_v38 = vadd.f32 %v2763_v13, %v2348_v35  ;;  %v2351_v51 = vadd.f32 %v6689_v61, %v10707_v46  ;;  %v2766_v45 = vpop.f32.mrf.mxu0  ;;  %v4080_v35 = vld [vmem:[#allocation2 + $0xf9] sm:$0xff]  ;;  %v10714_v61 = vld [vmem:[#allocation12_spill] sm:$0xff] }
 0x210   :  { %v2204_v48 = vpop.f32.mrf.mxu1 }
 0x211   :  { %10706 = vst [vmem:[#allocation4_spill] sm:$0xff] %v8540_v38  ;;  %v8543_v19 = vadd.f32 %v6757_v3, %v2351_v51  ;;  %v2349_v33 = vadd.f32 %v2204_v48, %v10709_v23  ;;  %v6760_v4 = vpop.f32.mrf.mxu0  ;;  %6999 = vmatmul.mubr.msk.bf16.gmra.mxu0 %vm18_vm0, %v10710_v5  ;;  %v4642_v23 = vld [vmem:[#allocation2 + $0xfa] sm:$0xff]  ;;  %v4134_v51 = vpack.c.bf16 %v4078_v11, %v4077_v8  ;;  %v4081_v8 = vld [vmem:[#allocation2 + $0x109] sm:$0xff] }
 0x212   :  { %v6692_v58 = vpop.f32.mrf.mxu1  ;;  %6931 = vmatmul.mubr.msk.bf16.gmra.mxu1 %vm18_vm0, %v4132_v41  ;;  %7002 = vmatprep.mubr.msk.bf16.mxu0 %vm18_vm0, %v4695_v24  ;;  %v10716_v48 = vld [vmem:[#allocation14_spill] sm:$0xff]  ;;  %v10721_v11 = vld [vmem:[#allocation16_spill] sm:$0xff] }
 0x213   :  { %10708 = vst [vmem:[#allocation6_spill] sm:$0xff] %v8543_v19  ;;  %v8550_v13 = vadd.f32 %v2766_v45, %v2349_v33  ;;  %v2354_v1 = vadd.f32 %v6692_v58, %v10712_v22  ;;  %v2779_v37 = vpop.f32.mrf.mxu0  ;;  %6934 = vmatprep.mubr.msk.bf16.mxu1 %vm18_vm0, %v4133_v10  ;;  %v4697_v33 = vpack.c.bf16 %v4642_v23, %v4641_v14  ;;  %v10718_v19 = vld [vmem:[#allocation15_spill] sm:$0xff] }
 0x214   :  { %v2217_v18 = vpop.f32.mrf.mxu1  ;;  %v4135_v10 = vpack.c.bf16 %v4080_v35, %v4079_v53  ;;  %v4645_v53 = vld [vmem:[#allocation2 + $0x122] sm:$0xff] }
 0x215   :  { %10711 = vst [vmem:[#allocation9_spill] sm:$0xff] %v8550_v13  ;;  %v8554_v3 = vadd.f32 %v6760_v4, %v2354_v1  ;;  %v2352_v41 = vadd.f32 %v2217_v18, %v10714_v61  ;;  %v6761_v46 = vpop.f32.mrf.mxu0  ;;  %v10719_v4 = vld [vmem:[#allocation13_spill] sm:$0xff]  ;;  %v4083_v61 = vld [vmem:[#allocation2 + $0x121] sm:$0xff] }
 0x216   :  { %v6693_v24 = vpop.f32.mrf.mxu1  ;;  %v4082_v18 = vld [vmem:[#allocation2 + $0x111] sm:$0xff] }
 0x217   :  { %10713 = vst [vmem:[#allocation10_spill] sm:$0xff] %v8554_v3  ;;  %v8557_v45 = vadd.f32 %v2779_v37, %v2352_v41  ;;  %v2355_v5 = vadd.f32 %v6693_v24, %v10716_v48  ;;  %v2782_v58 = vpop.f32.mrf.mxu0  ;;  %v4084_v41 = vld [vmem:[#allocation2 + $0x129] sm:$0xff] }
 0x218   :  { %v2220_v22 = vpop.f32.mrf.mxu1  ;;  %v10723_v24 = vld [vmem:[#allocation17_spill] sm:$0xff] }
 0x219   :  { %10715 = vst [vmem:[#allocation8_spill] sm:$0xff] %v8557_v45  ;;  %v8560_v13 = vadd.f32 %v6761_v46, %v2355_v5  ;;  %v2353_v38 = vadd.f32 %v2220_v22, %v10718_v19  ;;  %v6764_v44 = vpop.f32.mrf.mxu0  ;;  %7003 = vmatmul.mubr.msk.bf16.gmra.mxu0 %vm18_vm0, %v10719_v4  ;;  %v4646_v19 = vld [vmem:[#allocation2 + $0x12a] sm:$0xff]  ;;  %v4136_v5 = vpack.c.bf16 %v4082_v18, %v4081_v8  ;;  %v10725_v22 = vld [vmem:[#allocation19_spill] sm:$0xff] }
 0x21a   :  { %v6696_v1 = vpop.f32.mrf.mxu1  ;;  %6935 = vmatmul.mubr.msk.bf16.gmra.mxu1 %vm18_vm0, %v4134_v51  ;;  %7006 = vmatprep.mubr.msk.bf16.mxu0 %vm18_vm0, %v4697_v33  ;;  %v4085_v8 = vld [vmem:[#allocation2 + $0x139] sm:$0xff]  ;;  %v10730_v18 = vld [vmem:[#allocation21_spill] sm:$0xff] }
 0x21b   :  { %10717 = vst [vmem:[#allocation11_spill] sm:$0xff] %v8560_v13  ;;  %v8567_v37 = vadd.f32 %v2782_v58, %v2353_v38  ;;  %v2358_v14 = vadd.f32 %v6696_v1, %v10721_v11  ;;  %v2795_v23 = vpop.f32.mrf.mxu0  ;;  %6938 = vmatprep.mubr.msk.bf16.mxu1 %vm18_vm0, %v4135_v10  ;;  %v4699_v38 = vpack.c.bf16 %v4646_v19, %v4645_v53  ;;  %v10727_v13 = vld [vmem:[#allocation20_spill] sm:$0xff] }
 0x21c   :  { %v2233_v35 = vpop.f32.mrf.mxu1  ;;  %v4137_v10 = vpack.c.bf16 %v4084_v41, %v4083_v61  ;;  %v4649_v61 = vld [vmem:[#allocation2 + $0x152] sm:$0xff] }
 0x21d   :  { %10720 = vst [vmem:[#allocation12_spill] sm:$0xff] %v8567_v37  ;;  %v8571_v46 = vadd.f32 %v6764_v44, %v2358_v14  ;;  %v2356_v51 = vadd.f32 %v2233_v35, %v10723_v24  ;;  %v6765_v48 = vpop.f32.mrf.mxu0  ;;  %v10728_v44 = vld [vmem:[#allocation18_spill] sm:$0xff]  ;;  %v4086_v35 = vld [vmem:[#allocation2 + $0x141] sm:$0xff] }
 0x21e   :  { %v6697_v33 = vpop.f32.mrf.mxu1  ;;  %v4087_v24 = vld [vmem:[#allocation2 + $0x151] sm:$0xff] }
 0x21f   :  { %10722 = vst [vmem:[#allocation14_spill] sm:$0xff] %v8571_v46  ;;  %v8574_v58 = vadd.f32 %v2795_v23, %v2356_v51  ;;  %v2359_v4 = vadd.f32 %v6697_v33, %v10725_v22  ;;  %v2798_v1 = vpop.f32.mrf.mxu0  ;;  %v4088_v51 = vld [vmem:[#allocation2 + $0x159] sm:$0xff] }
 0x220   :  { %v2236_v11 = vpop.f32.mrf.mxu1  ;;  %v10732_v33 = vld [vmem:[#allocation22_spill] sm:$0xff] }
 0x221   :  { %10724 = vst [vmem:[#allocation15_spill] sm:$0xff] %v8574_v58  ;;  %v8577_v37 = vadd.f32 %v6765_v48, %v2359_v4  ;;  %v2357_v45 = vadd.f32 %v2236_v11, %v10727_v13  ;;  %v6768_v3 = vpop.f32.mrf.mxu0  ;;  %7007 = vmatmul.mubr.msk.bf16.gmra.mxu0 %vm18_vm0, %v10728_v44  ;;  %v4650_v13 = vld [vmem:[#allocation2 + $0x15a] sm:$0xff]  ;;  %v4138_v4 = vpack.c.bf16 %v4086_v35, %v4085_v8  ;;  %v10734_v11 = vld [vmem:[#allocation37_spill] sm:$0xff] }
 0x222   :  { %v6700_v14 = vpop.f32.mrf.mxu1  ;;  %6939 = vmatmul.mubr.msk.bf16.gmra.mxu1 %vm18_vm0, %v4136_v5  ;;  %7010 = vmatprep.mubr.msk.bf16.mxu0 %vm18_vm0, %v4699_v38  ;;  %v4089_v8 = vld [vmem:[#allocation2 + $0x169] sm:$0xff] }
 0x223   :  { %10726 = vst [vmem:[#allocation13_spill] sm:$0xff] %v8577_v37  ;;  %v8584_v23 = vadd.f32 %v2798_v1, %v2357_v45  ;;  %v2362_v53 = vadd.f32 %v6700_v14, %v10730_v18  ;;  %v2811_v19 = vpop.f32.mrf.mxu0  ;;  %6942 = vmatprep.mubr.msk.bf16.mxu1 %vm18_vm0, %v4137_v10  ;;  %v4701_v45 = vpack.c.bf16 %v4650_v13, %v4649_v61  ;;  %v10736_v37 = vld [vmem:[#allocation24_spill] sm:$0xff]  ;;  %v10739_v35 = vld [vmem:[#allocation25_spill] sm:$0xff] }
 0x224   :  { %v2249_v41 = vpop.f32.mrf.mxu1  ;;  %v4139_v10 = vpack.c.bf16 %v4088_v51, %v4087_v24  ;;  %v4653_v24 = vld [vmem:[#allocation2 + $0x182] sm:$0xff] }
 0x225   :  { %10729 = vst [vmem:[#allocation16_spill] sm:$0xff] %v8584_v23  ;;  %v8588_v48 = vadd.f32 %v6768_v3, %v2362_v53  ;;  %v2360_v5 = vadd.f32 %v2249_v41, %v10732_v33  ;;  %v6769_v22 = vpop.f32.mrf.mxu0  ;;  %v10737_v3 = vld [vmem:[#allocation23_spill] sm:$0xff]  ;;  %v4090_v41 = vld [vmem:[#allocation2 + $0x171] sm:$0xff] }
 0x226   :  { %v6701_v38 = vpop.f32.mrf.mxu1  ;;  %v4091_v33 = vld [vmem:[#allocation2 + $0x181] sm:$0xff] }
 0x227   :  { %10731 = vst [vmem:[#allocation17_spill] sm:$0xff] %v8588_v48  ;;  %v8591_v1 = vadd.f32 %v2811_v19, %v2360_v5  ;;  %v2363_v44 = vadd.f32 %v6701_v38, %v10734_v11  ;;  %v2814_v14 = vpop.f32.mrf.mxu0  ;;  %v4092_v5 = vld [vmem:[#allocation2 + $0x189] sm:$0xff]  ;;  %v10741_v38 = vld [vmem:[#allocation26_spill] sm:$0xff] }
 0x228   :  { %v2252_v18 = vpop.f32.mrf.mxu1 }
 0x229   :  { %10733 = vst [vmem:[#allocation19_spill] sm:$0xff] %v8591_v1  ;;  %v8594_v23 = vadd.f32 %v6769_v22, %v2363_v44  ;;  %v2361_v58 = vadd.f32 %v2252_v18, %v10736_v37  ;;  %v6772_v46 = vpop.f32.mrf.mxu0  ;;  %7011 = vmatmul.mubr.msk.bf16.gmra.mxu0 %vm18_vm0, %v10737_v3  ;;  %v4654_v37 = vld [vmem:[#allocation2 + $0x18a] sm:$0xff]  ;;  %v4140_v44 = vpack.c.bf16 %v4090_v41, %v4089_v8  ;;  %v10743_v18 = vld [vmem:[#allocation38_spill] sm:$0xff]  ;;  %v4656_v41 = vld [vmem:[#allocation2 + $0x1a2] sm:$0xff] }
 0x22a   :  { %v6704_v53 = vpop.f32.mrf.mxu1  ;;  %6943 = vmatmul.mubr.msk.bf16.gmra.mxu1 %vm18_vm0, %v4138_v4  ;;  %7014 = vmatprep.mubr.msk.bf16.mxu0 %vm18_vm0, %v4701_v45  ;;  %v4093_v8 = vld [vmem:[#allocation2 + $0x199] sm:$0xff] }
 0x22b   :  { %10735 = vst [vmem:[#allocation20_spill] sm:$0xff] %v8594_v23  ;;  %v8601_v19 = vadd.f32 %v2814_v14, %v2361_v58  ;;  %v2366_v61 = vadd.f32 %v6704_v53, %v10739_v35  ;;  %v2827_v13 = vpop.f32.mrf.mxu0  ;;  %6946 = vmatprep.mubr.msk.bf16.mxu1 %vm18_vm0, %v4139_v10  ;;  %v4703_v58 = vpack.c.bf16 %v4654_v37, %v4653_v24  ;;  %v10745_v23 = vld [vmem:[#allocation28_spill] sm:$0xff] }
 0x22c   :  { %v2265_v51 = vpop.f32.mrf.mxu1  ;;  %v4141_v10 = vpack.c.bf16 %v4092_v5, %v4091_v33  ;;  %v4657_v33 = vld [vmem:[#allocation2 + $0x1e2] sm:$0xff]  ;;  %v4658_v5 = vld [vmem:[#allocation2 + $0x1ea] sm:$0xff] }
 0x22d   :  { %10738 = vst [vmem:[#allocation18_spill] sm:$0xff] %v8601_v19  ;;  %v8605_v22 = vadd.f32 %v6772_v46, %v2366_v61  ;;  %v2364_v4 = vadd.f32 %v2265_v51, %v10741_v38  ;;  %v6773_v11 = vpop.f32.mrf.mxu0  ;;  %v10746_v46 = vld [vmem:[#allocation27_spill] sm:$0xff] }
 0x22e   :  { %v6705_v45 = vpop.f32.mrf.mxu1 }
 0x22f   :  { %10740 = vst [vmem:[#allocation21_spill] sm:$0xff] %v8605_v22  ;;  %v8608_v14 = vadd.f32 %v2827_v13, %v2364_v4  ;;  %v2367_v3 = vadd.f32 %v6705_v45, %v10743_v18  ;;  %v2830_v53 = vpop.f32.mrf.mxu0  ;;  %v4655_v13 = vld [vmem:[#allocation2 + $0x19a] sm:$0xff] }
 0x230   :  { %v2268_v35 = vpop.f32.mrf.mxu1  ;;  %v4095_v4 = vld [vmem:[#allocation2 + $0x1e1] sm:$0xff] }
 0x231   :  { %10742 = vst [vmem:[#allocation22_spill] sm:$0xff] %v8608_v14  ;;  %v8611_v19 = vadd.f32 %v6773_v11, %v2367_v3  ;;  %v2365_v1 = vadd.f32 %v2268_v35, %v10745_v23  ;;  %v6776_v48 = vpop.f32.mrf.mxu0  ;;  %7015 = vmatmul.mubr.msk.bf16.gmra.mxu0 %vm18_vm0, %v10746_v46  ;;  %v4094_v23 = vld [vmem:[#allocation2 + $0x1a1] sm:$0xff]  ;;  %v4096_v11 = vld [vmem:[#allocation2 + $0x1e9] sm:$0xff]  ;;  %v4704_v3 = vpack.c.bf16 %v4656_v41, %v4655_v13 }
 0x232   :  { %v6708_v61 = vpop.f32.mrf.mxu1  ;;  %6947 = vmatmul.mubr.msk.bf16.gmra.mxu1 %vm18_vm0, %v4140_v44  ;;  %7018 = vmatprep.mubr.msk.bf16.mxu0 %vm18_vm0, %v4703_v58  ;;  %v10748_v44 = vld [vmem:[#allocation29_spill] sm:$0xff]  ;;  %v10750_v22 = vld [vmem:[#allocation31_spill] sm:$0xff] }
 0x233   :  { %10744 = vst [vmem:[#allocation37_spill] sm:$0xff] %v8611_v19  ;;  %v8618_v24 = vadd.f32 %v2830_v53, %v2365_v1  ;;  %v2370_v37 = vadd.f32 %v6708_v61, %v8317_v30  ;;  %v2843_v51 = vpop.f32.mrf.mxu0  ;;  %6950 = vmatprep.mubr.msk.bf16.mxu1 %vm18_vm0, %v4141_v10  ;;  %v4142_v1 = vpack.c.bf16 %v4094_v23, %v4093_v8  ;;  %v10749_v30 = vld [vmem:[#allocation30_spill] sm:$0xff]  ;;  %v4098_v23 = vld [vmem:[#allocation2 + $0x201] sm:$0xff] }
 0x234   :  { %v2281_v38 = vpop.f32.mrf.mxu1  ;;  %v4705_v53 = vpack.c.bf16 %v4658_v5, %v4657_v33  ;;  %v4099_v5 = vld [vmem:[#allocation2 + $0x211] sm:$0xff] }
 0x235   :  { %10747 = vst [vmem:[#allocation24_spill] sm:$0xff] %v8618_v24  ;;  %v8622_v45 = vadd.f32 %v6776_v48, %v2370_v37  ;;  %v2368_v58 = vadd.f32 %v2281_v38, %v10748_v44  ;;  %v6777_v18 = vpop.f32.mrf.mxu0  ;;  %v4143_v24 = vpack.c.bf16 %v4096_v11, %v4095_v4 }
 0x236   :  { %v6709_v35 = vpop.f32.mrf.mxu1 }
 0x237   :  { %v8625_v46 = vadd.f32 %v2843_v51, %v2368_v58  ;;  %v2371_v61 = vadd.f32 %v6709_v35, %v10749_v30  ;;  %v2846_v10 = vpop.f32.mrf.mxu0  ;;  %v4097_v51 = vld [vmem:[#allocation2 + $0x1f9] sm:$0xff] }
 0x238   :  { %v2284_v19 = vpop.f32.mrf.mxu1  ;;  %v4144_v44 = vpack.c.bf16 %v4098_v23, %v4097_v51 }
 0x239   :  { %v8628_v14 = vadd.f32 %v6777_v18, %v2371_v61  ;;  %v2369_v31 = vadd.f32 %v2284_v19, %v10750_v22  ;;  %v6780_v48 = vpop.f32.mrf.mxu0  ;;  %7019 = vmatmul.mubr.msk.bf16.gmra.mxu0 %vm18_vm0, %v4704_v3  ;;  %v4100_v19 = vld [vmem:[#allocation2 + $0x219] sm:$0xff] }
 0x23a   :  { %v6712_v37 = vpop.f32.mrf.mxu1  ;;  %6951 = vmatmul.mubr.msk.bf16.gmra.mxu1 %vm18_vm0, %v4142_v1  ;;  %7022 = vmatprep.mubr.msk.bf16.mxu0 %vm18_vm0, %v4705_v53  ;;  %v4145_v18 = vpack.c.bf16 %v4100_v19, %v4099_v5  ;;  %v10751_v53 = vld [vmem:[#allocation32_spill] sm:$0xff] }
 0x23b   :  { %v8634_v8 = vadd.f32 %v2846_v10, %v2369_v31  ;;  %v2374_v13 = vadd.f32 %v6712_v37, %v8333_v54  ;;  %v2859_v41 = vpop.f32.mrf.mxu0  ;;  %6954 = vmatprep.mubr.msk.bf16.mxu1 %vm18_vm0, %v4143_v24  ;;  %v4101_v10 = vld [vmem:[#allocation2 + $0x229] sm:$0xff]  ;;  %v4103_v37 = vld [vmem:[#allocation2 + $0x241] sm:$0xff] }
 0x23c   :  { %v2297_v33 = vpop.f32.mrf.mxu1 }
 0x23d   :  { %v8638_v22 = vadd.f32 %v6780_v48, %v2374_v13  ;;  %v2372_v38 = vadd.f32 %v2297_v33, %v8336_v32  ;;  %v6781_v4 = vpop.f32.mrf.mxu0  ;;  %v4102_v48 = vld [vmem:[#allocation2 + $0x231] sm:$0xff]  ;;  %v4104_v13 = vld [vmem:[#allocation2 + $0x249] sm:$0xff] }
 0x23e   :  { %v6713_v11 = vpop.f32.mrf.mxu1  ;;  %v4146_v5 = vpack.c.bf16 %v4102_v48, %v4101_v10 }
 0x23f   :  { %v8641_v58 = vadd.f32 %v2859_v41, %v2372_v38  ;;  %v2375_v31 = vadd.f32 %v6713_v11, %v8341_v20  ;;  %v2862_v54 = vpop.f32.mrf.mxu0  ;;  %v4147_v38 = vpack.c.bf16 %v4104_v13, %v4103_v37 }
 0x240   :  { %v2300_v3 = vpop.f32.mrf.mxu1 }
 0x241   :  { %v8644_v24 = vadd.f32 %v6781_v4, %v2375_v31  ;;  %v2373_v35 = vadd.f32 %v2300_v3, %v8347_v12  ;;  %v6856_v1 = vpop.f32.mrf.mxu0  ;;  %7023 = vmatmul.mubr.msk.bf16.gmra.mxu0 %vm18_vm0, %v10751_v53  ;;  %v4106_v53 = vld [vmem:[#allocation2 + $0x261] sm:$0xff] }
 0x242   :  { %v6788_v30 = vpop.f32.mrf.mxu1  ;;  %6955 = vmatmul.mubr.msk.bf16.gmra.mxu1 %vm18_vm0, %v4144_v44  ;;  %7026 = vmatprep.mubr.msk.bf16.mxu0 %vm18_vm0, %v8355_v15  ;;  %v10752_v44 = vld [vmem:[#allocation34_spill] sm:$0xff] }
 0x243   :  { %v8652_v32 = vadd.f32 %v2862_v54, %v2373_v35  ;;  %v3438_v20 = vadd.f32 %v6788_v30, %v8352_v52  ;;  %v3744_v61 = vpop.f32.mrf.mxu0  ;;  %6958 = vmatprep.mubr.msk.bf16.mxu1 %vm18_vm0, %v4145_v18  ;;  %v10753_v18 = vld [vmem:[#allocation33_spill] sm:$0xff] }
 0x244   :  { %v3181_v12 = vpop.f32.mrf.mxu1 }
 0x245   :  { %v8656_v41 = vadd.f32 %v6856_v1, %v3438_v20  ;;  %v3436_v51 = vadd.f32 %v3181_v12, %v8357_v34  ;;  %v6857_v23 = vpop.f32.mrf.mxu0  ;;  %v4105_v1 = vld [vmem:[#allocation2 + $0x259] sm:$0xff]  ;;  %v4107_v20 = vld [vmem:[#allocation2 + $0x271] sm:$0xff] }
 0x246   :  { %v6789_v33 = vpop.f32.mrf.mxu1  ;;  %v4148_v13 = vpack.c.bf16 %v4106_v53, %v4105_v1 }
 0x247   :  { %v8659_v15 = vadd.f32 %v3744_v61, %v3436_v51  ;;  %v3439_v19 = vadd.f32 %v6789_v33, %v8362_v49  ;;  %v3747_v52 = vpop.f32.mrf.mxu0  ;;  %v4108_v61 = vld [vmem:[#allocation2 + $0x279] sm:$0xff] }
 0x248   :  { %v3184_v4 = vpop.f32.mrf.mxu1 }
 0x249   :  { %v8662_v11 = vadd.f32 %v6857_v23, %v3439_v19  ;;  %v3437_v31 = vadd.f32 %v3184_v4, %v10752_v44  ;;  %v6860_v54 = vpop.f32.mrf.mxu0  ;;  %7027 = vmatmul.mubr.msk.bf16.gmra.mxu0 %vm18_vm0, %v10753_v18  ;;  %v4149_v23 = vpack.c.bf16 %v4108_v61, %v4107_v20  ;;  %v10754_v19 = vld [vmem:[#allocation36_spill] sm:$0xff]  ;;  %v10755_v4 = vld [vmem:[#allocation35_spill] sm:$0xff]  ;;  %v4110_v18 = vld [vmem:[#allocation2 + $0x291] sm:$0xff] }
 0x24a   :  { %v6792_v3 = vpop.f32.mrf.mxu1  ;;  %6959 = vmatmul.mubr.msk.bf16.gmra.mxu1 %vm18_vm0, %v4146_v5  ;;  %7030 = vmatprep.mubr.msk.bf16.mxu0 %vm18_vm0, %v8377_v40 }
 0x24b   :  { %v8670_v34 = vadd.f32 %v3747_v52, %v3437_v31  ;;  %v3442_v49 = vadd.f32 %v6792_v3, %v8374_v62  ;;  %v3760_v35 = vpop.f32.mrf.mxu0  ;;  %6962 = vmatprep.mubr.msk.bf16.mxu1 %vm18_vm0, %v4147_v38 }
 0x24c   :  { %v3197_v30 = vpop.f32.mrf.mxu1 }
 0x24d   :  { %v8674_v10 = vadd.f32 %v6860_v54, %v3442_v49  ;;  %v3440_v48 = vadd.f32 %v3197_v30, %v8379_v42  ;;  %v6861_v12 = vpop.f32.mrf.mxu0  ;;  %v4109_v54 = vld [vmem:[#allocation2 + $0x289] sm:$0xff]  ;;  %v4111_v49 = vld [vmem:[#allocation2 + $0x2a1] sm:$0xff] }
 0x24e   :  { %v6793_v37 = vpop.f32.mrf.mxu1  ;;  %v4150_v61 = vpack.c.bf16 %v4110_v18, %v4109_v54 }
 0x24f   :  { %v8677_v40 = vadd.f32 %v3760_v35, %v3440_v48  ;;  %v3443_v51 = vadd.f32 %v6793_v37, %v8384_v29  ;;  %v3763_v62 = vpop.f32.mrf.mxu0  ;;  %v4112_v35 = vld [vmem:[#allocation2 + $0x2a9] sm:$0xff] }
 0x250   :  { %v3200_v33 = vpop.f32.mrf.mxu1 }
 0x251   :  { %v8680_v5 = vadd.f32 %v6861_v12, %v3443_v51  ;;  %v3441_v52 = vadd.f32 %v3200_v33, %v10754_v19  ;;  %v6864_v38 = vpop.f32.mrf.mxu0  ;;  %7031 = vmatmul.mubr.msk.bf16.gmra.mxu0 %vm18_vm0, %v10755_v4  ;;  %v4151_v12 = vpack.c.bf16 %v4112_v35, %v4111_v49  ;;  %v10756_v51 = vld [vmem:[#allocation40_spill] sm:$0xff]  ;;  %v10757_v33 = vld [vmem:[#allocation39_spill] sm:$0xff] }
 0x252   :  { %v6796_v44 = vpop.f32.mrf.mxu1  ;;  %6963 = vmatmul.mubr.msk.bf16.gmra.mxu1 %vm18_vm0, %v4148_v13  ;;  %7034 = vmatprep.mubr.msk.bf16.mxu0 %vm18_vm0, %v8399_v36  ;;  %v4114_v4 = vld [vmem:[#allocation2 + $0x2c1] sm:$0xff] }
 0x253   :  { %v8688_v42 = vadd.f32 %v3763_v62, %v3441_v52  ;;  %v3446_v29 = vadd.f32 %v6796_v44, %v8396_v25  ;;  %v3776_v31 = vpop.f32.mrf.mxu0  ;;  %6966 = vmatprep.mubr.msk.bf16.mxu1 %vm18_vm0, %v4149_v23 }
 0x254   :  { %v3213_v3 = vpop.f32.mrf.mxu1 }
 0x255   :  { %v8692_v1 = vadd.f32 %v6864_v38, %v3446_v29  ;;  %v3444_v53 = vadd.f32 %v3213_v3, %v8401_v39  ;;  %v6865_v30 = vpop.f32.mrf.mxu0  ;;  %v4113_v38 = vld [vmem:[#allocation2 + $0x2b9] sm:$0xff]  ;;  %v4115_v29 = vld [vmem:[#allocation2 + $0x2d1] sm:$0xff] }
 0x256   :  { %v6797_v20 = vpop.f32.mrf.mxu1  ;;  %v4152_v35 = vpack.c.bf16 %v4114_v4, %v4113_v38 }
 0x257   :  { %v8695_v36 = vadd.f32 %v3776_v31, %v3444_v53  ;;  %v3447_v48 = vadd.f32 %v6797_v20, %v8406_v63  ;;  %v3779_v25 = vpop.f32.mrf.mxu0  ;;  %v4116_v31 = vld [vmem:[#allocation2 + $0x2d9] sm:$0xff] }
 0x258   :  { %v3216_v37 = vpop.f32.mrf.mxu1 }
 0x259   :  { %v8698_v13 = vadd.f32 %v6865_v30, %v3447_v48  ;;  %v3445_v62 = vadd.f32 %v3216_v37, %v10756_v51  ;;  %v6868_v23 = vpop.f32.mrf.mxu0  ;;  %7035 = vmatmul.mubr.msk.bf16.gmra.mxu0 %vm18_vm0, %v10757_v33  ;;  %v4153_v30 = vpack.c.bf16 %v4116_v31, %v4115_v29  ;;  %v10758_v48 = vld [vmem:[#allocation42_spill] sm:$0xff]  ;;  %v10759_v37 = vld [vmem:[#allocation41_spill] sm:$0xff] }
 0x25a   :  { %v6800_v19 = vpop.f32.mrf.mxu1  ;;  %6967 = vmatmul.mubr.msk.bf16.gmra.mxu1 %vm18_vm0, %v4150_v61  ;;  %7038 = vmatprep.mubr.msk.bf16.mxu0 %vm18_vm0, %v8421_v60  ;;  %v4118_v33 = vld [vmem:[#allocation2 + $0x2f1] sm:$0xff] }
 0x25b   :  { %v8706_v39 = vadd.f32 %v3779_v25, %v3445_v62  ;;  %v3450_v63 = vadd.f32 %v6800_v19, %v8418_v59  ;;  %v3792_v52 = vpop.f32.mrf.mxu0  ;;  %6970 = vmatprep.mubr.msk.bf16.mxu1 %vm18_vm0, %v4151_v12 }
 0x25c   :  { %v3229_v44 = vpop.f32.mrf.mxu1 }
 0x25d   :  { %v8710_v54 = vadd.f32 %v6868_v23, %v3450_v63  ;;  %v3448_v18 = vadd.f32 %v3229_v44, %v8423_v2  ;;  %v6869_v3 = vpop.f32.mrf.mxu0  ;;  %v4117_v23 = vld [vmem:[#allocation2 + $0x2e9] sm:$0xff]  ;;  %v4119_v63 = vld [vmem:[#allocation2 + $0x301] sm:$0xff] }
 0x25e   :  { %v6801_v49 = vpop.f32.mrf.mxu1  ;;  %v4154_v31 = vpack.c.bf16 %v4118_v33, %v4117_v23 }
 0x25f   :  { %v8713_v60 = vadd.f32 %v3792_v52, %v3448_v18  ;;  %v3451_v53 = vadd.f32 %v6801_v49, %v8428_v57  ;;  %v3795_v59 = vpop.f32.mrf.mxu0  ;;  %v4120_v52 = vld [vmem:[#allocation2 + $0x309] sm:$0xff] }
 0x260   :  { %v3232_v20 = vpop.f32.mrf.mxu1 }
 0x261   :  { %v8716_v61 = vadd.f32 %v6869_v3, %v3451_v53  ;;  %v3449_v25 = vadd.f32 %v3232_v20, %v10758_v48  ;;  %v6872_v12 = vpop.f32.mrf.mxu0  ;;  %7039 = vmatmul.mubr.msk.bf16.gmra.mxu0 %vm18_vm0, %v10759_v37  ;;  %v4155_v3 = vpack.c.bf16 %v4120_v52, %v4119_v63  ;;  %v10760_v53 = vld [vmem:[#allocation44_spill] sm:$0xff]  ;;  %v10761_v20 = vld [vmem:[#allocation43_spill] sm:$0xff] }
 0x262   :  { %v6804_v51 = vpop.f32.mrf.mxu1  ;;  %6971 = vmatmul.mubr.msk.bf16.gmra.mxu1 %vm18_vm0, %v4152_v35  ;;  %7042 = vmatprep.mubr.msk.bf16.mxu0 %vm18_vm0, %v8443_v16  ;;  %v4122_v37 = vld [vmem:[#allocation2 + $0x321] sm:$0xff] }
 0x263   :  { %v8724_v2 = vadd.f32 %v3795_v59, %v3449_v25  ;;  %v3454_v57 = vadd.f32 %v6804_v51, %v8440_v27  ;;  %v3808_v62 = vpop.f32.mrf.mxu0  ;;  %6974 = vmatprep.mubr.msk.bf16.mxu1 %vm18_vm0, %v4153_v30 }
 0x264   :  { %v3245_v19 = vpop.f32.mrf.mxu1 }
 0x265   :  { %v8728_v38 = vadd.f32 %v6872_v12, %v3454_v57  ;;  %v3452_v4 = vadd.f32 %v3245_v19, %v8445_v26  ;;  %v6873_v44 = vpop.f32.mrf.mxu0  ;;  %v4121_v12 = vld [vmem:[#allocation2 + $0x319] sm:$0xff]  ;;  %v4123_v57 = vld [vmem:[#allocation2 + $0x331] sm:$0xff] }
 0x266   :  { %v6805_v29 = vpop.f32.mrf.mxu1  ;;  %v4156_v52 = vpack.c.bf16 %v4122_v37, %v4121_v12 }
 0x267   :  { %v8731_v16 = vadd.f32 %v3808_v62, %v3452_v4  ;;  %v3455_v18 = vadd.f32 %v6805_v29, %v8450_v9  ;;  %v3811_v27 = vpop.f32.mrf.mxu0  ;;  %v4124_v62 = vld [vmem:[#allocation2 + $0x339] sm:$0xff] }
 0x268   :  { %v3248_v49 = vpop.f32.mrf.mxu1 }
 0x269   :  { %v8734_v35 = vadd.f32 %v6873_v44, %v3455_v18  ;;  %v3453_v59 = vadd.f32 %v3248_v49, %v10760_v53  ;;  %v6876_v30 = vpop.f32.mrf.mxu0  ;;  %7043 = vmatmul.mubr.msk.bf16.gmra.mxu0 %vm18_vm0, %v10761_v20  ;;  %v4157_v44 = vpack.c.bf16 %v4124_v62, %v4123_v57  ;;  %v10762_v18 = vld [vmem:[#allocation46_spill] sm:$0xff]  ;;  %v10763_v49 = vld [vmem:[#allocation45_spill] sm:$0xff] }
 0x26a   :  { %v6808_v48 = vpop.f32.mrf.mxu1  ;;  %6975 = vmatmul.mubr.msk.bf16.gmra.mxu1 %vm18_vm0, %v4154_v31  ;;  %7046 = vmatprep.mubr.msk.bf16.mxu0 %vm18_vm0, %v8465_v28 }
 0x26b   :  { %v8742_v26 = vadd.f32 %v3811_v27, %v3453_v59  ;;  %v3458_v9 = vadd.f32 %v6808_v48, %v8462_v56  ;;  %v3824_v25 = vpop.f32.mrf.mxu0  ;;  %6978 = vmatprep.mubr.msk.bf16.mxu1 %vm18_vm0, %v4155_v3  ;;  %v4688_v59 = vld [vmem:[#allocation2 + $0x352] sm:$0xff]  ;;  %v4125_v48 = vld [vmem:[#allocation2 + $0x349] sm:$0xff] }
 0x26c   :  { %v3261_v51 = vpop.f32.mrf.mxu1 }
 0x26d   :  { %v8746_v23 = vadd.f32 %v6876_v30, %v3458_v9  ;;  %v3456_v33 = vadd.f32 %v3261_v51, %v8467_v7  ;;  %v6877_v19 = vpop.f32.mrf.mxu0  ;;  %v4687_v7 = vld [vmem:[#allocation2 + $0x34a] sm:$0xff] }
 0x26e   :  { %v6809_v63 = vpop.f32.mrf.mxu1  ;;  %v4126_v9 = vld [vmem:[#allocation2 + $0x351] sm:$0xff]  ;;  %v4720_v57 = vpack.c.bf16 %v4688_v59, %v4687_v7 }
 0x26f   :  { %v8749_v28 = vadd.f32 %v3824_v25, %v3456_v33  ;;  %v3459_v4 = vadd.f32 %v6809_v63, %v8472_v6  ;;  %v3827_v56 = vpop.f32.mrf.mxu0 }
 0x270   :  { %v3264_v29 = vpop.f32.mrf.mxu1 }
 0x271   :  { %v8752_v31 = vadd.f32 %v6877_v19, %v3459_v4  ;;  %v3457_v27 = vadd.f32 %v3264_v29, %v10762_v18  ;;  %v6880_v3 = vpop.f32.mrf.mxu0  ;;  %7047 = vmatmul.mubr.msk.bf16.gmra.mxu0 %vm18_vm0, %v10763_v49 }
 0x272   :  { %v6812_v53 = vpop.f32.mrf.mxu1  ;;  %6979 = vmatmul.mubr.msk.bf16.gmra.mxu1 %vm18_vm0, %v4156_v52  ;;  %7050 = vmatprep.mubr.msk.bf16.mxu0 %vm18_vm0, %v8487_v17  ;;  %v4158_v17 = vpack.c.bf16 %v4126_v9, %v4125_v48  ;;  %v10765_v9 = vld [vmem:[#allocation48_spill] sm:$0xff] }
 0x273   :  { %v8760_v6 = vadd.f32 %v3827_v56, %v3457_v27  ;;  %v3462_v30 = vadd.f32 %v6812_v53, %v8484_v21  ;;  %v3840_v20 = vpop.f32.mrf.mxu0  ;;  %6982 = vmatprep.mubr.msk.bf16.mxu1 %vm18_vm0, %v4157_v44 }
 0x274   :  { %v3277_v25 = vpop.f32.mrf.mxu1 }
 0x275   :  { %v8764_v12 = vadd.f32 %v6880_v3, %v3462_v30  ;;  %v3460_v37 = vadd.f32 %v3277_v25, %v8489_v0  ;;  %v6881_v51 = vpop.f32.mrf.mxu0 }
 0x276   :  { %v6813_v62 = vpop.f32.mrf.mxu1 }
 0x277   :  { %v8767_v33 = vadd.f32 %v3840_v20, %v3460_v37  ;;  %v3463_v19 = vadd.f32 %v6813_v62, %v8492_v47  ;;  %v3843_v63 = vpop.f32.mrf.mxu0 }
 0x278   :  { %v3280_v21 = vpop.f32.mrf.mxu1 }
 0x279   :  { %v8770_v52 = vadd.f32 %v6881_v51, %v3463_v19  ;;  %v3461_v4 = vadd.f32 %v3280_v21, %v8499_v43  ;;  %v6884_v56 = vpop.f32.mrf.mxu0  ;;  %7051 = vmatmul.mubr.msk.bf16.gmra.mxu0 %vm18_vm0, %v4720_v57  ;;  %v10764_v43 = vld [vmem:[#allocation47_spill] sm:$0xff]  ;;  %v10766_v57 = vld [vmem:[#allocation49_spill] sm:$0xff] }
 0x27a   :  { %v6816_v44 = vpop.f32.mrf.mxu1  ;;  %6983 = vmatmul.mubr.msk.bf16.gmra.mxu1 %vm18_vm0, %v4158_v17 }
 0x27b   :  { %v8775_v0 = vadd.f32 %v3843_v63, %v3461_v4  ;;  %v3466_v29 = vadd.f32 %v6816_v44, %v8503_v55  ;;  %v3856_v18 = vpop.f32.mrf.mxu0  ;;  %v10767_v63 = vld [vmem:[#allocation50_spill] sm:$0xff] }
 0x27c   :  { %v3293_v27 = vpop.f32.mrf.mxu1 }
 0x27d   :  { %v8778_v3 = vadd.f32 %v6884_v56, %v3466_v29  ;;  %v3464_v47 = vadd.f32 %v3293_v27, %v8506_v50  ;;  %v6885_v49 = vpop.f32.mrf.mxu0  ;;  %v10768_v29 = vld [vmem:[#allocation3_spill] sm:$0xff] }
 0x27e   :  { %v6817_v53 = vpop.f32.mrf.mxu1 }
 0x27f   :  { %v8781_v7 = vadd.f32 %v3856_v18, %v3464_v47  ;;  %v3467_v59 = vadd.f32 %v6817_v53, %v10764_v43  ;;  %v3859_v30 = vpop.f32.mrf.mxu0  ;;  %v10769_v53 = vld [vmem:[#allocation5_spill] sm:$0xff] }
 0x280   :  { %v3296_v20 = vpop.f32.mrf.mxu1 }
 0x281   :  { %v8784_v48 = vadd.f32 %v6885_v49, %v3467_v59  ;;  %v3465_v25 = vadd.f32 %v3296_v20, %v10765_v9  ;;  %v6888_v37 = vpop.f32.mrf.mxu0  ;;  %v10770_v9 = vld [vmem:[#allocation7_spill] sm:$0xff] }
 0x282   :  { %v6820_v55 = vpop.f32.mrf.mxu1 }
 0x283   :  { %v8787_v51 = vadd.f32 %v3859_v30, %v3465_v25  ;;  %v3470_v62 = vadd.f32 %v6820_v55, %v10766_v57  ;;  %v3872_v17 = vpop.f32.mrf.mxu0 }
 0x284   :  { %v3309_v50 = vpop.f32.mrf.mxu1 }
 0x285   :  { %v8790_v19 = vadd.f32 %v6888_v37, %v3470_v62  ;;  %v3468_v21 = vadd.f32 %v3309_v50, %v10767_v63  ;;  %v6889_v4 = vpop.f32.mrf.mxu0  ;;  %v10772_v62 = vld [vmem:[#allocation4_spill] sm:$0xff] }
 0x286   :  { %v6821_v56 = vpop.f32.mrf.mxu1 }
 0x287   :  { %v8793_v44 = vadd.f32 %v3872_v17, %v3468_v21  ;;  %v3471_v18 = vadd.f32 %v6821_v56, %v10768_v29  ;;  %v3875_v27 = vpop.f32.mrf.mxu0 }
 0x288   :  { %v3312_v47 = vpop.f32.mrf.mxu1 }
 0x289   :  { %v8796_v49 = vadd.f32 %v6889_v4, %v3471_v18  ;;  %v3469_v43 = vadd.f32 %v3312_v47, %v10769_v53  ;;  %v6892_v59 = vpop.f32.mrf.mxu0  ;;  %v10774_v4 = vld [vmem:[#allocation6_spill] sm:$0xff] }
 0x28a   :  { %v6824_v30 = vpop.f32.mrf.mxu1 }
 0x28b   :  { %v8799_v20 = vadd.f32 %v3875_v27, %v3469_v43  ;;  %v3474_v25 = vadd.f32 %v6824_v30, %v10770_v9  ;;  %v3888_v37 = vpop.f32.mrf.mxu0  ;;  %v10776_v27 = vld [vmem:[#allocation9_spill] sm:$0xff] }
 0x28c   :  { %v3325_v55 = vpop.f32.mrf.mxu1 }
 0x28d   :  { %v8802_v57 = vadd.f32 %v6892_v59, %v3474_v25  ;;  %v3472_v17 = vadd.f32 %v3325_v55, %v10772_v62  ;;  %v6893_v50 = vpop.f32.mrf.mxu0  ;;  %v10778_v59 = vld [vmem:[#allocation10_spill] sm:$0xff] }
 0x28e   :  { %v6825_v63 = vpop.f32.mrf.mxu1 }
 0x28f   :  { %10771 = vst [vmem:[#allocation23_spill] sm:$0xff] %v8802_v57  ;;  %v8805_v21 = vadd.f32 %v3888_v37, %v3472_v17  ;;  %v3475_v56 = vadd.f32 %v6825_v63, %v10774_v4  ;;  %v3891_v29 = vpop.f32.mrf.mxu0  ;;  %v10780_v37 = vld [vmem:[#allocation8_spill] sm:$0xff] }
 0x290   :  { %v3328_v18 = vpop.f32.mrf.mxu1 }
 0x291   :  { %10773 = vst [vmem:[#allocation25_spill] sm:$0xff] %v8805_v21  ;;  %v8808_v47 = vadd.f32 %v6893_v50, %v3475_v56  ;;  %v3473_v53 = vadd.f32 %v3328_v18, %v10776_v27  ;;  %v6896_v43 = vpop.f32.mrf.mxu0  ;;  %v10782_v50 = vld [vmem:[#allocation11_spill] sm:$0xff] }
 0x292   :  { %v6828_v30 = vpop.f32.mrf.mxu1 }
 0x293   :  { %10775 = vst [vmem:[#allocation26_spill] sm:$0xff] %v8808_v47  ;;  %v8811_v9 = vadd.f32 %v3891_v29, %v3473_v53  ;;  %v3478_v25 = vadd.f32 %v6828_v30, %v10778_v59  ;;  %v3904_v57 = vpop.f32.mrf.mxu0  ;;  %v10784_v29 = vld [vmem:[#allocation12_spill] sm:$0xff] }
 0x294   :  { %v3341_v55 = vpop.f32.mrf.mxu1 }
 0x295   :  { %10777 = vst [vmem:[#allocation38_spill] sm:$0xff] %v8811_v9  ;;  %v8814_v62 = vadd.f32 %v6896_v43, %v3478_v25  ;;  %v3476_v17 = vadd.f32 %v3341_v55, %v10780_v37  ;;  %v6897_v21 = vpop.f32.mrf.mxu0  ;;  %v10786_v43 = vld [vmem:[#allocation14_spill] sm:$0xff] }
 0x296   :  { %v6829_v63 = vpop.f32.mrf.mxu1 }
 0x297   :  { %10779 = vst [vmem:[#allocation28_spill] sm:$0xff] %v8814_v62  ;;  %v8817_v4 = vadd.f32 %v3904_v57, %v3476_v17  ;;  %v3479_v56 = vadd.f32 %v6829_v63, %v10782_v50  ;;  %v3907_v47 = vpop.f32.mrf.mxu0  ;;  %v10788_v57 = vld [vmem:[#allocation15_spill] sm:$0xff] }
 0x298   :  { %v3344_v18 = vpop.f32.mrf.mxu1 }
 0x299   :  { %10781 = vst [vmem:[#allocation27_spill] sm:$0xff] %v8817_v4  ;;  %v8820_v27 = vadd.f32 %v6897_v21, %v3479_v56  ;;  %v3477_v53 = vadd.f32 %v3344_v18, %v10784_v29  ;;  %v6900_v9 = vpop.f32.mrf.mxu0  ;;  %v10790_v21 = vld [vmem:[#allocation13_spill] sm:$0xff] }
 0x29a   :  { %v6832_v30 = vpop.f32.mrf.mxu1 }
 0x29b   :  { %10783 = vst [vmem:[#allocation29_spill] sm:$0xff] %v8820_v27  ;;  %v8823_v59 = vadd.f32 %v3907_v47, %v3477_v53  ;;  %v3482_v25 = vadd.f32 %v6832_v30, %v10786_v43  ;;  %v3920_v62 = vpop.f32.mrf.mxu0  ;;  %v10792_v47 = vld [vmem:[#allocation16_spill] sm:$0xff] }
 0x29c   :  { %v3357_v55 = vpop.f32.mrf.mxu1 }
 0x29d   :  { %10785 = vst [vmem:[#allocation30_spill] sm:$0xff] %v8823_v59  ;;  %v8826_v37 = vadd.f32 %v6900_v9, %v3482_v25  ;;  %v3480_v17 = vadd.f32 %v3357_v55, %v10788_v57  ;;  %v6901_v4 = vpop.f32.mrf.mxu0  ;;  %v10794_v9 = vld [vmem:[#allocation17_spill] sm:$0xff] }
 0x29e   :  { %v6833_v63 = vpop.f32.mrf.mxu1 }
 0x29f   :  { %10787 = vst [vmem:[#allocation31_spill] sm:$0xff] %v8826_v37  ;;  %v8829_v50 = vadd.f32 %v3920_v62, %v3480_v17  ;;  %v3483_v56 = vadd.f32 %v6833_v63, %v10790_v21  ;;  %v3923_v27 = vpop.f32.mrf.mxu0  ;;  %v10796_v62 = vld [vmem:[#allocation19_spill] sm:$0xff] }
 0x2a0   :  { %v3360_v18 = vpop.f32.mrf.mxu1 }
 0x2a1   :  { %10789 = vst [vmem:[#allocation32_spill] sm:$0xff] %v8829_v50  ;;  %v8832_v29 = vadd.f32 %v6901_v4, %v3483_v56  ;;  %v3481_v53 = vadd.f32 %v3360_v18, %v10792_v47  ;;  %v6904_v59 = vpop.f32.mrf.mxu0  ;;  %v10798_v4 = vld [vmem:[#allocation20_spill] sm:$0xff] }
 0x2a2   :  { %v6836_v30 = vpop.f32.mrf.mxu1 }
 0x2a3   :  { %10791 = vst [vmem:[#allocation34_spill] sm:$0xff] %v8832_v29  ;;  %v8835_v43 = vadd.f32 %v3923_v27, %v3481_v53  ;;  %v3486_v25 = vadd.f32 %v6836_v30, %v10794_v9  ;;  %v3936_v37 = vpop.f32.mrf.mxu0  ;;  %v10800_v27 = vld [vmem:[#allocation18_spill] sm:$0xff] }
 0x2a4   :  { %v3373_v55 = vpop.f32.mrf.mxu1 }
 0x2a5   :  { %10793 = vst [vmem:[#allocation33_spill] sm:$0xff] %v8835_v43  ;;  %v8838_v57 = vadd.f32 %v6904_v59, %v3486_v25  ;;  %v3484_v17 = vadd.f32 %v3373_v55, %v10796_v62  ;;  %v6905_v50 = vpop.f32.mrf.mxu0  ;;  %v10802_v59 = vld [vmem:[#allocation21_spill] sm:$0xff] }
 0x2a6   :  { %v6837_v63 = vpop.f32.mrf.mxu1 }
 0x2a7   :  { %10795 = vst [vmem:[#allocation36_spill] sm:$0xff] %v8838_v57  ;;  %v8841_v21 = vadd.f32 %v3936_v37, %v3484_v17  ;;  %v3487_v56 = vadd.f32 %v6837_v63, %v10798_v4  ;;  %v3939_v29 = vpop.f32.mrf.mxu0  ;;  %v10803_v37 = vld [vmem:[#allocation22_spill] sm:$0xff] }
 0x2a8   :  { %v3376_v18 = vpop.f32.mrf.mxu1 }
 0x2a9   :  { %10797 = vst [vmem:[#allocation35_spill] sm:$0xff] %v8841_v21  ;;  %v8844_v47 = vadd.f32 %v6905_v50, %v3487_v56  ;;  %v3485_v53 = vadd.f32 %v3376_v18, %v10800_v27  ;;  %v6908_v43 = vpop.f32.mrf.mxu0  ;;  %v10804_v50 = vld [vmem:[#allocation37_spill] sm:$0xff] }
 0x2aa   :  { %v6840_v30 = vpop.f32.mrf.mxu1 }
 0x2ab   :  { %10799 = vst [vmem:[#allocation40_spill] sm:$0xff] %v8844_v47  ;;  %v8847_v9 = vadd.f32 %v3939_v29, %v3485_v53  ;;  %v3490_v25 = vadd.f32 %v6840_v30, %v10802_v59  ;;  %v3952_v57 = vpop.f32.mrf.mxu0  ;;  %v10805_v29 = vld [vmem:[#allocation24_spill] sm:$0xff] }
 0x2ac   :  { %v3389_v55 = vpop.f32.mrf.mxu1 }
 0x2ad   :  { %10801 = vst [vmem:[#allocation39_spill] sm:$0xff] %v8847_v9  ;;  %v8850_v62 = vadd.f32 %v6908_v43, %v3490_v25  ;;  %v3488_v17 = vadd.f32 %v3389_v55, %v10803_v37  ;;  %v6909_v21 = vpop.f32.mrf.mxu0 }
 0x2ae   :  { %v6841_v63 = vpop.f32.mrf.mxu1 }
 0x2af   :  { %v8853_v4 = vadd.f32 %v3952_v57, %v3488_v17  ;;  %v3491_v56 = vadd.f32 %v6841_v63, %v10804_v50  ;;  %v3955_v47 = vpop.f32.mrf.mxu0 }
 0x2b0   :  { %v3392_v18 = vpop.f32.mrf.mxu1 }
 0x2b1   :  { %v8856_v27 = vadd.f32 %v6909_v21, %v3491_v56  ;;  %v3489_v53 = vadd.f32 %v3392_v18, %v10805_v29  ;;  %v6912_v9 = vpop.f32.mrf.mxu0 }
 0x2b2   :  { %v6844_v30 = vpop.f32.mrf.mxu1 }
 0x2b3   :  { %v8859_v59 = vadd.f32 %v3955_v47, %v3489_v53  ;;  %v3494_v43 = vadd.f32 %v6844_v30, %v8622_v45  ;;  %v3968_v25 = vpop.f32.mrf.mxu0 }
 0x2b4   :  { %v3405_v55 = vpop.f32.mrf.mxu1 }
 0x2b5   :  { %v8862_v37 = vadd.f32 %v6912_v9, %v3494_v43  ;;  %v3492_v57 = vadd.f32 %v3405_v55, %v8625_v46  ;;  %v6913_v17 = vpop.f32.mrf.mxu0 }
 0x2b6   :  { %v6845_v63 = vpop.f32.mrf.mxu1 }
 0x2b7   :  { %v8865_v50 = vadd.f32 %v3968_v25, %v3492_v57  ;;  %v3495_v21 = vadd.f32 %v6845_v63, %v8628_v14  ;;  %v3971_v56 = vpop.f32.mrf.mxu0 }
 0x2b8   :  { %v3408_v18 = vpop.f32.mrf.mxu1 }
 0x2b9   :  { %v8868_v29 = vadd.f32 %v6913_v17, %v3495_v21  ;;  %v3493_v47 = vadd.f32 %v3408_v18, %v8634_v8  ;;  %v6916_v53 = vpop.f32.mrf.mxu0 }
 0x2ba   :  { %v6848_v45 = vpop.f32.mrf.mxu1 }
 0x2bb   :  { %v8871_v30 = vadd.f32 %v3971_v56, %v3493_v47  ;;  %v3498_v9 = vadd.f32 %v6848_v45, %v8638_v22  ;;  %v3984_v43 = vpop.f32.mrf.mxu0 }
 0x2bc   :  { %v3421_v46 = vpop.f32.mrf.mxu1 }
 0x2bd   :  { %v8874_v55 = vadd.f32 %v6916_v53, %v3498_v9  ;;  %v3496_v25 = vadd.f32 %v3421_v46, %v8641_v58  ;;  %v6917_v57 = vpop.f32.mrf.mxu0 }
 0x2be   :  { %v6849_v14 = vpop.f32.mrf.mxu1 }
 0x2bf   :  { %10806 = vst [vmem:[#allocation42_spill] sm:$0xff] %v8874_v55  ;;  %v8877_v63 = vadd.f32 %v3984_v43, %v3496_v25  ;;  %v3499_v17 = vadd.f32 %v6849_v14, %v8644_v24  ;;  %v3987_v21 = vpop.f32.mrf.mxu0 }
 0x2c0   :  { %v3424_v8 = vpop.f32.mrf.mxu1 }
 0x2c1   :  { %v8880_v18 = vadd.f32 %v6917_v57, %v3499_v17  ;;  %v3497_v56 = vadd.f32 %v3424_v8, %v8652_v32  ;;  %v6992_v47 = vpop.f32.mrf.mxu0 }
 0x2c2   :  { %v6924_v22 = vpop.f32.mrf.mxu1 }
 0x2c3   :  { %10807 = vst [vmem:[#allocation41_spill] sm:$0xff] %v8880_v18  ;;  %v8883_v45 = vadd.f32 %v3987_v21, %v3497_v56  ;;  %v4868_v53 = vpop.f32.mrf.mxu0  ;;  %v4563_v24 = vadd.f32 %v6924_v22, %v8656_v41 }
 0x2c4   :  { %v4306_v9 = vpop.f32.mrf.mxu1 }
 0x2c5   :  { %10808 = vst [vmem:[#allocation44_spill] sm:$0xff] %v8883_v45  ;;  %v6993_v55 = vpop.f32.mrf.mxu0  ;;  %v4561_v46 = vadd.f32 %v4306_v9, %v8659_v15  ;;  %v8893_v45 = vadd.f32 %v6992_v47, %v4563_v24 }
 0x2c6   :  { %v6925_v58 = vpop.f32.mrf.mxu1 }
 0x2c7   :  { %v4871_v43 = vpop.f32.mrf.mxu0  ;;  %v8888_v18 = vadd.f32 %v4868_v53, %v4561_v46  ;;  %v4564_v32 = vadd.f32 %v6925_v58, %v8662_v11  ;;  %10809 = vst [vmem:[#allocation43_spill] sm:$0xff] %v8893_v45 }
 0x2c8   :  { %v4309_v25 = vpop.f32.mrf.mxu1 }
 0x2c9   :  { %v4562_v14 = vadd.f32 %v4309_v25, %v8670_v34  ;;  %v6996_v57 = vpop.f32.mrf.mxu0  ;;  %v8898_v34 = vadd.f32 %v6993_v55, %v4564_v32 }
 0x2ca   :  { %v6928_v17 = vpop.f32.mrf.mxu1 }
 0x2cb   :  { %v8891_v21 = vadd.f32 %v4871_v43, %v4562_v14  ;;  %v4884_v8 = vpop.f32.mrf.mxu0  ;;  %v4567_v11 = vadd.f32 %v6928_v17, %v8674_v10 }
 0x2cc   :  { %v4322_v56 = vpop.f32.mrf.mxu1 }
 0x2cd   :  { %v5187_v15 = vadd.f32 %v8891_v21, %v8888_v18  ;;  %v4565_v9 = vadd.f32 %v4322_v56, %v8677_v40  ;;  %v6997_v41 = vpop.f32.mrf.mxu0 }
 0x2ce   :  { %v6929_v22 = vpop.f32.mrf.mxu1 }
 0x2cf   :  { %v5188_v53 = vadd.f32 %v5187_v15, %v8893_v45  ;;  %v4887_v46 = vpop.f32.mrf.mxu0  ;;  %v8902_v58 = vadd.f32 %v4884_v8, %v4565_v9  ;;  %v4568_v56 = vadd.f32 %v6929_v22, %v8680_v5  ;;  %v8910_v45 = vadd.f32 %v6996_v57, %v4567_v11 }
 0x2d0   :  { %v4325_v25 = vpop.f32.mrf.mxu1 }
 0x2d1   :  { %v5189_v47 = vadd.f32 %v5188_v53, %v8898_v34  ;;  %v4566_v43 = vadd.f32 %v4325_v25, %v8688_v42  ;;  %v7000_v24 = vpop.f32.mrf.mxu0  ;;  %v8914_v53 = vadd.f32 %v6997_v41, %v4568_v56 }
 0x2d2   :  { %v6932_v14 = vpop.f32.mrf.mxu1 }
 0x2d3   :  { %v5190_v40 = vadd.f32 %v5189_v47, %v8902_v58  ;;  %v8908_v55 = vadd.f32 %v4887_v46, %v4566_v43  ;;  %v4900_v32 = vpop.f32.mrf.mxu0  ;;  %v4571_v5 = vadd.f32 %v6932_v14, %v8692_v1 }
 0x2d4   :  { %v4338_v15 = vpop.f32.mrf.mxu1 }
 0x2d5   :  { %v5191_v10 = vadd.f32 %v5190_v40, %v8908_v55  ;;  %v4569_v17 = vadd.f32 %v4338_v15, %v8695_v36  ;;  %v7001_v8 = vpop.f32.mrf.mxu0 }
 0x2d6   :  { %v6933_v9 = vpop.f32.mrf.mxu1 }
 0x2d7   :  { %v5192_v42 = vadd.f32 %v5191_v10, %v8910_v45  ;;  %v4903_v25 = vpop.f32.mrf.mxu0  ;;  %v8918_v22 = vadd.f32 %v4900_v32, %v4569_v17  ;;  %v4572_v40 = vadd.f32 %v6933_v9, %v8698_v13  ;;  %v8926_v10 = vadd.f32 %v7000_v24, %v4571_v5 }
 0x2d8   :  { %v4341_v47 = vpop.f32.mrf.mxu1 }
 0x2d9   :  { %v5193_v46 = vadd.f32 %v5192_v42, %v8914_v53  ;;  %v4570_v57 = vadd.f32 %v4341_v47, %v8706_v39  ;;  %v7004_v11 = vpop.f32.mrf.mxu0  ;;  %v8930_v42 = vadd.f32 %v7001_v8, %v4572_v40 }
 0x2da   :  { %v6936_v43 = vpop.f32.mrf.mxu1 }
 0x2db   :  { %v5194_v36 = vadd.f32 %v5193_v46, %v8918_v22  ;;  %v8924_v41 = vadd.f32 %v4903_v25, %v4570_v57  ;;  %v4916_v56 = vpop.f32.mrf.mxu0  ;;  %v4575_v13 = vadd.f32 %v6936_v43, %v8710_v54 }
 0x2dc   :  { %v4354_v15 = vpop.f32.mrf.mxu1 }
 0x2dd   :  { %v5195_v1 = vadd.f32 %v5194_v36, %v8924_v41  ;;  %v4573_v14 = vadd.f32 %v4354_v15, %v8713_v60  ;;  %v7005_v32 = vpop.f32.mrf.mxu0 }
 0x2de   :  { %v6937_v17 = vpop.f32.mrf.mxu1 }
 0x2df   :  { %v5196_v39 = vadd.f32 %v5195_v1, %v8926_v10  ;;  %v4919_v47 = vpop.f32.mrf.mxu0  ;;  %v8934_v9 = vadd.f32 %v4916_v56, %v4573_v14  ;;  %v4576_v36 = vadd.f32 %v6937_v17, %v8716_v61  ;;  %v8942_v1 = vadd.f32 %v7004_v11, %v4575_v13 }
 0x2e0   :  { %v4357_v46 = vpop.f32.mrf.mxu1 }
 0x2e1   :  { %v5197_v25 = vadd.f32 %v5196_v39, %v8930_v42  ;;  %v4574_v24 = vadd.f32 %v4357_v46, %v8724_v2  ;;  %v7008_v5 = vpop.f32.mrf.mxu0  ;;  %v8946_v39 = vadd.f32 %v7005_v32, %v4576_v36 }
 0x2e2   :  { %v6940_v57 = vpop.f32.mrf.mxu1 }
 0x2e3   :  { %v5198_v60 = vadd.f32 %v5197_v25, %v8934_v9  ;;  %v8940_v8 = vadd.f32 %v4919_v47, %v4574_v24  ;;  %v4932_v40 = vpop.f32.mrf.mxu0  ;;  %v4579_v61 = vadd.f32 %v6940_v57, %v8728_v38 }
 0x2e4   :  { %v4370_v15 = vpop.f32.mrf.mxu1 }
 0x2e5   :  { %v5199_v54 = vadd.f32 %v5198_v60, %v8940_v8  ;;  %v4577_v43 = vadd.f32 %v4370_v15, %v8731_v16  ;;  %v7009_v56 = vpop.f32.mrf.mxu0 }
 0x2e6   :  { %v6941_v14 = vpop.f32.mrf.mxu1 }
 0x2e7   :  { %v5200_v2 = vadd.f32 %v5199_v54, %v8942_v1  ;;  %v4935_v46 = vpop.f32.mrf.mxu0  ;;  %v8950_v17 = vadd.f32 %v4932_v40, %v4577_v43  ;;  %v4580_v60 = vadd.f32 %v6941_v14, %v8734_v35  ;;  %v8958_v54 = vadd.f32 %v7008_v5, %v4579_v61 }
 0x2e8   :  { %v4373_v25 = vpop.f32.mrf.mxu1 }
 0x2e9   :  { %v5201_v47 = vadd.f32 %v5200_v2, %v8946_v39  ;;  %v4578_v11 = vadd.f32 %v4373_v25, %v8742_v26  ;;  %v7012_v13 = vpop.f32.mrf.mxu0  ;;  %v8962_v2 = vadd.f32 %v7009_v56, %v4580_v60 }
 0x2ea   :  { %v6944_v24 = vpop.f32.mrf.mxu1 }
 0x2eb   :  { %v5202_v16 = vadd.f32 %v5201_v47, %v8950_v17  ;;  %v8956_v32 = vadd.f32 %v4935_v46, %v4578_v11  ;;  %v4948_v36 = vpop.f32.mrf.mxu0  ;;  %v4583_v35 = vadd.f32 %v6944_v24, %v8746_v23 }
 0x2ec   :  { %v4386_v15 = vpop.f32.mrf.mxu1 }
 0x2ed   :  { %v5203_v38 = vadd.f32 %v5202_v16, %v8956_v32  ;;  %v4581_v57 = vadd.f32 %v4386_v15, %v8749_v28  ;;  %v7013_v40 = vpop.f32.mrf.mxu0 }
 0x2ee   :  { %v6945_v43 = vpop.f32.mrf.mxu1 }
 0x2ef   :  { %v5204_v26 = vadd.f32 %v5203_v38, %v8958_v54  ;;  %v4951_v25 = vpop.f32.mrf.mxu0  ;;  %v8966_v14 = vadd.f32 %v4948_v36, %v4581_v57  ;;  %v4584_v16 = vadd.f32 %v6945_v43, %v8752_v31  ;;  %v8974_v38 = vadd.f32 %v7012_v13, %v4583_v35 }
 0x2f0   :  { %v4389_v47 = vpop.f32.mrf.mxu1 }
 0x2f1   :  { %v5205_v46 = vadd.f32 %v5204_v26, %v8962_v2  ;;  %v4582_v5 = vadd.f32 %v4389_v47, %v8760_v6  ;;  %v7016_v61 = vpop.f32.mrf.mxu0  ;;  %10811 = vst [vmem:[#allocation45_spill] sm:$0xff] %v8974_v38  ;;  %v8978_v26 = vadd.f32 %v7013_v40, %v4584_v16 }
 0x2f2   :  { %v6948_v11 = vpop.f32.mrf.mxu1 }
 0x2f3   :  { %v5206_v28 = vadd.f32 %v5205_v46, %v8966_v14  ;;  %v8972_v56 = vadd.f32 %v4951_v25, %v4582_v5  ;;  %v4964_v60 = vpop.f32.mrf.mxu0  ;;  %10812 = vst [vmem:[#allocation47_spill] sm:$0xff] %v8978_v26  ;;  %v4587_v31 = vadd.f32 %v6948_v11, %v8764_v12 }
 0x2f4   :  { %v4402_v15 = vpop.f32.mrf.mxu1 }
 0x2f5   :  { %10810 = vst [vmem:[#allocation46_spill] sm:$0xff] %v8972_v56  ;;  %v5207_v23 = vadd.f32 %v5206_v28, %v8972_v56  ;;  %v4585_v24 = vadd.f32 %v4402_v15, %v8767_v33  ;;  %v7017_v36 = vpop.f32.mrf.mxu0 }
 0x2f6   :  { %v6949_v57 = vpop.f32.mrf.mxu1 }
 0x2f7   :  { %v5208_v6 = vadd.f32 %v5207_v23, %v8974_v38  ;;  %v4967_v47 = vpop.f32.mrf.mxu0  ;;  %v8982_v43 = vadd.f32 %v4964_v60, %v4585_v24  ;;  %v4588_v28 = vadd.f32 %v6949_v57, %v8770_v52  ;;  %v8990_v23 = vadd.f32 %v7016_v61, %v4587_v31 }
 0x2f8   :  { %v4405_v46 = vpop.f32.mrf.mxu1 }
 0x2f9   :  { %10813 = vst [vmem:[#allocation48_spill] sm:$0xff] %v8982_v43  ;;  %v5209_v25 = vadd.f32 %v5208_v6, %v8978_v26  ;;  %v4586_v13 = vadd.f32 %v4405_v46, %v8775_v0  ;;  %v7020_v35 = vpop.f32.mrf.mxu0  ;;  %10815 = vst [vmem:[#allocation50_spill] sm:$0xff] %v8990_v23  ;;  %v8994_v6 = vadd.f32 %v7017_v36, %v4588_v28 }
 0x2fa   :  { %v6952_v5 = vpop.f32.mrf.mxu1 }
 0x2fb   :  { %v5210_v33 = vadd.f32 %v5209_v25, %v8982_v43  ;;  %v8988_v40 = vadd.f32 %v4967_v47, %v4586_v13  ;;  %v4980_v16 = vpop.f32.mrf.mxu0  ;;  %10816 = vst [vmem:[#allocation3_spill] sm:$0xff] %v8994_v6  ;;  %v4591_v52 = vadd.f32 %v6952_v5, %v8778_v3 }
 0x2fc   :  { %v4418_v15 = vpop.f32.mrf.mxu1 }
 0x2fd   :  { %10814 = vst [vmem:[#allocation49_spill] sm:$0xff] %v8988_v40  ;;  %v5211_v12 = vadd.f32 %v5210_v33, %v8988_v40  ;;  %v4589_v11 = vadd.f32 %v4418_v15, %v8781_v7  ;;  %v7021_v60 = vpop.f32.mrf.mxu0 }
 0x2fe   :  { %v6953_v24 = vpop.f32.mrf.mxu1 }
 0x2ff   :  { %v5212_v0 = vadd.f32 %v5211_v12, %v8990_v23  ;;  %v4983_v46 = vpop.f32.mrf.mxu0  ;;  %v8998_v57 = vadd.f32 %v4980_v16, %v4589_v11  ;;  %v4592_v33 = vadd.f32 %v6953_v24, %v8784_v48  ;;  %v9006_v12 = vadd.f32 %v7020_v35, %v4591_v52 }
 0x300   :  { %v4421_v25 = vpop.f32.mrf.mxu1 }
 0x301   :  { %10817 = vst [vmem:[#allocation5_spill] sm:$0xff] %v8998_v57  ;;  %v5213_v47 = vadd.f32 %v5212_v0, %v8994_v6  ;;  %v4590_v61 = vadd.f32 %v4421_v25, %v8787_v51  ;;  %v7024_v31 = vpop.f32.mrf.mxu0  ;;  %10819 = vst [vmem:[#allocation4_spill] sm:$0xff] %v9006_v12  ;;  %v9010_v0 = vadd.f32 %v7021_v60, %v4592_v33 }
 0x302   :  { %v6956_v13 = vpop.f32.mrf.mxu1 }
 0x303   :  { %v5214_v7 = vadd.f32 %v5213_v47, %v8998_v57  ;;  %v9004_v36 = vadd.f32 %v4983_v46, %v4590_v61  ;;  %v4996_v28 = vpop.f32.mrf.mxu0  ;;  %10820 = vst [vmem:[#allocation6_spill] sm:$0xff] %v9010_v0  ;;  %v4595_v48 = vadd.f32 %v6956_v13, %v8790_v19  ;;  %v10824_v13 = vld [vmem:[#allocation25_spill] sm:$0xff] }
 0x304   :  { %v4434_v15 = vpop.f32.mrf.mxu1 }
 0x305   :  { %10818 = vst [vmem:[#allocation7_spill] sm:$0xff] %v9004_v36  ;;  %v5215_v3 = vadd.f32 %v5214_v7, %v9004_v36  ;;  %v4593_v5 = vadd.f32 %v4434_v15, %v8793_v44  ;;  %v7025_v16 = vpop.f32.mrf.mxu0 }
 0x306   :  { %v6957_v11 = vpop.f32.mrf.mxu1 }
 0x307   :  { %v5216_v51 = vadd.f32 %v5215_v3, %v9006_v12  ;;  %v4999_v25 = vpop.f32.mrf.mxu0  ;;  %v9014_v24 = vadd.f32 %v4996_v28, %v4593_v5  ;;  %v4596_v7 = vadd.f32 %v6957_v11, %v8796_v49  ;;  %v9022_v3 = vadd.f32 %v7024_v31, %v4595_v48  ;;  %v10828_v31 = vld [vmem:[#allocation38_spill] sm:$0xff] }
 0x308   :  { %v4437_v47 = vpop.f32.mrf.mxu1 }
 0x309   :  { %10821 = vst [vmem:[#allocation9_spill] sm:$0xff] %v9014_v24  ;;  %v5217_v46 = vadd.f32 %v5216_v51, %v9010_v0  ;;  %v4594_v35 = vadd.f32 %v4437_v47, %v8799_v20  ;;  %v7028_v52 = vpop.f32.mrf.mxu0  ;;  %10823 = vst [vmem:[#allocation8_spill] sm:$0xff] %v9022_v3  ;;  %v9026_v0 = vadd.f32 %v7025_v16, %v4596_v7 }
 0x30a   :  { %v6960_v61 = vpop.f32.mrf.mxu1 }
 0x30b   :  { %v5218_v44 = vadd.f32 %v5217_v46, %v9014_v24  ;;  %v9020_v60 = vadd.f32 %v4999_v25, %v4594_v35  ;;  %v5012_v33 = vpop.f32.mrf.mxu0  ;;  %10825 = vst [vmem:[#allocation11_spill] sm:$0xff] %v9026_v0  ;;  %v10826_v24 = vld [vmem:[#allocation23_spill] sm:$0xff] }
 0x30c   :  { %v4450_v15 = vpop.f32.mrf.mxu1  ;;  %v4599_v49 = vadd.f32 %v6960_v61, %v10826_v24  ;;  %v10832_v61 = vld [vmem:[#allocation27_spill] sm:$0xff] }
 0x30d   :  { %10822 = vst [vmem:[#allocation10_spill] sm:$0xff] %v9020_v60  ;;  %v5219_v19 = vadd.f32 %v5218_v44, %v9020_v60  ;;  %v4597_v28 = vadd.f32 %v4450_v15, %v10824_v13  ;;  %v7029_v5 = vpop.f32.mrf.mxu0  ;;  %v10829_v13 = vld [vmem:[#allocation26_spill] sm:$0xff] }
 0x30e   :  { %v6961_v51 = vpop.f32.mrf.mxu1 }
 0x30f   :  { %v5220_v20 = vadd.f32 %v5219_v19, %v9022_v3  ;;  %v5015_v47 = vpop.f32.mrf.mxu0  ;;  %v9030_v11 = vadd.f32 %v5012_v33, %v4597_v28  ;;  %v4600_v60 = vadd.f32 %v6961_v51, %v10829_v13  ;;  %v9038_v3 = vadd.f32 %v7028_v52, %v4599_v49  ;;  %v10836_v52 = vld [vmem:[#allocation30_spill] sm:$0xff] }
 0x310   :  { %v4453_v46 = vpop.f32.mrf.mxu1 }
 0x311   :  { %10827 = vst [vmem:[#allocation12_spill] sm:$0xff] %v9030_v11  ;;  %v5221_v25 = vadd.f32 %v5220_v20, %v9026_v0  ;;  %v4598_v48 = vadd.f32 %v4453_v46, %v10828_v31  ;;  %v7032_v35 = vpop.f32.mrf.mxu0  ;;  %10831 = vst [vmem:[#allocation15_spill] sm:$0xff] %v9038_v3  ;;  %v9042_v0 = vadd.f32 %v7029_v5, %v4600_v60 }
 0x312   :  { %v6964_v44 = vpop.f32.mrf.mxu1 }
 0x313   :  { %v5222_v15 = vadd.f32 %v5221_v25, %v9030_v11  ;;  %v9036_v16 = vadd.f32 %v5015_v47, %v4598_v48  ;;  %v5028_v7 = vpop.f32.mrf.mxu0  ;;  %10833 = vst [vmem:[#allocation13_spill] sm:$0xff] %v9042_v0  ;;  %v10834_v11 = vld [vmem:[#allocation28_spill] sm:$0xff] }
 0x314   :  { %v4466_v19 = vpop.f32.mrf.mxu1  ;;  %v4603_v51 = vadd.f32 %v6964_v44, %v10834_v11  ;;  %v10840_v44 = vld [vmem:[#allocation32_spill] sm:$0xff] }
 0x315   :  { %10830 = vst [vmem:[#allocation14_spill] sm:$0xff] %v9036_v16  ;;  %v5223_v24 = vadd.f32 %v5222_v15, %v9036_v16  ;;  %v4601_v33 = vadd.f32 %v4466_v19, %v10832_v61  ;;  %v7033_v28 = vpop.f32.mrf.mxu0  ;;  %v10837_v61 = vld [vmem:[#allocation29_spill] sm:$0xff] }
 0x316   :  { %v6965_v20 = vpop.f32.mrf.mxu1 }
 0x317   :  { %v5224_v46 = vadd.f32 %v5223_v24, %v9038_v3  ;;  %v5031_v31 = vpop.f32.mrf.mxu0  ;;  %v9046_v47 = vadd.f32 %v5028_v7, %v4601_v33  ;;  %v4604_v16 = vadd.f32 %v6965_v20, %v10837_v61  ;;  %v9054_v3 = vadd.f32 %v7032_v35, %v4603_v51  ;;  %v10844_v35 = vld [vmem:[#allocation33_spill] sm:$0xff] }
 0x318   :  { %v4469_v25 = vpop.f32.mrf.mxu1 }
 0x319   :  { %10835 = vst [vmem:[#allocation16_spill] sm:$0xff] %v9046_v47  ;;  %v5225_v48 = vadd.f32 %v5224_v46, %v9042_v0  ;;  %v4602_v49 = vadd.f32 %v4469_v25, %v10836_v52  ;;  %v7036_v13 = vpop.f32.mrf.mxu0  ;;  %10839 = vst [vmem:[#allocation19_spill] sm:$0xff] %v9054_v3  ;;  %v9058_v0 = vadd.f32 %v7033_v28, %v4604_v16 }
 0x31a   :  { %v6968_v15 = vpop.f32.mrf.mxu1 }
 0x31b   :  { %v5226_v19 = vadd.f32 %v5225_v48, %v9046_v47  ;;  %v9052_v60 = vadd.f32 %v5031_v31, %v4602_v49  ;;  %v5044_v5 = vpop.f32.mrf.mxu0  ;;  %10841 = vst [vmem:[#allocation20_spill] sm:$0xff] %v9058_v0  ;;  %v10842_v47 = vld [vmem:[#allocation31_spill] sm:$0xff] }
 0x31c   :  { %v4482_v24 = vpop.f32.mrf.mxu1  ;;  %v4607_v20 = vadd.f32 %v6968_v15, %v10842_v47  ;;  %v10846_v15 = vld [vmem:[#allocation35_spill] sm:$0xff] }
 0x31d   :  { %10838 = vst [vmem:[#allocation17_spill] sm:$0xff] %v9052_v60  ;;  %v5227_v11 = vadd.f32 %v5226_v19, %v9052_v60  ;;  %v4605_v7 = vadd.f32 %v4482_v24, %v10840_v44  ;;  %v7037_v33 = vpop.f32.mrf.mxu0  ;;  %v10845_v44 = vld [vmem:[#allocation34_spill] sm:$0xff] }
 0x31e   :  { %v6969_v46 = vpop.f32.mrf.mxu1 }
 0x31f   :  { %v5228_v25 = vadd.f32 %v5227_v11, %v9054_v3  ;;  %v5047_v52 = vpop.f32.mrf.mxu0  ;;  %v9062_v31 = vadd.f32 %v5044_v5, %v4605_v7  ;;  %v4608_v60 = vadd.f32 %v6969_v46, %v10845_v44  ;;  %v9070_v3 = vadd.f32 %v7036_v13, %v4607_v20  ;;  %v10848_v13 = vld [vmem:[#allocation39_spill] sm:$0xff] }
 0x320   :  { %v4485_v48 = vpop.f32.mrf.mxu1 }
 0x321   :  { %10843 = vst [vmem:[#allocation18_spill] sm:$0xff] %v9062_v31  ;;  %v5229_v49 = vadd.f32 %v5228_v25, %v9058_v0  ;;  %v4606_v51 = vadd.f32 %v4485_v48, %v10844_v35  ;;  %v7040_v61 = vpop.f32.mrf.mxu0  ;;  %v9074_v0 = vadd.f32 %v7037_v33, %v4608_v60 }
 0x322   :  { %v6972_v19 = vpop.f32.mrf.mxu1 }
 0x323   :  { %v5230_v24 = vadd.f32 %v5229_v49, %v9062_v31  ;;  %v9068_v16 = vadd.f32 %v5047_v52, %v4606_v51  ;;  %v5060_v28 = vpop.f32.mrf.mxu0  ;;  %v10847_v31 = vld [vmem:[#allocation36_spill] sm:$0xff] }
 0x324   :  { %v4498_v11 = vpop.f32.mrf.mxu1  ;;  %v4611_v46 = vadd.f32 %v6972_v19, %v10847_v31 }
 0x325   :  { %v5231_v47 = vadd.f32 %v5230_v24, %v9068_v16  ;;  %v4609_v5 = vadd.f32 %v4498_v11, %v10846_v15  ;;  %v7041_v7 = vpop.f32.mrf.mxu0  ;;  %v10849_v15 = vld [vmem:[#allocation40_spill] sm:$0xff] }
 0x326   :  { %v6973_v25 = vpop.f32.mrf.mxu1  ;;  %v9086_v36 = vadd.f32 %v7040_v61, %v4611_v46 }
 0x327   :  { %v5232_v48 = vadd.f32 %v5231_v47, %v9070_v3  ;;  %v5063_v35 = vpop.f32.mrf.mxu0  ;;  %v9078_v52 = vadd.f32 %v5060_v28, %v4609_v5  ;;  %v4612_v12 = vadd.f32 %v6973_v25, %v10849_v15 }
 0x328   :  { %v4501_v49 = vpop.f32.mrf.mxu1 }
 0x329   :  { %v5233_v51 = vadd.f32 %v5232_v48, %v9074_v0  ;;  %v4610_v20 = vadd.f32 %v4501_v49, %v10848_v13  ;;  %v7044_v44 = vpop.f32.mrf.mxu0  ;;  %v9090_v48 = vadd.f32 %v7041_v7, %v4612_v12 }
 0x32a   :  { %v6976_v24 = vpop.f32.mrf.mxu1 }
 0x32b   :  { %v5234_v11 = vadd.f32 %v5233_v51, %v9078_v52  ;;  %v9084_v60 = vadd.f32 %v5063_v35, %v4610_v20  ;;  %v5076_v33 = vpop.f32.mrf.mxu0  ;;  %v4615_v25 = vadd.f32 %v6976_v24, %v8850_v62 }
 0x32c   :  { %v4514_v47 = vpop.f32.mrf.mxu1 }
 0x32d   :  { %v5235_v31 = vadd.f32 %v5234_v11, %v9084_v60  ;;  %v4613_v19 = vadd.f32 %v4514_v47, %v8853_v4  ;;  %v7045_v28 = vpop.f32.mrf.mxu0 }
 0x32e   :  { %v6977_v5 = vpop.f32.mrf.mxu1 }
 0x32f   :  { %v5236_v49 = vadd.f32 %v5235_v31, %v9086_v36  ;;  %v5079_v13 = vpop.f32.mrf.mxu0  ;;  %v9094_v35 = vadd.f32 %v5076_v33, %v4613_v19  ;;  %v4616_v15 = vadd.f32 %v6977_v5, %v8856_v27  ;;  %v5177_v31 = vadd.f32 %v7044_v44, %v4615_v25 }
 0x330   :  { %v4517_v51 = vpop.f32.mrf.mxu1 }
 0x331   :  { %v5237_v20 = vadd.f32 %v5236_v49, %v9090_v48  ;;  %v4614_v61 = vadd.f32 %v4517_v51, %v8859_v59  ;;  %v7048_v46 = vpop.f32.mrf.mxu0  ;;  %v5178_v33 = vadd.f32 %v7045_v28, %v4616_v15 }
 0x332   :  { %v6980_v11 = vpop.f32.mrf.mxu1 }
 0x333   :  { %v5238_v4 = vadd.f32 %v5237_v20, %v9094_v35  ;;  %v5176_v12 = vadd.f32 %v5079_v13, %v4614_v61  ;;  %v5092_v7 = vpop.f32.mrf.mxu0  ;;  %v4619_v59 = vadd.f32 %v6980_v11, %v8862_v37  ;;  %v10850_v11 = vld [vmem:[#allocation42_spill] sm:$0xff] }
 0x334   :  { %v4530_v47 = vpop.f32.mrf.mxu1 }
 0x335   :  { %v5239_v57 = vadd.f32 %v5238_v4, %v5176_v12  ;;  %v4617_v6 = vadd.f32 %v4530_v47, %v8865_v50  ;;  %v7049_v62 = vpop.f32.mrf.mxu0  ;;  %v5181_v4 = vadd.f32 %v7048_v46, %v4619_v59 }
 0x336   :  { %v6981_v24 = vpop.f32.mrf.mxu1 }
 0x337   :  { %v5240_v19 = vadd.f32 %v5239_v57, %v5177_v31  ;;  %v5095_v49 = vpop.f32.mrf.mxu0  ;;  %v5179_v51 = vadd.f32 %v5092_v7, %v4617_v6  ;;  %v4620_v44 = vadd.f32 %v6981_v24, %v8868_v29  ;;  %v10852_v24 = vld [vmem:[#allocation41_spill] sm:$0xff] }
 0x338   :  { %v4533_v23 = vpop.f32.mrf.mxu1 }
 0x339   :  { %v5241_v40 = vadd.f32 %v5240_v19, %v5178_v33  ;;  %v4618_v20 = vadd.f32 %v4533_v23, %v8871_v30  ;;  %v7052_v27 = vpop.f32.mrf.mxu0  ;;  %v5182_v43 = vadd.f32 %v7049_v62, %v4620_v44  ;;  %v10851_v19 = vld [vmem:[#allocation44_spill] sm:$0xff] }
 0x33a   :  { %v6984_v5 = vpop.f32.mrf.mxu1 }
 0x33b   :  { %v5242_v13 = vadd.f32 %v5241_v40, %v5179_v51  ;;  %v5180_v25 = vadd.f32 %v5095_v49, %v4618_v20  ;;  %v5108_v61 = vpop.f32.mrf.mxu0  ;;  %v4623_v7 = vadd.f32 %v6984_v5, %v10850_v11 }
 0x33c   :  { %v4546_v50 = vpop.f32.mrf.mxu1 }
 0x33d   :  { %v5243_v47 = vadd.f32 %v5242_v13, %v5180_v25  ;;  %v4621_v57 = vadd.f32 %v4546_v50, %v8877_v63  ;;  %v7053_v15 = vpop.f32.mrf.mxu0  ;;  %v5185_v46 = vadd.f32 %v7052_v27, %v4623_v7 }
 0x33e   :  { %v6985_v28 = vpop.f32.mrf.mxu1 }
 0x33f   :  { %v5244_v37 = vadd.f32 %v5243_v47, %v5181_v4  ;;  %v5183_v30 = vadd.f32 %v5108_v61, %v4621_v57  ;;  %v5111_v26 = vpop.f32.mrf.mxu0  ;;  %v4624_v49 = vadd.f32 %v6985_v28, %v10852_v24 }
 0x340   :  { %v4549_v6 = vpop.f32.mrf.mxu1 }
 0x341   :  { %v5245_v23 = vadd.f32 %v5244_v37, %v5182_v43  ;;  %v4622_v40 = vadd.f32 %v4549_v6, %v10851_v19  ;;  %v5186_v13 = vadd.f32 %v7053_v15, %v4624_v49 }
 0x343   :  { %v5246_v29 = vadd.f32 %v5245_v23, %v5183_v30  ;;  %v5184_v20 = vadd.f32 %v5111_v26, %v4622_v40 }
 0x345   :  { %v5247_v59 = vadd.f32 %v5246_v29, %v5184_v20 }
 0x347   :  { %v5248_v63 = vadd.f32 %v5247_v59, %v5185_v46 }
 0x349   :  { %v5249_v50 = vadd.f32 %v5248_v63, %v5186_v13 }
 0x34b   :  { %v5250_v38 = vrot.slane %v5249_v50, 4 }
 0x34d   :  { %v5251_v62 = vadd.f32 %v5250_v38, %v5249_v50 }
 0x34f   :  { %v5252_v44 = vrot.slane %v5251_v62, 2 }
 0x351   :  { %v5253_v47 = vadd.f32 %v5252_v44, %v5251_v62 }
 0x353   :  { %v5254_v56 = vrot.slane %v5253_v47, 1 }
 0x355   :  { %v5255_v5 = vadd.f32 %v5254_v56, %v5253_v47 }
 0x357   :  { %v9108_v61 = vmul.f32 0.001953125, %v5255_v5 }
 0x359   :  { %v9112_v57 = vsub.f32 %v9068_v16, %v9108_v61  ;;  %v9116_v26 = vsub.f32 %v9070_v3, %v9108_v61  ;;  %v9120_v27 = vsub.f32 %v9074_v0, %v9108_v61  ;;  %v9124_v38 = vsub.f32 %v9078_v52, %v9108_v61 }
 0x35a   :  { %v9128_v56 = vsub.f32 %v9084_v60, %v9108_v61  ;;  %v9132_v16 = vsub.f32 %v9086_v36, %v9108_v61  ;;  %v9136_v3 = vsub.f32 %v9090_v48, %v9108_v61  ;;  %v9140_v0 = vsub.f32 %v9094_v35, %v9108_v61 }
 0x35b   :  { %v9143_v28 = vsub.f32 %v5176_v12, %v9108_v61  ;;  %v9146_v52 = vsub.f32 %v5177_v31, %v9108_v61  ;;  %v9149_v60 = vsub.f32 %v5178_v33, %v9108_v61  ;;  %v9152_v36 = vsub.f32 %v5179_v51, %v9108_v61 }
 0x35c   :  { %v9155_v15 = vsub.f32 %v5180_v25, %v9108_v61  ;;  %v9158_v48 = vsub.f32 %v5181_v4, %v9108_v61  ;;  %v9161_v35 = vsub.f32 %v5182_v43, %v9108_v61  ;;  %v9164_v12 = vsub.f32 %v5183_v30, %v9108_v61  ;;  %v10858_v4 = vld [vmem:[#allocation43_spill] sm:$0xff] }
 0x35d   :  { %v9167_v31 = vsub.f32 %v5184_v20, %v9108_v61  ;;  %v9170_v33 = vsub.f32 %v5185_v46, %v9108_v61  ;;  %v9173_v51 = vsub.f32 %v5186_v13, %v9108_v61  ;;  %v9177_v25 = vsub.f32 %v8888_v18, %v9108_v61 }
 0x35e   :  { %10853 = vst [vmem:[#allocation21_spill] sm:$0xff] %v9155_v15  ;;  %10854 = vst [vmem:[#allocation22_spill] sm:$0xff] %v9158_v48  ;;  %v9181_v43 = vsub.f32 %v8891_v21, %v9108_v61  ;;  %v9185_v37 = vsub.f32 %v10858_v4, %v9108_v61  ;;  %v9193_v7 = vsub.f32 %v8898_v34, %v9108_v61 }
 0x35f   :  { %10855 = vst [vmem:[#allocation37_spill] sm:$0xff] %v9161_v35  ;;  %10856 = vst [vmem:[#allocation24_spill] sm:$0xff] %v9164_v12  ;;  %v5322_v6 = vmul.f32 %v9177_v25, %v9177_v25  ;;  %v9197_v18 = vsub.f32 %v8902_v58, %v9108_v61  ;;  %v9203_v23 = vsub.f32 %v8908_v55, %v9108_v61 }
 0x360   :  { %10857 = vst [vmem:[#allocation25_spill] sm:$0xff] %v9167_v31  ;;  %v5323_v11 = vmul.f32 %v9181_v43, %v9181_v43  ;;  %v5324_v21 = vmul.f32 %v9185_v37, %v9185_v37  ;;  %v5325_v19 = vmul.f32 %v9193_v7, %v9193_v7  ;;  %v9209_v34 = vsub.f32 %v8910_v45, %v9108_v61 }
 0x361   :  { %v5326_v58 = vmul.f32 %v9197_v18, %v9197_v18  ;;  %v9215_v24 = vsub.f32 %v8914_v53, %v9108_v61  ;;  %v5327_v55 = vmul.f32 %v9203_v23, %v9203_v23  ;;  %v9221_v20 = vsub.f32 %v8918_v22, %v9108_v61 }
 0x362   :  { %v5386_v30 = vadd.f32 %v5323_v11, %v5322_v6  ;;  %v5328_v45 = vmul.f32 %v9209_v34, %v9209_v34  ;;  %v9227_v59 = vsub.f32 %v8924_v41, %v9108_v61  ;;  %v9233_v63 = vsub.f32 %v8926_v10, %v9108_v61 }
 0x363   :  { %v5329_v53 = vmul.f32 %v9215_v24, %v9215_v24  ;;  %v5330_v22 = vmul.f32 %v9221_v20, %v9221_v20  ;;  %v9239_v62 = vsub.f32 %v8930_v42, %v9108_v61  ;;  %v9245_v47 = vsub.f32 %v8934_v9, %v9108_v61 }
 0x364   :  { %v5387_v40 = vadd.f32 %v5386_v30, %v5324_v21  ;;  %v5331_v41 = vmul.f32 %v9227_v59, %v9227_v59  ;;  %v5332_v10 = vmul.f32 %v9233_v63, %v9233_v63  ;;  %v9251_v4 = vsub.f32 %v8940_v8, %v9108_v61 }
 0x365   :  { %v5333_v42 = vmul.f32 %v9239_v62, %v9239_v62  ;;  %v9257_v11 = vsub.f32 %v8942_v1, %v9108_v61  ;;  %v5334_v9 = vmul.f32 %v9245_v47, %v9245_v47  ;;  %v9263_v30 = vsub.f32 %v8946_v39, %v9108_v61 }
 0x366   :  { %v5388_v29 = vadd.f32 %v5387_v40, %v5325_v19  ;;  %v5335_v8 = vmul.f32 %v9251_v4, %v9251_v4  ;;  %v9269_v40 = vsub.f32 %v8950_v17, %v9108_v61 }
 0x367   :  { %v5336_v1 = vmul.f32 %v9257_v11, %v9257_v11  ;;  %v5337_v39 = vmul.f32 %v9263_v30, %v9263_v30 }
 0x368   :  { %v5389_v49 = vadd.f32 %v5388_v29, %v5326_v58  ;;  %v9275_v29 = vsub.f32 %v8956_v32, %v9108_v61  ;;  %v5338_v17 = vmul.f32 %v9269_v40, %v9269_v40 }
 0x36a   :  { %v5390_v46 = vadd.f32 %v5389_v49, %v5327_v55  ;;  %v9281_v49 = vsub.f32 %v8958_v54, %v9108_v61  ;;  %v5339_v32 = vmul.f32 %v9275_v29, %v9275_v29 }
 0x36c   :  { %v5391_v13 = vadd.f32 %v5390_v46, %v5328_v45  ;;  %v9287_v46 = vsub.f32 %v8962_v2, %v9108_v61  ;;  %v5340_v54 = vmul.f32 %v9281_v49, %v9281_v49 }
 0x36e   :  { %v5392_v50 = vadd.f32 %v5391_v13, %v5329_v53  ;;  %v9293_v13 = vsub.f32 %v8966_v14, %v9108_v61  ;;  %v5341_v2 = vmul.f32 %v9287_v46, %v9287_v46 }
 0x370   :  { %v5393_v44 = vadd.f32 %v5392_v50, %v5330_v22  ;;  %v10859_v50 = vld [vmem:[#allocation46_spill] sm:$0xff]  ;;  %v5342_v14 = vmul.f32 %v9293_v13, %v9293_v13 }
 0x372   :  { %v5394_v5 = vadd.f32 %v5393_v44, %v5331_v41  ;;  %v9299_v41 = vsub.f32 %v10859_v50, %v9108_v61 }
 0x374   :  { %v5395_v6 = vadd.f32 %v5394_v5, %v5332_v10  ;;  %v10860_v10 = vld [vmem:[#allocation45_spill] sm:$0xff] }
 0x375   :  { %v9305_v5 = vsub.f32 %v10860_v10, %v9108_v61 }
 0x376   :  { %v5396_v21 = vadd.f32 %v5395_v6, %v5333_v42  ;;  %v10861_v6 = vld [vmem:[#allocation47_spill] sm:$0xff] }
 0x378   :  { %v5397_v19 = vadd.f32 %v5396_v21, %v5334_v9  ;;  %v9311_v9 = vsub.f32 %v10861_v6, %v9108_v61  ;;  %v5343_v21 = vmul.f32 %v9299_v41, %v9299_v41 }
 0x37a   :  { %v5398_v58 = vadd.f32 %v5397_v19, %v5335_v8  ;;  %v10862_v19 = vld [vmem:[#allocation48_spill] sm:$0xff] }
 0x37c   :  { %v5399_v55 = vadd.f32 %v5398_v58, %v5336_v1  ;;  %v9317_v1 = vsub.f32 %v10862_v19, %v9108_v61  ;;  %v5344_v58 = vmul.f32 %v9305_v5, %v9305_v5  ;;  %v10868_v19 = vld [vmem:[#allocation7_spill] sm:$0xff] }
 0x37e   :  { %v5400_v45 = vadd.f32 %v5399_v55, %v5337_v39  ;;  %v10863_v55 = vld [vmem:[#allocation49_spill] sm:$0xff] }
 0x380   :  { %v5401_v53 = vadd.f32 %v5400_v45, %v5338_v17  ;;  %v9323_v17 = vsub.f32 %v10863_v55, %v9108_v61  ;;  %v5345_v45 = vmul.f32 %v9311_v9, %v9311_v9 }
 0x382   :  { %v5402_v22 = vadd.f32 %v5401_v53, %v5339_v32  ;;  %v10864_v53 = vld [vmem:[#allocation50_spill] sm:$0xff]  ;;  %v5347_v10 = vmul.f32 %v9323_v17, %v9323_v17 }
 0x384   :  { %v5403_v44 = vadd.f32 %v5402_v22, %v5340_v54  ;;  %v9329_v54 = vsub.f32 %v10864_v53, %v9108_v61  ;;  %v5346_v22 = vmul.f32 %v9317_v1, %v9317_v1 }
 0x386   :  { %v5404_v42 = vadd.f32 %v5403_v44, %v5341_v2  ;;  %v10865_v2 = vld [vmem:[#allocation3_spill] sm:$0xff] }
 0x387   :  { %v9335_v44 = vsub.f32 %v10865_v2, %v9108_v61 }
 0x388   :  { %v5405_v8 = vadd.f32 %v5404_v42, %v5342_v14  ;;  %v10866_v42 = vld [vmem:[#allocation5_spill] sm:$0xff] }
 0x389   :  { %v9341_v6 = vsub.f32 %v10866_v42, %v9108_v61  ;;  %v10874_v42 = vld [vmem:[#allocation9_spill] sm:$0xff] }
 0x38a   :  { %v5406_v39 = vadd.f32 %v5405_v8, %v5343_v21  ;;  %v5348_v21 = vmul.f32 %v9329_v54, %v9329_v54 }
 0x38b   :  { %10867 = vst [vmem:[#allocation23_spill] sm:$0xff] %v9341_v6  ;;  %v5350_v53 = vmul.f32 %v9341_v6, %v9341_v6 }
 0x38c   :  { %v5407_v32 = vadd.f32 %v5406_v39, %v5344_v58  ;;  %v9347_v58 = vsub.f32 %v10868_v19, %v9108_v61  ;;  %v5349_v39 = vmul.f32 %v9335_v44, %v9335_v44  ;;  %v9365_v19 = vsub.f32 %v10874_v42, %v9108_v61  ;;  %v10880_v42 = vld [vmem:[#allocation11_spill] sm:$0xff] }
 0x38e   :  { %v5408_v50 = vadd.f32 %v5407_v32, %v5345_v45  ;;  %10869 = vst [vmem:[#allocation38_spill] sm:$0xff] %v9347_v58  ;;  %v10870_v45 = vld [vmem:[#allocation4_spill] sm:$0xff]  ;;  %10875 = vst [vmem:[#allocation28_spill] sm:$0xff] %v9365_v19 }
 0x38f   :  { %v9353_v32 = vsub.f32 %v10870_v45, %v9108_v61  ;;  %v10876_v45 = vld [vmem:[#allocation10_spill] sm:$0xff] }
 0x390   :  { %v5409_v14 = vadd.f32 %v5408_v50, %v5346_v22  ;;  %v10872_v50 = vld [vmem:[#allocation6_spill] sm:$0xff]  ;;  %v9371_v6 = vsub.f32 %v10876_v45, %v9108_v61  ;;  %v10882_v45 = vld [vmem:[#allocation12_spill] sm:$0xff] }
 0x391   :  { %10871 = vst [vmem:[#allocation26_spill] sm:$0xff] %v9353_v32  ;;  %v9359_v2 = vsub.f32 %v10872_v50, %v9108_v61  ;;  %v10878_v50 = vld [vmem:[#allocation8_spill] sm:$0xff] }
 0x392   :  { %v5410_v8 = vadd.f32 %v5409_v14, %v5347_v10  ;;  %v5351_v10 = vmul.f32 %v9347_v58, %v9347_v58  ;;  %10877 = vst [vmem:[#allocation30_spill] sm:$0xff] %v9371_v6  ;;  %v9377_v58 = vsub.f32 %v10878_v50, %v9108_v61  ;;  %v10884_v50 = vld [vmem:[#allocation14_spill] sm:$0xff] }
 0x393   :  { %10873 = vst [vmem:[#allocation27_spill] sm:$0xff] %v9359_v2 }
 0x394   :  { %v5411_v55 = vadd.f32 %v5410_v8, %v5348_v21  ;;  %v5352_v21 = vmul.f32 %v9353_v32, %v9353_v32  ;;  %10879 = vst [vmem:[#allocation29_spill] sm:$0xff] %v9377_v58  ;;  %v9383_v32 = vsub.f32 %v10880_v42, %v9108_v61  ;;  %v10886_v42 = vld [vmem:[#allocation15_spill] sm:$0xff] }
 0x396   :  { %v5412_v22 = vadd.f32 %v5411_v55, %v5349_v39  ;;  %v5353_v39 = vmul.f32 %v9359_v2, %v9359_v2  ;;  %10881 = vst [vmem:[#allocation32_spill] sm:$0xff] %v9383_v32  ;;  %v9389_v2 = vsub.f32 %v10882_v45, %v9108_v61  ;;  %v10888_v45 = vld [vmem:[#allocation13_spill] sm:$0xff] }
 0x398   :  { %v5413_v14 = vadd.f32 %v5412_v22, %v5350_v53  ;;  %v5354_v53 = vmul.f32 %v9365_v19, %v9365_v19  ;;  %10883 = vst [vmem:[#allocation31_spill] sm:$0xff] %v9389_v2  ;;  %v9395_v19 = vsub.f32 %v10884_v50, %v9108_v61  ;;  %v10890_v50 = vld [vmem:[#allocation16_spill] sm:$0xff] }
 0x39a   :  { %v5414_v8 = vadd.f32 %v5413_v14, %v5351_v10  ;;  %v5355_v10 = vmul.f32 %v9371_v6, %v9371_v6  ;;  %10885 = vst [vmem:[#allocation33_spill] sm:$0xff] %v9395_v19  ;;  %v9401_v6 = vsub.f32 %v10886_v42, %v9108_v61  ;;  %v10891_v42 = vld [vmem:[#allocation17_spill] sm:$0xff] }
 0x39c   :  { %v5415_v55 = vadd.f32 %v5414_v8, %v5352_v21  ;;  %v5356_v21 = vmul.f32 %v9377_v58, %v9377_v58  ;;  %10887 = vst [vmem:[#allocation34_spill] sm:$0xff] %v9401_v6  ;;  %v9407_v58 = vsub.f32 %v10888_v45, %v9108_v61  ;;  %v10893_v45 = vld [vmem:[#allocation19_spill] sm:$0xff] }
 0x39e   :  { %v5416_v22 = vadd.f32 %v5415_v55, %v5353_v39  ;;  %v5357_v39 = vmul.f32 %v9383_v32, %v9383_v32  ;;  %10889 = vst [vmem:[#allocation35_spill] sm:$0xff] %v9407_v58  ;;  %v9413_v32 = vsub.f32 %v10890_v50, %v9108_v61  ;;  %v10894_v50 = vld [vmem:[#allocation20_spill] sm:$0xff] }
 0x3a0   :  { %v5417_v14 = vadd.f32 %v5416_v22, %v5354_v53  ;;  %v5358_v53 = vmul.f32 %v9389_v2, %v9389_v2  ;;  %v9419_v2 = vsub.f32 %v10891_v42, %v9108_v61  ;;  %v10895_v42 = vld [vmem:[#allocation18_spill] sm:$0xff] }
 0x3a2   :  { %v5418_v8 = vadd.f32 %v5417_v14, %v5355_v10  ;;  %v5359_v10 = vmul.f32 %v9395_v19, %v9395_v19  ;;  %10892 = vst [vmem:[#allocation36_spill] sm:$0xff] %v9419_v2  ;;  %v9425_v19 = vsub.f32 %v10893_v45, %v9108_v61 }
 0x3a4   :  { %v5419_v55 = vadd.f32 %v5418_v8, %v5356_v21  ;;  %v5360_v21 = vmul.f32 %v9401_v6, %v9401_v6  ;;  %v9431_v6 = vsub.f32 %v10894_v50, %v9108_v61 }
 0x3a6   :  { %v5420_v22 = vadd.f32 %v5419_v55, %v5357_v39  ;;  %v5361_v39 = vmul.f32 %v9407_v58, %v9407_v58  ;;  %v9437_v58 = vsub.f32 %v10895_v42, %v9108_v61  ;;  %v5365_v45 = vmul.f32 %v9431_v6, %v9431_v6 }
 0x3a7   :  { %v5368_v61 = vmul.f32 %v9116_v26, %v9116_v26  ;;  %v5369_v42 = vmul.f32 %v9120_v27, %v9120_v27 }
 0x3a8   :  { %v5421_v14 = vadd.f32 %v5420_v22, %v5358_v53  ;;  %v5362_v53 = vmul.f32 %v9413_v32, %v9413_v32 }
 0x3aa   :  { %v5422_v8 = vadd.f32 %v5421_v14, %v5359_v10  ;;  %v5363_v10 = vmul.f32 %v9419_v2, %v9419_v2  ;;  %v5367_v2 = vmul.f32 %v9112_v57, %v9112_v57 }
 0x3ac   :  { %v5423_v55 = vadd.f32 %v5422_v8, %v5360_v21  ;;  %v5364_v21 = vmul.f32 %v9425_v19, %v9425_v19 }
 0x3ae   :  { %v5424_v22 = vadd.f32 %v5423_v55, %v5361_v39  ;;  %v5366_v55 = vmul.f32 %v9437_v58, %v9437_v58 }
 0x3b0   :  { %v5425_v14 = vadd.f32 %v5424_v22, %v5362_v53 }
 0x3b2   :  { %v5426_v8 = vadd.f32 %v5425_v14, %v5363_v10  ;;  %v5370_v14 = vmul.f32 %v9124_v38, %v9124_v38 }
 0x3b4   :  { %v5427_v39 = vadd.f32 %v5426_v8, %v5364_v21  ;;  %v5371_v8 = vmul.f32 %v9128_v56, %v9128_v56 }
 0x3b6   :  { %v5428_v50 = vadd.f32 %v5427_v39, %v5365_v45  ;;  %v5372_v39 = vmul.f32 %v9132_v16, %v9132_v16 }
 0x3b8   :  { %v5429_v53 = vadd.f32 %v5428_v50, %v5366_v55  ;;  %v5373_v50 = vmul.f32 %v9136_v3, %v9136_v3 }
 0x3ba   :  { %v5430_v22 = vadd.f32 %v5429_v53, %v5367_v2  ;;  %v5374_v53 = vmul.f32 %v9140_v0, %v9140_v0 }
 0x3bc   :  { %v5431_v10 = vadd.f32 %v5430_v22, %v5368_v61  ;;  %v5375_v22 = vmul.f32 %v9143_v28, %v9143_v28 }
 0x3be   :  { %v5432_v21 = vadd.f32 %v5431_v10, %v5369_v42  ;;  %v5376_v10 = vmul.f32 %v9146_v52, %v9146_v52 }
 0x3c0   :  { %v5433_v45 = vadd.f32 %v5432_v21, %v5370_v14  ;;  %v5377_v21 = vmul.f32 %v9149_v60, %v9149_v60 }
 0x3c2   :  { %v5434_v55 = vadd.f32 %v5433_v45, %v5371_v8  ;;  %v5378_v45 = vmul.f32 %v9152_v36, %v9152_v36 }
 0x3c4   :  { %v5435_v2 = vadd.f32 %v5434_v55, %v5372_v39  ;;  %v5379_v55 = vmul.f32 %v9155_v15, %v9155_v15 }
 0x3c6   :  { %v5436_v61 = vadd.f32 %v5435_v2, %v5373_v50  ;;  %v5380_v2 = vmul.f32 %v9158_v48, %v9158_v48 }
 0x3c8   :  { %v5437_v42 = vadd.f32 %v5436_v61, %v5374_v53  ;;  %v5381_v61 = vmul.f32 %v9161_v35, %v9161_v35 }
 0x3ca   :  { %v5438_v14 = vadd.f32 %v5437_v42, %v5375_v22  ;;  %v5382_v42 = vmul.f32 %v9164_v12, %v9164_v12 }
 0x3cc   :  { %v5439_v8 = vadd.f32 %v5438_v14, %v5376_v10  ;;  %v5383_v14 = vmul.f32 %v9167_v31, %v9167_v31 }
 0x3ce   :  { %v5440_v39 = vadd.f32 %v5439_v8, %v5377_v21  ;;  %v5384_v8 = vmul.f32 %v9170_v33, %v9170_v33 }
 0x3d0   :  { %v5441_v50 = vadd.f32 %v5440_v39, %v5378_v45  ;;  %v5385_v39 = vmul.f32 %v9173_v51, %v9173_v51 }
 0x3d2   :  { %v5442_v53 = vadd.f32 %v5441_v50, %v5379_v55 }
 0x3d4   :  { %v5443_v22 = vadd.f32 %v5442_v53, %v5380_v2 }
 0x3d6   :  { %v5444_v10 = vadd.f32 %v5443_v22, %v5381_v61 }
 0x3d8   :  { %v5445_v21 = vadd.f32 %v5444_v10, %v5382_v42 }
 0x3da   :  { %v5446_v45 = vadd.f32 %v5445_v21, %v5383_v14  ;;  %v10897_v14 = vld [vmem:[#allocation38_spill] sm:$0xff] }
 0x3db   :  { %v10898_v21 = vld [vmem:[#allocation26_spill] sm:$0xff] }
 0x3dc   :  { %v5447_v55 = vadd.f32 %v5446_v45, %v5384_v8  ;;  %v10899_v8 = vld [vmem:[#allocation27_spill] sm:$0xff]  ;;  %v10900_v45 = vld [vmem:[#allocation28_spill] sm:$0xff] }
 0x3de   :  { %v5448_v50 = vadd.f32 %v5447_v55, %v5385_v39  ;;  %v10901_v39 = vld [vmem:[#allocation30_spill] sm:$0xff] }
 0x3e0   :  { %v5449_v48 = vrot.slane %v5448_v50, 4 }
 0x3e2   :  { %v5450_v35 = vadd.f32 %v5449_v48, %v5448_v50  ;;  %v10902_v50 = vld [vmem:[#allocation29_spill] sm:$0xff] }
 0x3e4   :  { %v5451_v2 = vrot.slane %v5450_v35, 2 }
 0x3e6   :  { %v5452_v53 = vadd.f32 %v5451_v2, %v5450_v35 }
 0x3e8   :  { %v5453_v15 = vrot.slane %v5452_v53, 1 }
 0x3ea   :  { %v5454_v12 = vadd.f32 %v5453_v15, %v5452_v53  ;;  %v10903_v53 = vld [vmem:[#allocation32_spill] sm:$0xff] }
 0x3ec   :  { %v5455_v61 = vmul.f32 0.001953125, %v5454_v12 }
 0x3ee   :  { %v5456_v22 = vadd.f32 1e-05, %v5455_v61 }
 0x3f0   :  { %7077 = vrsqrt.f32 %v5456_v22  ;;  %v10905_v22 = vld [vmem:[#allocation31_spill] sm:$0xff] }
 0x3fd   :  { %v9483_v31 = vpop.eup %7077 }
 0x3fe   :  { %v9487_v42 = vmul.f32 %v9483_v31, %v9177_v25  ;;  %v9491_v10 = vmul.f32 %v9483_v31, %v9181_v43  ;;  %v9495_v48 = vmul.f32 %v9483_v31, %v9185_v37  ;;  %v9499_v15 = vmul.f32 %v9483_v31, %v9193_v7 }
 0x3ff   :  { %v9503_v35 = vmul.f32 %v9483_v31, %v9197_v18  ;;  %v9507_v12 = vmul.f32 %v9483_v31, %v9203_v23  ;;  %v9511_v25 = vmul.f32 %v9483_v31, %v9209_v34  ;;  %v9515_v43 = vmul.f32 %v9483_v31, %v9215_v24 }
 0x400   :  { %v9519_v37 = vmul.f32 %v9483_v31, %v9221_v20  ;;  %v9523_v7 = vmul.f32 %v9483_v31, %v9227_v59  ;;  %v9527_v18 = vmul.f32 %v9483_v31, %v9233_v63  ;;  %v9531_v23 = vmul.f32 %v9483_v31, %v9239_v62 }
 0x401   :  { %v9535_v34 = vmul.f32 %v9483_v31, %v9245_v47  ;;  %v9539_v24 = vmul.f32 %v9483_v31, %v9251_v4  ;;  %v9543_v20 = vmul.f32 %v9483_v31, %v9257_v11  ;;  %v9547_v59 = vmul.f32 %v9483_v31, %v9263_v30 }
 0x402   :  { %v9551_v63 = vmul.f32 %v9483_v31, %v9269_v40  ;;  %v9555_v62 = vmul.f32 %v9483_v31, %v9275_v29  ;;  %v9559_v47 = vmul.f32 %v9483_v31, %v9281_v49  ;;  %v9563_v4 = vmul.f32 %v9483_v31, %v9287_v46 }
 0x403   :  { %v9567_v11 = vmul.f32 %v9483_v31, %v9293_v13  ;;  %v9571_v30 = vmul.f32 %v9483_v31, %v9299_v41  ;;  %v9575_v40 = vmul.f32 %v9483_v31, %v9305_v5  ;;  %v9579_v29 = vmul.f32 %v9483_v31, %v9311_v9  ;;  %v10896_v5 = vld [vmem:[#allocation23_spill] sm:$0xff] }
 0x404   :  { %v9583_v49 = vmul.f32 %v9483_v31, %v9317_v1  ;;  %v9587_v46 = vmul.f32 %v9483_v31, %v9323_v17  ;;  %v9591_v13 = vmul.f32 %v9483_v31, %v9329_v54  ;;  %v9595_v41 = vmul.f32 %v9483_v31, %v9335_v44 }
 0x405   :  { %v9599_v9 = vmul.f32 %v9483_v31, %v10896_v5  ;;  %v9603_v1 = vmul.f32 %v9483_v31, %v10897_v14  ;;  %v9607_v17 = vmul.f32 %v9483_v31, %v10898_v21  ;;  %v9611_v54 = vmul.f32 %v9483_v31, %v10899_v8  ;;  %v10906_v14 = vld [vmem:[#allocation33_spill] sm:$0xff]  ;;  %v10907_v8 = vld [vmem:[#allocation34_spill] sm:$0xff] }
 0x406   :  { %v9615_v44 = vmul.f32 %v9483_v31, %v10900_v45  ;;  %v9619_v55 = vmul.f32 %v9483_v31, %v10901_v39  ;;  %v9623_v2 = vmul.f32 %v9483_v31, %v10902_v50  ;;  %v9627_v61 = vmul.f32 %v9483_v31, %v10903_v53  ;;  %v10908_v39 = vld [vmem:[#allocation35_spill] sm:$0xff] }
 0x407   :  { %v9631_v5 = vmul.f32 %v9483_v31, %v10905_v22  ;;  %v9635_v21 = vmul.f32 %v9483_v31, %v10906_v14  ;;  %v9639_v45 = vmul.f32 %v9483_v31, %v10907_v8  ;;  %v9643_v50 = vmul.f32 %v9483_v31, %v10908_v39 }
 0x408   :  { %10904 = vst [vmem:[#allocation39_spill] sm:$0xff] %v9627_v61  ;;  %v9647_v53 = vmul.f32 %v9483_v31, %v9413_v32  ;;  %v10909_v61 = vld [vmem:[#allocation36_spill] sm:$0xff]  ;;  %v9655_v14 = vmul.f32 %v9483_v31, %v9425_v19  ;;  %v9659_v8 = vmul.f32 %v9483_v31, %v9431_v6  ;;  %v9663_v39 = vmul.f32 %v9483_v31, %v9437_v58 }
 0x409   :  { %v9651_v22 = vmul.f32 %v9483_v31, %v10909_v61  ;;  %v9667_v32 = vmul.f32 %v9483_v31, %v9112_v57  ;;  %v9671_v61 = vmul.f32 %v9483_v31, %v9116_v26  ;;  %v9675_v19 = vmul.f32 %v9483_v31, %v9120_v27 }
 0x40a   :  { %v9679_v6 = vmul.f32 %v9483_v31, %v9124_v38  ;;  %v9683_v58 = vmul.f32 %v9483_v31, %v9128_v56  ;;  %v9687_v57 = vmul.f32 %v9483_v31, %v9132_v16  ;;  %v9691_v26 = vmul.f32 %v9483_v31, %v9136_v3  ;;  %v9712_v3 = vld [vmem:[%s10521_s2] ss:$0 sm:$0xff] }
 0x40b   :  { %v9695_v27 = vmul.f32 %v9483_v31, %v9140_v0  ;;  %v9699_v38 = vmul.f32 %v9483_v31, %v9143_v28  ;;  %v9703_v56 = vmul.f32 %v9483_v31, %v9146_v52  ;;  %v9707_v16 = vmul.f32 %v9483_v31, %v9149_v60 }
 0x40c   :  { %10910 = vst [vmem:[#allocation40_spill] sm:$0xff] %v9687_v57  ;;  %10911 = vst [vmem:[#allocation42_spill] sm:$0xff] %v9691_v26  ;;  %v9716_v0 = vmul.f32 %v9483_v31, %v9152_v36  ;;  %v10920_v57 = vld [vmem:[#allocation25_spill] sm:$0xff] }
 0x40d   :  { %10912 = vst [vmem:[#allocation44_spill] sm:$0xff] %v9695_v27  ;;  %10913 = vst [vmem:[#allocation41_spill] sm:$0xff] %v9699_v38  ;;  %v10916_v27 = vld [vmem:[#allocation21_spill] sm:$0xff]  ;;  %v10917_v38 = vld [vmem:[#allocation22_spill] sm:$0xff]  ;;  %v9736_v36 = vmul.f32 %v9483_v31, %v10920_v57  ;;  %v9756_v57 = vmul.f32 %v9712_v3, %v9495_v48  ;;  %v9780_v48 = vmul.f32 %v9712_v3, %v9519_v37 }
 0x40e   :  { %10914 = vst [vmem:[#allocation43_spill] sm:$0xff] %v9703_v56  ;;  %10915 = vst [vmem:[#allocation46_spill] sm:$0xff] %v9707_v16  ;;  %v9720_v28 = vmul.f32 %v9483_v31, %v10916_v27  ;;  %v9724_v52 = vmul.f32 %v9483_v31, %v10917_v38  ;;  %v10918_v56 = vld [vmem:[#allocation37_spill] sm:$0xff]  ;;  %v10919_v16 = vld [vmem:[#allocation24_spill] sm:$0xff]  ;;  %v9740_v27 = vmul.f32 %v9483_v31, %v9170_v33 }
 0x40f   :  { %v9728_v60 = vmul.f32 %v9483_v31, %v10918_v56  ;;  %v9732_v26 = vmul.f32 %v9483_v31, %v10919_v16  ;;  %v9744_v38 = vmul.f32 %v9483_v31, %v9173_v51  ;;  %v9748_v56 = vmul.f32 %v9712_v3, %v9487_v42 }
 0x410   :  { %v9752_v16 = vmul.f32 %v9712_v3, %v9491_v10  ;;  %v9760_v33 = vmul.f32 %v9712_v3, %v9499_v15  ;;  %v9764_v31 = vmul.f32 %v9712_v3, %v9503_v35  ;;  %v9768_v51 = vmul.f32 %v9712_v3, %v9507_v12 }
 0x411   :  { %v9772_v42 = vmul.f32 %v9712_v3, %v9511_v25  ;;  %v9776_v10 = vmul.f32 %v9712_v3, %v9515_v43  ;;  %v9784_v15 = vmul.f32 %v9712_v3, %v9523_v7  ;;  %v9788_v35 = vmul.f32 %v9712_v3, %v9527_v18 }
 0x412   :  { %v9792_v12 = vmul.f32 %v9712_v3, %v9531_v23  ;;  %v9796_v25 = vmul.f32 %v9712_v3, %v9535_v34  ;;  %v9800_v43 = vmul.f32 %v9712_v3, %v9539_v24  ;;  %v9804_v37 = vmul.f32 %v9712_v3, %v9543_v20 }
 0x413   :  { %v9808_v7 = vmul.f32 %v9712_v3, %v9547_v59  ;;  %v9812_v18 = vmul.f32 %v9712_v3, %v9551_v63  ;;  %v9816_v23 = vmul.f32 %v9712_v3, %v9555_v62  ;;  %v9820_v34 = vmul.f32 %v9712_v3, %v9559_v47 }
 0x414   :  { %v9824_v24 = vmul.f32 %v9712_v3, %v9563_v4  ;;  %v9828_v20 = vmul.f32 %v9712_v3, %v9567_v11  ;;  %v9832_v59 = vmul.f32 %v9712_v3, %v9571_v30  ;;  %v9836_v63 = vmul.f32 %v9712_v3, %v9575_v40 }
 0x415   :  { %v9840_v62 = vmul.f32 %v9712_v3, %v9579_v29  ;;  %v9844_v47 = vmul.f32 %v9712_v3, %v9583_v49  ;;  %v9848_v4 = vmul.f32 %v9712_v3, %v9587_v46  ;;  %v9852_v11 = vmul.f32 %v9712_v3, %v9591_v13 }
 0x416   :  { %v9856_v30 = vmul.f32 %v9712_v3, %v9595_v41  ;;  %v9860_v40 = vmul.f32 %v9712_v3, %v9599_v9  ;;  %v9864_v29 = vmul.f32 %v9712_v3, %v9603_v1  ;;  %v9868_v49 = vmul.f32 %v9712_v3, %v9607_v17  ;;  %v10921_v1 = vld [vmem:[#allocation39_spill] sm:$0xff] }
 0x417   :  { %v9872_v46 = vmul.f32 %v9712_v3, %v9611_v54  ;;  %v9876_v13 = vmul.f32 %v9712_v3, %v9615_v44  ;;  %v9880_v41 = vmul.f32 %v9712_v3, %v9619_v55  ;;  %v9884_v9 = vmul.f32 %v9712_v3, %v9623_v2 }
 0x418   :  { %v9888_v17 = vmul.f32 %v9712_v3, %v10921_v1  ;;  %v9892_v54 = vmul.f32 %v9712_v3, %v9631_v5  ;;  %v9896_v44 = vmul.f32 %v9712_v3, %v9635_v21  ;;  %v9900_v55 = vmul.f32 %v9712_v3, %v9639_v45 }
 0x419   :  { %v9904_v2 = vmul.f32 %v9712_v3, %v9643_v50  ;;  %v9908_v1 = vmul.f32 %v9712_v3, %v9647_v53  ;;  %v9912_v5 = vmul.f32 %v9712_v3, %v9651_v22  ;;  %v9916_v21 = vmul.f32 %v9712_v3, %v9655_v14 }
 0x41a   :  { %v9920_v45 = vmul.f32 %v9712_v3, %v9659_v8  ;;  %v9924_v50 = vmul.f32 %v9712_v3, %v9663_v39  ;;  %v9928_v53 = vmul.f32 %v9712_v3, %v9667_v32  ;;  %v9932_v22 = vmul.f32 %v9712_v3, %v9671_v61 }
 0x41b   :  { %v9936_v14 = vmul.f32 %v9712_v3, %v9675_v19  ;;  %v9940_v8 = vmul.f32 %v9712_v3, %v9679_v6  ;;  %v9944_v39 = vmul.f32 %v9712_v3, %v9683_v58 }
 0x41c   :  { %10922 = vst [vmem:[#allocation45_spill] sm:$0xff] %v9924_v50  ;;  %10923 = vst [vmem:[#allocation47_spill] sm:$0xff] %v9928_v53  ;;  %v10928_v50 = vld [vmem:[#allocation40_spill] sm:$0xff]  ;;  %v10929_v53 = vld [vmem:[#allocation42_spill] sm:$0xff] }
 0x41d   :  { %10924 = vst [vmem:[#allocation48_spill] sm:$0xff] %v9932_v22  ;;  %10925 = vst [vmem:[#allocation49_spill] sm:$0xff] %v9936_v14  ;;  %v9948_v32 = vmul.f32 %v9712_v3, %v10928_v50  ;;  %v9952_v61 = vmul.f32 %v9712_v3, %v10929_v53  ;;  %v10930_v22 = vld [vmem:[#allocation44_spill] sm:$0xff]  ;;  %v10931_v14 = vld [vmem:[#allocation41_spill] sm:$0xff] }
 0x41e   :  { %10926 = vst [vmem:[#allocation50_spill] sm:$0xff] %v9940_v8  ;;  %10927 = vst [vmem:[#allocation3_spill] sm:$0xff] %v9944_v39  ;;  %v9956_v19 = vmul.f32 %v9712_v3, %v10930_v22  ;;  %v9960_v6 = vmul.f32 %v9712_v3, %v10931_v14  ;;  %v10932_v8 = vld [vmem:[#allocation43_spill] sm:$0xff]  ;;  %v10933_v39 = vld [vmem:[#allocation46_spill] sm:$0xff]  ;;  %v9977_v22 = vmul.f32 %v9712_v3, %v9716_v0 }
 0x41f   :  { %v9964_v58 = vmul.f32 %v9712_v3, %v10932_v8  ;;  %v9968_v50 = vmul.f32 %v9712_v3, %v10933_v39  ;;  %v9973_v53 = vld [vmem:[%s10522_s3] ss:$0 sm:$0xff]  ;;  %v9981_v14 = vmul.f32 %v9712_v3, %v9720_v28  ;;  %v9985_v8 = vmul.f32 %v9712_v3, %v9724_v52 }
 0x420   :  { %v9989_v39 = vmul.f32 %v9712_v3, %v9728_v60  ;;  %v9997_v0 = vmul.f32 %v9712_v3, %v9736_v36  ;;  %v10001_v28 = vmul.f32 %v9712_v3, %v9740_v27  ;;  %v10005_v52 = vmul.f32 %v9712_v3, %v9744_v38 }
 0x421   :  { %10934 = vst [vmem:[#allocation5_spill] sm:$0xff] %v9968_v50  ;;  %v9993_v50 = vmul.f32 %v9712_v3, %v9732_v26  ;;  %v10009_v60 = vadd.f32 %v9973_v53, %v9748_v56  ;;  %v10013_v26 = vadd.f32 %v9973_v53, %v9752_v16  ;;  %v10017_v36 = vadd.f32 %v9973_v53, %v9756_v57 }
 0x422   :  { %v10021_v27 = vadd.f32 %v9973_v53, %v9760_v33  ;;  %v10025_v3 = vadd.f32 %v9973_v53, %v9764_v31  ;;  %v10029_v38 = vadd.f32 %v9973_v53, %v9768_v51  ;;  %v10033_v56 = vadd.f32 %v9973_v53, %v9772_v42 }
 0x423   :  { %v10037_v16 = vadd.f32 %v9973_v53, %v9776_v10  ;;  %v10041_v57 = vadd.f32 %v9973_v53, %v9780_v48  ;;  %v10045_v33 = vadd.f32 %v9973_v53, %v9784_v15  ;;  %v10049_v31 = vadd.f32 %v9973_v53, %v9788_v35 }
 0x424   :  { %v10053_v51 = vadd.f32 %v9973_v53, %v9792_v12  ;;  %v10057_v42 = vadd.f32 %v9973_v53, %v9796_v25  ;;  %v10061_v10 = vadd.f32 %v9973_v53, %v9800_v43  ;;  %v10065_v48 = vadd.f32 %v9973_v53, %v9804_v37 }
 0x425   :  { %v10069_v15 = vadd.f32 %v9973_v53, %v9808_v7  ;;  %v10073_v35 = vadd.f32 %v9973_v53, %v9812_v18  ;;  %v10077_v12 = vadd.f32 %v9973_v53, %v9816_v23  ;;  %v10081_v25 = vadd.f32 %v9973_v53, %v9820_v34 }
 0x426   :  { %v10085_v43 = vadd.f32 %v9973_v53, %v9824_v24  ;;  %v10089_v37 = vadd.f32 %v9973_v53, %v9828_v20  ;;  %v10093_v7 = vadd.f32 %v9973_v53, %v9832_v59  ;;  %v10097_v18 = vadd.f32 %v9973_v53, %v9836_v63 }
 0x427   :  { %v10101_v23 = vadd.f32 %v9973_v53, %v9840_v62  ;;  %v10105_v34 = vadd.f32 %v9973_v53, %v9844_v47  ;;  %v10109_v24 = vadd.f32 %v9973_v53, %v9848_v4  ;;  %v10113_v20 = vadd.f32 %v9973_v53, %v9852_v11 }
 0x428   :  { %v10117_v59 = vadd.f32 %v9973_v53, %v9856_v30  ;;  %v10121_v63 = vadd.f32 %v9973_v53, %v9860_v40  ;;  %v10125_v62 = vadd.f32 %v9973_v53, %v9864_v29  ;;  %v10129_v47 = vadd.f32 %v9973_v53, %v9868_v49 }
 0x429   :  { %v10133_v4 = vadd.f32 %v9973_v53, %v9872_v46  ;;  %v10137_v11 = vadd.f32 %v9973_v53, %v9876_v13  ;;  %v10141_v30 = vadd.f32 %v9973_v53, %v9880_v41  ;;  %v10145_v40 = vadd.f32 %v9973_v53, %v9884_v9 }
 0x42a   :  { %v10149_v29 = vadd.f32 %v9973_v53, %v9888_v17  ;;  %v10153_v49 = vadd.f32 %v9973_v53, %v9892_v54  ;;  %v10157_v46 = vadd.f32 %v9973_v53, %v9896_v44  ;;  %v10161_v13 = vadd.f32 %v9973_v53, %v9900_v55  ;;  %v10940_v55 = vld [vmem:[#allocation45_spill] sm:$0xff] }
 0x42b   :  { %v10165_v41 = vadd.f32 %v9973_v53, %v9904_v2  ;;  %v10169_v9 = vadd.f32 %v9973_v53, %v9908_v1  ;;  %v10173_v17 = vadd.f32 %v9973_v53, %v9912_v5  ;;  %v10177_v54 = vadd.f32 %v9973_v53, %v9916_v21 }
 0x42c   :  { %v10181_v44 = vadd.f32 %v9973_v53, %v9920_v45  ;;  %v10185_v2 = vadd.f32 %v9973_v53, %v10940_v55 }
 0x42d   :  { %10935 = vst [vmem:[#allocation7_spill] sm:$0xff] %v10165_v41  ;;  %10936 = vst [vmem:[#allocation4_spill] sm:$0xff] %v10169_v9  ;;  %v10941_v41 = vld [vmem:[#allocation47_spill] sm:$0xff]  ;;  %v10942_v9 = vld [vmem:[#allocation48_spill] sm:$0xff] }
 0x42e   :  { %10937 = vst [vmem:[#allocation6_spill] sm:$0xff] %v10173_v17  ;;  %10938 = vst [vmem:[#allocation9_spill] sm:$0xff] %v10177_v54  ;;  %v10189_v1 = vadd.f32 %v9973_v53, %v10941_v41  ;;  %v10193_v5 = vadd.f32 %v9973_v53, %v10942_v9  ;;  %v10943_v17 = vld [vmem:[#allocation49_spill] sm:$0xff]  ;;  %v10944_v54 = vld [vmem:[#allocation50_spill] sm:$0xff]  ;;  %v10209_v41 = vadd.f32 %v9973_v53, %v9948_v32 }
 0x42f   :  { %10939 = vst [vmem:[#allocation10_spill] sm:$0xff] %v10181_v44  ;;  %v10197_v21 = vadd.f32 %v9973_v53, %v10943_v17  ;;  %v10201_v45 = vadd.f32 %v9973_v53, %v10944_v54  ;;  %v10945_v44 = vld [vmem:[#allocation3_spill] sm:$0xff]  ;;  %v10213_v9 = vadd.f32 %v9973_v53, %v9952_v61  ;;  %v10217_v17 = vadd.f32 %v9973_v53, %v9956_v19 }
 0x430   :  { %v10205_v55 = vadd.f32 %v9973_v53, %v10945_v44  ;;  %v10221_v54 = vadd.f32 %v9973_v53, %v9960_v6  ;;  %v10225_v44 = vadd.f32 %v9973_v53, %v9964_v58  ;;  %v10233_v61 = vadd.f32 %v9973_v53, %v9977_v22 }
 0x431   :  { %v10237_v19 = vadd.f32 %v9973_v53, %v9981_v14  ;;  %v10241_v6 = vadd.f32 %v9973_v53, %v9985_v8  ;;  %v10245_v58 = vadd.f32 %v9973_v53, %v9989_v39  ;;  %v10253_v22 = vadd.f32 %v9973_v53, %v9997_v0 }
 0x432   :  { %10946 = vst [vmem:[#allocation8_spill] sm:$0xff] %v10205_v55  ;;  %v10947_v55 = vld [vmem:[#allocation5_spill] sm:$0xff]  ;;  %v10257_v14 = vadd.f32 %v9973_v53, %v10001_v28  ;;  %v10261_v8 = vadd.f32 %v9973_v53, %v10005_v52  ;;  %v5665_v39 = vmax.f32 %v10013_v26, 0.0  ;;  %v5669_v0 = vmax.f32 %v10029_v38, 0.0 }
 0x433   :  { %v10229_v32 = vadd.f32 %v9973_v53, %v10947_v55  ;;  %10948 = vst [vmem:[#allocation11_spill] sm:$0xff] %v10241_v6  ;;  %10949 = vst [vmem:[#allocation12_spill] sm:$0xff] %v10245_v58  ;;  %v10249_v55 = vadd.f32 %v9973_v53, %v9993_v50  ;;  %v5664_v6 = vmax.f32 %v10009_v60, 0.0  ;;  %v5666_v58 = vmax.f32 %v10017_v36, 0.0 }
 0x434   :  { %10951 = vst [vmem:[#allocation15_spill] sm:$0xff] %v10253_v22  ;;  %10952 = vst [vmem:[#allocation13_spill] sm:$0xff] %v10257_v14  ;;  %v5667_v50 = vmax.f32 %v10021_v27, 0.0  ;;  %v5670_v22 = vmax.f32 %v10033_v56, 0.0  ;;  %v5671_v28 = vmax.f32 %v10037_v16, 0.0  ;;  %v5672_v14 = vmax.f32 %v10041_v57, 0.0 }
 0x435   :  { %10950 = vst [vmem:[#allocation14_spill] sm:$0xff] %v10249_v55  ;;  %v5668_v55 = vmax.f32 %v10025_v3, 0.0  ;;  %v5673_v53 = vmax.f32 %v10045_v33, 0.0  ;;  %v5674_v52 = vmax.f32 %v10049_v31, 0.0  ;;  %v5675_v60 = vmax.f32 %v10053_v51, 0.0  ;;  %5728 = vst [vmem:[%s10523_s4] sm:$0xff] %v5664_v6 }
 0x436   :  { %5729 = vst [vmem:[%s10523_s4 + $0x8] sm:$0xff] %v5665_v39  ;;  %5730 = vst [vmem:[%s10523_s4 + $0x10] sm:$0xff] %v5666_v58  ;;  %v5676_v26 = vmax.f32 %v10057_v42, 0.0  ;;  %v5677_v36 = vmax.f32 %v10061_v10, 0.0  ;;  %v5678_v27 = vmax.f32 %v10065_v48, 0.0  ;;  %v5679_v3 = vmax.f32 %v10069_v15, 0.0 }
 0x437   :  { %5731 = vst [vmem:[%s10523_s4 + $0x18] sm:$0xff] %v5667_v50  ;;  %5732 = vst [vmem:[%s10523_s4 + $0x20] sm:$0xff] %v5668_v55  ;;  %v5680_v38 = vmax.f32 %v10073_v35, 0.0  ;;  %v5681_v56 = vmax.f32 %v10077_v12, 0.0  ;;  %v5682_v16 = vmax.f32 %v10081_v25, 0.0  ;;  %v5683_v57 = vmax.f32 %v10085_v43, 0.0 }
 0x438   :  { %5733 = vst [vmem:[%s10523_s4 + $0x28] sm:$0xff] %v5669_v0  ;;  %5734 = vst [vmem:[%s10523_s4 + $0x30] sm:$0xff] %v5670_v22  ;;  %v5684_v33 = vmax.f32 %v10089_v37, 0.0  ;;  %v5685_v31 = vmax.f32 %v10093_v7, 0.0  ;;  %v5686_v51 = vmax.f32 %v10097_v18, 0.0  ;;  %v5687_v42 = vmax.f32 %v10101_v23, 0.0 }
 0x439   :  { %5735 = vst [vmem:[%s10523_s4 + $0x38] sm:$0xff] %v5671_v28  ;;  %5736 = vst [vmem:[%s10523_s4 + $0x40] sm:$0xff] %v5672_v14  ;;  %v5688_v10 = vmax.f32 %v10105_v34, 0.0  ;;  %v5689_v48 = vmax.f32 %v10109_v24, 0.0  ;;  %v5690_v15 = vmax.f32 %v10113_v20, 0.0  ;;  %v5691_v35 = vmax.f32 %v10117_v59, 0.0 }
 0x43a   :  { %5737 = vst [vmem:[%s10523_s4 + $0x48] sm:$0xff] %v5673_v53  ;;  %5738 = vst [vmem:[%s10523_s4 + $0x50] sm:$0xff] %v5674_v52  ;;  %v5692_v12 = vmax.f32 %v10121_v63, 0.0  ;;  %v5693_v25 = vmax.f32 %v10125_v62, 0.0  ;;  %v5694_v43 = vmax.f32 %v10129_v47, 0.0  ;;  %v5695_v37 = vmax.f32 %v10133_v4, 0.0 }
 0x43b   :  { %5739 = vst [vmem:[%s10523_s4 + $0x58] sm:$0xff] %v5675_v60  ;;  %5740 = vst [vmem:[%s10523_s4 + $0x60] sm:$0xff] %v5676_v26  ;;  %v5696_v7 = vmax.f32 %v10137_v11, 0.0  ;;  %v5697_v18 = vmax.f32 %v10141_v30, 0.0  ;;  %v5698_v23 = vmax.f32 %v10145_v40, 0.0  ;;  %v5699_v34 = vmax.f32 %v10149_v29, 0.0 }
 0x43c   :  { %5741 = vst [vmem:[%s10523_s4 + $0x68] sm:$0xff] %v5677_v36  ;;  %5742 = vst [vmem:[%s10523_s4 + $0x70] sm:$0xff] %v5678_v27  ;;  %v5700_v24 = vmax.f32 %v10153_v49, 0.0  ;;  %v5701_v20 = vmax.f32 %v10157_v46, 0.0  ;;  %v5702_v59 = vmax.f32 %v10161_v13, 0.0  ;;  %v10953_v63 = vld [vmem:[#allocation7_spill] sm:$0xff] }
 0x43d   :  { %5743 = vst [vmem:[%s10523_s4 + $0x78] sm:$0xff] %v5679_v3  ;;  %5744 = vst [vmem:[%s10523_s4 + $0x80] sm:$0xff] %v5680_v38  ;;  %v5703_v62 = vmax.f32 %v10953_v63, 0.0  ;;  %v10954_v47 = vld [vmem:[#allocation4_spill] sm:$0xff]  ;;  %v10955_v11 = vld [vmem:[#allocation6_spill] sm:$0xff]  ;;  %v5708_v13 = vmax.f32 %v10185_v2, 0.0 }
 0x43e   :  { %5745 = vst [vmem:[%s10523_s4 + $0x88] sm:$0xff] %v5681_v56  ;;  %5746 = vst [vmem:[%s10523_s4 + $0x90] sm:$0xff] %v5682_v16  ;;  %v5704_v4 = vmax.f32 %v10954_v47, 0.0  ;;  %v5705_v30 = vmax.f32 %v10955_v11, 0.0  ;;  %v10956_v40 = vld [vmem:[#allocation9_spill] sm:$0xff]  ;;  %v10957_v49 = vld [vmem:[#allocation10_spill] sm:$0xff] }
 0x43f   :  { %5747 = vst [vmem:[%s10523_s4 + $0x98] sm:$0xff] %v5683_v57  ;;  %5748 = vst [vmem:[%s10523_s4 + $0xa0] sm:$0xff] %v5684_v33  ;;  %v5706_v29 = vmax.f32 %v10956_v40, 0.0  ;;  %v5707_v46 = vmax.f32 %v10957_v49, 0.0  ;;  %v5709_v6 = vmax.f32 %v10189_v1, 0.0  ;;  %v5710_v58 = vmax.f32 %v10193_v5, 0.0 }
 0x440   :  { %5749 = vst [vmem:[%s10523_s4 + $0xa8] sm:$0xff] %v5685_v31  ;;  %5750 = vst [vmem:[%s10523_s4 + $0xb0] sm:$0xff] %v5686_v51  ;;  %v5711_v55 = vmax.f32 %v10197_v21, 0.0  ;;  %v5712_v2 = vmax.f32 %v10201_v45, 0.0  ;;  %v10958_v1 = vld [vmem:[#allocation8_spill] sm:$0xff]  ;;  %v5714_v21 = vmax.f32 %v10209_v41, 0.0 }
 0x441   :  { %5751 = vst [vmem:[%s10523_s4 + $0xb8] sm:$0xff] %v5687_v42  ;;  %5752 = vst [vmem:[%s10523_s4 + $0xc0] sm:$0xff] %v5688_v10  ;;  %v5713_v5 = vmax.f32 %v10958_v1, 0.0  ;;  %v5715_v22 = vmax.f32 %v10213_v9, 0.0  ;;  %v5716_v45 = vmax.f32 %v10217_v17, 0.0  ;;  %v5717_v41 = vmax.f32 %v10221_v54, 0.0 }
 0x442   :  { %5753 = vst [vmem:[%s10523_s4 + $0xc8] sm:$0xff] %v5689_v48  ;;  %5754 = vst [vmem:[%s10523_s4 + $0xd0] sm:$0xff] %v5690_v15  ;;  %v5718_v9 = vmax.f32 %v10225_v44, 0.0  ;;  %v5719_v14 = vmax.f32 %v10229_v32, 0.0  ;;  %v5720_v17 = vmax.f32 %v10233_v61, 0.0  ;;  %v5721_v54 = vmax.f32 %v10237_v19, 0.0 }
 0x443   :  { %5755 = vst [vmem:[%s10523_s4 + $0xd8] sm:$0xff] %v5691_v35  ;;  %5756 = vst [vmem:[%s10523_s4 + $0xe0] sm:$0xff] %v5692_v12  ;;  %v10959_v44 = vld [vmem:[#allocation11_spill] sm:$0xff]  ;;  %v10960_v39 = vld [vmem:[#allocation12_spill] sm:$0xff]  ;;  %v5727_v60 = vmax.f32 %v10261_v8, 0.0 }
 0x444   :  { %5757 = vst [vmem:[%s10523_s4 + $0xe8] sm:$0xff] %v5693_v25  ;;  %5758 = vst [vmem:[%s10523_s4 + $0xf0] sm:$0xff] %v5694_v43  ;;  %v5722_v32 = vmax.f32 %v10959_v44, 0.0  ;;  %v5723_v50 = vmax.f32 %v10960_v39, 0.0  ;;  %v10961_v61 = vld [vmem:[#allocation14_spill] sm:$0xff]  ;;  %v10962_v0 = vld [vmem:[#allocation15_spill] sm:$0xff] }
 0x445   :  { %5759 = vst [vmem:[%s10523_s4 + $0xf8] sm:$0xff] %v5695_v37  ;;  %5760 = vst [vmem:[%s10523_s4 + $0x100] sm:$0xff] %v5696_v7  ;;  %v5724_v19 = vmax.f32 %v10961_v61, 0.0  ;;  %v5725_v28 = vmax.f32 %v10962_v0, 0.0  ;;  %v10963_v53 = vld [vmem:[#allocation13_spill] sm:$0xff] }
 0x446   :  { %5761 = vst [vmem:[%s10523_s4 + $0x108] sm:$0xff] %v5697_v18  ;;  %5762 = vst [vmem:[%s10523_s4 + $0x110] sm:$0xff] %v5698_v23  ;;  %v5726_v52 = vmax.f32 %v10963_v53, 0.0 }
 0x447   :  { %5763 = vst [vmem:[%s10523_s4 + $0x118] sm:$0xff] %v5699_v34  ;;  %5764 = vst [vmem:[%s10523_s4 + $0x120] sm:$0xff] %v5700_v24 }
 0x448   :  { %5765 = vst [vmem:[%s10523_s4 + $0x128] sm:$0xff] %v5701_v20  ;;  %5766 = vst [vmem:[%s10523_s4 + $0x130] sm:$0xff] %v5702_v59 }
 0x449   :  { %5767 = vst [vmem:[%s10523_s4 + $0x138] sm:$0xff] %v5703_v62  ;;  %5768 = vst [vmem:[%s10523_s4 + $0x140] sm:$0xff] %v5704_v4 }
 0x44a   :  { %5769 = vst [vmem:[%s10523_s4 + $0x148] sm:$0xff] %v5705_v30  ;;  %5770 = vst [vmem:[%s10523_s4 + $0x150] sm:$0xff] %v5706_v29 }
 0x44b   :  { %5771 = vst [vmem:[%s10523_s4 + $0x158] sm:$0xff] %v5707_v46  ;;  %5772 = vst [vmem:[%s10523_s4 + $0x160] sm:$0xff] %v5708_v13 }
 0x44c   :  { %5773 = vst [vmem:[%s10523_s4 + $0x168] sm:$0xff] %v5709_v6  ;;  %5774 = vst [vmem:[%s10523_s4 + $0x170] sm:$0xff] %v5710_v58 }
 0x44d   :  { %5775 = vst [vmem:[%s10523_s4 + $0x178] sm:$0xff] %v5711_v55  ;;  %5776 = vst [vmem:[%s10523_s4 + $0x180] sm:$0xff] %v5712_v2 }
 0x44e   :  { %5777 = vst [vmem:[%s10523_s4 + $0x188] sm:$0xff] %v5713_v5  ;;  %5778 = vst [vmem:[%s10523_s4 + $0x190] sm:$0xff] %v5714_v21 }
 0x44f   :  { %5779 = vst [vmem:[%s10523_s4 + $0x198] sm:$0xff] %v5715_v22  ;;  %5780 = vst [vmem:[%s10523_s4 + $0x1a0] sm:$0xff] %v5716_v45 }
 0x450   :  { %5781 = vst [vmem:[%s10523_s4 + $0x1a8] sm:$0xff] %v5717_v41  ;;  %5782 = vst [vmem:[%s10523_s4 + $0x1b0] sm:$0xff] %v5718_v9 }
 0x451   :  { %5783 = vst [vmem:[%s10523_s4 + $0x1b8] sm:$0xff] %v5719_v14  ;;  %5784 = vst [vmem:[%s10523_s4 + $0x1c0] sm:$0xff] %v5720_v17 }
 0x452   :  { %5785 = vst [vmem:[%s10523_s4 + $0x1c8] sm:$0xff] %v5721_v54  ;;  %5786 = vst [vmem:[%s10523_s4 + $0x1d0] sm:$0xff] %v5722_v32 }
 0x453   :  { %5787 = vst [vmem:[%s10523_s4 + $0x1d8] sm:$0xff] %v5723_v50  ;;  %5788 = vst [vmem:[%s10523_s4 + $0x1e0] sm:$0xff] %v5724_v19 }
 0x454   :  { %5789 = vst [vmem:[%s10523_s4 + $0x1e8] sm:$0xff] %v5725_v28  ;;  %5790 = vst [vmem:[%s10523_s4 + $0x1f0] sm:$0xff] %v5726_v52 }
 0x455   :  { %5791 = vst [vmem:[%s10523_s4 + $0x1f8] sm:$0xff] %v5727_v60 }

</bundles_post_ra>
